<compile_context>
chip_gen: v5e
topology: v5e:2x2
jax: 0.10.0
libtpu: 0.0.40
codegen_flags: <defaults>
</compile_context>

<pallas_src>
import functools
import math

import jax
import jax.numpy as jnp
from jax.experimental import pallas as pl
from jax.experimental.pallas import tpu as pltpu

# ----------------------------- model hyperparams (small) --------------------
EMBED_DIM = 32
NUM_HEADS = 4
HEAD_DIM = EMBED_DIM // NUM_HEADS
NUM_LAYERS = 2
MAX_TCR_LEN = 8
MAX_EPI_LEN = 8
PLE_DIM = 16
CLS_HIDDEN = 32
INPUT_DIM = 1024                 # hard-coded in the PyTorch module
REDUCED_PLE = 64                 # hard-coded in the PyTorch module
SEQ_DIM = EMBED_DIM * (MAX_TCR_LEN + MAX_EPI_LEN)        # 512
TOTAL_FEAT = SEQ_DIM + 2 * REDUCED_PLE                   # 640
LN_EPS = 1e-5
ATTN_SCALE = 1.0 / math.sqrt(HEAD_DIM)


# ----------------------------- in-kernel helpers (values / refs) ------------
def _layer_norm(x, g, b):
    m = jnp.mean(x, axis=-1, keepdims=True)
    c = x - m
    v = jnp.mean(c * c, axis=-1, keepdims=True)
    return c * jax.lax.rsqrt(v + LN_EPS) * g + b


def _mha(xq, xkv, add_mask, p):
    """nn.MultiheadAttention(batch_first=True), eval mode, one sample.

    xq: (Lq, E), xkv: (Lk, E), add_mask: (1, Lk) additive (0 / -1e30).
    p: dict of VMEM refs {wq, bq, wkv, bkv, wo, bo} (K/V projection fused).
    """
    q = jnp.dot(xq, p["wq"][...], preferred_element_type=jnp.float32) + p["bq"][...]
    kv = jnp.dot(xkv, p["wkv"][...], preferred_element_type=jnp.float32) + p["bkv"][...]
    k = kv[:, :EMBED_DIM]
    v = kv[:, EMBED_DIM:]
    wo = p["wo"][...]

    acc = jnp.zeros((xq.shape[0], EMBED_DIM), jnp.float32)
    for h in range(NUM_HEADS):                       # static, tiny head count
        sl = slice(h * HEAD_DIM, (h + 1) * HEAD_DIM)
        qh, kh, vh = q[:, sl], k[:, sl], v[:, sl]
        s = jnp.dot(qh, kh.T, preferred_element_type=jnp.float32) * ATTN_SCALE
        s = s + add_mask
        s = s - jnp.max(s, axis=-1, keepdims=True)
        e = jnp.exp(s)
        attn_w = e / jnp.sum(e, axis=-1, keepdims=True)
        ctx = jnp.dot(attn_w, vh, preferred_element_type=jnp.float32)   # (Lq, hd)
        # output projection folded per head: concat(heads) @ Wo == sum_h ctx_h @ Wo[h]
        acc = acc + jnp.dot(ctx, wo[sl, :], preferred_element_type=jnp.float32)
    return acc + p["bo"][...]


def _attention_block(x, add_mask, lp):
    a = _mha(x, x, add_mask, lp["attn"])
    x = _layer_norm(x + a, lp["n1g"][...], lp["n1b"][...])
    h = jnp.dot(x, lp["ff_w1"][...], preferred_element_type=jnp.float32) + lp["ff_b1"][...]
    h = jnp.maximum(h, 0.0)
    h = jnp.dot(h, lp["ff_w2"][...], preferred_element_type=jnp.float32) + lp["ff_b2"][...]
    return _layer_norm(x + h, lp["n2g"][...], lp["n2b"][...])


# ----------------------------- the single fused kernel ----------------------
def _fused_forward_kernel(seq_ref, ple_ref, tmask_ref, emask_ref, *rest,
                          treedef, n_params):
    p = jax.tree_util.tree_unflatten(treedef, list(rest[:n_params]))
    out_ref = rest[n_params]
    feat_scr = rest[n_params + 1]

    x_seq = seq_ref[0]                                  # (Lt+Le, 1024) f32
    tmask = tmask_ref[0]                                # (1, Lt) additive mask
    emask = emask_ref[0]                                # (1, Le) additive mask

    # --- both embedding projections in ONE bf16 MXU matmul -------------------
    emb = jnp.dot(x_seq.astype(jnp.bfloat16), p["emb_w"][...],
                  preferred_element_type=jnp.float32) + p["emb_b"][...]   # (Lt+Le, 2E)
    tcr_emb = emb[:MAX_TCR_LEN, :EMBED_DIM] + p["tcr_pos"][0]
    epi_emb = emb[MAX_TCR_LEN:, EMBED_DIM:] + p["epi_pos"][0]

    # --- both PLE reductions in one matmul ------------------------------------
    ple_r = jnp.dot(ple_ref[0], p["ple_w"][...],
                    preferred_element_type=jnp.float32) + p["ple_b"][...]  # (2, 64)

    # --- transformer encoder layers -------------------------------------------
    for lp in p["layers"]:
        tcr_emb = _attention_block(tcr_emb, tmask, lp)
        epi_emb = _attention_block(epi_emb, emask, lp)

    # --- reciprocal attention ---------------------------------------------------
    ra = p["rec_attn"]
    tcr2pep = _mha(tcr_emb, epi_emb, emask, ra["p2t"])
    tcr_out = _layer_norm(tcr_emb + tcr2pep, ra["norm_tcr_g"][...], ra["norm_tcr_b"][...])
    pep2tcr = _mha(epi_emb, tcr_emb, tmask, ra["t2p"])
    pep_out = _layer_norm(epi_emb + pep2tcr, ra["norm_pep_g"][...], ra["norm_pep_b"][...])

    # --- assemble classifier feature row in VMEM (matches torch .view + cat) ---
    for i in range(MAX_TCR_LEN):
        feat_scr[0:1, i * EMBED_DIM:(i + 1) * EMBED_DIM] = tcr_out[i:i + 1, :]
    for i in range(MAX_EPI_LEN):
        off = (MAX_TCR_LEN + i) * EMBED_DIM
        feat_scr[0:1, off:off + EMBED_DIM] = pep_out[i:i + 1, :]
    feat_scr[0:1, SEQ_DIM:SEQ_DIM + REDUCED_PLE] = ple_r[0:1, :]
    feat_scr[0:1, SEQ_DIM + REDUCED_PLE:TOTAL_FEAT] = ple_r[1:2, :]
    feat = feat_scr[...]                                 # (1, 640)

    # --- classifier (Linear -> LN -> ReLU -> ResidualBlock -> Linear) ----------
    clf = p["clf"]
    h = jnp.dot(feat, clf["w_in"][...], preferred_element_type=jnp.float32) + clf["b_in"][...]
    h = jnp.maximum(_layer_norm(h, clf["ln_g"][...], clf["ln_b"][...]), 0.0)
    # ResidualBlock: x + (LN -> ReLU -> Linear -> LN -> ReLU -> Linear)(x)
    r = jnp.maximum(_layer_norm(h, clf["rb_ln1_g"][...], clf["rb_ln1_b"][...]), 0.0)
    r = jnp.dot(r, clf["rb_w1"][...], preferred_element_type=jnp.float32) + clf["rb_b1"][...]
    r = jnp.maximum(_layer_norm(r, clf["rb_ln2_g"][...], clf["rb_ln2_b"][...]), 0.0)
    r = jnp.dot(r, clf["rb_w2"][...], preferred_element_type=jnp.float32) + clf["rb_b2"][...]
    h = h + r
    out = jnp.dot(h, clf["w_out"][...], preferred_element_type=jnp.float32) + clf["b_out"][...]
    out_ref[0] = out                                     # (1, 1)


# ----------------------------- wrapper ---------------------------------------
def _full_spec(shape):
    zeros = (0,) * len(shape)
    return pl.BlockSpec(shape, lambda b: zeros)


def forward(params, tcr, epitope, tcr_ple, epi_ple):
    B, Lt, Din = tcr.shape
    Le = epitope.shape[1]
    assert Lt == MAX_TCR_LEN and Le == MAX_EPI_LEN and Din == INPUT_DIM

    # key_padding_mask -> additive masks (True where whole token vector is zero)
    tcr_amask = jnp.where(jnp.sum(jnp.abs(tcr), axis=-1) == 0.0,
                          -1e30, 0.0).astype(jnp.float32)[:, None, :]      # (B,1,Lt)
    epi_amask = jnp.where(jnp.sum(jnp.abs(epitope), axis=-1) == 0.0,
                          -1e30, 0.0).astype(jnp.float32)[:, None, :]      # (B,1,Le)

    # stack the two sequences / the two PLE vectors so the kernel does one matmul
    seq = jnp.concatenate([tcr, epitope], axis=1)                          # (B,Lt+Le,1024)
    ple = jnp.concatenate([tcr_ple[:, None, :], epi_ple[:, None, :]], axis=1)  # (B,2,16)

    leaves, treedef = jax.tree_util.tree_flatten(params)
    kernel = functools.partial(_fused_forward_kernel,
                               treedef=treedef, n_params=len(leaves))

    in_specs = [
        pl.BlockSpec((1, Lt + Le, Din), lambda b: (b, 0, 0)),
        pl.BlockSpec((1, 2, PLE_DIM), lambda b: (b, 0, 0)),
        pl.BlockSpec((1, 1, Lt), lambda b: (b, 0, 0)),
        pl.BlockSpec((1, 1, Le), lambda b: (b, 0, 0)),
    ] + [_full_spec(w.shape) for w in leaves]

    out = pl.pallas_call(
        kernel,
        out_shape=jax.ShapeDtypeStruct((B, 1, 1), jnp.float32),
        grid=(B,),
        in_specs=in_specs,
        out_specs=pl.BlockSpec((1, 1, 1), lambda b: (b, 0, 0)),
        scratch_shapes=[pltpu.VMEM((1, TOTAL_FEAT), jnp.float32)],
        compiler_params=pltpu.CompilerParams(
            dimension_semantics=("parallel",)),       # v7x: shard batch over TCs
    )(seq, ple, tcr_amask, epi_amask, *leaves)
    return out[:, 0, 0]                               # squeeze(-1)


# ----------------------------- deterministic params --------------------------
def init_params(key):
    kit = iter(jax.random.split(key, 64))

    def dense(din, dout, w_dtype=jnp.float32):
        w = (jax.random.normal(next(kit), (din, dout), jnp.float32)
             / math.sqrt(din)).astype(w_dtype)
        b = jnp.zeros((1, dout), jnp.float32)
        return w, b

    def ln(d):
        return jnp.ones((1, d), jnp.float32), jnp.zeros((1, d), jnp.float32)

    def mha_p(E):
        wq, bq = dense(E, E)
        wkv, bkv = dense(E, 2 * E)          # packed K/V projection
        wo, bo = dense(E, E)
        return dict(wq=wq, bq=bq, wkv=wkv, bkv=bkv, wo=wo, bo=bo)

    params = {}
    # tcr + epitope embedding weights packed along N; stored bf16 for the MXU.
    params["emb_w"], params["emb_b"] = dense(INPUT_DIM, 2 * EMBED_DIM,
                                             w_dtype=jnp.bfloat16)
    params["ple_w"], params["ple_b"] = dense(PLE_DIM, REDUCED_PLE)
    params["tcr_pos"] = jax.random.normal(next(kit), (1, MAX_TCR_LEN, EMBED_DIM),
                                          jnp.float32)
    params["epi_pos"] = jax.random.normal(next(kit), (1, MAX_EPI_LEN, EMBED_DIM),
                                          jnp.float32)

    layers = []
    for _ in range(NUM_LAYERS):
        lp = dict(attn=mha_p(EMBED_DIM))
        lp["n1g"], lp["n1b"] = ln(EMBED_DIM)
        lp["ff_w1"], lp["ff_b1"] = dense(EMBED_DIM, 4 * EMBED_DIM)
        lp["ff_w2"], lp["ff_b2"] = dense(4 * EMBED_DIM, EMBED_DIM)
        lp["n2g"], lp["n2b"] = ln(EMBED_DIM)
        layers.append(lp)
    params["layers"] = layers

    ra = dict(p2t=mha_p(EMBED_DIM), t2p=mha_p(EMBED_DIM))
    ra["norm_tcr_g"], ra["norm_tcr_b"] = ln(EMBED_DIM)
    ra["norm_pep_g"], ra["norm_pep_b"] = ln(EMBED_DIM)
    params["rec_attn"] = ra

    clf = {}
    clf["w_in"], clf["b_in"] = dense(TOTAL_FEAT, CLS_HIDDEN)
    clf["ln_g"], clf["ln_b"] = ln(CLS_HIDDEN)
    clf["rb_ln1_g"], clf["rb_ln1_b"] = ln(CLS_HIDDEN)
    clf["rb_w1"], clf["rb_b1"] = dense(CLS_HIDDEN, CLS_HIDDEN)
    clf["rb_ln2_g"], clf["rb_ln2_b"] = ln(CLS_HIDDEN)
    clf["rb_w2"], clf["rb_b2"] = dense(CLS_HIDDEN, CLS_HIDDEN)
    clf["w_out"], clf["b_out"] = dense(CLS_HIDDEN, 1)
    params["clf"] = clf
    return params


# ----------------------------- main -------------------------------------------
if __name__ == "__main__":
    key = jax.random.PRNGKey(0)
    kp, k1, k2, k3, k4 = jax.random.split(key, 5)
    params = init_params(kp)

    B = 2
    tcr = jax.random.normal(k1, (B, MAX_TCR_LEN, INPUT_DIM), jnp.float32)
    epitope = jax.random.normal(k2, (B, MAX_EPI_LEN, INPUT_DIM), jnp.float32)
    tcr_ple = jax.random.normal(k3, (B, PLE_DIM), jnp.float32)
    epi_ple = jax.random.normal(k4, (B, PLE_DIM), jnp.float32)

    out = jax.jit(forward)(params, tcr, epitope, tcr_ple, epi_ple)
    out = jax.block_until_ready(out)
    assert out.shape == (B,)
    print("KERNEL_OK")
</pallas_src>

<mosaic_0001>
module attributes {stable_mosaic.version = 11 : i64} {
  func.func @_fused_forward_kernel(%arg0: i32, %arg1: memref<1x16x1024xf32, #tpu.memory_space<vmem>>, %arg2: memref<1x2x16xf32, #tpu.memory_space<vmem>>, %arg3: memref<1x1x8xf32, #tpu.memory_space<vmem>>, %arg4: memref<1x1x8xf32, #tpu.memory_space<vmem>>, %arg5: memref<1x32xf32, #tpu.memory_space<vmem>>, %arg6: memref<1x1xf32, #tpu.memory_space<vmem>>, %arg7: memref<1x32xf32, #tpu.memory_space<vmem>>, %arg8: memref<1x32xf32, #tpu.memory_space<vmem>>, %arg9: memref<1x32xf32, #tpu.memory_space<vmem>>, %arg10: memref<1x32xf32, #tpu.memory_space<vmem>>, %arg11: memref<1x32xf32, #tpu.memory_space<vmem>>, %arg12: memref<1x32xf32, #tpu.memory_space<vmem>>, %arg13: memref<1x32xf32, #tpu.memory_space<vmem>>, %arg14: memref<1x32xf32, #tpu.memory_space<vmem>>, %arg15: memref<32x32xf32, #tpu.memory_space<vmem>>, %arg16: memref<32x32xf32, #tpu.memory_space<vmem>>, %arg17: memref<640x32xf32, #tpu.memory_space<vmem>>, %arg18: memref<32x1xf32, #tpu.memory_space<vmem>>, %arg19: memref<1x64xf32, #tpu.memory_space<vmem>>, %arg20: memref<1024x64xbf16, #tpu.memory_space<vmem>>, %arg21: memref<1x8x32xf32, #tpu.memory_space<vmem>>, %arg22: memref<1x64xf32, #tpu.memory_space<vmem>>, %arg23: memref<1x32xf32, #tpu.memory_space<vmem>>, %arg24: memref<1x32xf32, #tpu.memory_space<vmem>>, %arg25: memref<32x64xf32, #tpu.memory_space<vmem>>, %arg26: memref<32x32xf32, #tpu.memory_space<vmem>>, %arg27: memref<32x32xf32, #tpu.memory_space<vmem>>, %arg28: memref<1x128xf32, #tpu.memory_space<vmem>>, %arg29: memref<1x32xf32, #tpu.memory_space<vmem>>, %arg30: memref<32x128xf32, #tpu.memory_space<vmem>>, %arg31: memref<128x32xf32, #tpu.memory_space<vmem>>, %arg32: memref<1x32xf32, #tpu.memory_space<vmem>>, %arg33: memref<1x32xf32, #tpu.memory_space<vmem>>, %arg34: memref<1x32xf32, #tpu.memory_space<vmem>>, %arg35: memref<1x32xf32, #tpu.memory_space<vmem>>, %arg36: memref<1x64xf32, #tpu.memory_space<vmem>>, %arg37: memref<1x32xf32, #tpu.memory_space<vmem>>, %arg38: memref<1x32xf32, #tpu.memory_space<vmem>>, %arg39: memref<32x64xf32, #tpu.memory_space<vmem>>, %arg40: memref<32x32xf32, #tpu.memory_space<vmem>>, %arg41: memref<32x32xf32, #tpu.memory_space<vmem>>, %arg42: memref<1x128xf32, #tpu.memory_space<vmem>>, %arg43: memref<1x32xf32, #tpu.memory_space<vmem>>, %arg44: memref<32x128xf32, #tpu.memory_space<vmem>>, %arg45: memref<128x32xf32, #tpu.memory_space<vmem>>, %arg46: memref<1x32xf32, #tpu.memory_space<vmem>>, %arg47: memref<1x32xf32, #tpu.memory_space<vmem>>, %arg48: memref<1x32xf32, #tpu.memory_space<vmem>>, %arg49: memref<1x32xf32, #tpu.memory_space<vmem>>, %arg50: memref<1x64xf32, #tpu.memory_space<vmem>>, %arg51: memref<16x64xf32, #tpu.memory_space<vmem>>, %arg52: memref<1x32xf32, #tpu.memory_space<vmem>>, %arg53: memref<1x32xf32, #tpu.memory_space<vmem>>, %arg54: memref<1x32xf32, #tpu.memory_space<vmem>>, %arg55: memref<1x32xf32, #tpu.memory_space<vmem>>, %arg56: memref<1x64xf32, #tpu.memory_space<vmem>>, %arg57: memref<1x32xf32, #tpu.memory_space<vmem>>, %arg58: memref<1x32xf32, #tpu.memory_space<vmem>>, %arg59: memref<32x64xf32, #tpu.memory_space<vmem>>, %arg60: memref<32x32xf32, #tpu.memory_space<vmem>>, %arg61: memref<32x32xf32, #tpu.memory_space<vmem>>, %arg62: memref<1x64xf32, #tpu.memory_space<vmem>>, %arg63: memref<1x32xf32, #tpu.memory_space<vmem>>, %arg64: memref<1x32xf32, #tpu.memory_space<vmem>>, %arg65: memref<32x64xf32, #tpu.memory_space<vmem>>, %arg66: memref<32x32xf32, #tpu.memory_space<vmem>>, %arg67: memref<32x32xf32, #tpu.memory_space<vmem>>, %arg68: memref<1x8x32xf32, #tpu.memory_space<vmem>>, %arg69: memref<1x1x1xf32, #tpu.memory_space<vmem>>, %arg70: memref<1x640xf32, #tpu.memory_space<vmem>>) attributes {dimension_semantics = [#tpu.dimension_semantics<parallel>], iteration_bounds = array<i64: 2>, scalar_prefetch = 0 : i64, scratch_operands = 1 : i64, tpu.core_type = #tpu.core_type<tc>, window_params = [{transform_indices = @transform_0, window_bounds = array<i64: 1, 16, 1024>}, {transform_indices = @transform_1, window_bounds = array<i64: 1, 2, 16>}, {transform_indices = @transform_2, window_bounds = array<i64: 1, 1, 8>}, {transform_indices = @transform_3, window_bounds = array<i64: 1, 1, 8>}, {pipeline_mode = #tpu.pipeline_mode<synchronous>, transform_indices = @transform_4, window_bounds = array<i64: 1, 32>}, {pipeline_mode = #tpu.pipeline_mode<synchronous>, transform_indices = @transform_5, window_bounds = array<i64: 1, 1>}, {pipeline_mode = #tpu.pipeline_mode<synchronous>, transform_indices = @transform_6, window_bounds = array<i64: 1, 32>}, {pipeline_mode = #tpu.pipeline_mode<synchronous>, transform_indices = @transform_7, window_bounds = array<i64: 1, 32>}, {pipeline_mode = #tpu.pipeline_mode<synchronous>, transform_indices = @transform_8, window_bounds = array<i64: 1, 32>}, {pipeline_mode = #tpu.pipeline_mode<synchronous>, transform_indices = @transform_9, window_bounds = array<i64: 1, 32>}, {pipeline_mode = #tpu.pipeline_mode<synchronous>, transform_indices = @transform_10, window_bounds = array<i64: 1, 32>}, {pipeline_mode = #tpu.pipeline_mode<synchronous>, transform_indices = @transform_11, window_bounds = array<i64: 1, 32>}, {pipeline_mode = #tpu.pipeline_mode<synchronous>, transform_indices = @transform_12, window_bounds = array<i64: 1, 32>}, {pipeline_mode = #tpu.pipeline_mode<synchronous>, transform_indices = @transform_13, window_bounds = array<i64: 1, 32>}, {pipeline_mode = #tpu.pipeline_mode<synchronous>, transform_indices = @transform_14, window_bounds = array<i64: 32, 32>}, {pipeline_mode = #tpu.pipeline_mode<synchronous>, transform_indices = @transform_15, window_bounds = array<i64: 32, 32>}, {pipeline_mode = #tpu.pipeline_mode<synchronous>, transform_indices = @transform_16, window_bounds = array<i64: 640, 32>}, {pipeline_mode = #tpu.pipeline_mode<synchronous>, transform_indices = @transform_17, window_bounds = array<i64: 32, 1>}, {pipeline_mode = #tpu.pipeline_mode<synchronous>, transform_indices = @transform_18, window_bounds = array<i64: 1, 64>}, {pipeline_mode = #tpu.pipeline_mode<synchronous>, transform_indices = @transform_19, window_bounds = array<i64: 1024, 64>}, {pipeline_mode = #tpu.pipeline_mode<synchronous>, transform_indices = @transform_20, window_bounds = array<i64: 1, 8, 32>}, {pipeline_mode = #tpu.pipeline_mode<synchronous>, transform_indices = @transform_21, window_bounds = array<i64: 1, 64>}, {pipeline_mode = #tpu.pipeline_mode<synchronous>, transform_indices = @transform_22, window_bounds = array<i64: 1, 32>}, {pipeline_mode = #tpu.pipeline_mode<synchronous>, transform_indices = @transform_23, window_bounds = array<i64: 1, 32>}, {pipeline_mode = #tpu.pipeline_mode<synchronous>, transform_indices = @transform_24, window_bounds = array<i64: 32, 64>}, {pipeline_mode = #tpu.pipeline_mode<synchronous>, transform_indices = @transform_25, window_bounds = array<i64: 32, 32>}, {pipeline_mode = #tpu.pipeline_mode<synchronous>, transform_indices = @transform_26, window_bounds = array<i64: 32, 32>}, {pipeline_mode = #tpu.pipeline_mode<synchronous>, transform_indices = @transform_27, window_bounds = array<i64: 1, 128>}, {pipeline_mode = #tpu.pipeline_mode<synchronous>, transform_indices = @transform_28, window_bounds = array<i64: 1, 32>}, {pipeline_mode = #tpu.pipeline_mode<synchronous>, transform_indices = @transform_29, window_bounds = array<i64: 32, 128>}, {pipeline_mode = #tpu.pipeline_mode<synchronous>, transform_indices = @transform_30, window_bounds = array<i64: 128, 32>}, {pipeline_mode = #tpu.pipeline_mode<synchronous>, transform_indices = @transform_31, window_bounds = array<i64: 1, 32>}, {pipeline_mode = #tpu.pipeline_mode<synchronous>, transform_indices = @transform_32, window_bounds = array<i64: 1, 32>}, {pipeline_mode = #tpu.pipeline_mode<synchronous>, transform_indices = @transform_33, window_bounds = array<i64: 1, 32>}, {pipeline_mode = #tpu.pipeline_mode<synchronous>, transform_indices = @transform_34, window_bounds = array<i64: 1, 32>}, {pipeline_mode = #tpu.pipeline_mode<synchronous>, transform_indices = @transform_35, window_bounds = array<i64: 1, 64>}, {pipeline_mode = #tpu.pipeline_mode<synchronous>, transform_indices = @transform_36, window_bounds = array<i64: 1, 32>}, {pipeline_mode = #tpu.pipeline_mode<synchronous>, transform_indices = @transform_37, window_bounds = array<i64: 1, 32>}, {pipeline_mode = #tpu.pipeline_mode<synchronous>, transform_indices = @transform_38, window_bounds = array<i64: 32, 64>}, {pipeline_mode = #tpu.pipeline_mode<synchronous>, transform_indices = @transform_39, window_bounds = array<i64: 32, 32>}, {pipeline_mode = #tpu.pipeline_mode<synchronous>, transform_indices = @transform_40, window_bounds = array<i64: 32, 32>}, {pipeline_mode = #tpu.pipeline_mode<synchronous>, transform_indices = @transform_41, window_bounds = array<i64: 1, 128>}, {pipeline_mode = #tpu.pipeline_mode<synchronous>, transform_indices = @transform_42, window_bounds = array<i64: 1, 32>}, {pipeline_mode = #tpu.pipeline_mode<synchronous>, transform_indices = @transform_43, window_bounds = array<i64: 32, 128>}, {pipeline_mode = #tpu.pipeline_mode<synchronous>, transform_indices = @transform_44, window_bounds = array<i64: 128, 32>}, {pipeline_mode = #tpu.pipeline_mode<synchronous>, transform_indices = @transform_45, window_bounds = array<i64: 1, 32>}, {pipeline_mode = #tpu.pipeline_mode<synchronous>, transform_indices = @transform_46, window_bounds = array<i64: 1, 32>}, {pipeline_mode = #tpu.pipeline_mode<synchronous>, transform_indices = @transform_47, window_bounds = array<i64: 1, 32>}, {pipeline_mode = #tpu.pipeline_mode<synchronous>, transform_indices = @transform_48, window_bounds = array<i64: 1, 32>}, {pipeline_mode = #tpu.pipeline_mode<synchronous>, transform_indices = @transform_49, window_bounds = array<i64: 1, 64>}, {pipeline_mode = #tpu.pipeline_mode<synchronous>, transform_indices = @transform_50, window_bounds = array<i64: 16, 64>}, {pipeline_mode = #tpu.pipeline_mode<synchronous>, transform_indices = @transform_51, window_bounds = array<i64: 1, 32>}, {pipeline_mode = #tpu.pipeline_mode<synchronous>, transform_indices = @transform_52, window_bounds = array<i64: 1, 32>}, {pipeline_mode = #tpu.pipeline_mode<synchronous>, transform_indices = @transform_53, window_bounds = array<i64: 1, 32>}, {pipeline_mode = #tpu.pipeline_mode<synchronous>, transform_indices = @transform_54, window_bounds = array<i64: 1, 32>}, {pipeline_mode = #tpu.pipeline_mode<synchronous>, transform_indices = @transform_55, window_bounds = array<i64: 1, 64>}, {pipeline_mode = #tpu.pipeline_mode<synchronous>, transform_indices = @transform_56, window_bounds = array<i64: 1, 32>}, {pipeline_mode = #tpu.pipeline_mode<synchronous>, transform_indices = @transform_57, window_bounds = array<i64: 1, 32>}, {pipeline_mode = #tpu.pipeline_mode<synchronous>, transform_indices = @transform_58, window_bounds = array<i64: 32, 64>}, {pipeline_mode = #tpu.pipeline_mode<synchronous>, transform_indices = @transform_59, window_bounds = array<i64: 32, 32>}, {pipeline_mode = #tpu.pipeline_mode<synchronous>, transform_indices = @transform_60, window_bounds = array<i64: 32, 32>}, {pipeline_mode = #tpu.pipeline_mode<synchronous>, transform_indices = @transform_61, window_bounds = array<i64: 1, 64>}, {pipeline_mode = #tpu.pipeline_mode<synchronous>, transform_indices = @transform_62, window_bounds = array<i64: 1, 32>}, {pipeline_mode = #tpu.pipeline_mode<synchronous>, transform_indices = @transform_63, window_bounds = array<i64: 1, 32>}, {pipeline_mode = #tpu.pipeline_mode<synchronous>, transform_indices = @transform_64, window_bounds = array<i64: 32, 64>}, {pipeline_mode = #tpu.pipeline_mode<synchronous>, transform_indices = @transform_65, window_bounds = array<i64: 32, 32>}, {pipeline_mode = #tpu.pipeline_mode<synchronous>, transform_indices = @transform_66, window_bounds = array<i64: 32, 32>}, {pipeline_mode = #tpu.pipeline_mode<synchronous>, transform_indices = @transform_67, window_bounds = array<i64: 1, 8, 32>}, {transform_indices = @transform_68, window_bounds = array<i64: 1, 1, 1>}]} {
    %c0 = arith.constant 0 : index
    %c0_0 = arith.constant 0 : index
    %c0_1 = arith.constant 0 : index
    %0 = vector.load %arg1[%c0, %c0_0, %c0_1] : memref<1x16x1024xf32, #tpu.memory_space<vmem>>, vector<1x16x1024xf32>
    %1 = vector.shape_cast %0 : vector<1x16x1024xf32> to vector<16x1024xf32>
    %c0_2 = arith.constant 0 : index
    %c0_3 = arith.constant 0 : index
    %c0_4 = arith.constant 0 : index
    %2 = vector.load %arg3[%c0_2, %c0_3, %c0_4] : memref<1x1x8xf32, #tpu.memory_space<vmem>>, vector<1x1x8xf32>
    %3 = vector.shape_cast %2 : vector<1x1x8xf32> to vector<1x8xf32>
    %c0_5 = arith.constant 0 : index
    %c0_6 = arith.constant 0 : index
    %c0_7 = arith.constant 0 : index
    %4 = vector.load %arg4[%c0_5, %c0_6, %c0_7] : memref<1x1x8xf32, #tpu.memory_space<vmem>>, vector<1x1x8xf32>
    %5 = vector.shape_cast %4 : vector<1x1x8xf32> to vector<1x8xf32>
    %6 = arith.truncf %1 : vector<16x1024xf32> to vector<16x1024xbf16>
    %c0_8 = arith.constant 0 : index
    %c0_9 = arith.constant 0 : index
    %7 = vector.load %arg20[%c0_8, %c0_9] : memref<1024x64xbf16, #tpu.memory_space<vmem>>, vector<1024x64xbf16>
    %cst = arith.constant dense<0.000000e+00> : vector<16x64xf32>
    %8 = tpu.matmul %6, %7, %cst {dimension_numbers = #tpu.dot_dimension_numbers<[1], [0], [0], [1], [0, 0, 1, 1], [], []>} : vector<16x1024xbf16>, vector<1024x64xbf16>, vector<16x64xf32> -> vector<16x64xf32>
    %c0_10 = arith.constant 0 : index
    %c0_11 = arith.constant 0 : index
    %9 = vector.load %arg19[%c0_10, %c0_11] : memref<1x64xf32, #tpu.memory_space<vmem>>, vector<1x64xf32>
    %10 = vector.broadcast %9 : vector<1x64xf32> to vector<16x64xf32>
    %11 = arith.addf %8, %10 : vector<16x64xf32>
    %12 = vector.extract_strided_slice %11 {offsets = [0, 0], sizes = [8, 32], strides = [1, 1]} : vector<16x64xf32> to vector<8x32xf32>
    %c0_12 = arith.constant 0 : index
    %c0_13 = arith.constant 0 : index
    %c0_14 = arith.constant 0 : index
    %13 = vector.load %arg68[%c0_12, %c0_13, %c0_14] : memref<1x8x32xf32, #tpu.memory_space<vmem>>, vector<1x8x32xf32>
    %14 = vector.shape_cast %13 : vector<1x8x32xf32> to vector<8x32xf32>
    %15 = arith.addf %12, %14 : vector<8x32xf32>
    %16 = vector.extract_strided_slice %11 {offsets = [8, 32], sizes = [8, 32], strides = [1, 1]} : vector<16x64xf32> to vector<8x32xf32>
    %c0_15 = arith.constant 0 : index
    %c0_16 = arith.constant 0 : index
    %c0_17 = arith.constant 0 : index
    %17 = vector.load %arg21[%c0_15, %c0_16, %c0_17] : memref<1x8x32xf32, #tpu.memory_space<vmem>>, vector<1x8x32xf32>
    %18 = vector.shape_cast %17 : vector<1x8x32xf32> to vector<8x32xf32>
    %19 = arith.addf %16, %18 : vector<8x32xf32>
    %c0_18 = arith.constant 0 : index
    %c0_19 = arith.constant 0 : index
    %c0_20 = arith.constant 0 : index
    %20 = vector.load %arg2[%c0_18, %c0_19, %c0_20] : memref<1x2x16xf32, #tpu.memory_space<vmem>>, vector<1x2x16xf32>
    %21 = vector.shape_cast %20 : vector<1x2x16xf32> to vector<2x16xf32>
    %c0_21 = arith.constant 0 : index
    %c0_22 = arith.constant 0 : index
    %22 = vector.load %arg51[%c0_21, %c0_22] : memref<16x64xf32, #tpu.memory_space<vmem>>, vector<16x64xf32>
    %cst_23 = arith.constant dense<0.000000e+00> : vector<2x64xf32>
    %23 = tpu.matmul %21, %22, %cst_23 {dimension_numbers = #tpu.dot_dimension_numbers<[1], [0], [0], [1], [0, 0, 1, 1], [], []>} : vector<2x16xf32>, vector<16x64xf32>, vector<2x64xf32> -> vector<2x64xf32>
    %c0_24 = arith.constant 0 : index
    %c0_25 = arith.constant 0 : index
    %24 = vector.load %arg50[%c0_24, %c0_25] : memref<1x64xf32, #tpu.memory_space<vmem>>, vector<1x64xf32>
    %25 = vector.broadcast %24 : vector<1x64xf32> to vector<2x64xf32>
    %26 = arith.addf %23, %25 : vector<2x64xf32>
    %c0_26 = arith.constant 0 : index
    %c0_27 = arith.constant 0 : index
    %27 = vector.load %arg27[%c0_26, %c0_27] : memref<32x32xf32, #tpu.memory_space<vmem>>, vector<32x32xf32>
    %cst_28 = arith.constant dense<0.000000e+00> : vector<8x32xf32>
    %28 = tpu.matmul %15, %27, %cst_28 {dimension_numbers = #tpu.dot_dimension_numbers<[1], [0], [0], [1], [0, 0, 1, 1], [], []>} : vector<8x32xf32>, vector<32x32xf32>, vector<8x32xf32> -> vector<8x32xf32>
    %c0_29 = arith.constant 0 : index
    %c0_30 = arith.constant 0 : index
    %29 = vector.load %arg24[%c0_29, %c0_30] : memref<1x32xf32, #tpu.memory_space<vmem>>, vector<1x32xf32>
    %30 = vector.broadcast %29 : vector<1x32xf32> to vector<8x32xf32>
    %31 = arith.addf %28, %30 : vector<8x32xf32>
    %c0_31 = arith.constant 0 : index
    %c0_32 = arith.constant 0 : index
    %32 = vector.load %arg25[%c0_31, %c0_32] : memref<32x64xf32, #tpu.memory_space<vmem>>, vector<32x64xf32>
    %cst_33 = arith.constant dense<0.000000e+00> : vector<8x64xf32>
    %33 = tpu.matmul %15, %32, %cst_33 {dimension_numbers = #tpu.dot_dimension_numbers<[1], [0], [0], [1], [0, 0, 1, 1], [], []>} : vector<8x32xf32>, vector<32x64xf32>, vector<8x64xf32> -> vector<8x64xf32>
    %c0_34 = arith.constant 0 : index
    %c0_35 = arith.constant 0 : index
    %34 = vector.load %arg22[%c0_34, %c0_35] : memref<1x64xf32, #tpu.memory_space<vmem>>, vector<1x64xf32>
    %35 = vector.broadcast %34 : vector<1x64xf32> to vector<8x64xf32>
    %36 = arith.addf %33, %35 : vector<8x64xf32>
    %37 = vector.extract_strided_slice %36 {offsets = [0, 0], sizes = [8, 32], strides = [1, 1]} : vector<8x64xf32> to vector<8x32xf32>
    %38 = vector.extract_strided_slice %36 {offsets = [0, 32], sizes = [8, 32], strides = [1, 1]} : vector<8x64xf32> to vector<8x32xf32>
    %c0_36 = arith.constant 0 : index
    %c0_37 = arith.constant 0 : index
    %39 = vector.load %arg26[%c0_36, %c0_37] : memref<32x32xf32, #tpu.memory_space<vmem>>, vector<32x32xf32>
    %cst_38 = arith.constant 0.000000e+00 : f32
    %40 = vector.broadcast %cst_38 : f32 to vector<8x32xf32>
    %41 = vector.extract_strided_slice %31 {offsets = [0, 0], sizes = [8, 8], strides = [1, 1]} : vector<8x32xf32> to vector<8x8xf32>
    %42 = vector.extract_strided_slice %37 {offsets = [0, 0], sizes = [8, 8], strides = [1, 1]} : vector<8x32xf32> to vector<8x8xf32>
    %43 = vector.extract_strided_slice %38 {offsets = [0, 0], sizes = [8, 8], strides = [1, 1]} : vector<8x32xf32> to vector<8x8xf32>
    %44 = tpu.transpose %42, [1, 0] : vector<8x8xf32> -> vector<8x8xf32>
    %cst_39 = arith.constant dense<0.000000e+00> : vector<8x8xf32>
    %45 = tpu.matmul %41, %44, %cst_39 {dimension_numbers = #tpu.dot_dimension_numbers<[1], [0], [0], [1], [0, 0, 1, 1], [], []>} : vector<8x8xf32>, vector<8x8xf32>, vector<8x8xf32> -> vector<8x8xf32>
    %cst_40 = arith.constant 0.353553385 : f32
    %46 = vector.broadcast %cst_40 : f32 to vector<8x8xf32>
    %47 = arith.mulf %45, %46 : vector<8x8xf32>
    %48 = vector.broadcast %3 : vector<1x8xf32> to vector<8x8xf32>
    %49 = arith.addf %47, %48 : vector<8x8xf32>
    %cst_41 = arith.constant dense<0xFF800000> : vector<8xf32>
    %50 = vector.multi_reduction <maximumf>, %49, %cst_41 [1] : vector<8x8xf32> to vector<8xf32>
    %51 = vector.shape_cast %50 : vector<8xf32> to vector<8x1xf32>
    %52 = vector.broadcast %51 : vector<8x1xf32> to vector<8x8xf32>
    %53 = arith.subf %49, %52 : vector<8x8xf32>
    %54 = math.exp %53 : vector<8x8xf32>
    %cst_42 = arith.constant dense<0.000000e+00> : vector<8xf32>
    %55 = vector.multi_reduction <add>, %54, %cst_42 [1] : vector<8x8xf32> to vector<8xf32>
    %56 = vector.shape_cast %55 : vector<8xf32> to vector<8x1xf32>
    %57 = vector.broadcast %56 : vector<8x1xf32> to vector<8x8xf32>
    %58 = arith.divf %54, %57 : vector<8x8xf32>
    %cst_43 = arith.constant dense<0.000000e+00> : vector<8x8xf32>
    %59 = tpu.matmul %58, %43, %cst_43 {dimension_numbers = #tpu.dot_dimension_numbers<[1], [0], [0], [1], [0, 0, 1, 1], [], []>} : vector<8x8xf32>, vector<8x8xf32>, vector<8x8xf32> -> vector<8x8xf32>
    %60 = vector.extract_strided_slice %39 {offsets = [0, 0], sizes = [8, 32], strides = [1, 1]} : vector<32x32xf32> to vector<8x32xf32>
    %cst_44 = arith.constant dense<0.000000e+00> : vector<8x32xf32>
    %61 = tpu.matmul %59, %60, %cst_44 {dimension_numbers = #tpu.dot_dimension_numbers<[1], [0], [0], [1], [0, 0, 1, 1], [], []>} : vector<8x8xf32>, vector<8x32xf32>, vector<8x32xf32> -> vector<8x32xf32>
    %62 = arith.addf %40, %61 : vector<8x32xf32>
    %63 = vector.extract_strided_slice %31 {offsets = [0, 8], sizes = [8, 8], strides = [1, 1]} : vector<8x32xf32> to vector<8x8xf32>
    %64 = vector.extract_strided_slice %37 {offsets = [0, 8], sizes = [8, 8], strides = [1, 1]} : vector<8x32xf32> to vector<8x8xf32>
    %65 = vector.extract_strided_slice %38 {offsets = [0, 8], sizes = [8, 8], strides = [1, 1]} : vector<8x32xf32> to vector<8x8xf32>
    %66 = tpu.transpose %64, [1, 0] : vector<8x8xf32> -> vector<8x8xf32>
    %cst_45 = arith.constant dense<0.000000e+00> : vector<8x8xf32>
    %67 = tpu.matmul %63, %66, %cst_45 {dimension_numbers = #tpu.dot_dimension_numbers<[1], [0], [0], [1], [0, 0, 1, 1], [], []>} : vector<8x8xf32>, vector<8x8xf32>, vector<8x8xf32> -> vector<8x8xf32>
    %cst_46 = arith.constant 0.353553385 : f32
    %68 = vector.broadcast %cst_46 : f32 to vector<8x8xf32>
    %69 = arith.mulf %67, %68 : vector<8x8xf32>
    %70 = vector.broadcast %3 : vector<1x8xf32> to vector<8x8xf32>
    %71 = arith.addf %69, %70 : vector<8x8xf32>
    %cst_47 = arith.constant dense<0xFF800000> : vector<8xf32>
    %72 = vector.multi_reduction <maximumf>, %71, %cst_47 [1] : vector<8x8xf32> to vector<8xf32>
    %73 = vector.shape_cast %72 : vector<8xf32> to vector<8x1xf32>
    %74 = vector.broadcast %73 : vector<8x1xf32> to vector<8x8xf32>
    %75 = arith.subf %71, %74 : vector<8x8xf32>
    %76 = math.exp %75 : vector<8x8xf32>
    %cst_48 = arith.constant dense<0.000000e+00> : vector<8xf32>
    %77 = vector.multi_reduction <add>, %76, %cst_48 [1] : vector<8x8xf32> to vector<8xf32>
    %78 = vector.shape_cast %77 : vector<8xf32> to vector<8x1xf32>
    %79 = vector.broadcast %78 : vector<8x1xf32> to vector<8x8xf32>
    %80 = arith.divf %76, %79 : vector<8x8xf32>
    %cst_49 = arith.constant dense<0.000000e+00> : vector<8x8xf32>
    %81 = tpu.matmul %80, %65, %cst_49 {dimension_numbers = #tpu.dot_dimension_numbers<[1], [0], [0], [1], [0, 0, 1, 1], [], []>} : vector<8x8xf32>, vector<8x8xf32>, vector<8x8xf32> -> vector<8x8xf32>
    %82 = vector.extract_strided_slice %39 {offsets = [8, 0], sizes = [8, 32], strides = [1, 1]} : vector<32x32xf32> to vector<8x32xf32>
    %cst_50 = arith.constant dense<0.000000e+00> : vector<8x32xf32>
    %83 = tpu.matmul %81, %82, %cst_50 {dimension_numbers = #tpu.dot_dimension_numbers<[1], [0], [0], [1], [0, 0, 1, 1], [], []>} : vector<8x8xf32>, vector<8x32xf32>, vector<8x32xf32> -> vector<8x32xf32>
    %84 = arith.addf %62, %83 : vector<8x32xf32>
    %85 = vector.extract_strided_slice %31 {offsets = [0, 16], sizes = [8, 8], strides = [1, 1]} : vector<8x32xf32> to vector<8x8xf32>
    %86 = vector.extract_strided_slice %37 {offsets = [0, 16], sizes = [8, 8], strides = [1, 1]} : vector<8x32xf32> to vector<8x8xf32>
    %87 = vector.extract_strided_slice %38 {offsets = [0, 16], sizes = [8, 8], strides = [1, 1]} : vector<8x32xf32> to vector<8x8xf32>
    %88 = tpu.transpose %86, [1, 0] : vector<8x8xf32> -> vector<8x8xf32>
    %cst_51 = arith.constant dense<0.000000e+00> : vector<8x8xf32>
    %89 = tpu.matmul %85, %88, %cst_51 {dimension_numbers = #tpu.dot_dimension_numbers<[1], [0], [0], [1], [0, 0, 1, 1], [], []>} : vector<8x8xf32>, vector<8x8xf32>, vector<8x8xf32> -> vector<8x8xf32>
    %cst_52 = arith.constant 0.353553385 : f32
    %90 = vector.broadcast %cst_52 : f32 to vector<8x8xf32>
    %91 = arith.mulf %89, %90 : vector<8x8xf32>
    %92 = vector.broadcast %3 : vector<1x8xf32> to vector<8x8xf32>
    %93 = arith.addf %91, %92 : vector<8x8xf32>
    %cst_53 = arith.constant dense<0xFF800000> : vector<8xf32>
    %94 = vector.multi_reduction <maximumf>, %93, %cst_53 [1] : vector<8x8xf32> to vector<8xf32>
    %95 = vector.shape_cast %94 : vector<8xf32> to vector<8x1xf32>
    %96 = vector.broadcast %95 : vector<8x1xf32> to vector<8x8xf32>
    %97 = arith.subf %93, %96 : vector<8x8xf32>
    %98 = math.exp %97 : vector<8x8xf32>
    %cst_54 = arith.constant dense<0.000000e+00> : vector<8xf32>
    %99 = vector.multi_reduction <add>, %98, %cst_54 [1] : vector<8x8xf32> to vector<8xf32>
    %100 = vector.shape_cast %99 : vector<8xf32> to vector<8x1xf32>
    %101 = vector.broadcast %100 : vector<8x1xf32> to vector<8x8xf32>
    %102 = arith.divf %98, %101 : vector<8x8xf32>
    %cst_55 = arith.constant dense<0.000000e+00> : vector<8x8xf32>
    %103 = tpu.matmul %102, %87, %cst_55 {dimension_numbers = #tpu.dot_dimension_numbers<[1], [0], [0], [1], [0, 0, 1, 1], [], []>} : vector<8x8xf32>, vector<8x8xf32>, vector<8x8xf32> -> vector<8x8xf32>
    %104 = vector.extract_strided_slice %39 {offsets = [16, 0], sizes = [8, 32], strides = [1, 1]} : vector<32x32xf32> to vector<8x32xf32>
    %cst_56 = arith.constant dense<0.000000e+00> : vector<8x32xf32>
    %105 = tpu.matmul %103, %104, %cst_56 {dimension_numbers = #tpu.dot_dimension_numbers<[1], [0], [0], [1], [0, 0, 1, 1], [], []>} : vector<8x8xf32>, vector<8x32xf32>, vector<8x32xf32> -> vector<8x32xf32>
    %106 = arith.addf %84, %105 : vector<8x32xf32>
    %107 = vector.extract_strided_slice %31 {offsets = [0, 24], sizes = [8, 8], strides = [1, 1]} : vector<8x32xf32> to vector<8x8xf32>
    %108 = vector.extract_strided_slice %37 {offsets = [0, 24], sizes = [8, 8], strides = [1, 1]} : vector<8x32xf32> to vector<8x8xf32>
    %109 = vector.extract_strided_slice %38 {offsets = [0, 24], sizes = [8, 8], strides = [1, 1]} : vector<8x32xf32> to vector<8x8xf32>
    %110 = tpu.transpose %108, [1, 0] : vector<8x8xf32> -> vector<8x8xf32>
    %cst_57 = arith.constant dense<0.000000e+00> : vector<8x8xf32>
    %111 = tpu.matmul %107, %110, %cst_57 {dimension_numbers = #tpu.dot_dimension_numbers<[1], [0], [0], [1], [0, 0, 1, 1], [], []>} : vector<8x8xf32>, vector<8x8xf32>, vector<8x8xf32> -> vector<8x8xf32>
    %cst_58 = arith.constant 0.353553385 : f32
    %112 = vector.broadcast %cst_58 : f32 to vector<8x8xf32>
    %113 = arith.mulf %111, %112 : vector<8x8xf32>
    %114 = vector.broadcast %3 : vector<1x8xf32> to vector<8x8xf32>
    %115 = arith.addf %113, %114 : vector<8x8xf32>
    %cst_59 = arith.constant dense<0xFF800000> : vector<8xf32>
    %116 = vector.multi_reduction <maximumf>, %115, %cst_59 [1] : vector<8x8xf32> to vector<8xf32>
    %117 = vector.shape_cast %116 : vector<8xf32> to vector<8x1xf32>
    %118 = vector.broadcast %117 : vector<8x1xf32> to vector<8x8xf32>
    %119 = arith.subf %115, %118 : vector<8x8xf32>
    %120 = math.exp %119 : vector<8x8xf32>
    %cst_60 = arith.constant dense<0.000000e+00> : vector<8xf32>
    %121 = vector.multi_reduction <add>, %120, %cst_60 [1] : vector<8x8xf32> to vector<8xf32>
    %122 = vector.shape_cast %121 : vector<8xf32> to vector<8x1xf32>
    %123 = vector.broadcast %122 : vector<8x1xf32> to vector<8x8xf32>
    %124 = arith.divf %120, %123 : vector<8x8xf32>
    %cst_61 = arith.constant dense<0.000000e+00> : vector<8x8xf32>
    %125 = tpu.matmul %124, %109, %cst_61 {dimension_numbers = #tpu.dot_dimension_numbers<[1], [0], [0], [1], [0, 0, 1, 1], [], []>} : vector<8x8xf32>, vector<8x8xf32>, vector<8x8xf32> -> vector<8x8xf32>
    %126 = vector.extract_strided_slice %39 {offsets = [24, 0], sizes = [8, 32], strides = [1, 1]} : vector<32x32xf32> to vector<8x32xf32>
    %cst_62 = arith.constant dense<0.000000e+00> : vector<8x32xf32>
    %127 = tpu.matmul %125, %126, %cst_62 {dimension_numbers = #tpu.dot_dimension_numbers<[1], [0], [0], [1], [0, 0, 1, 1], [], []>} : vector<8x8xf32>, vector<8x32xf32>, vector<8x32xf32> -> vector<8x32xf32>
    %128 = arith.addf %106, %127 : vector<8x32xf32>
    %c0_63 = arith.constant 0 : index
    %c0_64 = arith.constant 0 : index
    %129 = vector.load %arg23[%c0_63, %c0_64] : memref<1x32xf32, #tpu.memory_space<vmem>>, vector<1x32xf32>
    %130 = vector.broadcast %129 : vector<1x32xf32> to vector<8x32xf32>
    %131 = arith.addf %128, %130 : vector<8x32xf32>
    %132 = arith.addf %15, %131 : vector<8x32xf32>
    %c0_65 = arith.constant 0 : index
    %c0_66 = arith.constant 0 : index
    %133 = vector.load %arg33[%c0_65, %c0_66] : memref<1x32xf32, #tpu.memory_space<vmem>>, vector<1x32xf32>
    %c0_67 = arith.constant 0 : index
    %c0_68 = arith.constant 0 : index
    %134 = vector.load %arg32[%c0_67, %c0_68] : memref<1x32xf32, #tpu.memory_space<vmem>>, vector<1x32xf32>
    %cst_69 = arith.constant dense<0.000000e+00> : vector<8xf32>
    %135 = vector.multi_reduction <add>, %132, %cst_69 [1] : vector<8x32xf32> to vector<8xf32>
    %136 = vector.shape_cast %135 : vector<8xf32> to vector<8x1xf32>
    %cst_70 = arith.constant 3.200000e+01 : f32
    %137 = vector.broadcast %cst_70 : f32 to vector<8x1xf32>
    %138 = arith.divf %136, %137 : vector<8x1xf32>
    %139 = vector.broadcast %138 : vector<8x1xf32> to vector<8x32xf32>
    %140 = arith.subf %132, %139 : vector<8x32xf32>
    %141 = arith.mulf %140, %140 : vector<8x32xf32>
    %cst_71 = arith.constant dense<0.000000e+00> : vector<8xf32>
    %142 = vector.multi_reduction <add>, %141, %cst_71 [1] : vector<8x32xf32> to vector<8xf32>
    %143 = vector.shape_cast %142 : vector<8xf32> to vector<8x1xf32>
    %cst_72 = arith.constant 3.200000e+01 : f32
    %144 = vector.broadcast %cst_72 : f32 to vector<8x1xf32>
    %145 = arith.divf %143, %144 : vector<8x1xf32>
    %cst_73 = arith.constant 9.99999974E-6 : f32
    %146 = vector.broadcast %cst_73 : f32 to vector<8x1xf32>
    %147 = arith.addf %145, %146 : vector<8x1xf32>
    %148 = math.rsqrt %147 : vector<8x1xf32>
    %149 = vector.broadcast %148 : vector<8x1xf32> to vector<8x32xf32>
    %150 = arith.mulf %140, %149 : vector<8x32xf32>
    %151 = vector.broadcast %133 : vector<1x32xf32> to vector<8x32xf32>
    %152 = arith.mulf %150, %151 : vector<8x32xf32>
    %153 = vector.broadcast %134 : vector<1x32xf32> to vector<8x32xf32>
    %154 = arith.addf %152, %153 : vector<8x32xf32>
    %c0_74 = arith.constant 0 : index
    %c0_75 = arith.constant 0 : index
    %155 = vector.load %arg30[%c0_74, %c0_75] : memref<32x128xf32, #tpu.memory_space<vmem>>, vector<32x128xf32>
    %cst_76 = arith.constant dense<0.000000e+00> : vector<8x128xf32>
    %156 = tpu.matmul %154, %155, %cst_76 {dimension_numbers = #tpu.dot_dimension_numbers<[1], [0], [0], [1], [0, 0, 1, 1], [], []>} : vector<8x32xf32>, vector<32x128xf32>, vector<8x128xf32> -> vector<8x128xf32>
    %c0_77 = arith.constant 0 : index
    %c0_78 = arith.constant 0 : index
    %157 = vector.load %arg28[%c0_77, %c0_78] : memref<1x128xf32, #tpu.memory_space<vmem>>, vector<1x128xf32>
    %158 = vector.broadcast %157 : vector<1x128xf32> to vector<8x128xf32>
    %159 = arith.addf %156, %158 : vector<8x128xf32>
    %cst_79 = arith.constant 0.000000e+00 : f32
    %160 = vector.broadcast %cst_79 : f32 to vector<8x128xf32>
    %161 = arith.maximumf %159, %160 : vector<8x128xf32>
    %c0_80 = arith.constant 0 : index
    %c0_81 = arith.constant 0 : index
    %162 = vector.load %arg31[%c0_80, %c0_81] : memref<128x32xf32, #tpu.memory_space<vmem>>, vector<128x32xf32>
    %cst_82 = arith.constant dense<0.000000e+00> : vector<8x32xf32>
    %163 = tpu.matmul %161, %162, %cst_82 {dimension_numbers = #tpu.dot_dimension_numbers<[1], [0], [0], [1], [0, 0, 1, 1], [], []>} : vector<8x128xf32>, vector<128x32xf32>, vector<8x32xf32> -> vector<8x32xf32>
    %c0_83 = arith.constant 0 : index
    %c0_84 = arith.constant 0 : index
    %164 = vector.load %arg29[%c0_83, %c0_84] : memref<1x32xf32, #tpu.memory_space<vmem>>, vector<1x32xf32>
    %165 = vector.broadcast %164 : vector<1x32xf32> to vector<8x32xf32>
    %166 = arith.addf %163, %165 : vector<8x32xf32>
    %167 = arith.addf %154, %166 : vector<8x32xf32>
    %c0_85 = arith.constant 0 : index
    %c0_86 = arith.constant 0 : index
    %168 = vector.load %arg35[%c0_85, %c0_86] : memref<1x32xf32, #tpu.memory_space<vmem>>, vector<1x32xf32>
    %c0_87 = arith.constant 0 : index
    %c0_88 = arith.constant 0 : index
    %169 = vector.load %arg34[%c0_87, %c0_88] : memref<1x32xf32, #tpu.memory_space<vmem>>, vector<1x32xf32>
    %cst_89 = arith.constant dense<0.000000e+00> : vector<8xf32>
    %170 = vector.multi_reduction <add>, %167, %cst_89 [1] : vector<8x32xf32> to vector<8xf32>
    %171 = vector.shape_cast %170 : vector<8xf32> to vector<8x1xf32>
    %cst_90 = arith.constant 3.200000e+01 : f32
    %172 = vector.broadcast %cst_90 : f32 to vector<8x1xf32>
    %173 = arith.divf %171, %172 : vector<8x1xf32>
    %174 = vector.broadcast %173 : vector<8x1xf32> to vector<8x32xf32>
    %175 = arith.subf %167, %174 : vector<8x32xf32>
    %176 = arith.mulf %175, %175 : vector<8x32xf32>
    %cst_91 = arith.constant dense<0.000000e+00> : vector<8xf32>
    %177 = vector.multi_reduction <add>, %176, %cst_91 [1] : vector<8x32xf32> to vector<8xf32>
    %178 = vector.shape_cast %177 : vector<8xf32> to vector<8x1xf32>
    %cst_92 = arith.constant 3.200000e+01 : f32
    %179 = vector.broadcast %cst_92 : f32 to vector<8x1xf32>
    %180 = arith.divf %178, %179 : vector<8x1xf32>
    %cst_93 = arith.constant 9.99999974E-6 : f32
    %181 = vector.broadcast %cst_93 : f32 to vector<8x1xf32>
    %182 = arith.addf %180, %181 : vector<8x1xf32>
    %183 = math.rsqrt %182 : vector<8x1xf32>
    %184 = vector.broadcast %183 : vector<8x1xf32> to vector<8x32xf32>
    %185 = arith.mulf %175, %184 : vector<8x32xf32>
    %186 = vector.broadcast %168 : vector<1x32xf32> to vector<8x32xf32>
    %187 = arith.mulf %185, %186 : vector<8x32xf32>
    %188 = vector.broadcast %169 : vector<1x32xf32> to vector<8x32xf32>
    %189 = arith.addf %187, %188 : vector<8x32xf32>
    %c0_94 = arith.constant 0 : index
    %c0_95 = arith.constant 0 : index
    %190 = vector.load %arg27[%c0_94, %c0_95] : memref<32x32xf32, #tpu.memory_space<vmem>>, vector<32x32xf32>
    %cst_96 = arith.constant dense<0.000000e+00> : vector<8x32xf32>
    %191 = tpu.matmul %19, %190, %cst_96 {dimension_numbers = #tpu.dot_dimension_numbers<[1], [0], [0], [1], [0, 0, 1, 1], [], []>} : vector<8x32xf32>, vector<32x32xf32>, vector<8x32xf32> -> vector<8x32xf32>
    %c0_97 = arith.constant 0 : index
    %c0_98 = arith.constant 0 : index
    %192 = vector.load %arg24[%c0_97, %c0_98] : memref<1x32xf32, #tpu.memory_space<vmem>>, vector<1x32xf32>
    %193 = vector.broadcast %192 : vector<1x32xf32> to vector<8x32xf32>
    %194 = arith.addf %191, %193 : vector<8x32xf32>
    %c0_99 = arith.constant 0 : index
    %c0_100 = arith.constant 0 : index
    %195 = vector.load %arg25[%c0_99, %c0_100] : memref<32x64xf32, #tpu.memory_space<vmem>>, vector<32x64xf32>
    %cst_101 = arith.constant dense<0.000000e+00> : vector<8x64xf32>
    %196 = tpu.matmul %19, %195, %cst_101 {dimension_numbers = #tpu.dot_dimension_numbers<[1], [0], [0], [1], [0, 0, 1, 1], [], []>} : vector<8x32xf32>, vector<32x64xf32>, vector<8x64xf32> -> vector<8x64xf32>
    %c0_102 = arith.constant 0 : index
    %c0_103 = arith.constant 0 : index
    %197 = vector.load %arg22[%c0_102, %c0_103] : memref<1x64xf32, #tpu.memory_space<vmem>>, vector<1x64xf32>
    %198 = vector.broadcast %197 : vector<1x64xf32> to vector<8x64xf32>
    %199 = arith.addf %196, %198 : vector<8x64xf32>
    %200 = vector.extract_strided_slice %199 {offsets = [0, 0], sizes = [8, 32], strides = [1, 1]} : vector<8x64xf32> to vector<8x32xf32>
    %201 = vector.extract_strided_slice %199 {offsets = [0, 32], sizes = [8, 32], strides = [1, 1]} : vector<8x64xf32> to vector<8x32xf32>
    %c0_104 = arith.constant 0 : index
    %c0_105 = arith.constant 0 : index
    %202 = vector.load %arg26[%c0_104, %c0_105] : memref<32x32xf32, #tpu.memory_space<vmem>>, vector<32x32xf32>
    %cst_106 = arith.constant 0.000000e+00 : f32
    %203 = vector.broadcast %cst_106 : f32 to vector<8x32xf32>
    %204 = vector.extract_strided_slice %194 {offsets = [0, 0], sizes = [8, 8], strides = [1, 1]} : vector<8x32xf32> to vector<8x8xf32>
    %205 = vector.extract_strided_slice %200 {offsets = [0, 0], sizes = [8, 8], strides = [1, 1]} : vector<8x32xf32> to vector<8x8xf32>
    %206 = vector.extract_strided_slice %201 {offsets = [0, 0], sizes = [8, 8], strides = [1, 1]} : vector<8x32xf32> to vector<8x8xf32>
    %207 = tpu.transpose %205, [1, 0] : vector<8x8xf32> -> vector<8x8xf32>
    %cst_107 = arith.constant dense<0.000000e+00> : vector<8x8xf32>
    %208 = tpu.matmul %204, %207, %cst_107 {dimension_numbers = #tpu.dot_dimension_numbers<[1], [0], [0], [1], [0, 0, 1, 1], [], []>} : vector<8x8xf32>, vector<8x8xf32>, vector<8x8xf32> -> vector<8x8xf32>
    %cst_108 = arith.constant 0.353553385 : f32
    %209 = vector.broadcast %cst_108 : f32 to vector<8x8xf32>
    %210 = arith.mulf %208, %209 : vector<8x8xf32>
    %211 = vector.broadcast %5 : vector<1x8xf32> to vector<8x8xf32>
    %212 = arith.addf %210, %211 : vector<8x8xf32>
    %cst_109 = arith.constant dense<0xFF800000> : vector<8xf32>
    %213 = vector.multi_reduction <maximumf>, %212, %cst_109 [1] : vector<8x8xf32> to vector<8xf32>
    %214 = vector.shape_cast %213 : vector<8xf32> to vector<8x1xf32>
    %215 = vector.broadcast %214 : vector<8x1xf32> to vector<8x8xf32>
    %216 = arith.subf %212, %215 : vector<8x8xf32>
    %217 = math.exp %216 : vector<8x8xf32>
    %cst_110 = arith.constant dense<0.000000e+00> : vector<8xf32>
    %218 = vector.multi_reduction <add>, %217, %cst_110 [1] : vector<8x8xf32> to vector<8xf32>
    %219 = vector.shape_cast %218 : vector<8xf32> to vector<8x1xf32>
    %220 = vector.broadcast %219 : vector<8x1xf32> to vector<8x8xf32>
    %221 = arith.divf %217, %220 : vector<8x8xf32>
    %cst_111 = arith.constant dense<0.000000e+00> : vector<8x8xf32>
    %222 = tpu.matmul %221, %206, %cst_111 {dimension_numbers = #tpu.dot_dimension_numbers<[1], [0], [0], [1], [0, 0, 1, 1], [], []>} : vector<8x8xf32>, vector<8x8xf32>, vector<8x8xf32> -> vector<8x8xf32>
    %223 = vector.extract_strided_slice %202 {offsets = [0, 0], sizes = [8, 32], strides = [1, 1]} : vector<32x32xf32> to vector<8x32xf32>
    %cst_112 = arith.constant dense<0.000000e+00> : vector<8x32xf32>
    %224 = tpu.matmul %222, %223, %cst_112 {dimension_numbers = #tpu.dot_dimension_numbers<[1], [0], [0], [1], [0, 0, 1, 1], [], []>} : vector<8x8xf32>, vector<8x32xf32>, vector<8x32xf32> -> vector<8x32xf32>
    %225 = arith.addf %203, %224 : vector<8x32xf32>
    %226 = vector.extract_strided_slice %194 {offsets = [0, 8], sizes = [8, 8], strides = [1, 1]} : vector<8x32xf32> to vector<8x8xf32>
    %227 = vector.extract_strided_slice %200 {offsets = [0, 8], sizes = [8, 8], strides = [1, 1]} : vector<8x32xf32> to vector<8x8xf32>
    %228 = vector.extract_strided_slice %201 {offsets = [0, 8], sizes = [8, 8], strides = [1, 1]} : vector<8x32xf32> to vector<8x8xf32>
    %229 = tpu.transpose %227, [1, 0] : vector<8x8xf32> -> vector<8x8xf32>
    %cst_113 = arith.constant dense<0.000000e+00> : vector<8x8xf32>
    %230 = tpu.matmul %226, %229, %cst_113 {dimension_numbers = #tpu.dot_dimension_numbers<[1], [0], [0], [1], [0, 0, 1, 1], [], []>} : vector<8x8xf32>, vector<8x8xf32>, vector<8x8xf32> -> vector<8x8xf32>
    %cst_114 = arith.constant 0.353553385 : f32
    %231 = vector.broadcast %cst_114 : f32 to vector<8x8xf32>
    %232 = arith.mulf %230, %231 : vector<8x8xf32>
    %233 = vector.broadcast %5 : vector<1x8xf32> to vector<8x8xf32>
    %234 = arith.addf %232, %233 : vector<8x8xf32>
    %cst_115 = arith.constant dense<0xFF800000> : vector<8xf32>
    %235 = vector.multi_reduction <maximumf>, %234, %cst_115 [1] : vector<8x8xf32> to vector<8xf32>
    %236 = vector.shape_cast %235 : vector<8xf32> to vector<8x1xf32>
    %237 = vector.broadcast %236 : vector<8x1xf32> to vector<8x8xf32>
    %238 = arith.subf %234, %237 : vector<8x8xf32>
    %239 = math.exp %238 : vector<8x8xf32>
    %cst_116 = arith.constant dense<0.000000e+00> : vector<8xf32>
    %240 = vector.multi_reduction <add>, %239, %cst_116 [1] : vector<8x8xf32> to vector<8xf32>
    %241 = vector.shape_cast %240 : vector<8xf32> to vector<8x1xf32>
    %242 = vector.broadcast %241 : vector<8x1xf32> to vector<8x8xf32>
    %243 = arith.divf %239, %242 : vector<8x8xf32>
    %cst_117 = arith.constant dense<0.000000e+00> : vector<8x8xf32>
    %244 = tpu.matmul %243, %228, %cst_117 {dimension_numbers = #tpu.dot_dimension_numbers<[1], [0], [0], [1], [0, 0, 1, 1], [], []>} : vector<8x8xf32>, vector<8x8xf32>, vector<8x8xf32> -> vector<8x8xf32>
    %245 = vector.extract_strided_slice %202 {offsets = [8, 0], sizes = [8, 32], strides = [1, 1]} : vector<32x32xf32> to vector<8x32xf32>
    %cst_118 = arith.constant dense<0.000000e+00> : vector<8x32xf32>
    %246 = tpu.matmul %244, %245, %cst_118 {dimension_numbers = #tpu.dot_dimension_numbers<[1], [0], [0], [1], [0, 0, 1, 1], [], []>} : vector<8x8xf32>, vector<8x32xf32>, vector<8x32xf32> -> vector<8x32xf32>
    %247 = arith.addf %225, %246 : vector<8x32xf32>
    %248 = vector.extract_strided_slice %194 {offsets = [0, 16], sizes = [8, 8], strides = [1, 1]} : vector<8x32xf32> to vector<8x8xf32>
    %249 = vector.extract_strided_slice %200 {offsets = [0, 16], sizes = [8, 8], strides = [1, 1]} : vector<8x32xf32> to vector<8x8xf32>
    %250 = vector.extract_strided_slice %201 {offsets = [0, 16], sizes = [8, 8], strides = [1, 1]} : vector<8x32xf32> to vector<8x8xf32>
    %251 = tpu.transpose %249, [1, 0] : vector<8x8xf32> -> vector<8x8xf32>
    %cst_119 = arith.constant dense<0.000000e+00> : vector<8x8xf32>
    %252 = tpu.matmul %248, %251, %cst_119 {dimension_numbers = #tpu.dot_dimension_numbers<[1], [0], [0], [1], [0, 0, 1, 1], [], []>} : vector<8x8xf32>, vector<8x8xf32>, vector<8x8xf32> -> vector<8x8xf32>
    %cst_120 = arith.constant 0.353553385 : f32
    %253 = vector.broadcast %cst_120 : f32 to vector<8x8xf32>
    %254 = arith.mulf %252, %253 : vector<8x8xf32>
    %255 = vector.broadcast %5 : vector<1x8xf32> to vector<8x8xf32>
    %256 = arith.addf %254, %255 : vector<8x8xf32>
    %cst_121 = arith.constant dense<0xFF800000> : vector<8xf32>
    %257 = vector.multi_reduction <maximumf>, %256, %cst_121 [1] : vector<8x8xf32> to vector<8xf32>
    %258 = vector.shape_cast %257 : vector<8xf32> to vector<8x1xf32>
    %259 = vector.broadcast %258 : vector<8x1xf32> to vector<8x8xf32>
    %260 = arith.subf %256, %259 : vector<8x8xf32>
    %261 = math.exp %260 : vector<8x8xf32>
    %cst_122 = arith.constant dense<0.000000e+00> : vector<8xf32>
    %262 = vector.multi_reduction <add>, %261, %cst_122 [1] : vector<8x8xf32> to vector<8xf32>
    %263 = vector.shape_cast %262 : vector<8xf32> to vector<8x1xf32>
    %264 = vector.broadcast %263 : vector<8x1xf32> to vector<8x8xf32>
    %265 = arith.divf %261, %264 : vector<8x8xf32>
    %cst_123 = arith.constant dense<0.000000e+00> : vector<8x8xf32>
    %266 = tpu.matmul %265, %250, %cst_123 {dimension_numbers = #tpu.dot_dimension_numbers<[1], [0], [0], [1], [0, 0, 1, 1], [], []>} : vector<8x8xf32>, vector<8x8xf32>, vector<8x8xf32> -> vector<8x8xf32>
    %267 = vector.extract_strided_slice %202 {offsets = [16, 0], sizes = [8, 32], strides = [1, 1]} : vector<32x32xf32> to vector<8x32xf32>
    %cst_124 = arith.constant dense<0.000000e+00> : vector<8x32xf32>
    %268 = tpu.matmul %266, %267, %cst_124 {dimension_numbers = #tpu.dot_dimension_numbers<[1], [0], [0], [1], [0, 0, 1, 1], [], []>} : vector<8x8xf32>, vector<8x32xf32>, vector<8x32xf32> -> vector<8x32xf32>
    %269 = arith.addf %247, %268 : vector<8x32xf32>
    %270 = vector.extract_strided_slice %194 {offsets = [0, 24], sizes = [8, 8], strides = [1, 1]} : vector<8x32xf32> to vector<8x8xf32>
    %271 = vector.extract_strided_slice %200 {offsets = [0, 24], sizes = [8, 8], strides = [1, 1]} : vector<8x32xf32> to vector<8x8xf32>
    %272 = vector.extract_strided_slice %201 {offsets = [0, 24], sizes = [8, 8], strides = [1, 1]} : vector<8x32xf32> to vector<8x8xf32>
    %273 = tpu.transpose %271, [1, 0] : vector<8x8xf32> -> vector<8x8xf32>
    %cst_125 = arith.constant dense<0.000000e+00> : vector<8x8xf32>
    %274 = tpu.matmul %270, %273, %cst_125 {dimension_numbers = #tpu.dot_dimension_numbers<[1], [0], [0], [1], [0, 0, 1, 1], [], []>} : vector<8x8xf32>, vector<8x8xf32>, vector<8x8xf32> -> vector<8x8xf32>
    %cst_126 = arith.constant 0.353553385 : f32
    %275 = vector.broadcast %cst_126 : f32 to vector<8x8xf32>
    %276 = arith.mulf %274, %275 : vector<8x8xf32>
    %277 = vector.broadcast %5 : vector<1x8xf32> to vector<8x8xf32>
    %278 = arith.addf %276, %277 : vector<8x8xf32>
    %cst_127 = arith.constant dense<0xFF800000> : vector<8xf32>
    %279 = vector.multi_reduction <maximumf>, %278, %cst_127 [1] : vector<8x8xf32> to vector<8xf32>
    %280 = vector.shape_cast %279 : vector<8xf32> to vector<8x1xf32>
    %281 = vector.broadcast %280 : vector<8x1xf32> to vector<8x8xf32>
    %282 = arith.subf %278, %281 : vector<8x8xf32>
    %283 = math.exp %282 : vector<8x8xf32>
    %cst_128 = arith.constant dense<0.000000e+00> : vector<8xf32>
    %284 = vector.multi_reduction <add>, %283, %cst_128 [1] : vector<8x8xf32> to vector<8xf32>
    %285 = vector.shape_cast %284 : vector<8xf32> to vector<8x1xf32>
    %286 = vector.broadcast %285 : vector<8x1xf32> to vector<8x8xf32>
    %287 = arith.divf %283, %286 : vector<8x8xf32>
    %cst_129 = arith.constant dense<0.000000e+00> : vector<8x8xf32>
    %288 = tpu.matmul %287, %272, %cst_129 {dimension_numbers = #tpu.dot_dimension_numbers<[1], [0], [0], [1], [0, 0, 1, 1], [], []>} : vector<8x8xf32>, vector<8x8xf32>, vector<8x8xf32> -> vector<8x8xf32>
    %289 = vector.extract_strided_slice %202 {offsets = [24, 0], sizes = [8, 32], strides = [1, 1]} : vector<32x32xf32> to vector<8x32xf32>
    %cst_130 = arith.constant dense<0.000000e+00> : vector<8x32xf32>
    %290 = tpu.matmul %288, %289, %cst_130 {dimension_numbers = #tpu.dot_dimension_numbers<[1], [0], [0], [1], [0, 0, 1, 1], [], []>} : vector<8x8xf32>, vector<8x32xf32>, vector<8x32xf32> -> vector<8x32xf32>
    %291 = arith.addf %269, %290 : vector<8x32xf32>
    %c0_131 = arith.constant 0 : index
    %c0_132 = arith.constant 0 : index
    %292 = vector.load %arg23[%c0_131, %c0_132] : memref<1x32xf32, #tpu.memory_space<vmem>>, vector<1x32xf32>
    %293 = vector.broadcast %292 : vector<1x32xf32> to vector<8x32xf32>
    %294 = arith.addf %291, %293 : vector<8x32xf32>
    %295 = arith.addf %19, %294 : vector<8x32xf32>
    %c0_133 = arith.constant 0 : index
    %c0_134 = arith.constant 0 : index
    %296 = vector.load %arg33[%c0_133, %c0_134] : memref<1x32xf32, #tpu.memory_space<vmem>>, vector<1x32xf32>
    %c0_135 = arith.constant 0 : index
    %c0_136 = arith.constant 0 : index
    %297 = vector.load %arg32[%c0_135, %c0_136] : memref<1x32xf32, #tpu.memory_space<vmem>>, vector<1x32xf32>
    %cst_137 = arith.constant dense<0.000000e+00> : vector<8xf32>
    %298 = vector.multi_reduction <add>, %295, %cst_137 [1] : vector<8x32xf32> to vector<8xf32>
    %299 = vector.shape_cast %298 : vector<8xf32> to vector<8x1xf32>
    %cst_138 = arith.constant 3.200000e+01 : f32
    %300 = vector.broadcast %cst_138 : f32 to vector<8x1xf32>
    %301 = arith.divf %299, %300 : vector<8x1xf32>
    %302 = vector.broadcast %301 : vector<8x1xf32> to vector<8x32xf32>
    %303 = arith.subf %295, %302 : vector<8x32xf32>
    %304 = arith.mulf %303, %303 : vector<8x32xf32>
    %cst_139 = arith.constant dense<0.000000e+00> : vector<8xf32>
    %305 = vector.multi_reduction <add>, %304, %cst_139 [1] : vector<8x32xf32> to vector<8xf32>
    %306 = vector.shape_cast %305 : vector<8xf32> to vector<8x1xf32>
    %cst_140 = arith.constant 3.200000e+01 : f32
    %307 = vector.broadcast %cst_140 : f32 to vector<8x1xf32>
    %308 = arith.divf %306, %307 : vector<8x1xf32>
    %cst_141 = arith.constant 9.99999974E-6 : f32
    %309 = vector.broadcast %cst_141 : f32 to vector<8x1xf32>
    %310 = arith.addf %308, %309 : vector<8x1xf32>
    %311 = math.rsqrt %310 : vector<8x1xf32>
    %312 = vector.broadcast %311 : vector<8x1xf32> to vector<8x32xf32>
    %313 = arith.mulf %303, %312 : vector<8x32xf32>
    %314 = vector.broadcast %296 : vector<1x32xf32> to vector<8x32xf32>
    %315 = arith.mulf %313, %314 : vector<8x32xf32>
    %316 = vector.broadcast %297 : vector<1x32xf32> to vector<8x32xf32>
    %317 = arith.addf %315, %316 : vector<8x32xf32>
    %c0_142 = arith.constant 0 : index
    %c0_143 = arith.constant 0 : index
    %318 = vector.load %arg30[%c0_142, %c0_143] : memref<32x128xf32, #tpu.memory_space<vmem>>, vector<32x128xf32>
    %cst_144 = arith.constant dense<0.000000e+00> : vector<8x128xf32>
    %319 = tpu.matmul %317, %318, %cst_144 {dimension_numbers = #tpu.dot_dimension_numbers<[1], [0], [0], [1], [0, 0, 1, 1], [], []>} : vector<8x32xf32>, vector<32x128xf32>, vector<8x128xf32> -> vector<8x128xf32>
    %c0_145 = arith.constant 0 : index
    %c0_146 = arith.constant 0 : index
    %320 = vector.load %arg28[%c0_145, %c0_146] : memref<1x128xf32, #tpu.memory_space<vmem>>, vector<1x128xf32>
    %321 = vector.broadcast %320 : vector<1x128xf32> to vector<8x128xf32>
    %322 = arith.addf %319, %321 : vector<8x128xf32>
    %cst_147 = arith.constant 0.000000e+00 : f32
    %323 = vector.broadcast %cst_147 : f32 to vector<8x128xf32>
    %324 = arith.maximumf %322, %323 : vector<8x128xf32>
    %c0_148 = arith.constant 0 : index
    %c0_149 = arith.constant 0 : index
    %325 = vector.load %arg31[%c0_148, %c0_149] : memref<128x32xf32, #tpu.memory_space<vmem>>, vector<128x32xf32>
    %cst_150 = arith.constant dense<0.000000e+00> : vector<8x32xf32>
    %326 = tpu.matmul %324, %325, %cst_150 {dimension_numbers = #tpu.dot_dimension_numbers<[1], [0], [0], [1], [0, 0, 1, 1], [], []>} : vector<8x128xf32>, vector<128x32xf32>, vector<8x32xf32> -> vector<8x32xf32>
    %c0_151 = arith.constant 0 : index
    %c0_152 = arith.constant 0 : index
    %327 = vector.load %arg29[%c0_151, %c0_152] : memref<1x32xf32, #tpu.memory_space<vmem>>, vector<1x32xf32>
    %328 = vector.broadcast %327 : vector<1x32xf32> to vector<8x32xf32>
    %329 = arith.addf %326, %328 : vector<8x32xf32>
    %330 = arith.addf %317, %329 : vector<8x32xf32>
    %c0_153 = arith.constant 0 : index
    %c0_154 = arith.constant 0 : index
    %331 = vector.load %arg35[%c0_153, %c0_154] : memref<1x32xf32, #tpu.memory_space<vmem>>, vector<1x32xf32>
    %c0_155 = arith.constant 0 : index
    %c0_156 = arith.constant 0 : index
    %332 = vector.load %arg34[%c0_155, %c0_156] : memref<1x32xf32, #tpu.memory_space<vmem>>, vector<1x32xf32>
    %cst_157 = arith.constant dense<0.000000e+00> : vector<8xf32>
    %333 = vector.multi_reduction <add>, %330, %cst_157 [1] : vector<8x32xf32> to vector<8xf32>
    %334 = vector.shape_cast %333 : vector<8xf32> to vector<8x1xf32>
    %cst_158 = arith.constant 3.200000e+01 : f32
    %335 = vector.broadcast %cst_158 : f32 to vector<8x1xf32>
    %336 = arith.divf %334, %335 : vector<8x1xf32>
    %337 = vector.broadcast %336 : vector<8x1xf32> to vector<8x32xf32>
    %338 = arith.subf %330, %337 : vector<8x32xf32>
    %339 = arith.mulf %338, %338 : vector<8x32xf32>
    %cst_159 = arith.constant dense<0.000000e+00> : vector<8xf32>
    %340 = vector.multi_reduction <add>, %339, %cst_159 [1] : vector<8x32xf32> to vector<8xf32>
    %341 = vector.shape_cast %340 : vector<8xf32> to vector<8x1xf32>
    %cst_160 = arith.constant 3.200000e+01 : f32
    %342 = vector.broadcast %cst_160 : f32 to vector<8x1xf32>
    %343 = arith.divf %341, %342 : vector<8x1xf32>
    %cst_161 = arith.constant 9.99999974E-6 : f32
    %344 = vector.broadcast %cst_161 : f32 to vector<8x1xf32>
    %345 = arith.addf %343, %344 : vector<8x1xf32>
    %346 = math.rsqrt %345 : vector<8x1xf32>
    %347 = vector.broadcast %346 : vector<8x1xf32> to vector<8x32xf32>
    %348 = arith.mulf %338, %347 : vector<8x32xf32>
    %349 = vector.broadcast %331 : vector<1x32xf32> to vector<8x32xf32>
    %350 = arith.mulf %348, %349 : vector<8x32xf32>
    %351 = vector.broadcast %332 : vector<1x32xf32> to vector<8x32xf32>
    %352 = arith.addf %350, %351 : vector<8x32xf32>
    %c0_162 = arith.constant 0 : index
    %c0_163 = arith.constant 0 : index
    %353 = vector.load %arg41[%c0_162, %c0_163] : memref<32x32xf32, #tpu.memory_space<vmem>>, vector<32x32xf32>
    %cst_164 = arith.constant dense<0.000000e+00> : vector<8x32xf32>
    %354 = tpu.matmul %189, %353, %cst_164 {dimension_numbers = #tpu.dot_dimension_numbers<[1], [0], [0], [1], [0, 0, 1, 1], [], []>} : vector<8x32xf32>, vector<32x32xf32>, vector<8x32xf32> -> vector<8x32xf32>
    %c0_165 = arith.constant 0 : index
    %c0_166 = arith.constant 0 : index
    %355 = vector.load %arg38[%c0_165, %c0_166] : memref<1x32xf32, #tpu.memory_space<vmem>>, vector<1x32xf32>
    %356 = vector.broadcast %355 : vector<1x32xf32> to vector<8x32xf32>
    %357 = arith.addf %354, %356 : vector<8x32xf32>
    %c0_167 = arith.constant 0 : index
    %c0_168 = arith.constant 0 : index
    %358 = vector.load %arg39[%c0_167, %c0_168] : memref<32x64xf32, #tpu.memory_space<vmem>>, vector<32x64xf32>
    %cst_169 = arith.constant dense<0.000000e+00> : vector<8x64xf32>
    %359 = tpu.matmul %189, %358, %cst_169 {dimension_numbers = #tpu.dot_dimension_numbers<[1], [0], [0], [1], [0, 0, 1, 1], [], []>} : vector<8x32xf32>, vector<32x64xf32>, vector<8x64xf32> -> vector<8x64xf32>
    %c0_170 = arith.constant 0 : index
    %c0_171 = arith.constant 0 : index
    %360 = vector.load %arg36[%c0_170, %c0_171] : memref<1x64xf32, #tpu.memory_space<vmem>>, vector<1x64xf32>
    %361 = vector.broadcast %360 : vector<1x64xf32> to vector<8x64xf32>
    %362 = arith.addf %359, %361 : vector<8x64xf32>
    %363 = vector.extract_strided_slice %362 {offsets = [0, 0], sizes = [8, 32], strides = [1, 1]} : vector<8x64xf32> to vector<8x32xf32>
    %364 = vector.extract_strided_slice %362 {offsets = [0, 32], sizes = [8, 32], strides = [1, 1]} : vector<8x64xf32> to vector<8x32xf32>
    %c0_172 = arith.constant 0 : index
    %c0_173 = arith.constant 0 : index
    %365 = vector.load %arg40[%c0_172, %c0_173] : memref<32x32xf32, #tpu.memory_space<vmem>>, vector<32x32xf32>
    %cst_174 = arith.constant 0.000000e+00 : f32
    %366 = vector.broadcast %cst_174 : f32 to vector<8x32xf32>
    %367 = vector.extract_strided_slice %357 {offsets = [0, 0], sizes = [8, 8], strides = [1, 1]} : vector<8x32xf32> to vector<8x8xf32>
    %368 = vector.extract_strided_slice %363 {offsets = [0, 0], sizes = [8, 8], strides = [1, 1]} : vector<8x32xf32> to vector<8x8xf32>
    %369 = vector.extract_strided_slice %364 {offsets = [0, 0], sizes = [8, 8], strides = [1, 1]} : vector<8x32xf32> to vector<8x8xf32>
    %370 = tpu.transpose %368, [1, 0] : vector<8x8xf32> -> vector<8x8xf32>
    %cst_175 = arith.constant dense<0.000000e+00> : vector<8x8xf32>
    %371 = tpu.matmul %367, %370, %cst_175 {dimension_numbers = #tpu.dot_dimension_numbers<[1], [0], [0], [1], [0, 0, 1, 1], [], []>} : vector<8x8xf32>, vector<8x8xf32>, vector<8x8xf32> -> vector<8x8xf32>
    %cst_176 = arith.constant 0.353553385 : f32
    %372 = vector.broadcast %cst_176 : f32 to vector<8x8xf32>
    %373 = arith.mulf %371, %372 : vector<8x8xf32>
    %374 = vector.broadcast %3 : vector<1x8xf32> to vector<8x8xf32>
    %375 = arith.addf %373, %374 : vector<8x8xf32>
    %cst_177 = arith.constant dense<0xFF800000> : vector<8xf32>
    %376 = vector.multi_reduction <maximumf>, %375, %cst_177 [1] : vector<8x8xf32> to vector<8xf32>
    %377 = vector.shape_cast %376 : vector<8xf32> to vector<8x1xf32>
    %378 = vector.broadcast %377 : vector<8x1xf32> to vector<8x8xf32>
    %379 = arith.subf %375, %378 : vector<8x8xf32>
    %380 = math.exp %379 : vector<8x8xf32>
    %cst_178 = arith.constant dense<0.000000e+00> : vector<8xf32>
    %381 = vector.multi_reduction <add>, %380, %cst_178 [1] : vector<8x8xf32> to vector<8xf32>
    %382 = vector.shape_cast %381 : vector<8xf32> to vector<8x1xf32>
    %383 = vector.broadcast %382 : vector<8x1xf32> to vector<8x8xf32>
    %384 = arith.divf %380, %383 : vector<8x8xf32>
    %cst_179 = arith.constant dense<0.000000e+00> : vector<8x8xf32>
    %385 = tpu.matmul %384, %369, %cst_179 {dimension_numbers = #tpu.dot_dimension_numbers<[1], [0], [0], [1], [0, 0, 1, 1], [], []>} : vector<8x8xf32>, vector<8x8xf32>, vector<8x8xf32> -> vector<8x8xf32>
    %386 = vector.extract_strided_slice %365 {offsets = [0, 0], sizes = [8, 32], strides = [1, 1]} : vector<32x32xf32> to vector<8x32xf32>
    %cst_180 = arith.constant dense<0.000000e+00> : vector<8x32xf32>
    %387 = tpu.matmul %385, %386, %cst_180 {dimension_numbers = #tpu.dot_dimension_numbers<[1], [0], [0], [1], [0, 0, 1, 1], [], []>} : vector<8x8xf32>, vector<8x32xf32>, vector<8x32xf32> -> vector<8x32xf32>
    %388 = arith.addf %366, %387 : vector<8x32xf32>
    %389 = vector.extract_strided_slice %357 {offsets = [0, 8], sizes = [8, 8], strides = [1, 1]} : vector<8x32xf32> to vector<8x8xf32>
    %390 = vector.extract_strided_slice %363 {offsets = [0, 8], sizes = [8, 8], strides = [1, 1]} : vector<8x32xf32> to vector<8x8xf32>
    %391 = vector.extract_strided_slice %364 {offsets = [0, 8], sizes = [8, 8], strides = [1, 1]} : vector<8x32xf32> to vector<8x8xf32>
    %392 = tpu.transpose %390, [1, 0] : vector<8x8xf32> -> vector<8x8xf32>
    %cst_181 = arith.constant dense<0.000000e+00> : vector<8x8xf32>
    %393 = tpu.matmul %389, %392, %cst_181 {dimension_numbers = #tpu.dot_dimension_numbers<[1], [0], [0], [1], [0, 0, 1, 1], [], []>} : vector<8x8xf32>, vector<8x8xf32>, vector<8x8xf32> -> vector<8x8xf32>
    %cst_182 = arith.constant 0.353553385 : f32
    %394 = vector.broadcast %cst_182 : f32 to vector<8x8xf32>
    %395 = arith.mulf %393, %394 : vector<8x8xf32>
    %396 = vector.broadcast %3 : vector<1x8xf32> to vector<8x8xf32>
    %397 = arith.addf %395, %396 : vector<8x8xf32>
    %cst_183 = arith.constant dense<0xFF800000> : vector<8xf32>
    %398 = vector.multi_reduction <maximumf>, %397, %cst_183 [1] : vector<8x8xf32> to vector<8xf32>
    %399 = vector.shape_cast %398 : vector<8xf32> to vector<8x1xf32>
    %400 = vector.broadcast %399 : vector<8x1xf32> to vector<8x8xf32>
    %401 = arith.subf %397, %400 : vector<8x8xf32>
    %402 = math.exp %401 : vector<8x8xf32>
    %cst_184 = arith.constant dense<0.000000e+00> : vector<8xf32>
    %403 = vector.multi_reduction <add>, %402, %cst_184 [1] : vector<8x8xf32> to vector<8xf32>
    %404 = vector.shape_cast %403 : vector<8xf32> to vector<8x1xf32>
    %405 = vector.broadcast %404 : vector<8x1xf32> to vector<8x8xf32>
    %406 = arith.divf %402, %405 : vector<8x8xf32>
    %cst_185 = arith.constant dense<0.000000e+00> : vector<8x8xf32>
    %407 = tpu.matmul %406, %391, %cst_185 {dimension_numbers = #tpu.dot_dimension_numbers<[1], [0], [0], [1], [0, 0, 1, 1], [], []>} : vector<8x8xf32>, vector<8x8xf32>, vector<8x8xf32> -> vector<8x8xf32>
    %408 = vector.extract_strided_slice %365 {offsets = [8, 0], sizes = [8, 32], strides = [1, 1]} : vector<32x32xf32> to vector<8x32xf32>
    %cst_186 = arith.constant dense<0.000000e+00> : vector<8x32xf32>
    %409 = tpu.matmul %407, %408, %cst_186 {dimension_numbers = #tpu.dot_dimension_numbers<[1], [0], [0], [1], [0, 0, 1, 1], [], []>} : vector<8x8xf32>, vector<8x32xf32>, vector<8x32xf32> -> vector<8x32xf32>
    %410 = arith.addf %388, %409 : vector<8x32xf32>
    %411 = vector.extract_strided_slice %357 {offsets = [0, 16], sizes = [8, 8], strides = [1, 1]} : vector<8x32xf32> to vector<8x8xf32>
    %412 = vector.extract_strided_slice %363 {offsets = [0, 16], sizes = [8, 8], strides = [1, 1]} : vector<8x32xf32> to vector<8x8xf32>
    %413 = vector.extract_strided_slice %364 {offsets = [0, 16], sizes = [8, 8], strides = [1, 1]} : vector<8x32xf32> to vector<8x8xf32>
    %414 = tpu.transpose %412, [1, 0] : vector<8x8xf32> -> vector<8x8xf32>
    %cst_187 = arith.constant dense<0.000000e+00> : vector<8x8xf32>
    %415 = tpu.matmul %411, %414, %cst_187 {dimension_numbers = #tpu.dot_dimension_numbers<[1], [0], [0], [1], [0, 0, 1, 1], [], []>} : vector<8x8xf32>, vector<8x8xf32>, vector<8x8xf32> -> vector<8x8xf32>
    %cst_188 = arith.constant 0.353553385 : f32
    %416 = vector.broadcast %cst_188 : f32 to vector<8x8xf32>
    %417 = arith.mulf %415, %416 : vector<8x8xf32>
    %418 = vector.broadcast %3 : vector<1x8xf32> to vector<8x8xf32>
    %419 = arith.addf %417, %418 : vector<8x8xf32>
    %cst_189 = arith.constant dense<0xFF800000> : vector<8xf32>
    %420 = vector.multi_reduction <maximumf>, %419, %cst_189 [1] : vector<8x8xf32> to vector<8xf32>
    %421 = vector.shape_cast %420 : vector<8xf32> to vector<8x1xf32>
    %422 = vector.broadcast %421 : vector<8x1xf32> to vector<8x8xf32>
    %423 = arith.subf %419, %422 : vector<8x8xf32>
    %424 = math.exp %423 : vector<8x8xf32>
    %cst_190 = arith.constant dense<0.000000e+00> : vector<8xf32>
    %425 = vector.multi_reduction <add>, %424, %cst_190 [1] : vector<8x8xf32> to vector<8xf32>
    %426 = vector.shape_cast %425 : vector<8xf32> to vector<8x1xf32>
    %427 = vector.broadcast %426 : vector<8x1xf32> to vector<8x8xf32>
    %428 = arith.divf %424, %427 : vector<8x8xf32>
    %cst_191 = arith.constant dense<0.000000e+00> : vector<8x8xf32>
    %429 = tpu.matmul %428, %413, %cst_191 {dimension_numbers = #tpu.dot_dimension_numbers<[1], [0], [0], [1], [0, 0, 1, 1], [], []>} : vector<8x8xf32>, vector<8x8xf32>, vector<8x8xf32> -> vector<8x8xf32>
    %430 = vector.extract_strided_slice %365 {offsets = [16, 0], sizes = [8, 32], strides = [1, 1]} : vector<32x32xf32> to vector<8x32xf32>
    %cst_192 = arith.constant dense<0.000000e+00> : vector<8x32xf32>
    %431 = tpu.matmul %429, %430, %cst_192 {dimension_numbers = #tpu.dot_dimension_numbers<[1], [0], [0], [1], [0, 0, 1, 1], [], []>} : vector<8x8xf32>, vector<8x32xf32>, vector<8x32xf32> -> vector<8x32xf32>
    %432 = arith.addf %410, %431 : vector<8x32xf32>
    %433 = vector.extract_strided_slice %357 {offsets = [0, 24], sizes = [8, 8], strides = [1, 1]} : vector<8x32xf32> to vector<8x8xf32>
    %434 = vector.extract_strided_slice %363 {offsets = [0, 24], sizes = [8, 8], strides = [1, 1]} : vector<8x32xf32> to vector<8x8xf32>
    %435 = vector.extract_strided_slice %364 {offsets = [0, 24], sizes = [8, 8], strides = [1, 1]} : vector<8x32xf32> to vector<8x8xf32>
    %436 = tpu.transpose %434, [1, 0] : vector<8x8xf32> -> vector<8x8xf32>
    %cst_193 = arith.constant dense<0.000000e+00> : vector<8x8xf32>
    %437 = tpu.matmul %433, %436, %cst_193 {dimension_numbers = #tpu.dot_dimension_numbers<[1], [0], [0], [1], [0, 0, 1, 1], [], []>} : vector<8x8xf32>, vector<8x8xf32>, vector<8x8xf32> -> vector<8x8xf32>
    %cst_194 = arith.constant 0.353553385 : f32
    %438 = vector.broadcast %cst_194 : f32 to vector<8x8xf32>
    %439 = arith.mulf %437, %438 : vector<8x8xf32>
    %440 = vector.broadcast %3 : vector<1x8xf32> to vector<8x8xf32>
    %441 = arith.addf %439, %440 : vector<8x8xf32>
    %cst_195 = arith.constant dense<0xFF800000> : vector<8xf32>
    %442 = vector.multi_reduction <maximumf>, %441, %cst_195 [1] : vector<8x8xf32> to vector<8xf32>
    %443 = vector.shape_cast %442 : vector<8xf32> to vector<8x1xf32>
    %444 = vector.broadcast %443 : vector<8x1xf32> to vector<8x8xf32>
    %445 = arith.subf %441, %444 : vector<8x8xf32>
    %446 = math.exp %445 : vector<8x8xf32>
    %cst_196 = arith.constant dense<0.000000e+00> : vector<8xf32>
    %447 = vector.multi_reduction <add>, %446, %cst_196 [1] : vector<8x8xf32> to vector<8xf32>
    %448 = vector.shape_cast %447 : vector<8xf32> to vector<8x1xf32>
    %449 = vector.broadcast %448 : vector<8x1xf32> to vector<8x8xf32>
    %450 = arith.divf %446, %449 : vector<8x8xf32>
    %cst_197 = arith.constant dense<0.000000e+00> : vector<8x8xf32>
    %451 = tpu.matmul %450, %435, %cst_197 {dimension_numbers = #tpu.dot_dimension_numbers<[1], [0], [0], [1], [0, 0, 1, 1], [], []>} : vector<8x8xf32>, vector<8x8xf32>, vector<8x8xf32> -> vector<8x8xf32>
    %452 = vector.extract_strided_slice %365 {offsets = [24, 0], sizes = [8, 32], strides = [1, 1]} : vector<32x32xf32> to vector<8x32xf32>
    %cst_198 = arith.constant dense<0.000000e+00> : vector<8x32xf32>
    %453 = tpu.matmul %451, %452, %cst_198 {dimension_numbers = #tpu.dot_dimension_numbers<[1], [0], [0], [1], [0, 0, 1, 1], [], []>} : vector<8x8xf32>, vector<8x32xf32>, vector<8x32xf32> -> vector<8x32xf32>
    %454 = arith.addf %432, %453 : vector<8x32xf32>
    %c0_199 = arith.constant 0 : index
    %c0_200 = arith.constant 0 : index
    %455 = vector.load %arg37[%c0_199, %c0_200] : memref<1x32xf32, #tpu.memory_space<vmem>>, vector<1x32xf32>
    %456 = vector.broadcast %455 : vector<1x32xf32> to vector<8x32xf32>
    %457 = arith.addf %454, %456 : vector<8x32xf32>
    %458 = arith.addf %189, %457 : vector<8x32xf32>
    %c0_201 = arith.constant 0 : index
    %c0_202 = arith.constant 0 : index
    %459 = vector.load %arg47[%c0_201, %c0_202] : memref<1x32xf32, #tpu.memory_space<vmem>>, vector<1x32xf32>
    %c0_203 = arith.constant 0 : index
    %c0_204 = arith.constant 0 : index
    %460 = vector.load %arg46[%c0_203, %c0_204] : memref<1x32xf32, #tpu.memory_space<vmem>>, vector<1x32xf32>
    %cst_205 = arith.constant dense<0.000000e+00> : vector<8xf32>
    %461 = vector.multi_reduction <add>, %458, %cst_205 [1] : vector<8x32xf32> to vector<8xf32>
    %462 = vector.shape_cast %461 : vector<8xf32> to vector<8x1xf32>
    %cst_206 = arith.constant 3.200000e+01 : f32
    %463 = vector.broadcast %cst_206 : f32 to vector<8x1xf32>
    %464 = arith.divf %462, %463 : vector<8x1xf32>
    %465 = vector.broadcast %464 : vector<8x1xf32> to vector<8x32xf32>
    %466 = arith.subf %458, %465 : vector<8x32xf32>
    %467 = arith.mulf %466, %466 : vector<8x32xf32>
    %cst_207 = arith.constant dense<0.000000e+00> : vector<8xf32>
    %468 = vector.multi_reduction <add>, %467, %cst_207 [1] : vector<8x32xf32> to vector<8xf32>
    %469 = vector.shape_cast %468 : vector<8xf32> to vector<8x1xf32>
    %cst_208 = arith.constant 3.200000e+01 : f32
    %470 = vector.broadcast %cst_208 : f32 to vector<8x1xf32>
    %471 = arith.divf %469, %470 : vector<8x1xf32>
    %cst_209 = arith.constant 9.99999974E-6 : f32
    %472 = vector.broadcast %cst_209 : f32 to vector<8x1xf32>
    %473 = arith.addf %471, %472 : vector<8x1xf32>
    %474 = math.rsqrt %473 : vector<8x1xf32>
    %475 = vector.broadcast %474 : vector<8x1xf32> to vector<8x32xf32>
    %476 = arith.mulf %466, %475 : vector<8x32xf32>
    %477 = vector.broadcast %459 : vector<1x32xf32> to vector<8x32xf32>
    %478 = arith.mulf %476, %477 : vector<8x32xf32>
    %479 = vector.broadcast %460 : vector<1x32xf32> to vector<8x32xf32>
    %480 = arith.addf %478, %479 : vector<8x32xf32>
    %c0_210 = arith.constant 0 : index
    %c0_211 = arith.constant 0 : index
    %481 = vector.load %arg44[%c0_210, %c0_211] : memref<32x128xf32, #tpu.memory_space<vmem>>, vector<32x128xf32>
    %cst_212 = arith.constant dense<0.000000e+00> : vector<8x128xf32>
    %482 = tpu.matmul %480, %481, %cst_212 {dimension_numbers = #tpu.dot_dimension_numbers<[1], [0], [0], [1], [0, 0, 1, 1], [], []>} : vector<8x32xf32>, vector<32x128xf32>, vector<8x128xf32> -> vector<8x128xf32>
    %c0_213 = arith.constant 0 : index
    %c0_214 = arith.constant 0 : index
    %483 = vector.load %arg42[%c0_213, %c0_214] : memref<1x128xf32, #tpu.memory_space<vmem>>, vector<1x128xf32>
    %484 = vector.broadcast %483 : vector<1x128xf32> to vector<8x128xf32>
    %485 = arith.addf %482, %484 : vector<8x128xf32>
    %cst_215 = arith.constant 0.000000e+00 : f32
    %486 = vector.broadcast %cst_215 : f32 to vector<8x128xf32>
    %487 = arith.maximumf %485, %486 : vector<8x128xf32>
    %c0_216 = arith.constant 0 : index
    %c0_217 = arith.constant 0 : index
    %488 = vector.load %arg45[%c0_216, %c0_217] : memref<128x32xf32, #tpu.memory_space<vmem>>, vector<128x32xf32>
    %cst_218 = arith.constant dense<0.000000e+00> : vector<8x32xf32>
    %489 = tpu.matmul %487, %488, %cst_218 {dimension_numbers = #tpu.dot_dimension_numbers<[1], [0], [0], [1], [0, 0, 1, 1], [], []>} : vector<8x128xf32>, vector<128x32xf32>, vector<8x32xf32> -> vector<8x32xf32>
    %c0_219 = arith.constant 0 : index
    %c0_220 = arith.constant 0 : index
    %490 = vector.load %arg43[%c0_219, %c0_220] : memref<1x32xf32, #tpu.memory_space<vmem>>, vector<1x32xf32>
    %491 = vector.broadcast %490 : vector<1x32xf32> to vector<8x32xf32>
    %492 = arith.addf %489, %491 : vector<8x32xf32>
    %493 = arith.addf %480, %492 : vector<8x32xf32>
    %c0_221 = arith.constant 0 : index
    %c0_222 = arith.constant 0 : index
    %494 = vector.load %arg49[%c0_221, %c0_222] : memref<1x32xf32, #tpu.memory_space<vmem>>, vector<1x32xf32>
    %c0_223 = arith.constant 0 : index
    %c0_224 = arith.constant 0 : index
    %495 = vector.load %arg48[%c0_223, %c0_224] : memref<1x32xf32, #tpu.memory_space<vmem>>, vector<1x32xf32>
    %cst_225 = arith.constant dense<0.000000e+00> : vector<8xf32>
    %496 = vector.multi_reduction <add>, %493, %cst_225 [1] : vector<8x32xf32> to vector<8xf32>
    %497 = vector.shape_cast %496 : vector<8xf32> to vector<8x1xf32>
    %cst_226 = arith.constant 3.200000e+01 : f32
    %498 = vector.broadcast %cst_226 : f32 to vector<8x1xf32>
    %499 = arith.divf %497, %498 : vector<8x1xf32>
    %500 = vector.broadcast %499 : vector<8x1xf32> to vector<8x32xf32>
    %501 = arith.subf %493, %500 : vector<8x32xf32>
    %502 = arith.mulf %501, %501 : vector<8x32xf32>
    %cst_227 = arith.constant dense<0.000000e+00> : vector<8xf32>
    %503 = vector.multi_reduction <add>, %502, %cst_227 [1] : vector<8x32xf32> to vector<8xf32>
    %504 = vector.shape_cast %503 : vector<8xf32> to vector<8x1xf32>
    %cst_228 = arith.constant 3.200000e+01 : f32
    %505 = vector.broadcast %cst_228 : f32 to vector<8x1xf32>
    %506 = arith.divf %504, %505 : vector<8x1xf32>
    %cst_229 = arith.constant 9.99999974E-6 : f32
    %507 = vector.broadcast %cst_229 : f32 to vector<8x1xf32>
    %508 = arith.addf %506, %507 : vector<8x1xf32>
    %509 = math.rsqrt %508 : vector<8x1xf32>
    %510 = vector.broadcast %509 : vector<8x1xf32> to vector<8x32xf32>
    %511 = arith.mulf %501, %510 : vector<8x32xf32>
    %512 = vector.broadcast %494 : vector<1x32xf32> to vector<8x32xf32>
    %513 = arith.mulf %511, %512 : vector<8x32xf32>
    %514 = vector.broadcast %495 : vector<1x32xf32> to vector<8x32xf32>
    %515 = arith.addf %513, %514 : vector<8x32xf32>
    %c0_230 = arith.constant 0 : index
    %c0_231 = arith.constant 0 : index
    %516 = vector.load %arg41[%c0_230, %c0_231] : memref<32x32xf32, #tpu.memory_space<vmem>>, vector<32x32xf32>
    %cst_232 = arith.constant dense<0.000000e+00> : vector<8x32xf32>
    %517 = tpu.matmul %352, %516, %cst_232 {dimension_numbers = #tpu.dot_dimension_numbers<[1], [0], [0], [1], [0, 0, 1, 1], [], []>} : vector<8x32xf32>, vector<32x32xf32>, vector<8x32xf32> -> vector<8x32xf32>
    %c0_233 = arith.constant 0 : index
    %c0_234 = arith.constant 0 : index
    %518 = vector.load %arg38[%c0_233, %c0_234] : memref<1x32xf32, #tpu.memory_space<vmem>>, vector<1x32xf32>
    %519 = vector.broadcast %518 : vector<1x32xf32> to vector<8x32xf32>
    %520 = arith.addf %517, %519 : vector<8x32xf32>
    %c0_235 = arith.constant 0 : index
    %c0_236 = arith.constant 0 : index
    %521 = vector.load %arg39[%c0_235, %c0_236] : memref<32x64xf32, #tpu.memory_space<vmem>>, vector<32x64xf32>
    %cst_237 = arith.constant dense<0.000000e+00> : vector<8x64xf32>
    %522 = tpu.matmul %352, %521, %cst_237 {dimension_numbers = #tpu.dot_dimension_numbers<[1], [0], [0], [1], [0, 0, 1, 1], [], []>} : vector<8x32xf32>, vector<32x64xf32>, vector<8x64xf32> -> vector<8x64xf32>
    %c0_238 = arith.constant 0 : index
    %c0_239 = arith.constant 0 : index
    %523 = vector.load %arg36[%c0_238, %c0_239] : memref<1x64xf32, #tpu.memory_space<vmem>>, vector<1x64xf32>
    %524 = vector.broadcast %523 : vector<1x64xf32> to vector<8x64xf32>
    %525 = arith.addf %522, %524 : vector<8x64xf32>
    %526 = vector.extract_strided_slice %525 {offsets = [0, 0], sizes = [8, 32], strides = [1, 1]} : vector<8x64xf32> to vector<8x32xf32>
    %527 = vector.extract_strided_slice %525 {offsets = [0, 32], sizes = [8, 32], strides = [1, 1]} : vector<8x64xf32> to vector<8x32xf32>
    %c0_240 = arith.constant 0 : index
    %c0_241 = arith.constant 0 : index
    %528 = vector.load %arg40[%c0_240, %c0_241] : memref<32x32xf32, #tpu.memory_space<vmem>>, vector<32x32xf32>
    %cst_242 = arith.constant 0.000000e+00 : f32
    %529 = vector.broadcast %cst_242 : f32 to vector<8x32xf32>
    %530 = vector.extract_strided_slice %520 {offsets = [0, 0], sizes = [8, 8], strides = [1, 1]} : vector<8x32xf32> to vector<8x8xf32>
    %531 = vector.extract_strided_slice %526 {offsets = [0, 0], sizes = [8, 8], strides = [1, 1]} : vector<8x32xf32> to vector<8x8xf32>
    %532 = vector.extract_strided_slice %527 {offsets = [0, 0], sizes = [8, 8], strides = [1, 1]} : vector<8x32xf32> to vector<8x8xf32>
    %533 = tpu.transpose %531, [1, 0] : vector<8x8xf32> -> vector<8x8xf32>
    %cst_243 = arith.constant dense<0.000000e+00> : vector<8x8xf32>
    %534 = tpu.matmul %530, %533, %cst_243 {dimension_numbers = #tpu.dot_dimension_numbers<[1], [0], [0], [1], [0, 0, 1, 1], [], []>} : vector<8x8xf32>, vector<8x8xf32>, vector<8x8xf32> -> vector<8x8xf32>
    %cst_244 = arith.constant 0.353553385 : f32
    %535 = vector.broadcast %cst_244 : f32 to vector<8x8xf32>
    %536 = arith.mulf %534, %535 : vector<8x8xf32>
    %537 = vector.broadcast %5 : vector<1x8xf32> to vector<8x8xf32>
    %538 = arith.addf %536, %537 : vector<8x8xf32>
    %cst_245 = arith.constant dense<0xFF800000> : vector<8xf32>
    %539 = vector.multi_reduction <maximumf>, %538, %cst_245 [1] : vector<8x8xf32> to vector<8xf32>
    %540 = vector.shape_cast %539 : vector<8xf32> to vector<8x1xf32>
    %541 = vector.broadcast %540 : vector<8x1xf32> to vector<8x8xf32>
    %542 = arith.subf %538, %541 : vector<8x8xf32>
    %543 = math.exp %542 : vector<8x8xf32>
    %cst_246 = arith.constant dense<0.000000e+00> : vector<8xf32>
    %544 = vector.multi_reduction <add>, %543, %cst_246 [1] : vector<8x8xf32> to vector<8xf32>
    %545 = vector.shape_cast %544 : vector<8xf32> to vector<8x1xf32>
    %546 = vector.broadcast %545 : vector<8x1xf32> to vector<8x8xf32>
    %547 = arith.divf %543, %546 : vector<8x8xf32>
    %cst_247 = arith.constant dense<0.000000e+00> : vector<8x8xf32>
    %548 = tpu.matmul %547, %532, %cst_247 {dimension_numbers = #tpu.dot_dimension_numbers<[1], [0], [0], [1], [0, 0, 1, 1], [], []>} : vector<8x8xf32>, vector<8x8xf32>, vector<8x8xf32> -> vector<8x8xf32>
    %549 = vector.extract_strided_slice %528 {offsets = [0, 0], sizes = [8, 32], strides = [1, 1]} : vector<32x32xf32> to vector<8x32xf32>
    %cst_248 = arith.constant dense<0.000000e+00> : vector<8x32xf32>
    %550 = tpu.matmul %548, %549, %cst_248 {dimension_numbers = #tpu.dot_dimension_numbers<[1], [0], [0], [1], [0, 0, 1, 1], [], []>} : vector<8x8xf32>, vector<8x32xf32>, vector<8x32xf32> -> vector<8x32xf32>
    %551 = arith.addf %529, %550 : vector<8x32xf32>
    %552 = vector.extract_strided_slice %520 {offsets = [0, 8], sizes = [8, 8], strides = [1, 1]} : vector<8x32xf32> to vector<8x8xf32>
    %553 = vector.extract_strided_slice %526 {offsets = [0, 8], sizes = [8, 8], strides = [1, 1]} : vector<8x32xf32> to vector<8x8xf32>
    %554 = vector.extract_strided_slice %527 {offsets = [0, 8], sizes = [8, 8], strides = [1, 1]} : vector<8x32xf32> to vector<8x8xf32>
    %555 = tpu.transpose %553, [1, 0] : vector<8x8xf32> -> vector<8x8xf32>
    %cst_249 = arith.constant dense<0.000000e+00> : vector<8x8xf32>
    %556 = tpu.matmul %552, %555, %cst_249 {dimension_numbers = #tpu.dot_dimension_numbers<[1], [0], [0], [1], [0, 0, 1, 1], [], []>} : vector<8x8xf32>, vector<8x8xf32>, vector<8x8xf32> -> vector<8x8xf32>
    %cst_250 = arith.constant 0.353553385 : f32
    %557 = vector.broadcast %cst_250 : f32 to vector<8x8xf32>
    %558 = arith.mulf %556, %557 : vector<8x8xf32>
    %559 = vector.broadcast %5 : vector<1x8xf32> to vector<8x8xf32>
    %560 = arith.addf %558, %559 : vector<8x8xf32>
    %cst_251 = arith.constant dense<0xFF800000> : vector<8xf32>
    %561 = vector.multi_reduction <maximumf>, %560, %cst_251 [1] : vector<8x8xf32> to vector<8xf32>
    %562 = vector.shape_cast %561 : vector<8xf32> to vector<8x1xf32>
    %563 = vector.broadcast %562 : vector<8x1xf32> to vector<8x8xf32>
    %564 = arith.subf %560, %563 : vector<8x8xf32>
    %565 = math.exp %564 : vector<8x8xf32>
    %cst_252 = arith.constant dense<0.000000e+00> : vector<8xf32>
    %566 = vector.multi_reduction <add>, %565, %cst_252 [1] : vector<8x8xf32> to vector<8xf32>
    %567 = vector.shape_cast %566 : vector<8xf32> to vector<8x1xf32>
    %568 = vector.broadcast %567 : vector<8x1xf32> to vector<8x8xf32>
    %569 = arith.divf %565, %568 : vector<8x8xf32>
    %cst_253 = arith.constant dense<0.000000e+00> : vector<8x8xf32>
    %570 = tpu.matmul %569, %554, %cst_253 {dimension_numbers = #tpu.dot_dimension_numbers<[1], [0], [0], [1], [0, 0, 1, 1], [], []>} : vector<8x8xf32>, vector<8x8xf32>, vector<8x8xf32> -> vector<8x8xf32>
    %571 = vector.extract_strided_slice %528 {offsets = [8, 0], sizes = [8, 32], strides = [1, 1]} : vector<32x32xf32> to vector<8x32xf32>
    %cst_254 = arith.constant dense<0.000000e+00> : vector<8x32xf32>
    %572 = tpu.matmul %570, %571, %cst_254 {dimension_numbers = #tpu.dot_dimension_numbers<[1], [0], [0], [1], [0, 0, 1, 1], [], []>} : vector<8x8xf32>, vector<8x32xf32>, vector<8x32xf32> -> vector<8x32xf32>
    %573 = arith.addf %551, %572 : vector<8x32xf32>
    %574 = vector.extract_strided_slice %520 {offsets = [0, 16], sizes = [8, 8], strides = [1, 1]} : vector<8x32xf32> to vector<8x8xf32>
    %575 = vector.extract_strided_slice %526 {offsets = [0, 16], sizes = [8, 8], strides = [1, 1]} : vector<8x32xf32> to vector<8x8xf32>
    %576 = vector.extract_strided_slice %527 {offsets = [0, 16], sizes = [8, 8], strides = [1, 1]} : vector<8x32xf32> to vector<8x8xf32>
    %577 = tpu.transpose %575, [1, 0] : vector<8x8xf32> -> vector<8x8xf32>
    %cst_255 = arith.constant dense<0.000000e+00> : vector<8x8xf32>
    %578 = tpu.matmul %574, %577, %cst_255 {dimension_numbers = #tpu.dot_dimension_numbers<[1], [0], [0], [1], [0, 0, 1, 1], [], []>} : vector<8x8xf32>, vector<8x8xf32>, vector<8x8xf32> -> vector<8x8xf32>
    %cst_256 = arith.constant 0.353553385 : f32
    %579 = vector.broadcast %cst_256 : f32 to vector<8x8xf32>
    %580 = arith.mulf %578, %579 : vector<8x8xf32>
    %581 = vector.broadcast %5 : vector<1x8xf32> to vector<8x8xf32>
    %582 = arith.addf %580, %581 : vector<8x8xf32>
    %cst_257 = arith.constant dense<0xFF800000> : vector<8xf32>
    %583 = vector.multi_reduction <maximumf>, %582, %cst_257 [1] : vector<8x8xf32> to vector<8xf32>
    %584 = vector.shape_cast %583 : vector<8xf32> to vector<8x1xf32>
    %585 = vector.broadcast %584 : vector<8x1xf32> to vector<8x8xf32>
    %586 = arith.subf %582, %585 : vector<8x8xf32>
    %587 = math.exp %586 : vector<8x8xf32>
    %cst_258 = arith.constant dense<0.000000e+00> : vector<8xf32>
    %588 = vector.multi_reduction <add>, %587, %cst_258 [1] : vector<8x8xf32> to vector<8xf32>
    %589 = vector.shape_cast %588 : vector<8xf32> to vector<8x1xf32>
    %590 = vector.broadcast %589 : vector<8x1xf32> to vector<8x8xf32>
    %591 = arith.divf %587, %590 : vector<8x8xf32>
    %cst_259 = arith.constant dense<0.000000e+00> : vector<8x8xf32>
    %592 = tpu.matmul %591, %576, %cst_259 {dimension_numbers = #tpu.dot_dimension_numbers<[1], [0], [0], [1], [0, 0, 1, 1], [], []>} : vector<8x8xf32>, vector<8x8xf32>, vector<8x8xf32> -> vector<8x8xf32>
    %593 = vector.extract_strided_slice %528 {offsets = [16, 0], sizes = [8, 32], strides = [1, 1]} : vector<32x32xf32> to vector<8x32xf32>
    %cst_260 = arith.constant dense<0.000000e+00> : vector<8x32xf32>
    %594 = tpu.matmul %592, %593, %cst_260 {dimension_numbers = #tpu.dot_dimension_numbers<[1], [0], [0], [1], [0, 0, 1, 1], [], []>} : vector<8x8xf32>, vector<8x32xf32>, vector<8x32xf32> -> vector<8x32xf32>
    %595 = arith.addf %573, %594 : vector<8x32xf32>
    %596 = vector.extract_strided_slice %520 {offsets = [0, 24], sizes = [8, 8], strides = [1, 1]} : vector<8x32xf32> to vector<8x8xf32>
    %597 = vector.extract_strided_slice %526 {offsets = [0, 24], sizes = [8, 8], strides = [1, 1]} : vector<8x32xf32> to vector<8x8xf32>
    %598 = vector.extract_strided_slice %527 {offsets = [0, 24], sizes = [8, 8], strides = [1, 1]} : vector<8x32xf32> to vector<8x8xf32>
    %599 = tpu.transpose %597, [1, 0] : vector<8x8xf32> -> vector<8x8xf32>
    %cst_261 = arith.constant dense<0.000000e+00> : vector<8x8xf32>
    %600 = tpu.matmul %596, %599, %cst_261 {dimension_numbers = #tpu.dot_dimension_numbers<[1], [0], [0], [1], [0, 0, 1, 1], [], []>} : vector<8x8xf32>, vector<8x8xf32>, vector<8x8xf32> -> vector<8x8xf32>
    %cst_262 = arith.constant 0.353553385 : f32
    %601 = vector.broadcast %cst_262 : f32 to vector<8x8xf32>
    %602 = arith.mulf %600, %601 : vector<8x8xf32>
    %603 = vector.broadcast %5 : vector<1x8xf32> to vector<8x8xf32>
    %604 = arith.addf %602, %603 : vector<8x8xf32>
    %cst_263 = arith.constant dense<0xFF800000> : vector<8xf32>
    %605 = vector.multi_reduction <maximumf>, %604, %cst_263 [1] : vector<8x8xf32> to vector<8xf32>
    %606 = vector.shape_cast %605 : vector<8xf32> to vector<8x1xf32>
    %607 = vector.broadcast %606 : vector<8x1xf32> to vector<8x8xf32>
    %608 = arith.subf %604, %607 : vector<8x8xf32>
    %609 = math.exp %608 : vector<8x8xf32>
    %cst_264 = arith.constant dense<0.000000e+00> : vector<8xf32>
    %610 = vector.multi_reduction <add>, %609, %cst_264 [1] : vector<8x8xf32> to vector<8xf32>
    %611 = vector.shape_cast %610 : vector<8xf32> to vector<8x1xf32>
    %612 = vector.broadcast %611 : vector<8x1xf32> to vector<8x8xf32>
    %613 = arith.divf %609, %612 : vector<8x8xf32>
    %cst_265 = arith.constant dense<0.000000e+00> : vector<8x8xf32>
    %614 = tpu.matmul %613, %598, %cst_265 {dimension_numbers = #tpu.dot_dimension_numbers<[1], [0], [0], [1], [0, 0, 1, 1], [], []>} : vector<8x8xf32>, vector<8x8xf32>, vector<8x8xf32> -> vector<8x8xf32>
    %615 = vector.extract_strided_slice %528 {offsets = [24, 0], sizes = [8, 32], strides = [1, 1]} : vector<32x32xf32> to vector<8x32xf32>
    %cst_266 = arith.constant dense<0.000000e+00> : vector<8x32xf32>
    %616 = tpu.matmul %614, %615, %cst_266 {dimension_numbers = #tpu.dot_dimension_numbers<[1], [0], [0], [1], [0, 0, 1, 1], [], []>} : vector<8x8xf32>, vector<8x32xf32>, vector<8x32xf32> -> vector<8x32xf32>
    %617 = arith.addf %595, %616 : vector<8x32xf32>
    %c0_267 = arith.constant 0 : index
    %c0_268 = arith.constant 0 : index
    %618 = vector.load %arg37[%c0_267, %c0_268] : memref<1x32xf32, #tpu.memory_space<vmem>>, vector<1x32xf32>
    %619 = vector.broadcast %618 : vector<1x32xf32> to vector<8x32xf32>
    %620 = arith.addf %617, %619 : vector<8x32xf32>
    %621 = arith.addf %352, %620 : vector<8x32xf32>
    %c0_269 = arith.constant 0 : index
    %c0_270 = arith.constant 0 : index
    %622 = vector.load %arg47[%c0_269, %c0_270] : memref<1x32xf32, #tpu.memory_space<vmem>>, vector<1x32xf32>
    %c0_271 = arith.constant 0 : index
    %c0_272 = arith.constant 0 : index
    %623 = vector.load %arg46[%c0_271, %c0_272] : memref<1x32xf32, #tpu.memory_space<vmem>>, vector<1x32xf32>
    %cst_273 = arith.constant dense<0.000000e+00> : vector<8xf32>
    %624 = vector.multi_reduction <add>, %621, %cst_273 [1] : vector<8x32xf32> to vector<8xf32>
    %625 = vector.shape_cast %624 : vector<8xf32> to vector<8x1xf32>
    %cst_274 = arith.constant 3.200000e+01 : f32
    %626 = vector.broadcast %cst_274 : f32 to vector<8x1xf32>
    %627 = arith.divf %625, %626 : vector<8x1xf32>
    %628 = vector.broadcast %627 : vector<8x1xf32> to vector<8x32xf32>
    %629 = arith.subf %621, %628 : vector<8x32xf32>
    %630 = arith.mulf %629, %629 : vector<8x32xf32>
    %cst_275 = arith.constant dense<0.000000e+00> : vector<8xf32>
    %631 = vector.multi_reduction <add>, %630, %cst_275 [1] : vector<8x32xf32> to vector<8xf32>
    %632 = vector.shape_cast %631 : vector<8xf32> to vector<8x1xf32>
    %cst_276 = arith.constant 3.200000e+01 : f32
    %633 = vector.broadcast %cst_276 : f32 to vector<8x1xf32>
    %634 = arith.divf %632, %633 : vector<8x1xf32>
    %cst_277 = arith.constant 9.99999974E-6 : f32
    %635 = vector.broadcast %cst_277 : f32 to vector<8x1xf32>
    %636 = arith.addf %634, %635 : vector<8x1xf32>
    %637 = math.rsqrt %636 : vector<8x1xf32>
    %638 = vector.broadcast %637 : vector<8x1xf32> to vector<8x32xf32>
    %639 = arith.mulf %629, %638 : vector<8x32xf32>
    %640 = vector.broadcast %622 : vector<1x32xf32> to vector<8x32xf32>
    %641 = arith.mulf %639, %640 : vector<8x32xf32>
    %642 = vector.broadcast %623 : vector<1x32xf32> to vector<8x32xf32>
    %643 = arith.addf %641, %642 : vector<8x32xf32>
    %c0_278 = arith.constant 0 : index
    %c0_279 = arith.constant 0 : index
    %644 = vector.load %arg44[%c0_278, %c0_279] : memref<32x128xf32, #tpu.memory_space<vmem>>, vector<32x128xf32>
    %cst_280 = arith.constant dense<0.000000e+00> : vector<8x128xf32>
    %645 = tpu.matmul %643, %644, %cst_280 {dimension_numbers = #tpu.dot_dimension_numbers<[1], [0], [0], [1], [0, 0, 1, 1], [], []>} : vector<8x32xf32>, vector<32x128xf32>, vector<8x128xf32> -> vector<8x128xf32>
    %c0_281 = arith.constant 0 : index
    %c0_282 = arith.constant 0 : index
    %646 = vector.load %arg42[%c0_281, %c0_282] : memref<1x128xf32, #tpu.memory_space<vmem>>, vector<1x128xf32>
    %647 = vector.broadcast %646 : vector<1x128xf32> to vector<8x128xf32>
    %648 = arith.addf %645, %647 : vector<8x128xf32>
    %cst_283 = arith.constant 0.000000e+00 : f32
    %649 = vector.broadcast %cst_283 : f32 to vector<8x128xf32>
    %650 = arith.maximumf %648, %649 : vector<8x128xf32>
    %c0_284 = arith.constant 0 : index
    %c0_285 = arith.constant 0 : index
    %651 = vector.load %arg45[%c0_284, %c0_285] : memref<128x32xf32, #tpu.memory_space<vmem>>, vector<128x32xf32>
    %cst_286 = arith.constant dense<0.000000e+00> : vector<8x32xf32>
    %652 = tpu.matmul %650, %651, %cst_286 {dimension_numbers = #tpu.dot_dimension_numbers<[1], [0], [0], [1], [0, 0, 1, 1], [], []>} : vector<8x128xf32>, vector<128x32xf32>, vector<8x32xf32> -> vector<8x32xf32>
    %c0_287 = arith.constant 0 : index
    %c0_288 = arith.constant 0 : index
    %653 = vector.load %arg43[%c0_287, %c0_288] : memref<1x32xf32, #tpu.memory_space<vmem>>, vector<1x32xf32>
    %654 = vector.broadcast %653 : vector<1x32xf32> to vector<8x32xf32>
    %655 = arith.addf %652, %654 : vector<8x32xf32>
    %656 = arith.addf %643, %655 : vector<8x32xf32>
    %c0_289 = arith.constant 0 : index
    %c0_290 = arith.constant 0 : index
    %657 = vector.load %arg49[%c0_289, %c0_290] : memref<1x32xf32, #tpu.memory_space<vmem>>, vector<1x32xf32>
    %c0_291 = arith.constant 0 : index
    %c0_292 = arith.constant 0 : index
    %658 = vector.load %arg48[%c0_291, %c0_292] : memref<1x32xf32, #tpu.memory_space<vmem>>, vector<1x32xf32>
    %cst_293 = arith.constant dense<0.000000e+00> : vector<8xf32>
    %659 = vector.multi_reduction <add>, %656, %cst_293 [1] : vector<8x32xf32> to vector<8xf32>
    %660 = vector.shape_cast %659 : vector<8xf32> to vector<8x1xf32>
    %cst_294 = arith.constant 3.200000e+01 : f32
    %661 = vector.broadcast %cst_294 : f32 to vector<8x1xf32>
    %662 = arith.divf %660, %661 : vector<8x1xf32>
    %663 = vector.broadcast %662 : vector<8x1xf32> to vector<8x32xf32>
    %664 = arith.subf %656, %663 : vector<8x32xf32>
    %665 = arith.mulf %664, %664 : vector<8x32xf32>
    %cst_295 = arith.constant dense<0.000000e+00> : vector<8xf32>
    %666 = vector.multi_reduction <add>, %665, %cst_295 [1] : vector<8x32xf32> to vector<8xf32>
    %667 = vector.shape_cast %666 : vector<8xf32> to vector<8x1xf32>
    %cst_296 = arith.constant 3.200000e+01 : f32
    %668 = vector.broadcast %cst_296 : f32 to vector<8x1xf32>
    %669 = arith.divf %667, %668 : vector<8x1xf32>
    %cst_297 = arith.constant 9.99999974E-6 : f32
    %670 = vector.broadcast %cst_297 : f32 to vector<8x1xf32>
    %671 = arith.addf %669, %670 : vector<8x1xf32>
    %672 = math.rsqrt %671 : vector<8x1xf32>
    %673 = vector.broadcast %672 : vector<8x1xf32> to vector<8x32xf32>
    %674 = arith.mulf %664, %673 : vector<8x32xf32>
    %675 = vector.broadcast %657 : vector<1x32xf32> to vector<8x32xf32>
    %676 = arith.mulf %674, %675 : vector<8x32xf32>
    %677 = vector.broadcast %658 : vector<1x32xf32> to vector<8x32xf32>
    %678 = arith.addf %676, %677 : vector<8x32xf32>
    %c0_298 = arith.constant 0 : index
    %c0_299 = arith.constant 0 : index
    %679 = vector.load %arg61[%c0_298, %c0_299] : memref<32x32xf32, #tpu.memory_space<vmem>>, vector<32x32xf32>
    %cst_300 = arith.constant dense<0.000000e+00> : vector<8x32xf32>
    %680 = tpu.matmul %515, %679, %cst_300 {dimension_numbers = #tpu.dot_dimension_numbers<[1], [0], [0], [1], [0, 0, 1, 1], [], []>} : vector<8x32xf32>, vector<32x32xf32>, vector<8x32xf32> -> vector<8x32xf32>
    %c0_301 = arith.constant 0 : index
    %c0_302 = arith.constant 0 : index
    %681 = vector.load %arg58[%c0_301, %c0_302] : memref<1x32xf32, #tpu.memory_space<vmem>>, vector<1x32xf32>
    %682 = vector.broadcast %681 : vector<1x32xf32> to vector<8x32xf32>
    %683 = arith.addf %680, %682 : vector<8x32xf32>
    %c0_303 = arith.constant 0 : index
    %c0_304 = arith.constant 0 : index
    %684 = vector.load %arg59[%c0_303, %c0_304] : memref<32x64xf32, #tpu.memory_space<vmem>>, vector<32x64xf32>
    %cst_305 = arith.constant dense<0.000000e+00> : vector<8x64xf32>
    %685 = tpu.matmul %678, %684, %cst_305 {dimension_numbers = #tpu.dot_dimension_numbers<[1], [0], [0], [1], [0, 0, 1, 1], [], []>} : vector<8x32xf32>, vector<32x64xf32>, vector<8x64xf32> -> vector<8x64xf32>
    %c0_306 = arith.constant 0 : index
    %c0_307 = arith.constant 0 : index
    %686 = vector.load %arg56[%c0_306, %c0_307] : memref<1x64xf32, #tpu.memory_space<vmem>>, vector<1x64xf32>
    %687 = vector.broadcast %686 : vector<1x64xf32> to vector<8x64xf32>
    %688 = arith.addf %685, %687 : vector<8x64xf32>
    %689 = vector.extract_strided_slice %688 {offsets = [0, 0], sizes = [8, 32], strides = [1, 1]} : vector<8x64xf32> to vector<8x32xf32>
    %690 = vector.extract_strided_slice %688 {offsets = [0, 32], sizes = [8, 32], strides = [1, 1]} : vector<8x64xf32> to vector<8x32xf32>
    %c0_308 = arith.constant 0 : index
    %c0_309 = arith.constant 0 : index
    %691 = vector.load %arg60[%c0_308, %c0_309] : memref<32x32xf32, #tpu.memory_space<vmem>>, vector<32x32xf32>
    %cst_310 = arith.constant 0.000000e+00 : f32
    %692 = vector.broadcast %cst_310 : f32 to vector<8x32xf32>
    %693 = vector.extract_strided_slice %683 {offsets = [0, 0], sizes = [8, 8], strides = [1, 1]} : vector<8x32xf32> to vector<8x8xf32>
    %694 = vector.extract_strided_slice %689 {offsets = [0, 0], sizes = [8, 8], strides = [1, 1]} : vector<8x32xf32> to vector<8x8xf32>
    %695 = vector.extract_strided_slice %690 {offsets = [0, 0], sizes = [8, 8], strides = [1, 1]} : vector<8x32xf32> to vector<8x8xf32>
    %696 = tpu.transpose %694, [1, 0] : vector<8x8xf32> -> vector<8x8xf32>
    %cst_311 = arith.constant dense<0.000000e+00> : vector<8x8xf32>
    %697 = tpu.matmul %693, %696, %cst_311 {dimension_numbers = #tpu.dot_dimension_numbers<[1], [0], [0], [1], [0, 0, 1, 1], [], []>} : vector<8x8xf32>, vector<8x8xf32>, vector<8x8xf32> -> vector<8x8xf32>
    %cst_312 = arith.constant 0.353553385 : f32
    %698 = vector.broadcast %cst_312 : f32 to vector<8x8xf32>
    %699 = arith.mulf %697, %698 : vector<8x8xf32>
    %700 = vector.broadcast %5 : vector<1x8xf32> to vector<8x8xf32>
    %701 = arith.addf %699, %700 : vector<8x8xf32>
    %cst_313 = arith.constant dense<0xFF800000> : vector<8xf32>
    %702 = vector.multi_reduction <maximumf>, %701, %cst_313 [1] : vector<8x8xf32> to vector<8xf32>
    %703 = vector.shape_cast %702 : vector<8xf32> to vector<8x1xf32>
    %704 = vector.broadcast %703 : vector<8x1xf32> to vector<8x8xf32>
    %705 = arith.subf %701, %704 : vector<8x8xf32>
    %706 = math.exp %705 : vector<8x8xf32>
    %cst_314 = arith.constant dense<0.000000e+00> : vector<8xf32>
    %707 = vector.multi_reduction <add>, %706, %cst_314 [1] : vector<8x8xf32> to vector<8xf32>
    %708 = vector.shape_cast %707 : vector<8xf32> to vector<8x1xf32>
    %709 = vector.broadcast %708 : vector<8x1xf32> to vector<8x8xf32>
    %710 = arith.divf %706, %709 : vector<8x8xf32>
    %cst_315 = arith.constant dense<0.000000e+00> : vector<8x8xf32>
    %711 = tpu.matmul %710, %695, %cst_315 {dimension_numbers = #tpu.dot_dimension_numbers<[1], [0], [0], [1], [0, 0, 1, 1], [], []>} : vector<8x8xf32>, vector<8x8xf32>, vector<8x8xf32> -> vector<8x8xf32>
    %712 = vector.extract_strided_slice %691 {offsets = [0, 0], sizes = [8, 32], strides = [1, 1]} : vector<32x32xf32> to vector<8x32xf32>
    %cst_316 = arith.constant dense<0.000000e+00> : vector<8x32xf32>
    %713 = tpu.matmul %711, %712, %cst_316 {dimension_numbers = #tpu.dot_dimension_numbers<[1], [0], [0], [1], [0, 0, 1, 1], [], []>} : vector<8x8xf32>, vector<8x32xf32>, vector<8x32xf32> -> vector<8x32xf32>
    %714 = arith.addf %692, %713 : vector<8x32xf32>
    %715 = vector.extract_strided_slice %683 {offsets = [0, 8], sizes = [8, 8], strides = [1, 1]} : vector<8x32xf32> to vector<8x8xf32>
    %716 = vector.extract_strided_slice %689 {offsets = [0, 8], sizes = [8, 8], strides = [1, 1]} : vector<8x32xf32> to vector<8x8xf32>
    %717 = vector.extract_strided_slice %690 {offsets = [0, 8], sizes = [8, 8], strides = [1, 1]} : vector<8x32xf32> to vector<8x8xf32>
    %718 = tpu.transpose %716, [1, 0] : vector<8x8xf32> -> vector<8x8xf32>
    %cst_317 = arith.constant dense<0.000000e+00> : vector<8x8xf32>
    %719 = tpu.matmul %715, %718, %cst_317 {dimension_numbers = #tpu.dot_dimension_numbers<[1], [0], [0], [1], [0, 0, 1, 1], [], []>} : vector<8x8xf32>, vector<8x8xf32>, vector<8x8xf32> -> vector<8x8xf32>
    %cst_318 = arith.constant 0.353553385 : f32
    %720 = vector.broadcast %cst_318 : f32 to vector<8x8xf32>
    %721 = arith.mulf %719, %720 : vector<8x8xf32>
    %722 = vector.broadcast %5 : vector<1x8xf32> to vector<8x8xf32>
    %723 = arith.addf %721, %722 : vector<8x8xf32>
    %cst_319 = arith.constant dense<0xFF800000> : vector<8xf32>
    %724 = vector.multi_reduction <maximumf>, %723, %cst_319 [1] : vector<8x8xf32> to vector<8xf32>
    %725 = vector.shape_cast %724 : vector<8xf32> to vector<8x1xf32>
    %726 = vector.broadcast %725 : vector<8x1xf32> to vector<8x8xf32>
    %727 = arith.subf %723, %726 : vector<8x8xf32>
    %728 = math.exp %727 : vector<8x8xf32>
    %cst_320 = arith.constant dense<0.000000e+00> : vector<8xf32>
    %729 = vector.multi_reduction <add>, %728, %cst_320 [1] : vector<8x8xf32> to vector<8xf32>
    %730 = vector.shape_cast %729 : vector<8xf32> to vector<8x1xf32>
    %731 = vector.broadcast %730 : vector<8x1xf32> to vector<8x8xf32>
    %732 = arith.divf %728, %731 : vector<8x8xf32>
    %cst_321 = arith.constant dense<0.000000e+00> : vector<8x8xf32>
    %733 = tpu.matmul %732, %717, %cst_321 {dimension_numbers = #tpu.dot_dimension_numbers<[1], [0], [0], [1], [0, 0, 1, 1], [], []>} : vector<8x8xf32>, vector<8x8xf32>, vector<8x8xf32> -> vector<8x8xf32>
    %734 = vector.extract_strided_slice %691 {offsets = [8, 0], sizes = [8, 32], strides = [1, 1]} : vector<32x32xf32> to vector<8x32xf32>
    %cst_322 = arith.constant dense<0.000000e+00> : vector<8x32xf32>
    %735 = tpu.matmul %733, %734, %cst_322 {dimension_numbers = #tpu.dot_dimension_numbers<[1], [0], [0], [1], [0, 0, 1, 1], [], []>} : vector<8x8xf32>, vector<8x32xf32>, vector<8x32xf32> -> vector<8x32xf32>
    %736 = arith.addf %714, %735 : vector<8x32xf32>
    %737 = vector.extract_strided_slice %683 {offsets = [0, 16], sizes = [8, 8], strides = [1, 1]} : vector<8x32xf32> to vector<8x8xf32>
    %738 = vector.extract_strided_slice %689 {offsets = [0, 16], sizes = [8, 8], strides = [1, 1]} : vector<8x32xf32> to vector<8x8xf32>
    %739 = vector.extract_strided_slice %690 {offsets = [0, 16], sizes = [8, 8], strides = [1, 1]} : vector<8x32xf32> to vector<8x8xf32>
    %740 = tpu.transpose %738, [1, 0] : vector<8x8xf32> -> vector<8x8xf32>
    %cst_323 = arith.constant dense<0.000000e+00> : vector<8x8xf32>
    %741 = tpu.matmul %737, %740, %cst_323 {dimension_numbers = #tpu.dot_dimension_numbers<[1], [0], [0], [1], [0, 0, 1, 1], [], []>} : vector<8x8xf32>, vector<8x8xf32>, vector<8x8xf32> -> vector<8x8xf32>
    %cst_324 = arith.constant 0.353553385 : f32
    %742 = vector.broadcast %cst_324 : f32 to vector<8x8xf32>
    %743 = arith.mulf %741, %742 : vector<8x8xf32>
    %744 = vector.broadcast %5 : vector<1x8xf32> to vector<8x8xf32>
    %745 = arith.addf %743, %744 : vector<8x8xf32>
    %cst_325 = arith.constant dense<0xFF800000> : vector<8xf32>
    %746 = vector.multi_reduction <maximumf>, %745, %cst_325 [1] : vector<8x8xf32> to vector<8xf32>
    %747 = vector.shape_cast %746 : vector<8xf32> to vector<8x1xf32>
    %748 = vector.broadcast %747 : vector<8x1xf32> to vector<8x8xf32>
    %749 = arith.subf %745, %748 : vector<8x8xf32>
    %750 = math.exp %749 : vector<8x8xf32>
    %cst_326 = arith.constant dense<0.000000e+00> : vector<8xf32>
    %751 = vector.multi_reduction <add>, %750, %cst_326 [1] : vector<8x8xf32> to vector<8xf32>
    %752 = vector.shape_cast %751 : vector<8xf32> to vector<8x1xf32>
    %753 = vector.broadcast %752 : vector<8x1xf32> to vector<8x8xf32>
    %754 = arith.divf %750, %753 : vector<8x8xf32>
    %cst_327 = arith.constant dense<0.000000e+00> : vector<8x8xf32>
    %755 = tpu.matmul %754, %739, %cst_327 {dimension_numbers = #tpu.dot_dimension_numbers<[1], [0], [0], [1], [0, 0, 1, 1], [], []>} : vector<8x8xf32>, vector<8x8xf32>, vector<8x8xf32> -> vector<8x8xf32>
    %756 = vector.extract_strided_slice %691 {offsets = [16, 0], sizes = [8, 32], strides = [1, 1]} : vector<32x32xf32> to vector<8x32xf32>
    %cst_328 = arith.constant dense<0.000000e+00> : vector<8x32xf32>
    %757 = tpu.matmul %755, %756, %cst_328 {dimension_numbers = #tpu.dot_dimension_numbers<[1], [0], [0], [1], [0, 0, 1, 1], [], []>} : vector<8x8xf32>, vector<8x32xf32>, vector<8x32xf32> -> vector<8x32xf32>
    %758 = arith.addf %736, %757 : vector<8x32xf32>
    %759 = vector.extract_strided_slice %683 {offsets = [0, 24], sizes = [8, 8], strides = [1, 1]} : vector<8x32xf32> to vector<8x8xf32>
    %760 = vector.extract_strided_slice %689 {offsets = [0, 24], sizes = [8, 8], strides = [1, 1]} : vector<8x32xf32> to vector<8x8xf32>
    %761 = vector.extract_strided_slice %690 {offsets = [0, 24], sizes = [8, 8], strides = [1, 1]} : vector<8x32xf32> to vector<8x8xf32>
    %762 = tpu.transpose %760, [1, 0] : vector<8x8xf32> -> vector<8x8xf32>
    %cst_329 = arith.constant dense<0.000000e+00> : vector<8x8xf32>
    %763 = tpu.matmul %759, %762, %cst_329 {dimension_numbers = #tpu.dot_dimension_numbers<[1], [0], [0], [1], [0, 0, 1, 1], [], []>} : vector<8x8xf32>, vector<8x8xf32>, vector<8x8xf32> -> vector<8x8xf32>
    %cst_330 = arith.constant 0.353553385 : f32
    %764 = vector.broadcast %cst_330 : f32 to vector<8x8xf32>
    %765 = arith.mulf %763, %764 : vector<8x8xf32>
    %766 = vector.broadcast %5 : vector<1x8xf32> to vector<8x8xf32>
    %767 = arith.addf %765, %766 : vector<8x8xf32>
    %cst_331 = arith.constant dense<0xFF800000> : vector<8xf32>
    %768 = vector.multi_reduction <maximumf>, %767, %cst_331 [1] : vector<8x8xf32> to vector<8xf32>
    %769 = vector.shape_cast %768 : vector<8xf32> to vector<8x1xf32>
    %770 = vector.broadcast %769 : vector<8x1xf32> to vector<8x8xf32>
    %771 = arith.subf %767, %770 : vector<8x8xf32>
    %772 = math.exp %771 : vector<8x8xf32>
    %cst_332 = arith.constant dense<0.000000e+00> : vector<8xf32>
    %773 = vector.multi_reduction <add>, %772, %cst_332 [1] : vector<8x8xf32> to vector<8xf32>
    %774 = vector.shape_cast %773 : vector<8xf32> to vector<8x1xf32>
    %775 = vector.broadcast %774 : vector<8x1xf32> to vector<8x8xf32>
    %776 = arith.divf %772, %775 : vector<8x8xf32>
    %cst_333 = arith.constant dense<0.000000e+00> : vector<8x8xf32>
    %777 = tpu.matmul %776, %761, %cst_333 {dimension_numbers = #tpu.dot_dimension_numbers<[1], [0], [0], [1], [0, 0, 1, 1], [], []>} : vector<8x8xf32>, vector<8x8xf32>, vector<8x8xf32> -> vector<8x8xf32>
    %778 = vector.extract_strided_slice %691 {offsets = [24, 0], sizes = [8, 32], strides = [1, 1]} : vector<32x32xf32> to vector<8x32xf32>
    %cst_334 = arith.constant dense<0.000000e+00> : vector<8x32xf32>
    %779 = tpu.matmul %777, %778, %cst_334 {dimension_numbers = #tpu.dot_dimension_numbers<[1], [0], [0], [1], [0, 0, 1, 1], [], []>} : vector<8x8xf32>, vector<8x32xf32>, vector<8x32xf32> -> vector<8x32xf32>
    %780 = arith.addf %758, %779 : vector<8x32xf32>
    %c0_335 = arith.constant 0 : index
    %c0_336 = arith.constant 0 : index
    %781 = vector.load %arg57[%c0_335, %c0_336] : memref<1x32xf32, #tpu.memory_space<vmem>>, vector<1x32xf32>
    %782 = vector.broadcast %781 : vector<1x32xf32> to vector<8x32xf32>
    %783 = arith.addf %780, %782 : vector<8x32xf32>
    %784 = arith.addf %515, %783 : vector<8x32xf32>
    %c0_337 = arith.constant 0 : index
    %c0_338 = arith.constant 0 : index
    %785 = vector.load %arg55[%c0_337, %c0_338] : memref<1x32xf32, #tpu.memory_space<vmem>>, vector<1x32xf32>
    %c0_339 = arith.constant 0 : index
    %c0_340 = arith.constant 0 : index
    %786 = vector.load %arg54[%c0_339, %c0_340] : memref<1x32xf32, #tpu.memory_space<vmem>>, vector<1x32xf32>
    %cst_341 = arith.constant dense<0.000000e+00> : vector<8xf32>
    %787 = vector.multi_reduction <add>, %784, %cst_341 [1] : vector<8x32xf32> to vector<8xf32>
    %788 = vector.shape_cast %787 : vector<8xf32> to vector<8x1xf32>
    %cst_342 = arith.constant 3.200000e+01 : f32
    %789 = vector.broadcast %cst_342 : f32 to vector<8x1xf32>
    %790 = arith.divf %788, %789 : vector<8x1xf32>
    %791 = vector.broadcast %790 : vector<8x1xf32> to vector<8x32xf32>
    %792 = arith.subf %784, %791 : vector<8x32xf32>
    %793 = arith.mulf %792, %792 : vector<8x32xf32>
    %cst_343 = arith.constant dense<0.000000e+00> : vector<8xf32>
    %794 = vector.multi_reduction <add>, %793, %cst_343 [1] : vector<8x32xf32> to vector<8xf32>
    %795 = vector.shape_cast %794 : vector<8xf32> to vector<8x1xf32>
    %cst_344 = arith.constant 3.200000e+01 : f32
    %796 = vector.broadcast %cst_344 : f32 to vector<8x1xf32>
    %797 = arith.divf %795, %796 : vector<8x1xf32>
    %cst_345 = arith.constant 9.99999974E-6 : f32
    %798 = vector.broadcast %cst_345 : f32 to vector<8x1xf32>
    %799 = arith.addf %797, %798 : vector<8x1xf32>
    %800 = math.rsqrt %799 : vector<8x1xf32>
    %801 = vector.broadcast %800 : vector<8x1xf32> to vector<8x32xf32>
    %802 = arith.mulf %792, %801 : vector<8x32xf32>
    %803 = vector.broadcast %785 : vector<1x32xf32> to vector<8x32xf32>
    %804 = arith.mulf %802, %803 : vector<8x32xf32>
    %805 = vector.broadcast %786 : vector<1x32xf32> to vector<8x32xf32>
    %806 = arith.addf %804, %805 : vector<8x32xf32>
    %c0_346 = arith.constant 0 : index
    %c0_347 = arith.constant 0 : index
    %807 = vector.load %arg67[%c0_346, %c0_347] : memref<32x32xf32, #tpu.memory_space<vmem>>, vector<32x32xf32>
    %cst_348 = arith.constant dense<0.000000e+00> : vector<8x32xf32>
    %808 = tpu.matmul %678, %807, %cst_348 {dimension_numbers = #tpu.dot_dimension_numbers<[1], [0], [0], [1], [0, 0, 1, 1], [], []>} : vector<8x32xf32>, vector<32x32xf32>, vector<8x32xf32> -> vector<8x32xf32>
    %c0_349 = arith.constant 0 : index
    %c0_350 = arith.constant 0 : index
    %809 = vector.load %arg64[%c0_349, %c0_350] : memref<1x32xf32, #tpu.memory_space<vmem>>, vector<1x32xf32>
    %810 = vector.broadcast %809 : vector<1x32xf32> to vector<8x32xf32>
    %811 = arith.addf %808, %810 : vector<8x32xf32>
    %c0_351 = arith.constant 0 : index
    %c0_352 = arith.constant 0 : index
    %812 = vector.load %arg65[%c0_351, %c0_352] : memref<32x64xf32, #tpu.memory_space<vmem>>, vector<32x64xf32>
    %cst_353 = arith.constant dense<0.000000e+00> : vector<8x64xf32>
    %813 = tpu.matmul %515, %812, %cst_353 {dimension_numbers = #tpu.dot_dimension_numbers<[1], [0], [0], [1], [0, 0, 1, 1], [], []>} : vector<8x32xf32>, vector<32x64xf32>, vector<8x64xf32> -> vector<8x64xf32>
    %c0_354 = arith.constant 0 : index
    %c0_355 = arith.constant 0 : index
    %814 = vector.load %arg62[%c0_354, %c0_355] : memref<1x64xf32, #tpu.memory_space<vmem>>, vector<1x64xf32>
    %815 = vector.broadcast %814 : vector<1x64xf32> to vector<8x64xf32>
    %816 = arith.addf %813, %815 : vector<8x64xf32>
    %817 = vector.extract_strided_slice %816 {offsets = [0, 0], sizes = [8, 32], strides = [1, 1]} : vector<8x64xf32> to vector<8x32xf32>
    %818 = vector.extract_strided_slice %816 {offsets = [0, 32], sizes = [8, 32], strides = [1, 1]} : vector<8x64xf32> to vector<8x32xf32>
    %c0_356 = arith.constant 0 : index
    %c0_357 = arith.constant 0 : index
    %819 = vector.load %arg66[%c0_356, %c0_357] : memref<32x32xf32, #tpu.memory_space<vmem>>, vector<32x32xf32>
    %cst_358 = arith.constant 0.000000e+00 : f32
    %820 = vector.broadcast %cst_358 : f32 to vector<8x32xf32>
    %821 = vector.extract_strided_slice %811 {offsets = [0, 0], sizes = [8, 8], strides = [1, 1]} : vector<8x32xf32> to vector<8x8xf32>
    %822 = vector.extract_strided_slice %817 {offsets = [0, 0], sizes = [8, 8], strides = [1, 1]} : vector<8x32xf32> to vector<8x8xf32>
    %823 = vector.extract_strided_slice %818 {offsets = [0, 0], sizes = [8, 8], strides = [1, 1]} : vector<8x32xf32> to vector<8x8xf32>
    %824 = tpu.transpose %822, [1, 0] : vector<8x8xf32> -> vector<8x8xf32>
    %cst_359 = arith.constant dense<0.000000e+00> : vector<8x8xf32>
    %825 = tpu.matmul %821, %824, %cst_359 {dimension_numbers = #tpu.dot_dimension_numbers<[1], [0], [0], [1], [0, 0, 1, 1], [], []>} : vector<8x8xf32>, vector<8x8xf32>, vector<8x8xf32> -> vector<8x8xf32>
    %cst_360 = arith.constant 0.353553385 : f32
    %826 = vector.broadcast %cst_360 : f32 to vector<8x8xf32>
    %827 = arith.mulf %825, %826 : vector<8x8xf32>
    %828 = vector.broadcast %3 : vector<1x8xf32> to vector<8x8xf32>
    %829 = arith.addf %827, %828 : vector<8x8xf32>
    %cst_361 = arith.constant dense<0xFF800000> : vector<8xf32>
    %830 = vector.multi_reduction <maximumf>, %829, %cst_361 [1] : vector<8x8xf32> to vector<8xf32>
    %831 = vector.shape_cast %830 : vector<8xf32> to vector<8x1xf32>
    %832 = vector.broadcast %831 : vector<8x1xf32> to vector<8x8xf32>
    %833 = arith.subf %829, %832 : vector<8x8xf32>
    %834 = math.exp %833 : vector<8x8xf32>
    %cst_362 = arith.constant dense<0.000000e+00> : vector<8xf32>
    %835 = vector.multi_reduction <add>, %834, %cst_362 [1] : vector<8x8xf32> to vector<8xf32>
    %836 = vector.shape_cast %835 : vector<8xf32> to vector<8x1xf32>
    %837 = vector.broadcast %836 : vector<8x1xf32> to vector<8x8xf32>
    %838 = arith.divf %834, %837 : vector<8x8xf32>
    %cst_363 = arith.constant dense<0.000000e+00> : vector<8x8xf32>
    %839 = tpu.matmul %838, %823, %cst_363 {dimension_numbers = #tpu.dot_dimension_numbers<[1], [0], [0], [1], [0, 0, 1, 1], [], []>} : vector<8x8xf32>, vector<8x8xf32>, vector<8x8xf32> -> vector<8x8xf32>
    %840 = vector.extract_strided_slice %819 {offsets = [0, 0], sizes = [8, 32], strides = [1, 1]} : vector<32x32xf32> to vector<8x32xf32>
    %cst_364 = arith.constant dense<0.000000e+00> : vector<8x32xf32>
    %841 = tpu.matmul %839, %840, %cst_364 {dimension_numbers = #tpu.dot_dimension_numbers<[1], [0], [0], [1], [0, 0, 1, 1], [], []>} : vector<8x8xf32>, vector<8x32xf32>, vector<8x32xf32> -> vector<8x32xf32>
    %842 = arith.addf %820, %841 : vector<8x32xf32>
    %843 = vector.extract_strided_slice %811 {offsets = [0, 8], sizes = [8, 8], strides = [1, 1]} : vector<8x32xf32> to vector<8x8xf32>
    %844 = vector.extract_strided_slice %817 {offsets = [0, 8], sizes = [8, 8], strides = [1, 1]} : vector<8x32xf32> to vector<8x8xf32>
    %845 = vector.extract_strided_slice %818 {offsets = [0, 8], sizes = [8, 8], strides = [1, 1]} : vector<8x32xf32> to vector<8x8xf32>
    %846 = tpu.transpose %844, [1, 0] : vector<8x8xf32> -> vector<8x8xf32>
    %cst_365 = arith.constant dense<0.000000e+00> : vector<8x8xf32>
    %847 = tpu.matmul %843, %846, %cst_365 {dimension_numbers = #tpu.dot_dimension_numbers<[1], [0], [0], [1], [0, 0, 1, 1], [], []>} : vector<8x8xf32>, vector<8x8xf32>, vector<8x8xf32> -> vector<8x8xf32>
    %cst_366 = arith.constant 0.353553385 : f32
    %848 = vector.broadcast %cst_366 : f32 to vector<8x8xf32>
    %849 = arith.mulf %847, %848 : vector<8x8xf32>
    %850 = vector.broadcast %3 : vector<1x8xf32> to vector<8x8xf32>
    %851 = arith.addf %849, %850 : vector<8x8xf32>
    %cst_367 = arith.constant dense<0xFF800000> : vector<8xf32>
    %852 = vector.multi_reduction <maximumf>, %851, %cst_367 [1] : vector<8x8xf32> to vector<8xf32>
    %853 = vector.shape_cast %852 : vector<8xf32> to vector<8x1xf32>
    %854 = vector.broadcast %853 : vector<8x1xf32> to vector<8x8xf32>
    %855 = arith.subf %851, %854 : vector<8x8xf32>
    %856 = math.exp %855 : vector<8x8xf32>
    %cst_368 = arith.constant dense<0.000000e+00> : vector<8xf32>
    %857 = vector.multi_reduction <add>, %856, %cst_368 [1] : vector<8x8xf32> to vector<8xf32>
    %858 = vector.shape_cast %857 : vector<8xf32> to vector<8x1xf32>
    %859 = vector.broadcast %858 : vector<8x1xf32> to vector<8x8xf32>
    %860 = arith.divf %856, %859 : vector<8x8xf32>
    %cst_369 = arith.constant dense<0.000000e+00> : vector<8x8xf32>
    %861 = tpu.matmul %860, %845, %cst_369 {dimension_numbers = #tpu.dot_dimension_numbers<[1], [0], [0], [1], [0, 0, 1, 1], [], []>} : vector<8x8xf32>, vector<8x8xf32>, vector<8x8xf32> -> vector<8x8xf32>
    %862 = vector.extract_strided_slice %819 {offsets = [8, 0], sizes = [8, 32], strides = [1, 1]} : vector<32x32xf32> to vector<8x32xf32>
    %cst_370 = arith.constant dense<0.000000e+00> : vector<8x32xf32>
    %863 = tpu.matmul %861, %862, %cst_370 {dimension_numbers = #tpu.dot_dimension_numbers<[1], [0], [0], [1], [0, 0, 1, 1], [], []>} : vector<8x8xf32>, vector<8x32xf32>, vector<8x32xf32> -> vector<8x32xf32>
    %864 = arith.addf %842, %863 : vector<8x32xf32>
    %865 = vector.extract_strided_slice %811 {offsets = [0, 16], sizes = [8, 8], strides = [1, 1]} : vector<8x32xf32> to vector<8x8xf32>
    %866 = vector.extract_strided_slice %817 {offsets = [0, 16], sizes = [8, 8], strides = [1, 1]} : vector<8x32xf32> to vector<8x8xf32>
    %867 = vector.extract_strided_slice %818 {offsets = [0, 16], sizes = [8, 8], strides = [1, 1]} : vector<8x32xf32> to vector<8x8xf32>
    %868 = tpu.transpose %866, [1, 0] : vector<8x8xf32> -> vector<8x8xf32>
    %cst_371 = arith.constant dense<0.000000e+00> : vector<8x8xf32>
    %869 = tpu.matmul %865, %868, %cst_371 {dimension_numbers = #tpu.dot_dimension_numbers<[1], [0], [0], [1], [0, 0, 1, 1], [], []>} : vector<8x8xf32>, vector<8x8xf32>, vector<8x8xf32> -> vector<8x8xf32>
    %cst_372 = arith.constant 0.353553385 : f32
    %870 = vector.broadcast %cst_372 : f32 to vector<8x8xf32>
    %871 = arith.mulf %869, %870 : vector<8x8xf32>
    %872 = vector.broadcast %3 : vector<1x8xf32> to vector<8x8xf32>
    %873 = arith.addf %871, %872 : vector<8x8xf32>
    %cst_373 = arith.constant dense<0xFF800000> : vector<8xf32>
    %874 = vector.multi_reduction <maximumf>, %873, %cst_373 [1] : vector<8x8xf32> to vector<8xf32>
    %875 = vector.shape_cast %874 : vector<8xf32> to vector<8x1xf32>
    %876 = vector.broadcast %875 : vector<8x1xf32> to vector<8x8xf32>
    %877 = arith.subf %873, %876 : vector<8x8xf32>
    %878 = math.exp %877 : vector<8x8xf32>
    %cst_374 = arith.constant dense<0.000000e+00> : vector<8xf32>
    %879 = vector.multi_reduction <add>, %878, %cst_374 [1] : vector<8x8xf32> to vector<8xf32>
    %880 = vector.shape_cast %879 : vector<8xf32> to vector<8x1xf32>
    %881 = vector.broadcast %880 : vector<8x1xf32> to vector<8x8xf32>
    %882 = arith.divf %878, %881 : vector<8x8xf32>
    %cst_375 = arith.constant dense<0.000000e+00> : vector<8x8xf32>
    %883 = tpu.matmul %882, %867, %cst_375 {dimension_numbers = #tpu.dot_dimension_numbers<[1], [0], [0], [1], [0, 0, 1, 1], [], []>} : vector<8x8xf32>, vector<8x8xf32>, vector<8x8xf32> -> vector<8x8xf32>
    %884 = vector.extract_strided_slice %819 {offsets = [16, 0], sizes = [8, 32], strides = [1, 1]} : vector<32x32xf32> to vector<8x32xf32>
    %cst_376 = arith.constant dense<0.000000e+00> : vector<8x32xf32>
    %885 = tpu.matmul %883, %884, %cst_376 {dimension_numbers = #tpu.dot_dimension_numbers<[1], [0], [0], [1], [0, 0, 1, 1], [], []>} : vector<8x8xf32>, vector<8x32xf32>, vector<8x32xf32> -> vector<8x32xf32>
    %886 = arith.addf %864, %885 : vector<8x32xf32>
    %887 = vector.extract_strided_slice %811 {offsets = [0, 24], sizes = [8, 8], strides = [1, 1]} : vector<8x32xf32> to vector<8x8xf32>
    %888 = vector.extract_strided_slice %817 {offsets = [0, 24], sizes = [8, 8], strides = [1, 1]} : vector<8x32xf32> to vector<8x8xf32>
    %889 = vector.extract_strided_slice %818 {offsets = [0, 24], sizes = [8, 8], strides = [1, 1]} : vector<8x32xf32> to vector<8x8xf32>
    %890 = tpu.transpose %888, [1, 0] : vector<8x8xf32> -> vector<8x8xf32>
    %cst_377 = arith.constant dense<0.000000e+00> : vector<8x8xf32>
    %891 = tpu.matmul %887, %890, %cst_377 {dimension_numbers = #tpu.dot_dimension_numbers<[1], [0], [0], [1], [0, 0, 1, 1], [], []>} : vector<8x8xf32>, vector<8x8xf32>, vector<8x8xf32> -> vector<8x8xf32>
    %cst_378 = arith.constant 0.353553385 : f32
    %892 = vector.broadcast %cst_378 : f32 to vector<8x8xf32>
    %893 = arith.mulf %891, %892 : vector<8x8xf32>
    %894 = vector.broadcast %3 : vector<1x8xf32> to vector<8x8xf32>
    %895 = arith.addf %893, %894 : vector<8x8xf32>
    %cst_379 = arith.constant dense<0xFF800000> : vector<8xf32>
    %896 = vector.multi_reduction <maximumf>, %895, %cst_379 [1] : vector<8x8xf32> to vector<8xf32>
    %897 = vector.shape_cast %896 : vector<8xf32> to vector<8x1xf32>
    %898 = vector.broadcast %897 : vector<8x1xf32> to vector<8x8xf32>
    %899 = arith.subf %895, %898 : vector<8x8xf32>
    %900 = math.exp %899 : vector<8x8xf32>
    %cst_380 = arith.constant dense<0.000000e+00> : vector<8xf32>
    %901 = vector.multi_reduction <add>, %900, %cst_380 [1] : vector<8x8xf32> to vector<8xf32>
    %902 = vector.shape_cast %901 : vector<8xf32> to vector<8x1xf32>
    %903 = vector.broadcast %902 : vector<8x1xf32> to vector<8x8xf32>
    %904 = arith.divf %900, %903 : vector<8x8xf32>
    %cst_381 = arith.constant dense<0.000000e+00> : vector<8x8xf32>
    %905 = tpu.matmul %904, %889, %cst_381 {dimension_numbers = #tpu.dot_dimension_numbers<[1], [0], [0], [1], [0, 0, 1, 1], [], []>} : vector<8x8xf32>, vector<8x8xf32>, vector<8x8xf32> -> vector<8x8xf32>
    %906 = vector.extract_strided_slice %819 {offsets = [24, 0], sizes = [8, 32], strides = [1, 1]} : vector<32x32xf32> to vector<8x32xf32>
    %cst_382 = arith.constant dense<0.000000e+00> : vector<8x32xf32>
    %907 = tpu.matmul %905, %906, %cst_382 {dimension_numbers = #tpu.dot_dimension_numbers<[1], [0], [0], [1], [0, 0, 1, 1], [], []>} : vector<8x8xf32>, vector<8x32xf32>, vector<8x32xf32> -> vector<8x32xf32>
    %908 = arith.addf %886, %907 : vector<8x32xf32>
    %c0_383 = arith.constant 0 : index
    %c0_384 = arith.constant 0 : index
    %909 = vector.load %arg63[%c0_383, %c0_384] : memref<1x32xf32, #tpu.memory_space<vmem>>, vector<1x32xf32>
    %910 = vector.broadcast %909 : vector<1x32xf32> to vector<8x32xf32>
    %911 = arith.addf %908, %910 : vector<8x32xf32>
    %912 = arith.addf %678, %911 : vector<8x32xf32>
    %c0_385 = arith.constant 0 : index
    %c0_386 = arith.constant 0 : index
    %913 = vector.load %arg53[%c0_385, %c0_386] : memref<1x32xf32, #tpu.memory_space<vmem>>, vector<1x32xf32>
    %c0_387 = arith.constant 0 : index
    %c0_388 = arith.constant 0 : index
    %914 = vector.load %arg52[%c0_387, %c0_388] : memref<1x32xf32, #tpu.memory_space<vmem>>, vector<1x32xf32>
    %cst_389 = arith.constant dense<0.000000e+00> : vector<8xf32>
    %915 = vector.multi_reduction <add>, %912, %cst_389 [1] : vector<8x32xf32> to vector<8xf32>
    %916 = vector.shape_cast %915 : vector<8xf32> to vector<8x1xf32>
    %cst_390 = arith.constant 3.200000e+01 : f32
    %917 = vector.broadcast %cst_390 : f32 to vector<8x1xf32>
    %918 = arith.divf %916, %917 : vector<8x1xf32>
    %919 = vector.broadcast %918 : vector<8x1xf32> to vector<8x32xf32>
    %920 = arith.subf %912, %919 : vector<8x32xf32>
    %921 = arith.mulf %920, %920 : vector<8x32xf32>
    %cst_391 = arith.constant dense<0.000000e+00> : vector<8xf32>
    %922 = vector.multi_reduction <add>, %921, %cst_391 [1] : vector<8x32xf32> to vector<8xf32>
    %923 = vector.shape_cast %922 : vector<8xf32> to vector<8x1xf32>
    %cst_392 = arith.constant 3.200000e+01 : f32
    %924 = vector.broadcast %cst_392 : f32 to vector<8x1xf32>
    %925 = arith.divf %923, %924 : vector<8x1xf32>
    %cst_393 = arith.constant 9.99999974E-6 : f32
    %926 = vector.broadcast %cst_393 : f32 to vector<8x1xf32>
    %927 = arith.addf %925, %926 : vector<8x1xf32>
    %928 = math.rsqrt %927 : vector<8x1xf32>
    %929 = vector.broadcast %928 : vector<8x1xf32> to vector<8x32xf32>
    %930 = arith.mulf %920, %929 : vector<8x32xf32>
    %931 = vector.broadcast %913 : vector<1x32xf32> to vector<8x32xf32>
    %932 = arith.mulf %930, %931 : vector<8x32xf32>
    %933 = vector.broadcast %914 : vector<1x32xf32> to vector<8x32xf32>
    %934 = arith.addf %932, %933 : vector<8x32xf32>
    %935 = vector.extract_strided_slice %806 {offsets = [0, 0], sizes = [1, 32], strides = [1, 1]} : vector<8x32xf32> to vector<1x32xf32>
    %c0_394 = arith.constant 0 : index
    %c0_395 = arith.constant 0 : index
    %936 = vector.load %arg70[%c0_394, %c0_395] : memref<1x640xf32, #tpu.memory_space<vmem>>, vector<1x32xf32>
    tpu.vector_store %arg70[%c0_394, %c0_395], %935 {strides = array<i32>} : memref<1x640xf32, #tpu.memory_space<vmem>>, vector<1x32xf32>,
    %937 = vector.extract_strided_slice %806 {offsets = [1, 0], sizes = [1, 32], strides = [1, 1]} : vector<8x32xf32> to vector<1x32xf32>
    %c0_396 = arith.constant 0 : index
    %c32 = arith.constant 32 : index
    %938 = vector.load %arg70[%c0_396, %c32] : memref<1x640xf32, #tpu.memory_space<vmem>>, vector<1x32xf32>
    tpu.vector_store %arg70[%c0_396, %c32], %937 {strides = array<i32>} : memref<1x640xf32, #tpu.memory_space<vmem>>, vector<1x32xf32>,
    %939 = vector.extract_strided_slice %806 {offsets = [2, 0], sizes = [1, 32], strides = [1, 1]} : vector<8x32xf32> to vector<1x32xf32>
    %c0_397 = arith.constant 0 : index
    %c64 = arith.constant 64 : index
    %940 = vector.load %arg70[%c0_397, %c64] : memref<1x640xf32, #tpu.memory_space<vmem>>, vector<1x32xf32>
    tpu.vector_store %arg70[%c0_397, %c64], %939 {strides = array<i32>} : memref<1x640xf32, #tpu.memory_space<vmem>>, vector<1x32xf32>,
    %941 = vector.extract_strided_slice %806 {offsets = [3, 0], sizes = [1, 32], strides = [1, 1]} : vector<8x32xf32> to vector<1x32xf32>
    %c0_398 = arith.constant 0 : index
    %c96 = arith.constant 96 : index
    %942 = vector.load %arg70[%c0_398, %c96] : memref<1x640xf32, #tpu.memory_space<vmem>>, vector<1x32xf32>
    tpu.vector_store %arg70[%c0_398, %c96], %941 {strides = array<i32>} : memref<1x640xf32, #tpu.memory_space<vmem>>, vector<1x32xf32>,
    %943 = vector.extract_strided_slice %806 {offsets = [4, 0], sizes = [1, 32], strides = [1, 1]} : vector<8x32xf32> to vector<1x32xf32>
    %c0_399 = arith.constant 0 : index
    %c128 = arith.constant 128 : index
    %944 = vector.load %arg70[%c0_399, %c128] : memref<1x640xf32, #tpu.memory_space<vmem>>, vector<1x32xf32>
    tpu.vector_store %arg70[%c0_399, %c128], %943 {strides = array<i32>} : memref<1x640xf32, #tpu.memory_space<vmem>>, vector<1x32xf32>,
    %945 = vector.extract_strided_slice %806 {offsets = [5, 0], sizes = [1, 32], strides = [1, 1]} : vector<8x32xf32> to vector<1x32xf32>
    %c0_400 = arith.constant 0 : index
    %c160 = arith.constant 160 : index
    %946 = vector.load %arg70[%c0_400, %c160] : memref<1x640xf32, #tpu.memory_space<vmem>>, vector<1x32xf32>
    tpu.vector_store %arg70[%c0_400, %c160], %945 {strides = array<i32>} : memref<1x640xf32, #tpu.memory_space<vmem>>, vector<1x32xf32>,
    %947 = vector.extract_strided_slice %806 {offsets = [6, 0], sizes = [1, 32], strides = [1, 1]} : vector<8x32xf32> to vector<1x32xf32>
    %c0_401 = arith.constant 0 : index
    %c192 = arith.constant 192 : index
    %948 = vector.load %arg70[%c0_401, %c192] : memref<1x640xf32, #tpu.memory_space<vmem>>, vector<1x32xf32>
    tpu.vector_store %arg70[%c0_401, %c192], %947 {strides = array<i32>} : memref<1x640xf32, #tpu.memory_space<vmem>>, vector<1x32xf32>,
    %949 = vector.extract_strided_slice %806 {offsets = [7, 0], sizes = [1, 32], strides = [1, 1]} : vector<8x32xf32> to vector<1x32xf32>
    %c0_402 = arith.constant 0 : index
    %c224 = arith.constant 224 : index
    %950 = vector.load %arg70[%c0_402, %c224] : memref<1x640xf32, #tpu.memory_space<vmem>>, vector<1x32xf32>
    tpu.vector_store %arg70[%c0_402, %c224], %949 {strides = array<i32>} : memref<1x640xf32, #tpu.memory_space<vmem>>, vector<1x32xf32>,
    %951 = vector.extract_strided_slice %934 {offsets = [0, 0], sizes = [1, 32], strides = [1, 1]} : vector<8x32xf32> to vector<1x32xf32>
    %c0_403 = arith.constant 0 : index
    %c256 = arith.constant 256 : index
    %952 = vector.load %arg70[%c0_403, %c256] : memref<1x640xf32, #tpu.memory_space<vmem>>, vector<1x32xf32>
    tpu.vector_store %arg70[%c0_403, %c256], %951 {strides = array<i32>} : memref<1x640xf32, #tpu.memory_space<vmem>>, vector<1x32xf32>,
    %953 = vector.extract_strided_slice %934 {offsets = [1, 0], sizes = [1, 32], strides = [1, 1]} : vector<8x32xf32> to vector<1x32xf32>
    %c0_404 = arith.constant 0 : index
    %c288 = arith.constant 288 : index
    %954 = vector.load %arg70[%c0_404, %c288] : memref<1x640xf32, #tpu.memory_space<vmem>>, vector<1x32xf32>
    tpu.vector_store %arg70[%c0_404, %c288], %953 {strides = array<i32>} : memref<1x640xf32, #tpu.memory_space<vmem>>, vector<1x32xf32>,
    %955 = vector.extract_strided_slice %934 {offsets = [2, 0], sizes = [1, 32], strides = [1, 1]} : vector<8x32xf32> to vector<1x32xf32>
    %c0_405 = arith.constant 0 : index
    %c320 = arith.constant 320 : index
    %956 = vector.load %arg70[%c0_405, %c320] : memref<1x640xf32, #tpu.memory_space<vmem>>, vector<1x32xf32>
    tpu.vector_store %arg70[%c0_405, %c320], %955 {strides = array<i32>} : memref<1x640xf32, #tpu.memory_space<vmem>>, vector<1x32xf32>,
    %957 = vector.extract_strided_slice %934 {offsets = [3, 0], sizes = [1, 32], strides = [1, 1]} : vector<8x32xf32> to vector<1x32xf32>
    %c0_406 = arith.constant 0 : index
    %c352 = arith.constant 352 : index
    %958 = vector.load %arg70[%c0_406, %c352] : memref<1x640xf32, #tpu.memory_space<vmem>>, vector<1x32xf32>
    tpu.vector_store %arg70[%c0_406, %c352], %957 {strides = array<i32>} : memref<1x640xf32, #tpu.memory_space<vmem>>, vector<1x32xf32>,
    %959 = vector.extract_strided_slice %934 {offsets = [4, 0], sizes = [1, 32], strides = [1, 1]} : vector<8x32xf32> to vector<1x32xf32>
    %c0_407 = arith.constant 0 : index
    %c384 = arith.constant 384 : index
    %960 = vector.load %arg70[%c0_407, %c384] : memref<1x640xf32, #tpu.memory_space<vmem>>, vector<1x32xf32>
    tpu.vector_store %arg70[%c0_407, %c384], %959 {strides = array<i32>} : memref<1x640xf32, #tpu.memory_space<vmem>>, vector<1x32xf32>,
    %961 = vector.extract_strided_slice %934 {offsets = [5, 0], sizes = [1, 32], strides = [1, 1]} : vector<8x32xf32> to vector<1x32xf32>
    %c0_408 = arith.constant 0 : index
    %c416 = arith.constant 416 : index
    %962 = vector.load %arg70[%c0_408, %c416] : memref<1x640xf32, #tpu.memory_space<vmem>>, vector<1x32xf32>
    tpu.vector_store %arg70[%c0_408, %c416], %961 {strides = array<i32>} : memref<1x640xf32, #tpu.memory_space<vmem>>, vector<1x32xf32>,
    %963 = vector.extract_strided_slice %934 {offsets = [6, 0], sizes = [1, 32], strides = [1, 1]} : vector<8x32xf32> to vector<1x32xf32>
    %c0_409 = arith.constant 0 : index
    %c448 = arith.constant 448 : index
    %964 = vector.load %arg70[%c0_409, %c448] : memref<1x640xf32, #tpu.memory_space<vmem>>, vector<1x32xf32>
    tpu.vector_store %arg70[%c0_409, %c448], %963 {strides = array<i32>} : memref<1x640xf32, #tpu.memory_space<vmem>>, vector<1x32xf32>,
    %965 = vector.extract_strided_slice %934 {offsets = [7, 0], sizes = [1, 32], strides = [1, 1]} : vector<8x32xf32> to vector<1x32xf32>
    %c0_410 = arith.constant 0 : index
    %c480 = arith.constant 480 : index
    %966 = vector.load %arg70[%c0_410, %c480] : memref<1x640xf32, #tpu.memory_space<vmem>>, vector<1x32xf32>
    tpu.vector_store %arg70[%c0_410, %c480], %965 {strides = array<i32>} : memref<1x640xf32, #tpu.memory_space<vmem>>, vector<1x32xf32>,
    %967 = vector.extract_strided_slice %26 {offsets = [0, 0], sizes = [1, 64], strides = [1, 1]} : vector<2x64xf32> to vector<1x64xf32>
    %c0_411 = arith.constant 0 : index
    %c512 = arith.constant 512 : index
    %968 = vector.load %arg70[%c0_411, %c512] : memref<1x640xf32, #tpu.memory_space<vmem>>, vector<1x64xf32>
    tpu.vector_store %arg70[%c0_411, %c512], %967 {strides = array<i32>} : memref<1x640xf32, #tpu.memory_space<vmem>>, vector<1x64xf32>,
    %969 = vector.extract_strided_slice %26 {offsets = [1, 0], sizes = [1, 64], strides = [1, 1]} : vector<2x64xf32> to vector<1x64xf32>
    %c0_412 = arith.constant 0 : index
    %c576 = arith.constant 576 : index
    %970 = vector.load %arg70[%c0_412, %c576] : memref<1x640xf32, #tpu.memory_space<vmem>>, vector<1x64xf32>
    tpu.vector_store %arg70[%c0_412, %c576], %969 {strides = array<i32>} : memref<1x640xf32, #tpu.memory_space<vmem>>, vector<1x64xf32>,
    %c0_413 = arith.constant 0 : index
    %c0_414 = arith.constant 0 : index
    %971 = vector.load %arg70[%c0_413, %c0_414] : memref<1x640xf32, #tpu.memory_space<vmem>>, vector<1x640xf32>
    %c0_415 = arith.constant 0 : index
    %c0_416 = arith.constant 0 : index
    %972 = vector.load %arg17[%c0_415, %c0_416] : memref<640x32xf32, #tpu.memory_space<vmem>>, vector<640x32xf32>
    %cst_417 = arith.constant dense<0.000000e+00> : vector<1x32xf32>
    %973 = tpu.matmul %971, %972, %cst_417 {dimension_numbers = #tpu.dot_dimension_numbers<[1], [0], [0], [1], [0, 0, 1, 1], [], []>} : vector<1x640xf32>, vector<640x32xf32>, vector<1x32xf32> -> vector<1x32xf32>
    %c0_418 = arith.constant 0 : index
    %c0_419 = arith.constant 0 : index
    %974 = vector.load %arg5[%c0_418, %c0_419] : memref<1x32xf32, #tpu.memory_space<vmem>>, vector<1x32xf32>
    %975 = arith.addf %973, %974 : vector<1x32xf32>
    %c0_420 = arith.constant 0 : index
    %c0_421 = arith.constant 0 : index
    %976 = vector.load %arg8[%c0_420, %c0_421] : memref<1x32xf32, #tpu.memory_space<vmem>>, vector<1x32xf32>
    %c0_422 = arith.constant 0 : index
    %c0_423 = arith.constant 0 : index
    %977 = vector.load %arg7[%c0_422, %c0_423] : memref<1x32xf32, #tpu.memory_space<vmem>>, vector<1x32xf32>
    %cst_424 = arith.constant dense<0.000000e+00> : vector<1xf32>
    %978 = vector.multi_reduction <add>, %975, %cst_424 [1] : vector<1x32xf32> to vector<1xf32>
    %979 = vector.shape_cast %978 : vector<1xf32> to vector<1x1xf32>
    %cst_425 = arith.constant 3.200000e+01 : f32
    %980 = vector.broadcast %cst_425 : f32 to vector<1x1xf32>
    %981 = arith.divf %979, %980 : vector<1x1xf32>
    %982 = vector.broadcast %981 : vector<1x1xf32> to vector<1x32xf32>
    %983 = arith.subf %975, %982 : vector<1x32xf32>
    %984 = arith.mulf %983, %983 : vector<1x32xf32>
    %cst_426 = arith.constant dense<0.000000e+00> : vector<1xf32>
    %985 = vector.multi_reduction <add>, %984, %cst_426 [1] : vector<1x32xf32> to vector<1xf32>
    %986 = vector.shape_cast %985 : vector<1xf32> to vector<1x1xf32>
    %cst_427 = arith.constant 3.200000e+01 : f32
    %987 = vector.broadcast %cst_427 : f32 to vector<1x1xf32>
    %988 = arith.divf %986, %987 : vector<1x1xf32>
    %cst_428 = arith.constant 9.99999974E-6 : f32
    %989 = vector.broadcast %cst_428 : f32 to vector<1x1xf32>
    %990 = arith.addf %988, %989 : vector<1x1xf32>
    %991 = math.rsqrt %990 : vector<1x1xf32>
    %992 = vector.broadcast %991 : vector<1x1xf32> to vector<1x32xf32>
    %993 = arith.mulf %983, %992 : vector<1x32xf32>
    %994 = arith.mulf %993, %976 : vector<1x32xf32>
    %995 = arith.addf %994, %977 : vector<1x32xf32>
    %cst_429 = arith.constant 0.000000e+00 : f32
    %996 = vector.broadcast %cst_429 : f32 to vector<1x32xf32>
    %997 = arith.maximumf %995, %996 : vector<1x32xf32>
    %c0_430 = arith.constant 0 : index
    %c0_431 = arith.constant 0 : index
    %998 = vector.load %arg12[%c0_430, %c0_431] : memref<1x32xf32, #tpu.memory_space<vmem>>, vector<1x32xf32>
    %c0_432 = arith.constant 0 : index
    %c0_433 = arith.constant 0 : index
    %999 = vector.load %arg11[%c0_432, %c0_433] : memref<1x32xf32, #tpu.memory_space<vmem>>, vector<1x32xf32>
    %cst_434 = arith.constant dense<0.000000e+00> : vector<1xf32>
    %1000 = vector.multi_reduction <add>, %997, %cst_434 [1] : vector<1x32xf32> to vector<1xf32>
    %1001 = vector.shape_cast %1000 : vector<1xf32> to vector<1x1xf32>
    %cst_435 = arith.constant 3.200000e+01 : f32
    %1002 = vector.broadcast %cst_435 : f32 to vector<1x1xf32>
    %1003 = arith.divf %1001, %1002 : vector<1x1xf32>
    %1004 = vector.broadcast %1003 : vector<1x1xf32> to vector<1x32xf32>
    %1005 = arith.subf %997, %1004 : vector<1x32xf32>
    %1006 = arith.mulf %1005, %1005 : vector<1x32xf32>
    %cst_436 = arith.constant dense<0.000000e+00> : vector<1xf32>
    %1007 = vector.multi_reduction <add>, %1006, %cst_436 [1] : vector<1x32xf32> to vector<1xf32>
    %1008 = vector.shape_cast %1007 : vector<1xf32> to vector<1x1xf32>
    %cst_437 = arith.constant 3.200000e+01 : f32
    %1009 = vector.broadcast %cst_437 : f32 to vector<1x1xf32>
    %1010 = arith.divf %1008, %1009 : vector<1x1xf32>
    %cst_438 = arith.constant 9.99999974E-6 : f32
    %1011 = vector.broadcast %cst_438 : f32 to vector<1x1xf32>
    %1012 = arith.addf %1010, %1011 : vector<1x1xf32>
    %1013 = math.rsqrt %1012 : vector<1x1xf32>
    %1014 = vector.broadcast %1013 : vector<1x1xf32> to vector<1x32xf32>
    %1015 = arith.mulf %1005, %1014 : vector<1x32xf32>
    %1016 = arith.mulf %1015, %998 : vector<1x32xf32>
    %1017 = arith.addf %1016, %999 : vector<1x32xf32>
    %cst_439 = arith.constant 0.000000e+00 : f32
    %1018 = vector.broadcast %cst_439 : f32 to vector<1x32xf32>
    %1019 = arith.maximumf %1017, %1018 : vector<1x32xf32>
    %c0_440 = arith.constant 0 : index
    %c0_441 = arith.constant 0 : index
    %1020 = vector.load %arg15[%c0_440, %c0_441] : memref<32x32xf32, #tpu.memory_space<vmem>>, vector<32x32xf32>
    %cst_442 = arith.constant dense<0.000000e+00> : vector<1x32xf32>
    %1021 = tpu.matmul %1019, %1020, %cst_442 {dimension_numbers = #tpu.dot_dimension_numbers<[1], [0], [0], [1], [0, 0, 1, 1], [], []>} : vector<1x32xf32>, vector<32x32xf32>, vector<1x32xf32> -> vector<1x32xf32>
    %c0_443 = arith.constant 0 : index
    %c0_444 = arith.constant 0 : index
    %1022 = vector.load %arg9[%c0_443, %c0_444] : memref<1x32xf32, #tpu.memory_space<vmem>>, vector<1x32xf32>
    %1023 = arith.addf %1021, %1022 : vector<1x32xf32>
    %c0_445 = arith.constant 0 : index
    %c0_446 = arith.constant 0 : index
    %1024 = vector.load %arg14[%c0_445, %c0_446] : memref<1x32xf32, #tpu.memory_space<vmem>>, vector<1x32xf32>
    %c0_447 = arith.constant 0 : index
    %c0_448 = arith.constant 0 : index
    %1025 = vector.load %arg13[%c0_447, %c0_448] : memref<1x32xf32, #tpu.memory_space<vmem>>, vector<1x32xf32>
    %cst_449 = arith.constant dense<0.000000e+00> : vector<1xf32>
    %1026 = vector.multi_reduction <add>, %1023, %cst_449 [1] : vector<1x32xf32> to vector<1xf32>
    %1027 = vector.shape_cast %1026 : vector<1xf32> to vector<1x1xf32>
    %cst_450 = arith.constant 3.200000e+01 : f32
    %1028 = vector.broadcast %cst_450 : f32 to vector<1x1xf32>
    %1029 = arith.divf %1027, %1028 : vector<1x1xf32>
    %1030 = vector.broadcast %1029 : vector<1x1xf32> to vector<1x32xf32>
    %1031 = arith.subf %1023, %1030 : vector<1x32xf32>
    %1032 = arith.mulf %1031, %1031 : vector<1x32xf32>
    %cst_451 = arith.constant dense<0.000000e+00> : vector<1xf32>
    %1033 = vector.multi_reduction <add>, %1032, %cst_451 [1] : vector<1x32xf32> to vector<1xf32>
    %1034 = vector.shape_cast %1033 : vector<1xf32> to vector<1x1xf32>
    %cst_452 = arith.constant 3.200000e+01 : f32
    %1035 = vector.broadcast %cst_452 : f32 to vector<1x1xf32>
    %1036 = arith.divf %1034, %1035 : vector<1x1xf32>
    %cst_453 = arith.constant 9.99999974E-6 : f32
    %1037 = vector.broadcast %cst_453 : f32 to vector<1x1xf32>
    %1038 = arith.addf %1036, %1037 : vector<1x1xf32>
    %1039 = math.rsqrt %1038 : vector<1x1xf32>
    %1040 = vector.broadcast %1039 : vector<1x1xf32> to vector<1x32xf32>
    %1041 = arith.mulf %1031, %1040 : vector<1x32xf32>
    %1042 = arith.mulf %1041, %1024 : vector<1x32xf32>
    %1043 = arith.addf %1042, %1025 : vector<1x32xf32>
    %cst_454 = arith.constant 0.000000e+00 : f32
    %1044 = vector.broadcast %cst_454 : f32 to vector<1x32xf32>
    %1045 = arith.maximumf %1043, %1044 : vector<1x32xf32>
    %c0_455 = arith.constant 0 : index
    %c0_456 = arith.constant 0 : index
    %1046 = vector.load %arg16[%c0_455, %c0_456] : memref<32x32xf32, #tpu.memory_space<vmem>>, vector<32x32xf32>
    %cst_457 = arith.constant dense<0.000000e+00> : vector<1x32xf32>
    %1047 = tpu.matmul %1045, %1046, %cst_457 {dimension_numbers = #tpu.dot_dimension_numbers<[1], [0], [0], [1], [0, 0, 1, 1], [], []>} : vector<1x32xf32>, vector<32x32xf32>, vector<1x32xf32> -> vector<1x32xf32>
    %c0_458 = arith.constant 0 : index
    %c0_459 = arith.constant 0 : index
    %1048 = vector.load %arg10[%c0_458, %c0_459] : memref<1x32xf32, #tpu.memory_space<vmem>>, vector<1x32xf32>
    %1049 = arith.addf %1047, %1048 : vector<1x32xf32>
    %1050 = arith.addf %997, %1049 : vector<1x32xf32>
    %c0_460 = arith.constant 0 : index
    %c0_461 = arith.constant 0 : index
    %1051 = vector.load %arg18[%c0_460, %c0_461] : memref<32x1xf32, #tpu.memory_space<vmem>>, vector<32x1xf32>
    %cst_462 = arith.constant dense<0.000000e+00> : vector<1x1xf32>
    %1052 = tpu.matmul %1050, %1051, %cst_462 {dimension_numbers = #tpu.dot_dimension_numbers<[1], [0], [0], [1], [0, 0, 1, 1], [], []>} : vector<1x32xf32>, vector<32x1xf32>, vector<1x1xf32> -> vector<1x1xf32>
    %c0_463 = arith.constant 0 : index
    %c0_464 = arith.constant 0 : index
    %1053 = vector.load %arg6[%c0_463, %c0_464] : memref<1x1xf32, #tpu.memory_space<vmem>>, vector<1x1xf32>
    %1054 = arith.addf %1052, %1053 : vector<1x1xf32>
    %c0_465 = arith.constant 0 : index
    %c0_466 = arith.constant 0 : index
    %c0_467 = arith.constant 0 : index
    %1055 = vector.load %arg69[%c0_465, %c0_466, %c0_467] : memref<1x1x1xf32, #tpu.memory_space<vmem>>, vector<1x1x1xf32>
    %1056 = vector.shape_cast %1055 : vector<1x1x1xf32> to vector<1x1xf32>
    %1057 = vector.shape_cast %1054 : vector<1x1xf32> to vector<1x1x1xf32>
    tpu.vector_store %arg69[%c0_465, %c0_466, %c0_467], %1057 {strides = array<i32>} : memref<1x1x1xf32, #tpu.memory_space<vmem>>, vector<1x1x1xf32>,
    return
  }
  func.func @transform_0(%arg0: i32) -> (i32, i32, i32) {
    %c0_i32 = arith.constant 0 : i32
    %c0_i32_0 = arith.constant 0 : i32
    %c0_i32_1 = arith.constant 0 : i32
    return %arg0, %c0_i32, %c0_i32_0 : i32, i32, i32
  }
  func.func @transform_1(%arg0: i32) -> (i32, i32, i32) {
    %c0_i32 = arith.constant 0 : i32
    %c0_i32_0 = arith.constant 0 : i32
    %c0_i32_1 = arith.constant 0 : i32
    return %arg0, %c0_i32, %c0_i32_0 : i32, i32, i32
  }
  func.func @transform_2(%arg0: i32) -> (i32, i32, i32) {
    %c0_i32 = arith.constant 0 : i32
    %c0_i32_0 = arith.constant 0 : i32
    %c0_i32_1 = arith.constant 0 : i32
    return %arg0, %c0_i32, %c0_i32_0 : i32, i32, i32
  }
  func.func @transform_3(%arg0: i32) -> (i32, i32, i32) {
    %c0_i32 = arith.constant 0 : i32
    %c0_i32_0 = arith.constant 0 : i32
    %c0_i32_1 = arith.constant 0 : i32
    return %arg0, %c0_i32, %c0_i32_0 : i32, i32, i32
  }
  func.func @transform_4(%arg0: i32) -> (i32, i32) {
    %c0_i32 = arith.constant 0 : i32
    %c0_i32_0 = arith.constant 0 : i32
    %c0_i32_1 = arith.constant 0 : i32
    return %c0_i32, %c0_i32_0 : i32, i32
  }
  func.func @transform_5(%arg0: i32) -> (i32, i32) {
    %c0_i32 = arith.constant 0 : i32
    %c0_i32_0 = arith.constant 0 : i32
    %c0_i32_1 = arith.constant 0 : i32
    return %c0_i32, %c0_i32_0 : i32, i32
  }
  func.func @transform_6(%arg0: i32) -> (i32, i32) {
    %c0_i32 = arith.constant 0 : i32
    %c0_i32_0 = arith.constant 0 : i32
    %c0_i32_1 = arith.constant 0 : i32
    return %c0_i32, %c0_i32_0 : i32, i32
  }
  func.func @transform_7(%arg0: i32) -> (i32, i32) {
    %c0_i32 = arith.constant 0 : i32
    %c0_i32_0 = arith.constant 0 : i32
    %c0_i32_1 = arith.constant 0 : i32
    return %c0_i32, %c0_i32_0 : i32, i32
  }
  func.func @transform_8(%arg0: i32) -> (i32, i32) {
    %c0_i32 = arith.constant 0 : i32
    %c0_i32_0 = arith.constant 0 : i32
    %c0_i32_1 = arith.constant 0 : i32
    return %c0_i32, %c0_i32_0 : i32, i32
  }
  func.func @transform_9(%arg0: i32) -> (i32, i32) {
    %c0_i32 = arith.constant 0 : i32
    %c0_i32_0 = arith.constant 0 : i32
    %c0_i32_1 = arith.constant 0 : i32
    return %c0_i32, %c0_i32_0 : i32, i32
  }
  func.func @transform_10(%arg0: i32) -> (i32, i32) {
    %c0_i32 = arith.constant 0 : i32
    %c0_i32_0 = arith.constant 0 : i32
    %c0_i32_1 = arith.constant 0 : i32
    return %c0_i32, %c0_i32_0 : i32, i32
  }
  func.func @transform_11(%arg0: i32) -> (i32, i32) {
    %c0_i32 = arith.constant 0 : i32
    %c0_i32_0 = arith.constant 0 : i32
    %c0_i32_1 = arith.constant 0 : i32
    return %c0_i32, %c0_i32_0 : i32, i32
  }
  func.func @transform_12(%arg0: i32) -> (i32, i32) {
    %c0_i32 = arith.constant 0 : i32
    %c0_i32_0 = arith.constant 0 : i32
    %c0_i32_1 = arith.constant 0 : i32
    return %c0_i32, %c0_i32_0 : i32, i32
  }
  func.func @transform_13(%arg0: i32) -> (i32, i32) {
    %c0_i32 = arith.constant 0 : i32
    %c0_i32_0 = arith.constant 0 : i32
    %c0_i32_1 = arith.constant 0 : i32
    return %c0_i32, %c0_i32_0 : i32, i32
  }
  func.func @transform_14(%arg0: i32) -> (i32, i32) {
    %c0_i32 = arith.constant 0 : i32
    %c0_i32_0 = arith.constant 0 : i32
    %c0_i32_1 = arith.constant 0 : i32
    return %c0_i32, %c0_i32_0 : i32, i32
  }
  func.func @transform_15(%arg0: i32) -> (i32, i32) {
    %c0_i32 = arith.constant 0 : i32
    %c0_i32_0 = arith.constant 0 : i32
    %c0_i32_1 = arith.constant 0 : i32
    return %c0_i32, %c0_i32_0 : i32, i32
  }
  func.func @transform_16(%arg0: i32) -> (i32, i32) {
    %c0_i32 = arith.constant 0 : i32
    %c0_i32_0 = arith.constant 0 : i32
    %c0_i32_1 = arith.constant 0 : i32
    return %c0_i32, %c0_i32_0 : i32, i32
  }
  func.func @transform_17(%arg0: i32) -> (i32, i32) {
    %c0_i32 = arith.constant 0 : i32
    %c0_i32_0 = arith.constant 0 : i32
    %c0_i32_1 = arith.constant 0 : i32
    return %c0_i32, %c0_i32_0 : i32, i32
  }
  func.func @transform_18(%arg0: i32) -> (i32, i32) {
    %c0_i32 = arith.constant 0 : i32
    %c0_i32_0 = arith.constant 0 : i32
    %c0_i32_1 = arith.constant 0 : i32
    return %c0_i32, %c0_i32_0 : i32, i32
  }
  func.func @transform_19(%arg0: i32) -> (i32, i32) {
    %c0_i32 = arith.constant 0 : i32
    %c0_i32_0 = arith.constant 0 : i32
    %c0_i32_1 = arith.constant 0 : i32
    return %c0_i32, %c0_i32_0 : i32, i32
  }
  func.func @transform_20(%arg0: i32) -> (i32, i32, i32) {
    %c0_i32 = arith.constant 0 : i32
    %c0_i32_0 = arith.constant 0 : i32
    %c0_i32_1 = arith.constant 0 : i32
    %c0_i32_2 = arith.constant 0 : i32
    return %c0_i32, %c0_i32_0, %c0_i32_1 : i32, i32, i32
  }
  func.func @transform_21(%arg0: i32) -> (i32, i32) {
    %c0_i32 = arith.constant 0 : i32
    %c0_i32_0 = arith.constant 0 : i32
    %c0_i32_1 = arith.constant 0 : i32
    return %c0_i32, %c0_i32_0 : i32, i32
  }
  func.func @transform_22(%arg0: i32) -> (i32, i32) {
    %c0_i32 = arith.constant 0 : i32
    %c0_i32_0 = arith.constant 0 : i32
    %c0_i32_1 = arith.constant 0 : i32
    return %c0_i32, %c0_i32_0 : i32, i32
  }
  func.func @transform_23(%arg0: i32) -> (i32, i32) {
    %c0_i32 = arith.constant 0 : i32
    %c0_i32_0 = arith.constant 0 : i32
    %c0_i32_1 = arith.constant 0 : i32
    return %c0_i32, %c0_i32_0 : i32, i32
  }
  func.func @transform_24(%arg0: i32) -> (i32, i32) {
    %c0_i32 = arith.constant 0 : i32
    %c0_i32_0 = arith.constant 0 : i32
    %c0_i32_1 = arith.constant 0 : i32
    return %c0_i32, %c0_i32_0 : i32, i32
  }
  func.func @transform_25(%arg0: i32) -> (i32, i32) {
    %c0_i32 = arith.constant 0 : i32
    %c0_i32_0 = arith.constant 0 : i32
    %c0_i32_1 = arith.constant 0 : i32
    return %c0_i32, %c0_i32_0 : i32, i32
  }
  func.func @transform_26(%arg0: i32) -> (i32, i32) {
    %c0_i32 = arith.constant 0 : i32
    %c0_i32_0 = arith.constant 0 : i32
    %c0_i32_1 = arith.constant 0 : i32
    return %c0_i32, %c0_i32_0 : i32, i32
  }
  func.func @transform_27(%arg0: i32) -> (i32, i32) {
    %c0_i32 = arith.constant 0 : i32
    %c0_i32_0 = arith.constant 0 : i32
    %c0_i32_1 = arith.constant 0 : i32
    return %c0_i32, %c0_i32_0 : i32, i32
  }
  func.func @transform_28(%arg0: i32) -> (i32, i32) {
    %c0_i32 = arith.constant 0 : i32
    %c0_i32_0 = arith.constant 0 : i32
    %c0_i32_1 = arith.constant 0 : i32
    return %c0_i32, %c0_i32_0 : i32, i32
  }
  func.func @transform_29(%arg0: i32) -> (i32, i32) {
    %c0_i32 = arith.constant 0 : i32
    %c0_i32_0 = arith.constant 0 : i32
    %c0_i32_1 = arith.constant 0 : i32
    return %c0_i32, %c0_i32_0 : i32, i32
  }
  func.func @transform_30(%arg0: i32) -> (i32, i32) {
    %c0_i32 = arith.constant 0 : i32
    %c0_i32_0 = arith.constant 0 : i32
    %c0_i32_1 = arith.constant 0 : i32
    return %c0_i32, %c0_i32_0 : i32, i32
  }
  func.func @transform_31(%arg0: i32) -> (i32, i32) {
    %c0_i32 = arith.constant 0 : i32
    %c0_i32_0 = arith.constant 0 : i32
    %c0_i32_1 = arith.constant 0 : i32
    return %c0_i32, %c0_i32_0 : i32, i32
  }
  func.func @transform_32(%arg0: i32) -> (i32, i32) {
    %c0_i32 = arith.constant 0 : i32
    %c0_i32_0 = arith.constant 0 : i32
    %c0_i32_1 = arith.constant 0 : i32
    return %c0_i32, %c0_i32_0 : i32, i32
  }
  func.func @transform_33(%arg0: i32) -> (i32, i32) {
    %c0_i32 = arith.constant 0 : i32
    %c0_i32_0 = arith.constant 0 : i32
    %c0_i32_1 = arith.constant 0 : i32
    return %c0_i32, %c0_i32_0 : i32, i32
  }
  func.func @transform_34(%arg0: i32) -> (i32, i32) {
    %c0_i32 = arith.constant 0 : i32
    %c0_i32_0 = arith.constant 0 : i32
    %c0_i32_1 = arith.constant 0 : i32
    return %c0_i32, %c0_i32_0 : i32, i32
  }
  func.func @transform_35(%arg0: i32) -> (i32, i32) {
    %c0_i32 = arith.constant 0 : i32
    %c0_i32_0 = arith.constant 0 : i32
    %c0_i32_1 = arith.constant 0 : i32
    return %c0_i32, %c0_i32_0 : i32, i32
  }
  func.func @transform_36(%arg0: i32) -> (i32, i32) {
    %c0_i32 = arith.constant 0 : i32
    %c0_i32_0 = arith.constant 0 : i32
    %c0_i32_1 = arith.constant 0 : i32
    return %c0_i32, %c0_i32_0 : i32, i32
  }
  func.func @transform_37(%arg0: i32) -> (i32, i32) {
    %c0_i32 = arith.constant 0 : i32
    %c0_i32_0 = arith.constant 0 : i32
    %c0_i32_1 = arith.constant 0 : i32
    return %c0_i32, %c0_i32_0 : i32, i32
  }
  func.func @transform_38(%arg0: i32) -> (i32, i32) {
    %c0_i32 = arith.constant 0 : i32
    %c0_i32_0 = arith.constant 0 : i32
    %c0_i32_1 = arith.constant 0 : i32
    return %c0_i32, %c0_i32_0 : i32, i32
  }
  func.func @transform_39(%arg0: i32) -> (i32, i32) {
    %c0_i32 = arith.constant 0 : i32
    %c0_i32_0 = arith.constant 0 : i32
    %c0_i32_1 = arith.constant 0 : i32
    return %c0_i32, %c0_i32_0 : i32, i32
  }
  func.func @transform_40(%arg0: i32) -> (i32, i32) {
    %c0_i32 = arith.constant 0 : i32
    %c0_i32_0 = arith.constant 0 : i32
    %c0_i32_1 = arith.constant 0 : i32
    return %c0_i32, %c0_i32_0 : i32, i32
  }
  func.func @transform_41(%arg0: i32) -> (i32, i32) {
    %c0_i32 = arith.constant 0 : i32
    %c0_i32_0 = arith.constant 0 : i32
    %c0_i32_1 = arith.constant 0 : i32
    return %c0_i32, %c0_i32_0 : i32, i32
  }
  func.func @transform_42(%arg0: i32) -> (i32, i32) {
    %c0_i32 = arith.constant 0 : i32
    %c0_i32_0 = arith.constant 0 : i32
    %c0_i32_1 = arith.constant 0 : i32
    return %c0_i32, %c0_i32_0 : i32, i32
  }
  func.func @transform_43(%arg0: i32) -> (i32, i32) {
    %c0_i32 = arith.constant 0 : i32
    %c0_i32_0 = arith.constant 0 : i32
    %c0_i32_1 = arith.constant 0 : i32
    return %c0_i32, %c0_i32_0 : i32, i32
  }
  func.func @transform_44(%arg0: i32) -> (i32, i32) {
    %c0_i32 = arith.constant 0 : i32
    %c0_i32_0 = arith.constant 0 : i32
    %c0_i32_1 = arith.constant 0 : i32
    return %c0_i32, %c0_i32_0 : i32, i32
  }
  func.func @transform_45(%arg0: i32) -> (i32, i32) {
    %c0_i32 = arith.constant 0 : i32
    %c0_i32_0 = arith.constant 0 : i32
    %c0_i32_1 = arith.constant 0 : i32
    return %c0_i32, %c0_i32_0 : i32, i32
  }
  func.func @transform_46(%arg0: i32) -> (i32, i32) {
    %c0_i32 = arith.constant 0 : i32
    %c0_i32_0 = arith.constant 0 : i32
    %c0_i32_1 = arith.constant 0 : i32
    return %c0_i32, %c0_i32_0 : i32, i32
  }
  func.func @transform_47(%arg0: i32) -> (i32, i32) {
    %c0_i32 = arith.constant 0 : i32
    %c0_i32_0 = arith.constant 0 : i32
    %c0_i32_1 = arith.constant 0 : i32
    return %c0_i32, %c0_i32_0 : i32, i32
  }
  func.func @transform_48(%arg0: i32) -> (i32, i32) {
    %c0_i32 = arith.constant 0 : i32
    %c0_i32_0 = arith.constant 0 : i32
    %c0_i32_1 = arith.constant 0 : i32
    return %c0_i32, %c0_i32_0 : i32, i32
  }
  func.func @transform_49(%arg0: i32) -> (i32, i32) {
    %c0_i32 = arith.constant 0 : i32
    %c0_i32_0 = arith.constant 0 : i32
    %c0_i32_1 = arith.constant 0 : i32
    return %c0_i32, %c0_i32_0 : i32, i32
  }
  func.func @transform_50(%arg0: i32) -> (i32, i32) {
    %c0_i32 = arith.constant 0 : i32
    %c0_i32_0 = arith.constant 0 : i32
    %c0_i32_1 = arith.constant 0 : i32
    return %c0_i32, %c0_i32_0 : i32, i32
  }
  func.func @transform_51(%arg0: i32) -> (i32, i32) {
    %c0_i32 = arith.constant 0 : i32
    %c0_i32_0 = arith.constant 0 : i32
    %c0_i32_1 = arith.constant 0 : i32
    return %c0_i32, %c0_i32_0 : i32, i32
  }
  func.func @transform_52(%arg0: i32) -> (i32, i32) {
    %c0_i32 = arith.constant 0 : i32
    %c0_i32_0 = arith.constant 0 : i32
    %c0_i32_1 = arith.constant 0 : i32
    return %c0_i32, %c0_i32_0 : i32, i32
  }
  func.func @transform_53(%arg0: i32) -> (i32, i32) {
    %c0_i32 = arith.constant 0 : i32
    %c0_i32_0 = arith.constant 0 : i32
    %c0_i32_1 = arith.constant 0 : i32
    return %c0_i32, %c0_i32_0 : i32, i32
  }
  func.func @transform_54(%arg0: i32) -> (i32, i32) {
    %c0_i32 = arith.constant 0 : i32
    %c0_i32_0 = arith.constant 0 : i32
    %c0_i32_1 = arith.constant 0 : i32
    return %c0_i32, %c0_i32_0 : i32, i32
  }
  func.func @transform_55(%arg0: i32) -> (i32, i32) {
    %c0_i32 = arith.constant 0 : i32
    %c0_i32_0 = arith.constant 0 : i32
    %c0_i32_1 = arith.constant 0 : i32
    return %c0_i32, %c0_i32_0 : i32, i32
  }
  func.func @transform_56(%arg0: i32) -> (i32, i32) {
    %c0_i32 = arith.constant 0 : i32
    %c0_i32_0 = arith.constant 0 : i32
    %c0_i32_1 = arith.constant 0 : i32
    return %c0_i32, %c0_i32_0 : i32, i32
  }
  func.func @transform_57(%arg0: i32) -> (i32, i32) {
    %c0_i32 = arith.constant 0 : i32
    %c0_i32_0 = arith.constant 0 : i32
    %c0_i32_1 = arith.constant 0 : i32
    return %c0_i32, %c0_i32_0 : i32, i32
  }
  func.func @transform_58(%arg0: i32) -> (i32, i32) {
    %c0_i32 = arith.constant 0 : i32
    %c0_i32_0 = arith.constant 0 : i32
    %c0_i32_1 = arith.constant 0 : i32
    return %c0_i32, %c0_i32_0 : i32, i32
  }
  func.func @transform_59(%arg0: i32) -> (i32, i32) {
    %c0_i32 = arith.constant 0 : i32
    %c0_i32_0 = arith.constant 0 : i32
    %c0_i32_1 = arith.constant 0 : i32
    return %c0_i32, %c0_i32_0 : i32, i32
  }
  func.func @transform_60(%arg0: i32) -> (i32, i32) {
    %c0_i32 = arith.constant 0 : i32
    %c0_i32_0 = arith.constant 0 : i32
    %c0_i32_1 = arith.constant 0 : i32
    return %c0_i32, %c0_i32_0 : i32, i32
  }
  func.func @transform_61(%arg0: i32) -> (i32, i32) {
    %c0_i32 = arith.constant 0 : i32
    %c0_i32_0 = arith.constant 0 : i32
    %c0_i32_1 = arith.constant 0 : i32
    return %c0_i32, %c0_i32_0 : i32, i32
  }
  func.func @transform_62(%arg0: i32) -> (i32, i32) {
    %c0_i32 = arith.constant 0 : i32
    %c0_i32_0 = arith.constant 0 : i32
    %c0_i32_1 = arith.constant 0 : i32
    return %c0_i32, %c0_i32_0 : i32, i32
  }
  func.func @transform_63(%arg0: i32) -> (i32, i32) {
    %c0_i32 = arith.constant 0 : i32
    %c0_i32_0 = arith.constant 0 : i32
    %c0_i32_1 = arith.constant 0 : i32
    return %c0_i32, %c0_i32_0 : i32, i32
  }
  func.func @transform_64(%arg0: i32) -> (i32, i32) {
    %c0_i32 = arith.constant 0 : i32
    %c0_i32_0 = arith.constant 0 : i32
    %c0_i32_1 = arith.constant 0 : i32
    return %c0_i32, %c0_i32_0 : i32, i32
  }
  func.func @transform_65(%arg0: i32) -> (i32, i32) {
    %c0_i32 = arith.constant 0 : i32
    %c0_i32_0 = arith.constant 0 : i32
    %c0_i32_1 = arith.constant 0 : i32
    return %c0_i32, %c0_i32_0 : i32, i32
  }
  func.func @transform_66(%arg0: i32) -> (i32, i32) {
    %c0_i32 = arith.constant 0 : i32
    %c0_i32_0 = arith.constant 0 : i32
    %c0_i32_1 = arith.constant 0 : i32
    return %c0_i32, %c0_i32_0 : i32, i32
  }
  func.func @transform_67(%arg0: i32) -> (i32, i32, i32) {
    %c0_i32 = arith.constant 0 : i32
    %c0_i32_0 = arith.constant 0 : i32
    %c0_i32_1 = arith.constant 0 : i32
    %c0_i32_2 = arith.constant 0 : i32
    return %c0_i32, %c0_i32_0, %c0_i32_1 : i32, i32, i32
  }
  func.func @transform_68(%arg0: i32) -> (i32, i32, i32) {
    %c0_i32 = arith.constant 0 : i32
    %c0_i32_0 = arith.constant 0 : i32
    %c0_i32_1 = arith.constant 0 : i32
    return %arg0, %c0_i32, %c0_i32_0 : i32, i32, i32
  }
}

</mosaic_0001>

<bundles_post_ra>
// kernel: forward.1
= control target key start
LH: loop header
LB: loop body
LE: loop exit
PB: predicated region body
PF: predicated region fallthrough
CT: control target
= control target key end

     0   :  { %s8906_s6 = smov 1   ;;  %s8907_s10 = smov 2   ;;  %s10810_s0 = inlined_call_operand.smem [shape: u32[69], index: -1, kind: input, shape index: {}] }
   0x1   :  { %s9012_s5 = sld [smem:[%s10810_s0]]   ;;  %s8908_s14 = smov 3  }
   0x2   :  { %s9017_s9 = sld [smem:[%s10810_s0 + %s8906_s6]]   ;;  %s8909_s18 = smov 4  }
   0x3   :  { %s9022_s13 = sld [smem:[%s10810_s0 + %s8907_s10]]   ;;  %s8910_s22 = smov 5  }
   0x4   :  { %s9027_s17 = sld [smem:[%s10810_s0 + %s8908_s14]]   ;;  %s8911_s26 = smov 6  }
   0x5   :  { %s9032_s21 = sld [smem:[%s10810_s0 + %s8909_s18]]   ;;  %s8912_s30 = smov 7  }
   0x6   :  { %s9037_s25 = sld [smem:[%s10810_s0 + %s8910_s22]]   ;;  %s8913_s4 = smov 8  }
   0x7   :  { %10873 = sst [smem:[#allocation46_spill]] %s9012_s5  ;;  %s8914_s10 = smov 9  }
   0x8   :  { %10874 = sst [smem:[#allocation47_spill]] %s9017_s9  ;;  %s8915_s15 = smov 10  }
   0x9   :  { %10875 = sst [smem:[#allocation48_spill]] %s9022_s13  ;;  %s8916_s20 = smov 11  }
   0xa   :  { %10876 = sst [smem:[#allocation49_spill]] %s9027_s17  ;;  %s8918_s1 = smov 13  }
   0xb   :  { %10877 = sst [smem:[#allocation50_spill]] %s9032_s21  ;;  %s8919_s7 = smov 14  }
   0xc   :  { %s9042_s29 = sld [smem:[%s10810_s0 + %s8911_s26]]   ;;  %s8917_s26 = smov 12   ;;  %v142_v0 = vstv %s9037_s25 }
   0xd   :  { %s9047_s3 = sld [smem:[%s10810_s0 + %s8912_s30]]   ;;  %s8921_s22 = smov 16   ;;  %143 = vst [vmem:[#allocation3] sm:$0x1] %v142_v0 }
   0xe   :  { %s9052_s8 = sld [smem:[%s10810_s0 + %s8913_s4]]   ;;  %s8922_s28 = smov 17  }
   0xf   :  { %s9057_s14 = sld [smem:[%s10810_s0 + %s8914_s10]]   ;;  %s8939_s21 = smov 34  }
  0x10   :  { %s9062_s19 = sld [smem:[%s10810_s0 + %s8915_s15]]   ;;  %s8920_s15 = smov 15  }
  0x11   :  { %s9067_s24 = sld [smem:[%s10810_s0 + %s8916_s20]]   ;;  %s8944_s25 = smov 39  }
  0x12   :  { %10878 = sst [smem:[#allocation51_spill]] %s9042_s29 }
  0x13   :  { %10879 = sst [smem:[#allocation52_spill]] %s9047_s3  ;;  %s8938_s3 = smov 33  }
  0x14   :  { %10880 = sst [smem:[#allocation53_spill]] %s9052_s8 }
  0x15   :  { %10881 = sst [smem:[#allocation54_spill]] %s9057_s14 }
  0x16   :  { %10882 = sst [smem:[#allocation55_spill]] %s9062_s19 }
  0x17   :  { %10883 = sst [smem:[#allocation56_spill]] %s9067_s24 }
  0x18   :  { %s9072_s30 = sld [smem:[%s10810_s0 + %s8917_s26]]  }
  0x19   :  { %s9077_s6 = sld [smem:[%s10810_s0 + %s8918_s1]]  }
  0x1a   :  { %s9082_s12 = sld [smem:[%s10810_s0 + %s8919_s7]]   ;;  %s8923_s7 = smov 18  }
  0x1b   :  { %s9087_s20 = sld [smem:[%s10810_s0 + %s8920_s15]]   ;;  %s8924_s15 = smov 19  }
  0x1c   :  { %s9092_s27 = sld [smem:[%s10810_s0 + %s8921_s22]]   ;;  %s8925_s22 = smov 20  }
  0x1d   :  { %s9097_s4 = sld [smem:[%s10810_s0 + %s8922_s28]]   ;;  %s8926_s28 = smov 21  }
  0x1e   :  { %10884 = sst [smem:[#allocation57_spill]] %s9072_s30 }
  0x1f   :  { %10885 = sst [smem:[#allocation58_spill]] %s9077_s6 }
  0x20   :  { %10886 = sst [smem:[#allocation59_spill]] %s9082_s12 }
  0x21   :  { %10887 = sst [smem:[#allocation60_spill]] %s9087_s20 }
  0x22   :  { %10888 = sst [smem:[#allocation61_spill]] %s9092_s27  ;;  %s8940_s27 = smov 35  }
  0x23   :  { %10889 = sst [smem:[#allocation62_spill]] %s9097_s4 }
  0x24   :  { %s9102_s14 = sld [smem:[%s10810_s0 + %s8923_s7]]   ;;  %s8927_s7 = smov 22  }
  0x25   :  { %s9107_s30 = sld [smem:[%s10810_s0 + %s8924_s15]]   ;;  %s8928_s15 = smov 23  }
  0x26   :  { %s9112_s6 = sld [smem:[%s10810_s0 + %s8925_s22]]   ;;  %s8929_s22 = smov 24  }
  0x27   :  { %s9117_s4 = sld [smem:[%s10810_s0 + %s8926_s28]]   ;;  %s8930_s28 = smov 25  }
  0x28   :  { %s9122_s20 = sld [smem:[%s10810_s0 + %s8927_s7]]   ;;  %s8931_s7 = smov 26  }
  0x29   :  { %s9127_s8 = sld [smem:[%s10810_s0 + %s8928_s15]]   ;;  %s8932_s15 = smov 27  }
  0x2a   :  { %10890 = sst [smem:[#allocation63_spill]] %s9102_s14 }
  0x2b   :  { %10891 = sst [smem:[#allocation64_spill]] %s9107_s30 }
  0x2c   :  { %10892 = sst [smem:[#allocation65_spill]] %s9112_s6 }
  0x2d   :  { %10893 = sst [smem:[#allocation66_spill]] %s9117_s4 }
  0x2e   :  { %10894 = sst [smem:[#allocation67_spill]] %s9122_s20 }
  0x2f   :  { %10895 = sst [smem:[#allocation68_spill]] %s9127_s8 }
  0x30   :  { %s9132_s19 = sld [smem:[%s10810_s0 + %s8929_s22]]   ;;  %s8933_s22 = smov 28  }
  0x31   :  { %s9137_s24 = sld [smem:[%s10810_s0 + %s8930_s28]]   ;;  %s8934_s28 = smov 29  }
  0x32   :  { %s9142_s12 = sld [smem:[%s10810_s0 + %s8931_s7]]   ;;  %s8935_s7 = smov 30  }
  0x33   :  { %s9147_s29 = sld [smem:[%s10810_s0 + %s8932_s15]]   ;;  %s8936_s15 = smov 31  }
  0x34   :  { %s9152_s1 = sld [smem:[%s10810_s0 + %s8933_s22]]   ;;  %s8937_s22 = smov 32  }
  0x35   :  { %s9157_s10 = sld [smem:[%s10810_s0 + %s8934_s28]]  }
  0x36   :  { %10896 = sst [smem:[#allocation69_spill]] %s9132_s19 }
  0x37   :  { %10897 = sst [smem:[#allocation70_spill]] %s9137_s24 }
  0x38   :  { %10898 = sst [smem:[#allocation71_spill]] %s9142_s12 }
  0x39   :  { %10899 = sst [smem:[#allocation72_spill]] %s9147_s29 }
  0x3a   :  { %10900 = sst [smem:[#allocation73_spill]] %s9152_s1  ;;  %s8941_s1 = smov 36  }
  0x3b   :  { %10901 = sst [smem:[#allocation74_spill]] %s9157_s10 }
  0x3c   :  { %s9162_s16 = sld [smem:[%s10810_s0 + %s8935_s7]]   ;;  %s8943_s7 = smov 38  }
  0x3d   :  { %s9167_s23 = sld [smem:[%s10810_s0 + %s8936_s15]]  }
  0x3e   :  { %s9172_s29 = sld [smem:[%s10810_s0 + %s8937_s22]]  }
  0x3f   :  { %s9177_s20 = sld [smem:[%s10810_s0 + %s8938_s3]]   ;;  %s8942_s3 = smov 37  }
  0x40   :  { %s9193_s28 = sld [smem:[%s10810_s0 + %s8941_s1]]   ;;  %s8945_s1 = smov 40  }
  0x41   :  { %s9208_s22 = sld [smem:[%s10810_s0 + %s8944_s25]]   ;;  %s8948_s25 = smov 43  }
  0x42   :  { %10902 = sst [smem:[#allocation75_spill]] %s9162_s16 }
  0x43   :  { %10903 = sst [smem:[#allocation76_spill]] %s9167_s23 }
  0x44   :  { %10904 = sst [smem:[#allocation77_spill]] %s9172_s29  ;;  %s8949_s29 = smov 44  }
  0x45   :  { %10905 = sst [smem:[#allocation78_spill]] %s9177_s20  ;;  %s8946_s20 = smov 41  }
  0x46   :  { %s9182_s16 = sld [smem:[%s10810_s0 + %s8939_s21]]  }
  0x47   :  { %s9187_s23 = sld [smem:[%s10810_s0 + %s8940_s27]]  }
  0x48   :  { %s9198_s21 = sld [smem:[%s10810_s0 + %s8942_s3]]  }
  0x49   :  { %s9203_s27 = sld [smem:[%s10810_s0 + %s8943_s7]]  }
  0x4a   :  { %10908 = sst [smem:[#allocation81_spill]] %s9208_s22 }
  0x4b   :  { %s9213_s17 = sld [smem:[%s10810_s0 + %s8945_s1]]  }
  0x4c   :  { %10906 = sst [smem:[#allocation79_spill]] %s9182_s16  ;;  %s8947_s16 = smov 42  }
  0x4d   :  { %s9218_s10 = sld [smem:[%s10810_s0 + %s8946_s20]]   ;;  %s8950_s20 = smov 45  }
  0x4e   :  { %s9228_s22 = sld [smem:[%s10810_s0 + %s8948_s25]]   ;;  %s8952_s25 = smov 47  }
  0x4f   :  { %10907 = sst [smem:[#allocation80_spill]] %s9203_s27 }
  0x50   :  { %s9223_s27 = sld [smem:[%s10810_s0 + %s8947_s16]]   ;;  %s8951_s16 = smov 46  }
  0x51   :  { %10909 = sst [smem:[#allocation82_spill]] %s9213_s17 }
  0x52   :  { %s9233_s17 = sld [smem:[%s10810_s0 + %s8949_s29]]   ;;  %s8953_s29 = smov 48  }
  0x53   :  { %10910 = sst [smem:[#allocation83_spill]] %s9218_s10 }
  0x54   :  { %10911 = sst [smem:[#allocation84_spill]] %s9228_s22 }
  0x55   :  { %s9238_s6 = sld [smem:[%s10810_s0 + %s8950_s20]]   ;;  %s8954_s20 = smov 49  }
  0x56   :  { %s9243_s24 = sld [smem:[%s10810_s0 + %s8951_s16]]   ;;  %s8955_s16 = smov 50  }
  0x57   :  { %s9248_s22 = sld [smem:[%s10810_s0 + %s8952_s25]]   ;;  %s8956_s25 = smov 51  }
  0x58   :  { %10912 = sst [smem:[#allocation85_spill]] %s9233_s17 }
  0x59   :  { %s9253_s17 = sld [smem:[%s10810_s0 + %s8953_s29]]   ;;  %s8957_s29 = smov 52  }
  0x5a   :  { %s9258_s9 = sld [smem:[%s10810_s0 + %s8954_s20]]   ;;  %s8958_s20 = smov 53  }
  0x5b   :  { %10913 = sst [smem:[#allocation86_spill]] %s9238_s6 }
  0x5c   :  { %s9263_s13 = sld [smem:[%s10810_s0 + %s8955_s16]]   ;;  %s8959_s16 = smov 54  }
  0x5d   :  { %s9268_s4 = sld [smem:[%s10810_s0 + %s8956_s25]]   ;;  %s8960_s25 = smov 55  }
  0x5e   :  { %s9273_s8 = sld [smem:[%s10810_s0 + %s8957_s29]]   ;;  %s8961_s29 = smov 56  }
  0x5f   :  { %s9278_s14 = sld [smem:[%s10810_s0 + %s8958_s20]]   ;;  %s8962_s20 = smov 57  }
  0x60   :  { %10914 = sst [smem:[#allocation87_spill]] %s9258_s9 }
  0x61   :  { %s9288_s19 = sld [smem:[%s10810_s0 + %s8960_s25]]   ;;  %s8964_s25 = smov 59  }
  0x62   :  { %10915 = sst [smem:[#allocation88_spill]] %s9263_s13 }
  0x63   :  { %10916 = sst [smem:[#allocation89_spill]] %s9268_s4 }
  0x64   :  { %10917 = sst [smem:[#allocation90_spill]] %s9273_s8 }
  0x65   :  { %10918 = sst [smem:[#allocation91_spill]] %s9278_s14 }
  0x66   :  { %s9283_s13 = sld [smem:[%s10810_s0 + %s8959_s16]]   ;;  %s8963_s16 = smov 58  }
  0x67   :  { %10919 = sst [smem:[#allocation92_spill]] %s9288_s19 }
  0x68   :  { %s9293_s12 = sld [smem:[%s10810_s0 + %s8961_s29]]   ;;  %s8965_s29 = smov 60  }
  0x69   :  { %s9298_s5 = sld [smem:[%s10810_s0 + %s8962_s20]]   ;;  %s8966_s20 = smov 61  }
  0x6a   :  { %s9303_s30 = sld [smem:[%s10810_s0 + %s8963_s16]]   ;;  %s8967_s16 = smov 62  }
  0x6b   :  { %s9308_s19 = sld [smem:[%s10810_s0 + %s8964_s25]]   ;;  %s8968_s25 = smov 63  }
  0x6c   :  { %s9313_s14 = sld [smem:[%s10810_s0 + %s8965_s29]]   ;;  %s8969_s29 = smov 64  }
  0x6f   :  { %10920 = sst [smem:[#allocation93_spill]] %s9298_s5 }
  0x70   :  { %10921 = sst [smem:[#allocation94_spill]] %s9303_s30 }
  0x71   :  { %10922 = sst [smem:[#allocation95_spill]] %s9308_s19 }
  0x72   :  { %10923 = sst [smem:[#allocation96_spill]] %s9313_s14 }
  0x73   :  { %s9318_s5 = sld [smem:[%s10810_s0 + %s8966_s20]]   ;;  %s8970_s20 = smov 65  }
  0x74   :  { %s9323_s30 = sld [smem:[%s10810_s0 + %s8967_s16]]   ;;  %s8971_s16 = smov 66  }
  0x75   :  { %s9328_s19 = sld [smem:[%s10810_s0 + %s8968_s25]]   ;;  %s8972_s25 = smov 67  }
  0x76   :  { %s9333_s14 = sld [smem:[%s10810_s0 + %s8969_s29]]   ;;  %s8973_s29 = smov 68  }
  0x77   :  { %s9338_s4 = sld [smem:[%s10810_s0 + %s8970_s20]]  }
  0x79   :  { %10924 = sst [smem:[#allocation97_spill]] %s9318_s5 }
  0x7a   :  { %10925 = sst [smem:[#allocation98_spill]] %s9323_s30 }
  0x7b   :  { %10926 = sst [smem:[#allocation99_spill]] %s9328_s19 }
  0x7c   :  { %10927 = sst [smem:[#allocation100_spill]] %s9333_s14 }
  0x7d   :  { %s9343_s30 = sld [smem:[%s10810_s0 + %s8971_s16]]  }
  0x7e   :  { %s9348_s19 = sld [smem:[%s10810_s0 + %s8972_s25]]  }
  0x7f   :  { %s9353_s14 = sld [smem:[%s10810_s0 + %s8973_s29]]  }
  0x85   :  { %10928 = sst [smem:[#allocation101_spill]] %s9353_s14 }
  0x86   :  { %144 = vsyncpa [#allocation5], 0 }
  0x87   :  { %145 = vsyncpa [#allocation7], 0 }
  0x88   :  { %146 = vsyncpa [#allocation10], 0 }
  0x89   :  { %147 = vsyncpa [#allocation13], 0 }
  0x8a   :  { %148 = vsyncpa [#allocation16], 0 }
  0x8b   :  { %149 = vsyncpa [#allocation19], 0 }
  0x8c   :  { %150 = vsyncpa [#allocation22], 0 }
  0x8d   :  { %151 = vsyncpa [#allocation25], 0 }
  0x8e   :  { %152 = vsyncpa [#allocation28], 0 }
  0x8f   :  { %153 = vsyncpa [#allocation31], 0 }
  0x90   :  { %154 = vsyncpa [#allocation34], 0  ;;  %s9355_s20 = smov 0  }
  0x91 LB: > { %s10929_s10 = sld [smem:[#allocation83_spill]]  ;;  %s1756_s0 = sshll.u32 %s9193_s28, 4  ;;  %s8904_s20 = sphi %s9355_s20, %s160_s20   ;;  %s9361_s0 = int_to_ptr.hbm [resolvable:$true] %s1756_s0 }
  0x92   : > { %s10930_s9 = sld [smem:[#allocation87_spill]]  ;;  %s9364_s3 = sadd.s32 4294967295, %s8904_s20  }
  0x93   : > { %s10931_s8 = sld [smem:[#allocation90_spill]]  ;;  %p7322_p0 = scmp.ge.s32.totalorder %s8904_s20, 1 }
  0x94   : > { %s10932_s6 = sld [smem:[#allocation86_spill]]  ;;  %p1639_p1 = scmp.lt.s32.totalorder %s8904_s20, 3 }
  0x95   : > { %s10933_s5 = sld [smem:[#allocation97_spill]]  ;;  %p7948_p2 = scmp.eq.s32.totalorder %s9364_s3, 0 }
  0x96   : > { %10934 = sst [smem:[#allocation102_spill]] %s8904_s20  ;;  %p9369_p3 = pnand %p7322_p0, %p1639_p1 }
  0x97   : > { %s8974_s16 = smov [#allocation6]   ;;  %s1789_s11 = sshll.u32 %s10929_s10, 4  ;;  %s9376_s11 = int_to_ptr.hbm [resolvable:$true] %s1789_s11 }
  0x98   : > { %s1758_s7 = sshll.u32 %s8974_s16, 4  ;;  %p7887_p4 = pneg %p9369_p3  ;;  %s1759_s7 = int_to_ptr.vmem [resolvable:$true] %s1758_s7 }
  0x99   : > { %s8975_s18 = smov [#allocation9]   ;;  %s8254_s1 = sshra.s32 %s9361_s0, 4  ;;  %s8255_s1 = int_to_ptr.hbm [resolvable:$true] %s8254_s1 }
  0x9a   : > { %s1819_s25 = sshll.u32 %s10932_s6, 4  ;;  %p9381_p5 = pnand %p7948_p2, %p7887_p4  ;;  %s9388_s25 = int_to_ptr.hbm [resolvable:$true] %s1819_s25 }
  0x9b   : > { %s9385_s29 = sshll.u32 %s8975_s18, 4  ;;  %s8256_s26 = scalar_lea.hbm %s8255_s1, 1  ;;  %s1792_s29 = int_to_ptr.vmem [resolvable:$true] %s9385_s29 }
  0x9c   : > { %p8257_p6 = scmp.ne.s32.totalorder %s8255_s1, %s8256_s26  ;;  %p9393_p7 = pneg %p9381_p5 }
  0x9d   : > { %s8261_s20 = scalar_lea.hbm %s9193_s28, 1  ;;  %p8262_p10 = scmp.lt.s32.totalorder %s8255_s1, %s9193_s28 }
  0x9e   : > { %p8259_p8 = pnand %p9393_p7, %p8257_p6  ;;  %p8263_p11 = scmp.lt.s32.totalorder %s8261_s20, %s8256_s26 }
  0xa0   : > { %p8260_p9 = pneg %p8259_p8  ;;  %p8264_p12 = por %p8263_p11, %p8262_p10 }
  0xa2   : > { %p8265_p13 = pnand %p8264_p12, %p8260_p9 }
  0xa4   : > { %8268 = shalt.err (!%p8265_p13)
}
  0xa5   : > { %7893 = dma.hbm_to_vmem [thread:$0]  (!%p9381_p5), %s9361_s0, 16, %s1759_s7, [#allocation7]  }
  0xa6   : > { %s8284_s18 = sshra.s32 %s9376_s11, 4  ;;  %s8291_s1 = scalar_lea.hbm %s10929_s10, 1  ;;  %s8285_s18 = int_to_ptr.hbm [resolvable:$true] %s8284_s18 }
  0xa7   : > { %s8286_s14 = scalar_lea.hbm %s8285_s18, 1  ;;  %p8292_p6 = scmp.lt.s32.totalorder %s8285_s18, %s10929_s10 }
  0xa8   : > { %p8287_p0 = scmp.ne.s32.totalorder %s8285_s18, %s8286_s14  ;;  %p8293_p8 = scmp.lt.s32.totalorder %s8291_s1, %s8286_s14 }
  0xaa   : > { %p8289_p1 = pnand %p8287_p0, %p9393_p7  ;;  %p8294_p9 = por %p8293_p8, %p8292_p6 }
  0xac   : > { %p8290_p4 = pneg %p8289_p1 }
  0xae   : > { %p8295_p10 = pnand %p8294_p9, %p8290_p4 }
  0xb0   : > { %8298 = shalt.err (!%p8295_p10)
}
  0xb1   : > { %7899 = dma.hbm_to_vmem [thread:$0]  (!%p9381_p5), %s9376_s11, 16, %s1792_s29, [#allocation10]  }
  0xb2   : > { %s8976_s20 = smov [#allocation12]   ;;  %s1843_s7 = sshll.u32 %s9248_s22, 4  ;;  %s9413_s7 = int_to_ptr.hbm [resolvable:$true] %s1843_s7 }
  0xb3   : > { %s1821_s0 = sshll.u32 %s8976_s20, 4  ;;  %s8314_s26 = sshra.s32 %s9388_s25, 4  ;;  %s1822_s0 = int_to_ptr.vmem [resolvable:$true] %s1821_s0  ;;  %s8315_s26 = int_to_ptr.hbm [resolvable:$true] %s8314_s26 }
  0xb4   : > { %s8316_s14 = scalar_lea.hbm %s8315_s26, 1  ;;  %s8321_s18 = scalar_lea.hbm %s10932_s6, 1 }
  0xb5   : > { %p8317_p11 = scmp.ne.s32.totalorder %s8315_s26, %s8316_s14  ;;  %p8322_p0 = scmp.lt.s32.totalorder %s8315_s26, %s10932_s6 }
  0xb6   : > { %p8323_p1 = scmp.lt.s32.totalorder %s8321_s18, %s8316_s14 }
  0xb7   : > { %p8319_p12 = pnand %p8317_p11, %p9393_p7 }
  0xb8   : > { %p8324_p4 = por %p8323_p1, %p8322_p0 }
  0xb9   : > { %p8320_p13 = pneg %p8319_p12 }
  0xbb   : > { %p8325_p6 = pnand %p8324_p4, %p8320_p13 }
  0xbd   : > { %8328 = shalt.err (!%p8325_p6)
}
  0xbe   : > { %7905 = dma.hbm_to_vmem [thread:$0]  (!%p9381_p5), %s9388_s25, 16, %s1822_s0, [#allocation13]  }
  0xbf   : > { %s1867_s11 = sshll.u32 %s10930_s9, 4  ;;  %s8977_s29 = smov [#allocation15]   ;;  %s9424_s11 = int_to_ptr.hbm [resolvable:$true] %s1867_s11 }
  0xc0   : > { %s1845_s1 = sshll.u32 %s8977_s29, 4  ;;  %s8344_s20 = sshra.s32 %s9413_s7, 4  ;;  %s1846_s1 = int_to_ptr.vmem [resolvable:$true] %s1845_s1  ;;  %s8345_s20 = int_to_ptr.hbm [resolvable:$true] %s8344_s20 }
  0xc1   : > { %s8346_s26 = scalar_lea.hbm %s8345_s20, 1  ;;  %s8351_s14 = scalar_lea.hbm %s9248_s22, 1 }
  0xc2   : > { %p8347_p8 = scmp.ne.s32.totalorder %s8345_s20, %s8346_s26  ;;  %p8352_p11 = scmp.lt.s32.totalorder %s8345_s20, %s9248_s22 }
  0xc3   : > { %p8353_p12 = scmp.lt.s32.totalorder %s8351_s14, %s8346_s26 }
  0xc4   : > { %p8349_p9 = pnand %p8347_p8, %p9393_p7 }
  0xc5   : > { %p8354_p13 = por %p8353_p12, %p8352_p11 }
  0xc6   : > { %p8350_p10 = pneg %p8349_p9 }
  0xc8   : > { %p8355_p0 = pnand %p8354_p13, %p8350_p10 }
  0xca   : > { %8358 = shalt.err (!%p8355_p0)
}
  0xcb   : > { %7911 = dma.hbm_to_vmem [thread:$0]  (!%p9381_p5), %s9413_s7, 16, %s1846_s1, [#allocation16]  }
  0xcc   : > { %s8978_s25 = smov [#allocation18]   ;;  %s1894_s18 = sshll.u32 %s10931_s8, 4  ;;  %s9435_s18 = int_to_ptr.hbm [resolvable:$true] %s1894_s18 }
  0xcd   : > { %s1869_s0 = sshll.u32 %s8978_s25, 4  ;;  %s8374_s29 = sshra.s32 %s9424_s11, 4  ;;  %s1870_s0 = int_to_ptr.vmem [resolvable:$true] %s1869_s0  ;;  %s8375_s29 = int_to_ptr.hbm [resolvable:$true] %s8374_s29 }
  0xce   : > { %s8376_s20 = scalar_lea.hbm %s8375_s29, 1  ;;  %s8381_s26 = scalar_lea.hbm %s10930_s9, 1 }
  0xcf   : > { %p8377_p1 = scmp.ne.s32.totalorder %s8375_s29, %s8376_s20  ;;  %p8382_p8 = scmp.lt.s32.totalorder %s8375_s29, %s10930_s9 }
  0xd0   : > { %p8383_p9 = scmp.lt.s32.totalorder %s8381_s26, %s8376_s20 }
  0xd1   : > { %p8379_p4 = pnand %p8377_p1, %p9393_p7 }
  0xd2   : > { %p8384_p10 = por %p8383_p9, %p8382_p8 }
  0xd3   : > { %p8380_p6 = pneg %p8379_p4 }
  0xd5   : > { %p8385_p11 = pnand %p8384_p10, %p8380_p6 }
  0xd7   : > { %8388 = shalt.err (!%p8385_p11)
}
  0xd8   : > { %7917 = dma.hbm_to_vmem [thread:$0]  (!%p9381_p5), %s9424_s11, 16, %s1870_s0, [#allocation19]  }
  0xd9   : > { %s1918_s7 = sshll.u32 %s9283_s13, 4  ;;  %s8979_s1 = smov [#allocation21]   ;;  %s9446_s7 = int_to_ptr.hbm [resolvable:$true] %s1918_s7 }
  0xda   : > { %s1896_s14 = sshll.u32 %s8979_s1, 4  ;;  %s8404_s25 = sshra.s32 %s9435_s18, 4  ;;  %s1897_s14 = int_to_ptr.vmem [resolvable:$true] %s1896_s14  ;;  %s8405_s25 = int_to_ptr.hbm [resolvable:$true] %s8404_s25 }
  0xdb   : > { %s8406_s29 = scalar_lea.hbm %s8405_s25, 1  ;;  %s8411_s20 = scalar_lea.hbm %s10931_s8, 1 }
  0xdc   : > { %p8407_p12 = scmp.ne.s32.totalorder %s8405_s25, %s8406_s29  ;;  %p8412_p1 = scmp.lt.s32.totalorder %s8405_s25, %s10931_s8 }
  0xdd   : > { %p8413_p4 = scmp.lt.s32.totalorder %s8411_s20, %s8406_s29 }
  0xde   : > { %p8409_p13 = pnand %p8407_p12, %p9393_p7 }
  0xdf   : > { %p8414_p6 = por %p8413_p4, %p8412_p1 }
  0xe0   : > { %p8410_p0 = pneg %p8409_p13 }
  0xe2   : > { %p8415_p8 = pnand %p8414_p6, %p8410_p0 }
  0xe4   : > { %8418 = shalt.err (!%p8415_p8)
}
  0xe5   : > { %7923 = dma.hbm_to_vmem [thread:$0]  (!%p9381_p5), %s9435_s18, 16, %s1897_s14, [#allocation22]  }
  0xe6   : > { %s8980_s11 = smov [#allocation24]   ;;  %s1942_s26 = sshll.u32 %s9293_s12, 4  ;;  %s9457_s26 = int_to_ptr.hbm [resolvable:$true] %s1942_s26 }
  0xe7   : > { %s1920_s0 = sshll.u32 %s8980_s11, 4  ;;  %s8434_s1 = sshra.s32 %s9446_s7, 4  ;;  %s1921_s0 = int_to_ptr.vmem [resolvable:$true] %s1920_s0  ;;  %s8435_s1 = int_to_ptr.hbm [resolvable:$true] %s8434_s1 }
  0xe8   : > { %s8436_s25 = scalar_lea.hbm %s8435_s1, 1  ;;  %s8441_s29 = scalar_lea.hbm %s9283_s13, 1 }
  0xe9   : > { %p8437_p9 = scmp.ne.s32.totalorder %s8435_s1, %s8436_s25  ;;  %p8442_p12 = scmp.lt.s32.totalorder %s8435_s1, %s9283_s13 }
  0xea   : > { %p8443_p13 = scmp.lt.s32.totalorder %s8441_s29, %s8436_s25 }
  0xeb   : > { %p8439_p10 = pnand %p8437_p9, %p9393_p7 }
  0xec   : > { %p8444_p0 = por %p8443_p13, %p8442_p12 }
  0xed   : > { %p8440_p11 = pneg %p8439_p10 }
  0xef   : > { %p8445_p1 = pnand %p8444_p0, %p8440_p11 }
  0xf1   : > { %8448 = shalt.err (!%p8445_p1)
}
  0xf2   : > { %7929 = dma.hbm_to_vmem [thread:$0]  (!%p9381_p5), %s9446_s7, 16, %s1921_s0, [#allocation25]  }
  0xf3   : > { %s1975_s18 = sshll.u32 %s10933_s5, 4  ;;  %s8981_s14 = smov [#allocation27]   ;;  %s9468_s18 = int_to_ptr.hbm [resolvable:$true] %s1975_s18 }
  0xf4   : > { %s1944_s20 = sshll.u32 %s8981_s14, 4  ;;  %s8464_s11 = sshra.s32 %s9457_s26, 4  ;;  %s1945_s20 = int_to_ptr.vmem [resolvable:$true] %s1944_s20  ;;  %s8465_s11 = int_to_ptr.hbm [resolvable:$true] %s8464_s11 }
  0xf5   : > { %s8466_s1 = scalar_lea.hbm %s8465_s11, 1  ;;  %s8471_s25 = scalar_lea.hbm %s9293_s12, 1 }
  0xf6   : > { %p8467_p4 = scmp.ne.s32.totalorder %s8465_s11, %s8466_s1  ;;  %p8472_p9 = scmp.lt.s32.totalorder %s8465_s11, %s9293_s12 }
  0xf7   : > { %p8473_p10 = scmp.lt.s32.totalorder %s8471_s25, %s8466_s1 }
  0xf8   : > { %p8469_p6 = pnand %p8467_p4, %p9393_p7 }
  0xf9   : > { %p8474_p11 = por %p8473_p10, %p8472_p9 }
  0xfa   : > { %p8470_p8 = pneg %p8469_p6 }
  0xfc   : > { %p8475_p12 = pnand %p8474_p11, %p8470_p8 }
  0xfe   : > { %8478 = shalt.err (!%p8475_p12)
}
  0xff   : > { %7935 = dma.hbm_to_vmem [thread:$0]  (!%p9381_p5), %s9457_s26, 16, %s1945_s20, [#allocation28]  }
 0x100   : > { %s8982_s7 = smov [#allocation30]   ;;  %s1744_s29 = sshll.u32 %s9187_s23, 4  ;;  %s9479_s29 = int_to_ptr.hbm [resolvable:$true] %s1744_s29 }
 0x101   : > { %s1977_s0 = sshll.u32 %s8982_s7, 4  ;;  %s8494_s14 = sshra.s32 %s9468_s18, 4  ;;  %s1978_s0 = int_to_ptr.vmem [resolvable:$true] %s1977_s0  ;;  %s8495_s14 = int_to_ptr.hbm [resolvable:$true] %s8494_s14 }
 0x102   : > { %s8496_s11 = scalar_lea.hbm %s8495_s14, 1  ;;  %s8501_s1 = scalar_lea.hbm %s10933_s5, 1 }
 0x103   : > { %p8497_p13 = scmp.ne.s32.totalorder %s8495_s14, %s8496_s11  ;;  %p8502_p4 = scmp.lt.s32.totalorder %s8495_s14, %s10933_s5 }
 0x104   : > { %p8503_p6 = scmp.lt.s32.totalorder %s8501_s1, %s8496_s11 }
 0x105   : > { %p8499_p0 = pnand %p8497_p13, %p9393_p7 }
 0x106   : > { %p8504_p8 = por %p8503_p6, %p8502_p4 }
 0x107   : > { %p8500_p1 = pneg %p8499_p0 }
 0x109   : > { %p8505_p9 = pnand %p8504_p8, %p8500_p1 }
 0x10b   : > { %8508 = shalt.err (!%p8505_p9)
}
 0x10c   : > { %7941 = dma.hbm_to_vmem [thread:$0]  (!%p9381_p5), %s9468_s18, 16, %s1978_s0, [#allocation31]  }
 0x10d   : > { %s1768_s26 = sshll.u32 %s9198_s21, 4  ;;  %s8983_s20 = smov [#allocation4]   ;;  %s9490_s26 = int_to_ptr.hbm [resolvable:$true] %s1768_s26 }
 0x10e   : > { %s1746_s25 = sshll.u32 %s8983_s20, 4  ;;  %s8524_s7 = sshra.s32 %s9479_s29, 4  ;;  %s1747_s25 = int_to_ptr.vmem [resolvable:$true] %s1746_s25  ;;  %s8525_s7 = int_to_ptr.hbm [resolvable:$true] %s8524_s7 }
 0x10f   : > { %s8526_s14 = scalar_lea.hbm %s8525_s7, 1  ;;  %s8531_s11 = scalar_lea.hbm %s9187_s23, 1 }
 0x110   : > { %p8527_p10 = scmp.ne.s32.totalorder %s8525_s7, %s8526_s14  ;;  %p8532_p13 = scmp.lt.s32.totalorder %s8525_s7, %s9187_s23 }
 0x111   : > { %p8533_p0 = scmp.lt.s32.totalorder %s8531_s11, %s8526_s14 }
 0x112   : > { %p8529_p11 = pnand %p8527_p10, %p9393_p7 }
 0x113   : > { %p8534_p1 = por %p8533_p0, %p8532_p13 }
 0x114   : > { %p8530_p12 = pneg %p8529_p11 }
 0x116   : > { %p8535_p4 = pnand %p8534_p1, %p8530_p12 }
 0x118   : > { %8538 = shalt.err (!%p8535_p4)
}
 0x119   : > { %7890 = dma.hbm_to_vmem [thread:$0]  (!%p9381_p5), %s9479_s29, 16, %s1747_s25, [#allocation5]  }
 0x11a   : > { %s8984_s18 = smov [#allocation8]   ;;  %s1801_s1 = sshll.u32 %s9223_s27, 4  ;;  %s9501_s1 = int_to_ptr.hbm [resolvable:$true] %s1801_s1 }
 0x11b   : > { %s1770_s0 = sshll.u32 %s8984_s18, 4  ;;  %s8554_s20 = sshra.s32 %s9490_s26, 4  ;;  %s1771_s0 = int_to_ptr.vmem [resolvable:$true] %s1770_s0  ;;  %s8555_s20 = int_to_ptr.hbm [resolvable:$true] %s8554_s20 }
 0x11c   : > { %s8556_s7 = scalar_lea.hbm %s8555_s20, 1  ;;  %s8561_s14 = scalar_lea.hbm %s9198_s21, 1 }
 0x11d   : > { %p8557_p6 = scmp.ne.s32.totalorder %s8555_s20, %s8556_s7  ;;  %p8562_p10 = scmp.lt.s32.totalorder %s8555_s20, %s9198_s21 }
 0x11e   : > { %p8563_p11 = scmp.lt.s32.totalorder %s8561_s14, %s8556_s7 }
 0x11f   : > { %p8559_p8 = pnand %p8557_p6, %p9393_p7 }
 0x120   : > { %p8564_p12 = por %p8563_p11, %p8562_p10 }
 0x121   : > { %p8560_p9 = pneg %p8559_p8 }
 0x123   : > { %p8565_p13 = pnand %p8564_p12, %p8560_p9 }
 0x125   : > { %8568 = shalt.err (!%p8565_p13)
}
 0x126   : > { %7896 = dma.hbm_to_vmem [thread:$0]  (!%p9381_p5), %s9490_s26, 16, %s1771_s0, [#allocation7]  }
 0x127   : > { %s1831_s29 = sshll.u32 %s9243_s24, 4  ;;  %s8985_s25 = smov [#allocation11]   ;;  %s9512_s29 = int_to_ptr.hbm [resolvable:$true] %s1831_s29 }
 0x128   : > { %s1803_s11 = sshll.u32 %s8985_s25, 4  ;;  %s8584_s18 = sshra.s32 %s9501_s1, 4  ;;  %s1804_s11 = int_to_ptr.vmem [resolvable:$true] %s1803_s11  ;;  %s8585_s18 = int_to_ptr.hbm [resolvable:$true] %s8584_s18 }
 0x129   : > { %s8586_s20 = scalar_lea.hbm %s8585_s18, 1  ;;  %s8591_s7 = scalar_lea.hbm %s9223_s27, 1 }
 0x12a   : > { %p8587_p0 = scmp.ne.s32.totalorder %s8585_s18, %s8586_s20  ;;  %p8592_p6 = scmp.lt.s32.totalorder %s8585_s18, %s9223_s27 }
 0x12b   : > { %p8593_p8 = scmp.lt.s32.totalorder %s8591_s7, %s8586_s20 }
 0x12c   : > { %p8589_p1 = pnand %p8587_p0, %p9393_p7 }
 0x12d   : > { %p8594_p9 = por %p8593_p8, %p8592_p6 }
 0x12e   : > { %p8590_p4 = pneg %p8589_p1 }
 0x130   : > { %p8595_p10 = pnand %p8594_p9, %p8590_p4 }
 0x132   : > { %8598 = shalt.err (!%p8595_p10)
}
 0x133   : > { %7902 = dma.hbm_to_vmem [thread:$0]  (!%p9381_p5), %s9501_s1, 16, %s1804_s11, [#allocation10]  }
 0x134   : > { %s8986_s26 = smov [#allocation14]   ;;  %s1855_s14 = sshll.u32 %s9253_s17, 4  ;;  %s9523_s14 = int_to_ptr.hbm [resolvable:$true] %s1855_s14 }
 0x135   : > { %s1833_s0 = sshll.u32 %s8986_s26, 4  ;;  %s8614_s25 = sshra.s32 %s9512_s29, 4  ;;  %s1834_s0 = int_to_ptr.vmem [resolvable:$true] %s1833_s0  ;;  %s8615_s25 = int_to_ptr.hbm [resolvable:$true] %s8614_s25 }
 0x136   : > { %s8616_s18 = scalar_lea.hbm %s8615_s25, 1  ;;  %s8621_s20 = scalar_lea.hbm %s9243_s24, 1 }
 0x137   : > { %p8617_p11 = scmp.ne.s32.totalorder %s8615_s25, %s8616_s18  ;;  %p8622_p0 = scmp.lt.s32.totalorder %s8615_s25, %s9243_s24 }
 0x138   : > { %p8623_p1 = scmp.lt.s32.totalorder %s8621_s20, %s8616_s18 }
 0x139   : > { %p8619_p12 = pnand %p8617_p11, %p9393_p7 }
 0x13a   : > { %p8624_p4 = por %p8623_p1, %p8622_p0 }
 0x13b   : > { %p8620_p13 = pneg %p8619_p12 }
 0x13d   : > { %p8625_p6 = pnand %p8624_p4, %p8620_p13 }
 0x13f   : > { %8628 = shalt.err (!%p8625_p6)
}
 0x140   : > { %s10938_s1 = sld [smem:[#allocation89_spill]]  ;;  %s8987_s7 = smov [#allocation17]  }
 0x141   : > { %7908 = dma.hbm_to_vmem [thread:$0]  (!%p9381_p5), %s9512_s29, 16, %s1834_s0, [#allocation13]  }
 0x142   : > { %s1857_s26 = sshll.u32 %s8987_s7, 4  ;;  %s8644_s25 = sshra.s32 %s9523_s14, 4  ;;  %s1858_s26 = int_to_ptr.vmem [resolvable:$true] %s1857_s26  ;;  %s8645_s25 = int_to_ptr.hbm [resolvable:$true] %s8644_s25 }
 0x143   : > { %s8646_s18 = scalar_lea.hbm %s8645_s25, 1  ;;  %s8651_s20 = scalar_lea.hbm %s9253_s17, 1 }
 0x144   : > { %p8647_p8 = scmp.ne.s32.totalorder %s8645_s25, %s8646_s18  ;;  %p8652_p11 = scmp.lt.s32.totalorder %s8645_s25, %s9253_s17 }
 0x145   : > { %p8653_p12 = scmp.lt.s32.totalorder %s8651_s20, %s8646_s18 }
 0x146   : > { %s1882_s11 = sshll.u32 %s10938_s1, 4  ;;  %p8649_p9 = pnand %p8647_p8, %p9393_p7  ;;  %s9534_s11 = int_to_ptr.hbm [resolvable:$true] %s1882_s11 }
 0x147   : > { %p8654_p13 = por %p8653_p12, %p8652_p11 }
 0x148   : > { %p8650_p10 = pneg %p8649_p9 }
 0x14a   : > { %p8655_p0 = pnand %p8654_p13, %p8650_p10 }
 0x14c   : > { %8658 = shalt.err (!%p8655_p0)
}
 0x14d   : > { %s10939_s29 = sld [smem:[#allocation91_spill]]  ;;  %s8988_s0 = smov [#allocation20]  }
 0x14e   : > { %7914 = dma.hbm_to_vmem [thread:$0]  (!%p9381_p5), %s9523_s14, 16, %s1858_s26, [#allocation16]  }
 0x14f   : > { %s1884_s7 = sshll.u32 %s8988_s0, 4  ;;  %s8674_s25 = sshra.s32 %s9534_s11, 4  ;;  %s1885_s7 = int_to_ptr.vmem [resolvable:$true] %s1884_s7  ;;  %s8675_s25 = int_to_ptr.hbm [resolvable:$true] %s8674_s25 }
 0x150   : > { %s8676_s18 = scalar_lea.hbm %s8675_s25, 1  ;;  %s8681_s20 = scalar_lea.hbm %s10938_s1, 1 }
 0x151   : > { %p8677_p1 = scmp.ne.s32.totalorder %s8675_s25, %s8676_s18  ;;  %p8682_p8 = scmp.lt.s32.totalorder %s8675_s25, %s10938_s1 }
 0x152   : > { %p8683_p9 = scmp.lt.s32.totalorder %s8681_s20, %s8676_s18 }
 0x153   : > { %s1906_s5 = sshll.u32 %s10939_s29, 4  ;;  %p8679_p4 = pnand %p8677_p1, %p9393_p7  ;;  %s9545_s5 = int_to_ptr.hbm [resolvable:$true] %s1906_s5 }
 0x154   : > { %p8684_p10 = por %p8683_p9, %p8682_p8 }
 0x155   : > { %p8680_p6 = pneg %p8679_p4 }
 0x157   : > { %p8685_p11 = pnand %p8684_p10, %p8680_p6 }
 0x159   : > { %8688 = shalt.err (!%p8685_p11)
}
 0x15a   : > { %s10940_s14 = sld [smem:[#allocation92_spill]]  ;;  %s8989_s0 = smov [#allocation23]  }
 0x15b   : > { %7920 = dma.hbm_to_vmem [thread:$0]  (!%p9381_p5), %s9534_s11, 16, %s1885_s7, [#allocation19]  }
 0x15c   : > { %s1908_s6 = sshll.u32 %s8989_s0, 4  ;;  %s8704_s25 = sshra.s32 %s9545_s5, 4  ;;  %s1909_s6 = int_to_ptr.vmem [resolvable:$true] %s1908_s6  ;;  %s8705_s25 = int_to_ptr.hbm [resolvable:$true] %s8704_s25 }
 0x15d   : > { %s8706_s18 = scalar_lea.hbm %s8705_s25, 1  ;;  %s8711_s20 = scalar_lea.hbm %s10939_s29, 1 }
 0x15e   : > { %p8707_p12 = scmp.ne.s32.totalorder %s8705_s25, %s8706_s18  ;;  %p8712_p1 = scmp.lt.s32.totalorder %s8705_s25, %s10939_s29 }
 0x15f   : > { %p8713_p4 = scmp.lt.s32.totalorder %s8711_s20, %s8706_s18 }
 0x160   : > { %s1930_s26 = sshll.u32 %s10940_s14, 4  ;;  %p8709_p13 = pnand %p8707_p12, %p9393_p7  ;;  %s9556_s26 = int_to_ptr.hbm [resolvable:$true] %s1930_s26 }
 0x161   : > { %p8714_p6 = por %p8713_p4, %p8712_p1 }
 0x162   : > { %p8710_p0 = pneg %p8709_p13 }
 0x164   : > { %p8715_p8 = pnand %p8714_p6, %p8710_p0 }
 0x166   : > { %8718 = shalt.err (!%p8715_p8)
}
 0x167   : > { %s10941_s11 = sld [smem:[#allocation93_spill]]  ;;  %s8990_s7 = smov [#allocation26]  }
 0x168   : > { %7926 = dma.hbm_to_vmem [thread:$0]  (!%p9381_p5), %s9545_s5, 16, %s1909_s6, [#allocation22]  }
 0x169   : > { %s1932_s0 = sshll.u32 %s8990_s7, 4  ;;  %s8734_s25 = sshra.s32 %s9556_s26, 4  ;;  %s1933_s0 = int_to_ptr.vmem [resolvable:$true] %s1932_s0  ;;  %s8735_s25 = int_to_ptr.hbm [resolvable:$true] %s8734_s25 }
 0x16a   : > { %s8736_s18 = scalar_lea.hbm %s8735_s25, 1  ;;  %s8741_s20 = scalar_lea.hbm %s10940_s14, 1 }
 0x16b   : > { %p8737_p9 = scmp.ne.s32.totalorder %s8735_s25, %s8736_s18  ;;  %p8742_p12 = scmp.lt.s32.totalorder %s8735_s25, %s10940_s14 }
 0x16c   : > { %p8743_p13 = scmp.lt.s32.totalorder %s8741_s20, %s8736_s18 }
 0x16d   : > { %s1954_s1 = sshll.u32 %s10941_s11, 4  ;;  %p8739_p10 = pnand %p8737_p9, %p9393_p7  ;;  %s9567_s1 = int_to_ptr.hbm [resolvable:$true] %s1954_s1 }
 0x16e   : > { %p8744_p0 = por %p8743_p13, %p8742_p12 }
 0x16f   : > { %p8740_p11 = pneg %p8739_p10 }
 0x171   : > { %p8745_p1 = pnand %p8744_p0, %p8740_p11 }
 0x173   : > { %8748 = shalt.err (!%p8745_p1)
}
 0x174   : > { %s10942_s5 = sld [smem:[#allocation98_spill]]  ;;  %s8991_s7 = smov [#allocation29]  }
 0x175   : > { %7932 = dma.hbm_to_vmem [thread:$0]  (!%p9381_p5), %s9556_s26, 16, %s1933_s0, [#allocation25]  }
 0x176   : > { %s1956_s8 = sshll.u32 %s8991_s7, 4  ;;  %s8764_s25 = sshra.s32 %s9567_s1, 4  ;;  %s1957_s8 = int_to_ptr.vmem [resolvable:$true] %s1956_s8  ;;  %s8765_s25 = int_to_ptr.hbm [resolvable:$true] %s8764_s25 }
 0x177   : > { %s8766_s18 = scalar_lea.hbm %s8765_s25, 1  ;;  %s8771_s20 = scalar_lea.hbm %s10941_s11, 1 }
 0x178   : > { %p8767_p4 = scmp.ne.s32.totalorder %s8765_s25, %s8766_s18  ;;  %p8772_p9 = scmp.lt.s32.totalorder %s8765_s25, %s10941_s11 }
 0x179   : > { %p8773_p10 = scmp.lt.s32.totalorder %s8771_s20, %s8766_s18 }
 0x17a   : > { %s1987_s6 = sshll.u32 %s10942_s5, 4  ;;  %p8769_p6 = pnand %p8767_p4, %p9393_p7  ;;  %s9578_s6 = int_to_ptr.hbm [resolvable:$true] %s1987_s6 }
 0x17b   : > { %p8774_p11 = por %p8773_p10, %p8772_p9 }
 0x17c   : > { %p8770_p8 = pneg %p8769_p6 }
 0x17e   : > { %p8775_p12 = pnand %p8774_p11, %p8770_p8 }
 0x180   : > { %8778 = shalt.err (!%p8775_p12)
}
 0x181   : > { %s10943_s26 = sld [smem:[#allocation99_spill]]  ;;  %s8992_s0 = smov [#allocation32]  }
 0x182   : > { %7938 = dma.hbm_to_vmem [thread:$0]  (!%p9381_p5), %s9567_s1, 16, %s1957_s8, [#allocation28]  }
 0x183   : > { %s1989_s7 = sshll.u32 %s8992_s0, 4  ;;  %s8794_s10 = sshra.s32 %s9578_s6, 4  ;;  %s1990_s7 = int_to_ptr.vmem [resolvable:$true] %s1989_s7  ;;  %s8795_s10 = int_to_ptr.hbm [resolvable:$true] %s8794_s10 }
 0x184   : > { %s8796_s25 = scalar_lea.hbm %s8795_s10, 1  ;;  %s8801_s18 = scalar_lea.hbm %s10942_s5, 1 }
 0x185   : > { %p8797_p13 = scmp.ne.s32.totalorder %s8795_s10, %s8796_s25  ;;  %p8802_p4 = scmp.lt.s32.totalorder %s8795_s10, %s10942_s5 }
 0x186   : > { %p8803_p6 = scmp.lt.s32.totalorder %s8801_s18, %s8796_s25 }
 0x187   : > { %s1999_s9 = sshll.u32 %s10943_s26, 4  ;;  %p8799_p0 = pnand %p8797_p13, %p9393_p7  ;;  %s2000_s9 = int_to_ptr.hbm [resolvable:$true] %s1999_s9 }
 0x188   : > { %p8804_p8 = por %p8803_p6, %p8802_p4 }
 0x189   : > { %p8800_p1 = pneg %p8799_p0 }
 0x18b   : > { %p8805_p9 = pnand %p8804_p8, %p8800_p1 }
 0x18d   : > { %8808 = shalt.err (!%p8805_p9)
}
 0x18e   : > { %7944 = dma.hbm_to_vmem [thread:$0]  (!%p9381_p5), %s9578_s6, 16, %s1990_s7, [#allocation31]  }
 0x18f   : > { %s8993_s8 = smov [#allocation33]   ;;  %s8824_s20 = sshra.s32 %s2000_s9, 4  ;;  %s8825_s20 = int_to_ptr.hbm [resolvable:$true] %s8824_s20 }
 0x190   : > { %s2001_s1 = sshll.u32 %s8993_s8, 4  ;;  %s8826_s0 = scalar_lea.hbm %s8825_s20, 1  ;;  %s2002_s1 = int_to_ptr.vmem [resolvable:$true] %s2001_s1 }
 0x191   : > { %p8827_p10 = scmp.ne.s32.totalorder %s8825_s20, %s8826_s0  ;;  %s8831_s10 = scalar_lea.hbm %s10943_s26, 1 }
 0x192   : > { %p8832_p13 = scmp.lt.s32.totalorder %s8825_s20, %s10943_s26  ;;  %p8833_p0 = scmp.lt.s32.totalorder %s8831_s10, %s8826_s0 }
 0x193   : > { %p8829_p11 = pnand %p8827_p10, %p9393_p7 }
 0x194   : > { %p8834_p1 = por %p8833_p0, %p8832_p13 }
 0x195   : > { %p8830_p12 = pneg %p8829_p11 }
 0x197   : > { %p8835_p4 = pnand %p8834_p1, %p8830_p12 }
 0x199   : > { %8838 = shalt.err (!%p8835_p4)
}
 0x19a   : > { %7947 = dma.hbm_to_vmem [thread:$0]  (!%p9381_p5), %s2000_s9, 16, %s2002_s1, [#allocation34]  }
 0x19b   : > { %2053 = sbr.rel (%p9369_p3) target bundleno = 12579 (0x3123), region = 292 }
 0x1a0   : > { %8859 = dma.done.wait (%p7948_p2), [#allocation5], 16  }
 0x1a1   : > { %8861 = vsyncadd (%p7948_p2), [#allocation5], 4294967280 }
 0x1a2   : > { %8863 = dma.done.wait (%p7948_p2), [#allocation7], 32  }
 0x1a3   : > { %8865 = vsyncadd (%p7948_p2), [#allocation7], 4294967264 }
 0x1a4   : > { %8867 = dma.done.wait (%p7948_p2), [#allocation10], 32  }
 0x1a5   : > { %8869 = vsyncadd (%p7948_p2), [#allocation10], 4294967264 }
 0x1a6   : > { %8871 = dma.done.wait (%p7948_p2), [#allocation13], 32  }
 0x1a7   : > { %8873 = vsyncadd (%p7948_p2), [#allocation13], 4294967264 }
 0x1a8   : > { %8875 = dma.done.wait (%p7948_p2), [#allocation16], 32  }
 0x1a9   : > { %8877 = vsyncadd (%p7948_p2), [#allocation16], 4294967264 }
 0x1aa   : > { %8879 = dma.done.wait (%p7948_p2), [#allocation19], 32  }
 0x1ab   : > { %8881 = vsyncadd (%p7948_p2), [#allocation19], 4294967264 }
 0x1ac   : > { %8883 = dma.done.wait (%p7948_p2), [#allocation22], 32  }
 0x1ad   : > { %8885 = vsyncadd (%p7948_p2), [#allocation22], 4294967264 }
 0x1ae   : > { %8887 = dma.done.wait (%p7948_p2), [#allocation25], 32  }
 0x1af   : > { %8889 = vsyncadd (%p7948_p2), [#allocation25], 4294967264 }
 0x1b0   : > { %8891 = dma.done.wait (%p7948_p2), [#allocation28], 32  }
 0x1b1   : > { %8893 = vsyncadd (%p7948_p2), [#allocation28], 4294967264 }
 0x1b2   : > { %8895 = dma.done.wait (%p7948_p2), [#allocation31], 32  }
 0x1b3   : > { %8897 = vsyncadd (%p7948_p2), [#allocation31], 4294967264 }
 0x1b4   : > { %8899 = dma.done.wait (%p7948_p2), [#allocation34], 16  }
 0x1b5   : > { %8901 = vsyncadd (%p7948_p2), [#allocation34], 4294967280  ;;  %s10944_s9 = sld [smem:[#allocation64_spill]]  ;;  %p2311_p2 = scmp.lt.s32.totalorder %s9364_s3, 1  ;;  %vm3030_vm0 = vcmask 261120   ;;  %vm3086_vm1 = vcmask 64512  }
 0x1b6   : > { %s10945_s2 = sld [smem:[#allocation46_spill]]  ;;  %s10856_s20 = smov 104   ;;  %vm2998_vm2 = vcmask 130048  }
 0x1b7   : > { %s11014_s3 = smov (!%p2311_p2, %s9364_s3), 1  ;;  %s10946_s6 = sld [smem:[#allocation71_spill]] }
 0x1b8   : > { %s7742_s15 = sshll.u32 %s11014_s3, 7  ;;  %s10947_s7 = sld [smem:[#allocation69_spill]] }
 0x1b9   : > { %s10948_s25 = sld [smem:[#allocation63_spill]]  ;;  %s10852_s10 = smov 96  }
 0x1ba   : > { %s10949_s18 = sld [smem:[#allocation68_spill]] }
 0x1bb   : > { %v7750_v1 = vld [vmem:[%s10944_s9 + $0x38] sm:$0xff]  ;;  %v7749_v5 = vld [vmem:[%s10944_s9 + $0x30] sm:$0xff]  ;;  %v7748_v9 = vld [vmem:[%s10944_s9 + $0x28] sm:$0xff]  ;;  %s10950_s8 = sld [smem:[#allocation66_spill]] }
 0x1bc   : > { %v7758_v2 = vld [vmem:[%s10944_s9 + $0x78] sm:$0xff]  ;;  %2871 = vmatpush.bf16.msra.mxu0 %v7750_v1  ;;  %v7757_v6 = vld [vmem:[%s10944_s9 + $0x70] sm:$0xff]  ;;  %v7756_v10 = vld [vmem:[%s10944_s9 + $0x68] sm:$0xff]  ;;  %s9681_s16 = scalar_lea.vmem %s10945_s2, %s7742_s15  ;;  %s10951_s1 = sld [smem:[#allocation48_spill]] }
 0x1bd   : > { %v7766_v3 = vld [vmem:[%s10944_s9 + $0xb8] sm:$0xff]  ;;  %2885 = vmatpush.bf16.msra.mxu1 %v7758_v2  ;;  %v7765_v7 = vld [vmem:[%s10944_s9 + $0xb0] sm:$0xff]  ;;  %v7764_v11 = vld [vmem:[%s10944_s9 + $0xa8] sm:$0xff]  ;;  %s10952_s0 = sld [smem:[#allocation88_spill]]  ;;  %s10858_s2 = smov 120  }
 0x1be   : > { %v7774_v4 = vld [vmem:[%s10944_s9 + $0xf8] sm:$0xff]  ;;  %2899 = vmatpush.bf16.msra.mxu2 %v7766_v3  ;;  %v7773_v8 = vld [vmem:[%s10944_s9 + $0xf0] sm:$0xff]  ;;  %v7772_v12 = vld [vmem:[%s10944_s9 + $0xe8] sm:$0xff]  ;;  %s10974_s5 = sld [smem:[#allocation80_spill]] }
 0x1bf   : > { %2913 = vmatpush.bf16.msra.mxu3 %v7774_v4  ;;  %v7747_v13 = vld [vmem:[%s10944_s9 + $0x20] sm:$0xff]  ;;  %v7746_v17 = vld [vmem:[%s10944_s9 + $0x18] sm:$0xff]  ;;  %v7745_v21 = vld [vmem:[%s10944_s9 + $0x10] sm:$0xff] }
 0x1c0   : > { %2872 = vmatpush.bf16.msra.mxu0 %v7749_v5  ;;  %v7755_v14 = vld [vmem:[%s10944_s9 + $0x60] sm:$0xff]  ;;  %v7754_v18 = vld [vmem:[%s10944_s9 + $0x58] sm:$0xff]  ;;  %v7753_v22 = vld [vmem:[%s10944_s9 + $0x50] sm:$0xff] }
 0x1c1   : > { %2886 = vmatpush.bf16.msra.mxu1 %v7757_v6  ;;  %v7763_v15 = vld [vmem:[%s10944_s9 + $0xa0] sm:$0xff]  ;;  %v7762_v19 = vld [vmem:[%s10944_s9 + $0x98] sm:$0xff]  ;;  %v7761_v23 = vld [vmem:[%s10944_s9 + $0x90] sm:$0xff] }
 0x1c2   : > { %2900 = vmatpush.bf16.msra.mxu2 %v7765_v7  ;;  %v7771_v16 = vld [vmem:[%s10944_s9 + $0xe0] sm:$0xff]  ;;  %v7770_v20 = vld [vmem:[%s10944_s9 + $0xd8] sm:$0xff]  ;;  %v7769_v24 = vld [vmem:[%s10944_s9 + $0xd0] sm:$0xff]  ;;  %s9810_s15 = scalar_lea.vmem %s10951_s1, %s11014_s3  ;;  %s7367_s1 = sshll.u32 %s11014_s3, 1 }
 0x1c3   : > { %2914 = vmatpush.bf16.msra.mxu3 %v7773_v8  ;;  %v7744_v25 = vld [vmem:[%s10944_s9 + $0x8] sm:$0xff]  ;;  %v7743_v29 = vld [vmem:[%s10944_s9] sm:$0xff]  ;;  %v2331_v33 = vld [vmem:[%s9681_s16 + $0x10] sm:$0xff] }
 0x1c4   : > { %2873 = vmatpush.bf16.msra.mxu0 %v7748_v9  ;;  %v7752_v26 = vld [vmem:[%s10944_s9 + $0x48] sm:$0xff]  ;;  %v7751_v30 = vld [vmem:[%s10944_s9 + $0x40] sm:$0xff]  ;;  %v2339_v34 = vld [vmem:[%s9681_s16 + $0x50] sm:$0xff] }
 0x1c5   : > { %2887 = vmatpush.bf16.msra.mxu1 %v7756_v10  ;;  %v7760_v27 = vld [vmem:[%s10944_s9 + $0x88] sm:$0xff]  ;;  %v7759_v31 = vld [vmem:[%s10944_s9 + $0x80] sm:$0xff]  ;;  %v7782_v37 = vld [vmem:[%s10944_s9 + $0x138] sm:$0xff]  ;;  %v2349_v46 = vpack.c.bf16 %v2339_v34, %v2331_v33 }
 0x1c6   : > { %2901 = vmatpush.bf16.msra.mxu2 %v7764_v11  ;;  %v7768_v28 = vld [vmem:[%s10944_s9 + $0xc8] sm:$0xff]  ;;  %v7767_v32 = vld [vmem:[%s10944_s9 + $0xc0] sm:$0xff]  ;;  %v7790_v38 = vld [vmem:[%s10944_s9 + $0x178] sm:$0xff] }
 0x1c7   : > { %2915 = vmatpush.bf16.msra.mxu3 %v7772_v12  ;;  %v2329_v35 = vld [vmem:[%s9681_s16] sm:$0xff]  ;;  %v2332_v39 = vld [vmem:[%s9681_s16 + $0x18] sm:$0xff]  ;;  %v2330_v41 = vld [vmem:[%s9681_s16 + $0x8] sm:$0xff] }
 0x1c8   : > { %2874 = vmatpush.bf16.msra.mxu0 %v7747_v13  ;;  %v2337_v36 = vld [vmem:[%s9681_s16 + $0x40] sm:$0xff]  ;;  %v2340_v40 = vld [vmem:[%s9681_s16 + $0x58] sm:$0xff]  ;;  %v2338_v42 = vld [vmem:[%s9681_s16 + $0x48] sm:$0xff] }
 0x1c9   : > { %2888 = vmatpush.bf16.msra.mxu1 %v7755_v14  ;;  %v7798_v43 = vld [vmem:[%s10944_s9 + $0x1b8] sm:$0xff]  ;;  %v7781_v45 = vld [vmem:[%s10944_s9 + $0x130] sm:$0xff]  ;;  %v2347_v47 = vpack.c.bf16 %v2337_v36, %v2329_v35  ;;  %v2350_v50 = vpack.c.bf16 %v2340_v40, %v2332_v39  ;;  %v2348_v51 = vpack.c.bf16 %v2338_v42, %v2330_v41  ;;  %v7780_v53 = vld [vmem:[%s10944_s9 + $0x128] sm:$0xff] }
 0x1ca   : > { %2902 = vmatpush.bf16.msra.mxu2 %v7763_v15  ;;  %v7806_v44 = vld [vmem:[%s10944_s9 + $0x1f8] sm:$0xff]  ;;  %v7789_v48 = vld [vmem:[%s10944_s9 + $0x170] sm:$0xff]  ;;  %v7788_v54 = vld [vmem:[%s10944_s9 + $0x168] sm:$0xff] }
 0x1cb   : > { %2916 = vmatpush.bf16.msra.mxu3 %v7771_v16  ;;  %v7797_v49 = vld [vmem:[%s10944_s9 + $0x1b0] sm:$0xff]  ;;  %v7796_v55 = vld [vmem:[%s10944_s9 + $0x1a8] sm:$0xff]  ;;  %v7779_v57 = vld [vmem:[%s10944_s9 + $0x120] sm:$0xff] }
 0x1cc   : > { %2875 = vmatpush.bf16.msra.mxu0 %v7746_v17  ;;  %v7805_v52 = vld [vmem:[%s10944_s9 + $0x1f0] sm:$0xff]  ;;  %v7804_v56 = vld [vmem:[%s10944_s9 + $0x1e8] sm:$0xff]  ;;  %v7787_v58 = vld [vmem:[%s10944_s9 + $0x160] sm:$0xff] }
 0x1cd   : > { %2889 = vmatpush.bf16.msra.mxu1 %v7754_v18  ;;  %v7795_v59 = vld [vmem:[%s10944_s9 + $0x1a0] sm:$0xff]  ;;  %v7778_v61 = vld [vmem:[%s10944_s9 + $0x118] sm:$0xff]  ;;  %v7777_v1 = vld [vmem:[%s10944_s9 + $0x110] sm:$0xff] }
 0x1ce   : > { %2903 = vmatpush.bf16.msra.mxu2 %v7762_v19  ;;  %v7803_v60 = vld [vmem:[%s10944_s9 + $0x1e0] sm:$0xff]  ;;  %v7786_v62 = vld [vmem:[%s10944_s9 + $0x158] sm:$0xff]  ;;  %v7785_v2 = vld [vmem:[%s10944_s9 + $0x150] sm:$0xff] }
 0x1cf   : > { %2917 = vmatpush.bf16.msra.mxu3 %v7770_v20  ;;  %v7794_v63 = vld [vmem:[%s10944_s9 + $0x198] sm:$0xff]  ;;  %v7793_v3 = vld [vmem:[%s10944_s9 + $0x190] sm:$0xff]  ;;  %v7776_v5 = vld [vmem:[%s10944_s9 + $0x108] sm:$0xff] }
 0x1d0   : > { %2876 = vmatpush.bf16.msra.mxu0 %v7745_v21  ;;  %v7802_v0 = vld [vmem:[%s10944_s9 + $0x1d8] sm:$0xff]  ;;  %v7801_v4 = vld [vmem:[%s10944_s9 + $0x1d0] sm:$0xff]  ;;  %v7784_v6 = vld [vmem:[%s10944_s9 + $0x148] sm:$0xff] }
 0x1d1   : > { %2890 = vmatpush.bf16.msra.mxu1 %v7753_v22  ;;  %v7792_v7 = vld [vmem:[%s10944_s9 + $0x188] sm:$0xff]  ;;  %v7775_v9 = vld [vmem:[%s10944_s9 + $0x100] sm:$0xff]  ;;  %v2335_v17 = vld [vmem:[%s9681_s16 + $0x30] sm:$0xff] }
 0x1d2   : > { %2904 = vmatpush.bf16.msra.mxu2 %v7761_v23  ;;  %v7800_v8 = vld [vmem:[%s10944_s9 + $0x1c8] sm:$0xff]  ;;  %v7783_v10 = vld [vmem:[%s10944_s9 + $0x140] sm:$0xff]  ;;  %v2343_v18 = vld [vmem:[%s9681_s16 + $0x70] sm:$0xff] }
 0x1d3   : > { %2918 = vmatpush.bf16.msra.mxu3 %v7769_v24  ;;  %v7791_v11 = vld [vmem:[%s10944_s9 + $0x180] sm:$0xff]  ;;  %v2334_v15 = vld [vmem:[%s9681_s16 + $0x28] sm:$0xff]  ;;  %v2336_v19 = vld [vmem:[%s9681_s16 + $0x38] sm:$0xff]  ;;  %v2353_v23 = vpack.c.bf16 %v2343_v18, %v2335_v17 }
 0x1d4   : > { %2877 = vmatpush.bf16.msra.mxu0 %v7744_v25  ;;  %v7799_v12 = vld [vmem:[%s10944_s9 + $0x1c0] sm:$0xff]  ;;  %v2342_v16 = vld [vmem:[%s9681_s16 + $0x68] sm:$0xff]  ;;  %v2344_v20 = vld [vmem:[%s9681_s16 + $0x78] sm:$0xff] }
 0x1d5   : > { %2891 = vmatpush.bf16.msra.mxu1 %v7752_v26  ;;  %v2333_v13 = vld [vmem:[%s9681_s16 + $0x20] sm:$0xff]  ;;  %v2352_v22 = vpack.c.bf16 %v2342_v16, %v2334_v15  ;;  %v2354_v24 = vpack.c.bf16 %v2344_v20, %v2336_v19  ;;  %v9738_v25 = vld [vmem:[%s10946_s6 + $0x18] sm:$0xff]  ;;  %v9742_v26 = vld [vmem:[%s10946_s6 + $0x10] sm:$0xff] }
 0x1d6   : > { %2905 = vmatpush.bf16.msra.mxu2 %v7760_v27  ;;  %v2341_v14 = vld [vmem:[%s9681_s16 + $0x60] sm:$0xff]  ;;  %v9746_v27 = vld [vmem:[%s10946_s6 + $0x8] sm:$0xff]  ;;  %s10844_s16 = smov 112  }
 0x1d7   : > { %2919 = vmatpush.bf16.msra.mxu3 %v7768_v28  ;;  %v2351_v21 = vpack.c.bf16 %v2341_v14, %v2333_v13  ;;  %v9750_v28 = vld [vmem:[%s10946_s6] sm:$0xff]  ;;  %v9765_v33 = vld [vmem:[%s10947_s7 + $0x8] sm:$0xff]  ;;  %s10979_s6 = sld [smem:[#allocation81_spill]] }
 0x1d8   : > { %2878 = vmatpush.bf16.msra.mxu0 %v7743_v29  ;;  %v9768_v34 = vld [vmem:[%s10947_s7] sm:$0xff] }
 0x1d9   : > { %2892 = vmatpush.bf16.msra.mxu1 %v7751_v30  ;;  %v9754_v30 = vld [vmem:[%s10947_s7 + $0x18] sm:$0xff] }
 0x1da   : > { %2906 = vmatpush.bf16.msra.mxu2 %v7759_v31  ;;  %v9758_v31 = vld [vmem:[%s10948_s25] ss:$0 sm:$0xff]  ;;  %s10953_s25 = sld [smem:[#allocation47_spill]] }
 0x1db   : > { %2920 = vmatpush.bf16.msra.mxu3 %v7767_v32  ;;  %2879 = vmatmul.bf16.vlgmr.msra.gmra.mxu0 %v2347_v47  ;;  %v9761_v32 = vld [vmem:[%s10947_s7 + $0x10] sm:$0xff]  ;;  %s10980_s7 = sld [smem:[#allocation84_spill]] }
 0x1dc   : > { %2927 = vmatpush.bf16.msrb.mxu0 %v7782_v37  ;;  %2893 = vmatmul.bf16.vlgmr.msra.gmra.mxu1 %v2348_v51 }
 0x1dd   : > { %2941 = vmatpush.bf16.msrb.mxu1 %v7790_v38  ;;  %2907 = vmatmul.bf16.vlgmr.msra.gmra.mxu2 %v2349_v46 }
 0x1de   : > { %2955 = vmatpush.bf16.msrb.mxu2 %v7798_v43  ;;  %2921 = vmatmul.bf16.vlgmr.msra.gmra.mxu3 %v2350_v50 }
 0x1df   : > { %2969 = vmatpush.bf16.msrb.mxu3 %v7806_v44 }
 0x1e0   : > { %2928 = vmatpush.bf16.msrb.mxu0 %v7781_v45 }
 0x1e1   : > { %2942 = vmatpush.bf16.msrb.mxu1 %v7789_v48 }
 0x1e2   : > { %2956 = vmatpush.bf16.msrb.mxu2 %v7797_v49 }
 0x1e3   : > { %2970 = vmatpush.bf16.msrb.mxu3 %v7805_v52 }
 0x1e4   : > { %2929 = vmatpush.bf16.msrb.mxu0 %v7780_v53  ;;  %v2983_v53 = vld [vmem:[%s9348_s19] sm:$0xff] }
 0x1e5   : > { %2943 = vmatpush.bf16.msrb.mxu1 %v7788_v54 }
 0x1e6   : > { %2957 = vmatpush.bf16.msrb.mxu2 %v7796_v55 }
 0x1e7   : > { %2971 = vmatpush.bf16.msrb.mxu3 %v7804_v56 }
 0x1e8   : > { %2930 = vmatpush.bf16.msrb.mxu0 %v7779_v57  ;;  %v9791_v57 = vld [vmem:[%s10949_s18] ss:$0 sm:$0xff]  ;;  %s10954_s18 = sld [smem:[#allocation70_spill]] }
 0x1e9   : > { %2944 = vmatpush.bf16.msrb.mxu1 %v7787_v58 }
 0x1ea   : > { %2958 = vmatpush.bf16.msrb.mxu2 %v7795_v59 }
 0x1eb   : > { %2972 = vmatpush.bf16.msrb.mxu3 %v7803_v60  ;;  %v9796_v60 = vld [vmem:[%s10950_s8] ss:$0 sm:$0xff]  ;;  %s10848_s8 = smov 72  }
 0x1ec   : > { %2931 = vmatpush.bf16.msrb.mxu0 %v7778_v61 }
 0x1ed   : > { %2945 = vmatpush.bf16.msrb.mxu1 %v7786_v62 }
 0x1ee   : > { %2959 = vmatpush.bf16.msrb.mxu2 %v7794_v63  ;;  %v2993_v63 = vld [vmem:[%s10952_s0 + $0x8] sm:$0xff]  ;;  %v9838_v19 = vld [vmem:[%s10954_s18] sm:$0xff] }
 0x1ef   : > { %2973 = vmatpush.bf16.msrb.mxu3 %v7802_v0  ;;  %v2992_v0 = vld [vmem:[%s10952_s0] sm:$0xff]  ;;  %s10971_s0 = sld [smem:[#allocation82_spill]] }
 0x1f0   : > { %2932 = vmatpush.bf16.msrb.mxu0 %v7777_v1 }
 0x1f1   : > { %2946 = vmatpush.bf16.msrb.mxu1 %v7785_v2 }
 0x1f2   : > { %2960 = vmatpush.bf16.msrb.mxu2 %v7793_v3 }
 0x1f3   : > { %2974 = vmatpush.bf16.msrb.mxu3 %v7801_v4 }
 0x1f4   : > { %2933 = vmatpush.bf16.msrb.mxu0 %v7776_v5 }
 0x1f5   : > { %2947 = vmatpush.bf16.msrb.mxu1 %v7784_v6 }
 0x1f6   : > { %2961 = vmatpush.bf16.msrb.mxu2 %v7792_v7 }
 0x1f7   : > { %2975 = vmatpush.bf16.msrb.mxu3 %v7800_v8  ;;  %v9826_v8 = vld [vmem:[%s9810_s15] ss:$0 sm:$0xff] }
 0x1f8   : > { %2934 = vmatpush.bf16.msrb.mxu0 %v7775_v9 }
 0x1f9   : > { %2948 = vmatpush.bf16.msrb.mxu1 %v7783_v10 }
 0x1fa   : > { %2962 = vmatpush.bf16.msrb.mxu2 %v7791_v11 }
 0x1fb   : > { %2976 = vmatpush.bf16.msrb.mxu3 %v7799_v12  ;;  %2935 = vmatmul.bf16.vlgmr.msrb.gmra.mxu0 %v2351_v21 }
 0x1fc   : > { %2949 = vmatmul.bf16.vlgmr.msrb.gmra.mxu1 %v2352_v22  ;;  %3016 = vmatpush.msra.mxu0 %v2993_v63 }
 0x1fd   : > { %2963 = vmatmul.bf16.vlgmr.msrb.gmra.mxu2 %v2353_v23 }
 0x1fe   : > { %2977 = vmatmul.bf16.vlgmr.msrb.gmra.mxu3 %v2354_v24  ;;  %3046 = vmatpush.msra.mxu2 %v9738_v25 }
 0x1ff   : > { %3017 = vmatpush.msra.mxu0 %v2992_v0 }
 0x200   : > { %3047 = vmatpush.msra.mxu2 %v9742_v26 }
 0x202   : > { %3048 = vmatpush.msra.mxu2 %v9746_v27 }
 0x204   : > { %3049 = vmatpush.msra.mxu2 %v9750_v28 }
 0x206   : > { %3074 = vmatpush.msrb.mxu2 %v9754_v30 }
 0x208   : > { %3075 = vmatpush.msrb.mxu2 %v9761_v32 }
 0x20a   : > { %3076 = vmatpush.msrb.mxu2 %v9765_v33 }
 0x20c   : > { %3077 = vmatpush.msrb.mxu2 %v9768_v34 }
 0x258   : > { %v2880_v29 = vpop.f32.mrf.mxu0 }
 0x259   : > { %v2894_v35 = vpop.f32.mrf.mxu1  ;;  %v2881_v36 = vadd.f32 %v9758_v31, %v2880_v29 }
 0x25b   : > { %v2895_v39 = vadd.f32 %v2894_v35, %v2881_v36 }
 0x260   : > { %v2908_v37 = vpop.f32.mrf.mxu2  ;;  %v9773_v40 = vpop.f32.mrf.mxu0 }
 0x261   : > { %v2922_v38 = vpop.f32.mrf.mxu3  ;;  %v2909_v41 = vadd.f32 %v2908_v37, %v2895_v39  ;;  %v9775_v42 = vpop.f32.mrf.mxu1 }
 0x263   : > { %v2923_v44 = vadd.f32 %v2922_v38, %v2909_v41 }
 0x268   : > { %v9777_v43 = vpop.f32.mrf.mxu2 }
 0x269   : > { %v9779_v46 = vpop.f32.mrf.mxu3 }
 0x278   : > { %v2936_v45 = vpop.f32.mrf.mxu0 }
 0x279   : > { %v2937_v47 = vadd.f32 %v2936_v45, %v2923_v44  ;;  %v2950_v48 = vpop.f32.mrf.mxu1 }
 0x27b   : > { %v2951_v49 = vadd.f32 %v2950_v48, %v2937_v47  ;;  %v6497_v48 = vlaneseq }
 0x27d   : > { %vm9849_vm7 = vcmp.lt.s32.totalorder %v6497_v48, 64 }
 0x280   : > { %v2964_v50 = vpop.f32.mrf.mxu2  ;;  %v2938_v47 = vpop.f32.mrf.mxu0 }
 0x281   : > { %v2965_v51 = vadd.f32 %v2964_v50, %v2951_v49  ;;  %v2978_v52 = vpop.f32.mrf.mxu3  ;;  %v8098_v49 = vld [vmem:[#allocation18] ss:$0 sm:$0xff] }
 0x283   : > { %v2979_v54 = vadd.f32 %v2978_v52, %v2965_v51 }
 0x285   : > { %v9782_v55 = vadd.f32 %v2983_v53, %v2979_v54 }
 0x287   : > { %7625 = vmatmul.msk.f32.vlgmr.msra.gmra.mxu2 %vm3030_vm0, %v9782_v55 }
 0x288   : > { %v9788_v56 = vpop.f32.mrf.mxu2 }
 0x289   : > { %v9822_v5 = vpop.f32.mrf.mxu3 }
 0x28f   : > { %7626 = vmatmul.msk.f32.vlgmr.msrb.gmra.mxu2 %vm3030_vm0, %v9782_v55 }
 0x30a   : > { %v3051_v58 = vpop.f32.mrf.mxu2 }
 0x30b   : > { %v3052_v59 = vadd.f32 %v9791_v57, %v3051_v58 }
 0x30d   : > { %3398 = vrot.lane.b32.xlu2 %v3052_v59, %s10856_s20 }
 0x312   : > { %v3079_v61 = vpop.f32.mrf.mxu2 }
 0x313   : > { %v9799_v62 = vadd.f32 %v9796_v60, %v3079_v61 }
 0x315   : > { %3142 = vrot.lane.b32.xlu1 %v9799_v62, %s10852_s10  ;;  %7627 = vmatpush.xpose.msk.msra.mxu3 %vm3086_vm1, %v9799_v62 }
 0x316   : > { %3170 = vrot.lane.b32.xlu2 %v9799_v62, %s10858_s2 }
 0x318   : > { %7628 = vmatmul.msk.f32.vlgmr.msra.gmra.mxu3 %vm3086_vm1, %v3052_v59 }
 0x31d   : > { %3400 = vrot.lane.b32.xlu1 %v9799_v62, %s10856_s20 }
 0x31e   : > { %3294 = vrot.lane.b32.xlu2 %v3052_v59, %s10844_s16 }
 0x325   : > { %3296 = vrot.lane.b32.xlu1 %v9799_v62, %s10844_s16  ;;  %s2319_s16 = scalar_lea.vmem %s10953_s25, %s7367_s1  ;;  %s10957_s25 = sld [smem:[#allocation65_spill]] }
 0x326   : > { %v2991_v18 = vld [vmem:[%s2319_s16] sm:$0x3]  ;;  %s10850_s16 = smov 80   ;;  %s10846_s1 = smov 32  }
 0x327   : > { %7624 = vmatmul.msk.f32.vlgmr.msra.gmra.mxu0 %vm2998_vm2, %v2991_v18  ;;  %v2883_v18 = vadd.f32 %v9758_v31, %v9773_v40 }
 0x367   : > { %v9819_v1 = vpop.permute.xlu2 %3398 }
 0x370   : > { %v3171_v2 = vpop.permute.xlu2 %3170 }
 0x371   : > { %7630 = vmatpush.xpose.msk.msrb.mxu3 %vm3086_vm1, %v3171_v2 }
 0x378   : > { %v3295_v7 = vpop.permute.xlu2 %3294 }
 0x387   : > { %v3143_v3 = vpop.permute.xlu1 %3142 }
 0x388   : > { %3163 = vmatpush.msrb.mxu0 %v3143_v3 }
 0x38a   : > { %3289 = vmatpush.msra.mxu0 %v9838_v19 }
 0x38f   : > { %v3401_v4 = vpop.permute.xlu1 %3400 }
 0x397   : > { %v3297_v6 = vpop.permute.xlu1 %3296 }
 0x398   : > { %7635 = vmatpush.xpose.msk.msra.mxu1 %vm3086_vm1, %v3297_v6 }
 0x39b   : > { %v3110_v9 = vpop.f32.mrf.mxu3  ;;  %7636 = vmatmul.msk.f32.vlgmr.msra.gmra.mxu1 %vm3086_vm1, %v3295_v7  ;;  %v2952_v7 = vpop.f32.mrf.mxu1 }
 0x39c   : > { %v3113_v10 = vmul.f32 0.35355338, %v3110_v9 }
 0x39e   : > { %v3117_v11 = vadd.f32 %v9826_v8, %v3113_v10 }
 0x3a0   : > { %v3118_v12 = vsel %vm3086_vm1, %v3117_v11, -inf }
 0x3a1   : > { %3119 = vmax.xlane.f32.xlu0 %v3118_v12 }
 0x3a4   : > { %v3019_v50 = vpop.f32.mrf.mxu0 }
 0x3a5   : > { %v9853_v52 = vadd.f32 %v8098_v49, %v3019_v50 }
 0x3a7   : > { %6610 = vst.msk [vmem:[#allocation2 + $0x4] sm:$0x1] %vm9849_vm7, %v9853_v52 }
 0x414   : > { %v3120_v13 = vpop.xlane.xlu0 %3119 }
 0x415   : > { %v3121_v14 = vsub.f32 %v3117_v11, %v3120_v13 }
 0x417   : > { %v3122_v15 = vmul.f32 1.442695, %v3121_v14 }
 0x418   : > { %v3319_v11 = vpop.f32.mrf.mxu1 }
 0x419   : > { %8126 = vpow2.f32 %v3122_v15  ;;  %v3322_v13 = vmul.f32 0.35355338, %v3319_v11 }
 0x41b   : > { %v3323_v15 = vadd.f32 %v9826_v8, %v3322_v13 }
 0x41f   : > { %v8127_v16 = vpop.eup %8126 }
 0x420   : > { %v3124_v17 = vsel %vm3086_vm1, %v8127_v16, 0.0 }
 0x421   : > { %3125 = vadd.xlane.f32.xlu0 %v3124_v17  ;;  %v2985_v17 = vld [vmem:[%s10957_s25] sm:$0xff]  ;;  %s10854_s25 = smov 88  }
 0x435   : > { %3168 = vrot.lane.b32.xlu0 %v3052_v59, %s10858_s2 }
 0x43d   : > { %3452 = vrot.lane.b32.xlu0 %v9799_v62, %s10848_s8  ;;  %s10959_s8 = sld [smem:[#allocation49_spill]] }
 0x494   : > { %v3126_v20 = vpop.xlane.xlu0 %3125 }
 0x495   : > { %8128 = vrcp.f32 %v3126_v20  ;;  %v3138_v24 = vand.u32 2147483648, %v3126_v20  ;;  %v3136_v35 = vand.u32 2147483647, %v3126_v20  ;;  %vm3132_vm4 = vweird.f32 %v3126_v20 }
 0x497   : > { %v3139_v37 = vor.u32 1.1754944e-38, %v3138_v24  ;;  %vm3137_vm6 = vcmp.eq.f32.partialorder %v3136_v35, 8.507059e+37 }
 0x49b   : > { %v8129_v21 = vpop.eup %8128 }
 0x49c   : > { %v3128_v22 = vmul.f32 %v8129_v21, %v3126_v20  ;;  %vm3133_vm3 = vweird.f32 %v8129_v21  ;;  %v2897_v20 = vadd.f32 %v9775_v42, %v2883_v18 }
 0x49d   : > { %vm3134_vm5 = vmor %vm3132_vm4, %vm3133_vm3 }
 0x49e   : > { %v3129_v23 = vsub.f32 1.0, %v3128_v22 }
 0x4a0   : > { %v3130_v29 = vmul.f32 %v8129_v21, %v3129_v23 }
 0x4a2   : > { %v3131_v36 = vadd.f32 %v8129_v21, %v3130_v29 }
 0x4a4   : > { %v3135_v38 = vsel %vm3134_vm5, %v8129_v21, %v3131_v36  ;;  %v2911_v21 = vadd.f32 %v9777_v43, %v2897_v20 }
 0x4a5   : > { %v3140_v39 = vsel %vm3137_vm6, %v3139_v37, %v3135_v38 }
 0x4a6   : > { %v3141_v41 = vmul.f32 %v8127_v16, %v3140_v39  ;;  %v3324_v16 = vsel %vm3086_vm1, %v3323_v15, -inf  ;;  %v2925_v23 = vadd.f32 %v9779_v46, %v2911_v21 }
 0x4a7   : > { %v3169_v44 = vpop.permute.xlu0 %3168 }
 0x4a8   : > { %7629 = vmatmul.msk.f32.vlgmr.msrb.gmra.mxu0 %vm3086_vm1, %v3141_v41  ;;  %7631 = vmatmul.msk.f32.vlgmr.msrb.gmra.mxu3 %vm3086_vm1, %v3169_v44  ;;  %v2939_v24 = vadd.f32 %v2938_v47, %v2925_v23 }
 0x4a9   : > { %7639 = vmatpush.xpose.msk.msrb.mxu0 %vm3086_vm1, %v3401_v4 }
 0x4aa   : > { %v2953_v36 = vadd.f32 %v2952_v7, %v2939_v24 }
 0x4ac   : > { %v2967_v39 = vadd.f32 %v9788_v56, %v2953_v36 }
 0x4ae   : > { %v2981_v43 = vadd.f32 %v9822_v5, %v2967_v39 }
 0x4af   : > { %v3453_v45 = vpop.permute.xlu0 %3452 }
 0x4b0   : > { %3473 = vmatpush.msrb.mxu1 %v3453_v45 }
 0x4b2   : > { %3669 = vmatpush.msra.mxu1 %v9738_v25 }
 0x4b4   : > { %3670 = vmatpush.msra.mxu1 %v9742_v26 }
 0x4b6   : > { %3671 = vmatpush.msra.mxu1 %v9746_v27 }
 0x4b8   : > { %3672 = vmatpush.msra.mxu1 %v9750_v28 }
 0x525   : > { %v3165_v25 = vpop.f32.mrf.mxu0 }
 0x526   : > { %7634 = vmatmul.msk.f32.vlgmr.msra.gmra.mxu0 %vm3086_vm1, %v3165_v25 }
 0x52b   : > { %v3193_v26 = vpop.f32.mrf.mxu3 }
 0x52c   : > { %v3196_v27 = vmul.f32 0.35355338, %v3193_v26 }
 0x52e   : > { %7640 = vmatmul.msk.f32.vlgmr.msrb.gmra.mxu0 %vm3086_vm1, %v9819_v1  ;;  %v3197_v28 = vadd.f32 %v9826_v8, %v3196_v27 }
 0x530   : > { %v3198_v53 = vsel %vm3086_vm1, %v3197_v28, -inf }
 0x531   : > { %3199 = vmax.xlane.f32.xlu0 %v3198_v53 }
 0x545   : > { %3348 = vrot.lane.b32.xlu0 %v9799_v62, %s10850_s16  ;;  %s10960_s16 = sld [smem:[#allocation67_spill]] }
 0x5a3   : > { %v9865_v54 = vpop.f32.mrf.mxu0 }
 0x5a4   : > { %v3200_v58 = vpop.xlane.xlu0 %3199 }
 0x5a5   : > { %v3201_v59 = vsub.f32 %v3197_v28, %v3200_v58 }
 0x5a7   : > { %v3202_v61 = vmul.f32 1.442695, %v3201_v59 }
 0x5a9   : > { %8130 = vpow2.f32 %v3202_v61 }
 0x5ab   : > { %v3423_v63 = vpop.f32.mrf.mxu0 }
 0x5ac   : > { %v3426_v0 = vmul.f32 0.35355338, %v3423_v63 }
 0x5ae   : > { %v3427_v2 = vadd.f32 %v9826_v8, %v3426_v0 }
 0x5af   : > { %v9869_v3 = vpop.eup %8130 }
 0x5b0   : > { %v3428_v1 = vsel %vm3086_vm1, %v3427_v2, -inf  ;;  %v3204_v4 = vsel %vm3086_vm1, %v9869_v3, 0.0 }
 0x5b1   : > { %3429 = vmax.xlane.f32.xlu1 %v3428_v1 }
 0x5b9   : > { %3205 = vadd.xlane.f32.xlu1 %v3204_v4 }
 0x624   : > { %v3430_v6 = vpop.xlane.xlu1 %3429 }
 0x625   : > { %v3431_v9 = vsub.f32 %v3427_v2, %v3430_v6 }
 0x627   : > { %v3432_v10 = vmul.f32 1.442695, %v3431_v9 }
 0x629   : > { %8132 = vpow2.f32 %v3432_v10 }
 0x62c   : > { %v3206_v27 = vpop.xlane.xlu1 %3205 }
 0x62d   : > { %v3218_v4 = vand.u32 2147483648, %v3206_v27  ;;  %vm3212_vm13 = vweird.f32 %v3206_v27  ;;  %v3216_v6 = vand.u32 2147483647, %v3206_v27 }
 0x62f   : > { %v8133_v12 = vpop.eup %8132  ;;  %v3219_v9 = vor.u32 1.1754944e-38, %v3218_v4  ;;  %vm3217_vm15 = vcmp.eq.f32.partialorder %v3216_v6, 8.507059e+37 }
 0x630   : > { %v3434_v14 = vsel %vm3086_vm1, %v8133_v12, 0.0 }
 0x631   : > { %3435 = vadd.xlane.f32.xlu2 %v3434_v14 }
 0x639   : > { %3325 = vmax.xlane.f32.xlu2 %v3324_v16  ;;  %v9896_v16 = vld [vmem:[%s10954_s18 + $0x18] sm:$0xff] }
 0x651   : > { %2987 = vrot.lane.b32.xlu2 %v2985_v17, %s10846_s1  ;;  %v3349_v17 = vpop.permute.xlu0 %3348  ;;  %s10958_s1 = sld [smem:[#allocation74_spill]] }
 0x6a4   : > { %v3436_v22 = vpop.xlane.xlu2 %3435 }
 0x6a5   : > { %8134 = vrcp.f32 %v3436_v22  ;;  %v3448_v41 = vand.u32 2147483648, %v3436_v22  ;;  %v3446_v40 = vand.u32 2147483647, %v3436_v22  ;;  %vm3442_vm9 = vweird.f32 %v3436_v22 }
 0x6a7   : > { %v3449_v46 = vor.u32 1.1754944e-38, %v3448_v41  ;;  %vm3447_vm11 = vcmp.eq.f32.partialorder %v3446_v40, 8.507059e+37 }
 0x6ab   : > { %v8135_v8 = vpop.eup %8134 }
 0x6ac   : > { %v3438_v29 = vmul.f32 %v8135_v8, %v3436_v22  ;;  %v3326_v35 = vpop.xlane.xlu2 %3325  ;;  %vm3443_vm8 = vweird.f32 %v8135_v8 }
 0x6ad   : > { %v3327_v37 = vsub.f32 %v3323_v15, %v3326_v35  ;;  %vm3444_vm10 = vmor %vm3442_vm9, %vm3443_vm8 }
 0x6ae   : > { %v3439_v38 = vsub.f32 1.0, %v3438_v29  ;;  %v9930_v29 = vld [vmem:[%s10958_s1] sm:$0xff] }
 0x6af   : > { %v3328_v44 = vmul.f32 1.442695, %v3327_v37 }
 0x6b0   : > { %v3440_v31 = vmul.f32 %v8135_v8, %v3439_v38 }
 0x6b1   : > { %8136 = vpow2.f32 %v3328_v44 }
 0x6b2   : > { %v3441_v42 = vadd.f32 %v8135_v8, %v3440_v31  ;;  %8138 = vrcp.f32 %v3206_v27 }
 0x6b4   : > { %v3445_v45 = vsel %vm3444_vm10, %v8135_v8, %v3441_v42  ;;  %v2988_v47 = vpop.permute.xlu2 %2987  ;;  %v9922_v8 = vld [vmem:[%s10958_s1 + $0x10] sm:$0xff]  ;;  %v9951_v42 = vld [vmem:[%s10960_s16] ss:$0 sm:$0xff]  ;;  %s10962_s16 = sld [smem:[#allocation77_spill]] }
 0x6b5   : > { %v9885_v49 = vadd.f32 %v2988_v47, %v2981_v43  ;;  %v3450_v50 = vsel %vm3447_vm11, %v3449_v46, %v3445_v45  ;;  %v9002_v47 = vmov 32.0  }
 0x6b6   : > { %v3451_v25 = vmul.f32 %v8133_v12, %v3450_v50 }
 0x6b7   : > { %v8137_v56 = vpop.eup %8136  ;;  %3653 = vrot.lane.b32.xlu2 %v9885_v49, %s10852_s10  ;;  %s9947_s10 = scalar_lea.vmem %s10959_s8, %s11014_s3  ;;  %s10961_s8 = smov 112  }
 0x6b8   : > { %7641 = vmatmul.msk.f32.vlgmr.msrb.gmra.mxu1 %vm3086_vm1, %v3451_v25  ;;  %v3330_v26 = vsel %vm3086_vm1, %v8137_v56, 0.0  ;;  %v8139_v28 = vpop.eup %8138 }
 0x6b9   : > { %3331 = vadd.xlane.f32.xlu1 %v3330_v26  ;;  %v3208_v58 = vmul.f32 %v8139_v28, %v3206_v27  ;;  %vm3213_vm12 = vweird.f32 %v8139_v28 }
 0x6ba   : > { %vm3214_vm14 = vmor %vm3212_vm13, %vm3213_vm12 }
 0x6bb   : > { %v3209_v59 = vsub.f32 1.0, %v3208_v58 }
 0x6bd   : > { %v3210_v63 = vmul.f32 %v8139_v28, %v3209_v59 }
 0x6bf   : > { %v3211_v2 = vadd.f32 %v8139_v28, %v3210_v63 }
 0x6d2   : > { %3222 = vrot.lane.b32.xlu1 %v9799_v62, %s10854_s25  ;;  %v3215_v62 = vsel %vm3214_vm14, %v8139_v28, %v3211_v2 }
 0x6d3   : > { %v3220_v10 = vsel %vm3217_vm15, %v3219_v9, %v3215_v62 }
 0x6d4   : > { %v3221_v15 = vmul.f32 %v9869_v3, %v3220_v10 }
 0x711   : > { %v3654_v5 = vpop.permute.xlu2 %3653 }
 0x712   : > { %7644 = vmatmul.msk.f32.vlgmr.msra.gmra.mxu1 %vm3030_vm0, %v3654_v5 }
 0x72c   : > { %v3332_v53 = vpop.xlane.xlu1 %3331 }
 0x72d   : > { %8140 = vrcp.f32 %v3332_v53  ;;  %v3344_v12 = vand.u32 2147483648, %v3332_v53  ;;  %vm3338_vm3 = vweird.f32 %v3332_v53  ;;  %v3342_v13 = vand.u32 2147483647, %v3332_v53 }
 0x72e   : > { %8142 = vrcp.f32 %v9002_v47 }
 0x72f   : > { %v3345_v20 = vor.u32 1.1754944e-38, %v3344_v12  ;;  %vm3343_vm5 = vcmp.eq.f32.partialorder %v3342_v13, 8.507059e+37 }
 0x733   : > { %v8141_v61 = vpop.eup %8140 }
 0x734   : > { %v3334_v0 = vmul.f32 %v8141_v61, %v3332_v53  ;;  %vm3339_vm2 = vweird.f32 %v8141_v61  ;;  %v8143_v50 = vpop.eup %8142 }
 0x735   : > { %vm3340_vm4 = vmor %vm3338_vm3, %vm3339_vm2  ;;  %v3475_v3 = vpop.f32.mrf.mxu1  ;;  %v3514_v25 = vmul.f32 32.0, %v8143_v50  ;;  %vm3518_vm6 = vweird.f32 %v8143_v50 }
 0x736   : > { %v3335_v1 = vsub.f32 1.0, %v3334_v0 }
 0x737   : > { %v3515_v26 = vsub.f32 1.0, %v3514_v25 }
 0x738   : > { %v3336_v7 = vmul.f32 %v8141_v61, %v3335_v1 }
 0x739   : > { %v3516_v28 = vmul.f32 %v8143_v50, %v3515_v26 }
 0x73a   : > { %v3337_v11 = vadd.f32 %v8141_v61, %v3336_v7 }
 0x73b   : > { %v3517_v58 = vadd.f32 %v8143_v50, %v3516_v28 }
 0x73c   : > { %v3341_v18 = vsel %vm3340_vm4, %v8141_v61, %v3337_v11 }
 0x73d   : > { %v3346_v21 = vsel %vm3343_vm5, %v3345_v20, %v3341_v18  ;;  %v9979_v20 = vld [vmem:[%s10962_s16] ss:$0 sm:$0xff]  ;;  %s10968_s16 = smov 96  }
 0x73e   : > { %v3347_v22 = vmul.f32 %v8137_v56, %v3346_v21  ;;  %v9957_v56 = vld [vmem:[%s9947_s10] ss:$0 sm:$0xff] }
 0x744   : > { %v3223_v14 = vpop.permute.xlu1 %3222 }
 0x745   : > { %3243 = vmatpush.msra.mxu2 %v3223_v14 }
 0x746   : > { %7632 = vmatmul.msk.f32.vlgmr.msra.gmra.mxu2 %vm3086_vm1, %v3221_v15 }
 0x747   : > { %3369 = vmatpush.msrb.mxu2 %v3349_v17 }
 0x749   : > { %3496 = vmatpush.msra.mxu2 %v9896_v16 }
 0x74e   : > { %7637 = vmatmul.msk.f32.vlgmr.msrb.gmra.mxu2 %vm3086_vm1, %v3347_v22 }
 0x74f   : > { %3689 = vmatpush.msrb.mxu2 %v9754_v30  ;;  %v9913_v30 = vld [vmem:[%s10954_s18 + $0x8] sm:$0xff] }
 0x750   : > { %3266 = vmatpush.msra.mxu3 %v9913_v30 }
 0x751   : > { %3690 = vmatpush.msrb.mxu2 %v9761_v32  ;;  %v3084_v32 = vld [vmem:[%s10954_s18 + $0x10] sm:$0xff] }
 0x752   : > { %3392 = vmatpush.msrb.mxu3 %v3084_v32 }
 0x753   : > { %3691 = vmatpush.msrb.mxu2 %v9765_v33  ;;  %v9918_v33 = vld [vmem:[%s10958_s1 + $0x18] sm:$0xff] }
 0x755   : > { %3692 = vmatpush.msrb.mxu2 %v9768_v34 }
 0x756   : > { %7642 = vmatmul.msk.f32.vlgmr.msra.gmra.mxu2 %vm3086_vm1, %v3475_v3 }
 0x75e   : > { %7645 = vmatmul.msk.f32.vlgmr.msrb.gmra.mxu2 %vm3030_vm0, %v3654_v5 }
 0x78f   : > { %v3674_v23 = vpop.f32.mrf.mxu1 }
 0x790   : > { %v9908_v24 = vadd.f32 %v9791_v57, %v3674_v23  ;;  %v9926_v57 = vld [vmem:[%s10958_s1 + $0x8] sm:$0xff]  ;;  %s10972_s1 = sld [smem:[#allocation79_spill]] }
 0x792   : > { %3778 = vrot.lane.b32.xlu0 %v9908_v24, %s10858_s2 }
 0x7c9   : > { %v3245_v34 = vpop.f32.mrf.mxu2 }
 0x7ca   : > { %7633 = vmatmul.msk.f32.vlgmr.msra.gmra.mxu3 %vm3086_vm1, %v3245_v34 }
 0x7cb   : > { %3570 = vmatpush.msra.mxu3 %v9918_v33 }
 0x7cd   : > { %3571 = vmatpush.msra.mxu3 %v9922_v8 }
 0x7cf   : > { %3572 = vmatpush.msra.mxu3 %v9926_v57 }
 0x7d1   : > { %v3371_v35 = vpop.f32.mrf.mxu2  ;;  %3573 = vmatpush.msra.mxu3 %v9930_v29 }
 0x7d2   : > { %7638 = vmatmul.msk.f32.vlgmr.msrb.gmra.mxu3 %vm3086_vm1, %v3371_v35 }
 0x7d9   : > { %v3498_v36 = vpop.f32.mrf.mxu2 }
 0x7e1   : > { %v3694_v37 = vpop.f32.mrf.mxu2 }
 0x7e2   : > { %v9936_v38 = vadd.f32 %v9796_v60, %v3694_v37 }
 0x7e4   : > { %3780 = vrot.lane.b32.xlu2 %v9936_v38, %s10858_s2  ;;  %7646 = vmatpush.xpose.msk.msrb.mxu3 %vm3086_vm1, %v9936_v38 }
 0x804   : > { %v3779_v41 = vpop.permute.xlu0 %3778 }
 0x83e   : > { %v3781_v39 = vpop.permute.xlu2 %3780 }
 0x83f   : > { %7649 = vmatpush.xpose.msk.msra.mxu2 %vm3086_vm1, %v3781_v39 }
 0x842   : > { %7650 = vmatmul.msk.f32.vlgmr.msra.gmra.mxu2 %vm3086_vm1, %v3779_v41 }
 0x843   : > { %3899 = vmatpush.msrb.mxu2 %v9838_v19 }
 0x845   : > { %4002 = vmatpush.msra.mxu2 %v3084_v32 }
 0x84d   : > { %v3268_v60 = vpop.f32.mrf.mxu3 }
 0x84e   : > { %v3292_v44 = vadd.f32 %v9865_v54, %v3268_v60 }
 0x855   : > { %v3394_v31 = vpop.f32.mrf.mxu3 }
 0x856   : > { %v3397_v40 = vadd.f32 %v3394_v31, %v3292_v44 }
 0x858   : > { %v3501_v43 = vadd.f32 %v3498_v36, %v3397_v40 }
 0x85a   : > { %v3506_v46 = vadd.f32 %v9951_v42, %v3501_v43 }
 0x85c   : > { %v3507_v45 = vadd.f32 %v3506_v46, %v9782_v55  ;;  %v9961_v55 = vsel %vm3518_vm6, %v8143_v50, %v3517_v58 }
 0x85e   : > { %v3510_v19 = vsel %vm3030_vm0, %v3507_v45, 0.0 }
 0x85f   : > { %3511 = vadd.xlane.f32.xlu1 %v3510_v19 }
 0x8c5   : > { %v3803_v54 = vpop.f32.mrf.mxu2 }
 0x8c6   : > { %v3806_v5 = vmul.f32 0.35355338, %v3803_v54 }
 0x8c8   : > { %v3807_v27 = vadd.f32 %v9957_v56, %v3806_v5 }
 0x8ca   : > { %v3808_v53 = vsel %vm3086_vm1, %v3807_v27, -inf }
 0x8cb   : > { %3809 = vmax.xlane.f32.xlu2 %v3808_v53 }
 0x8d2   : > { %v3512_v59 = vpop.xlane.xlu1 %3511 }
 0x8d3   : > { %v3520_v61 = vmul.f32 %v9961_v55, %v3512_v59 }
 0x8d5   : > { %v3521_v63 = vsub.f32 %v3507_v45, %v3520_v61 }
 0x8d7   : > { %v3522_v0 = vmul.f32 %v3521_v63, %v3521_v63 }
 0x8d9   : > { %v3523_v2 = vsel %vm3030_vm0, %v3522_v0, 0.0 }
 0x8da   : > { %3524 = vadd.xlane.f32.xlu0 %v3523_v2 }
 0x8e3   : > { %3832 = vrot.lane.b32.xlu2 %v9936_v38, %s10854_s25  ;;  %s10963_s25 = sld [smem:[#allocation76_spill]] }
 0x8e9   : > { %v9984_v3 = vld [vmem:[%s10963_s25] ss:$0 sm:$0xff]  ;;  %s10967_s25 = sld [smem:[#allocation73_spill]] }
 0x8eb   : > { %4008 = vrot.lane.b32.xlu2 %v9908_v24, %s10856_s20 }
 0x8ee   : > { %3906 = vrot.lane.b32.xlu0 %v9936_v38, %s10961_s8 }
 0x8f6   : > { %4010 = vrot.lane.b32.xlu0 %v9936_v38, %s10856_s20  ;;  %s10964_s20 = sld [smem:[#allocation75_spill]] }
 0x8fc   : > { %s10965_s2 = smov %s10964_s20  ;;  %v3594_v36 = vld [vmem:[%s10964_s20 + $0x78] sm:$0xff]  ;;  %s10966_s20 = sld [smem:[#allocation72_spill]] }
 0x8fd   : > { %v3593_v37 = vld [vmem:[%s10965_s2 + $0x70] sm:$0xff]  ;;  %3599 = vmatpush.msra.mxu0 %v3594_v36  ;;  %v3592_v39 = vld [vmem:[%s10965_s2 + $0x68] sm:$0xff]  ;;  %v3591_v41 = vld [vmem:[%s10965_s2 + $0x60] sm:$0xff] }
 0x8fe   : > { %v3590_v60 = vld [vmem:[%s10965_s2 + $0x58] sm:$0xff]  ;;  %v3589_v44 = vld [vmem:[%s10965_s2 + $0x50] sm:$0xff]  ;;  %v3588_v31 = vld [vmem:[%s10965_s2 + $0x48] sm:$0xff] }
 0x8ff   : > { %3600 = vmatpush.msra.mxu0 %v3593_v37  ;;  %v3587_v40 = vld [vmem:[%s10965_s2 + $0x40] sm:$0xff]  ;;  %v3586_v43 = vld [vmem:[%s10965_s2 + $0x38] sm:$0xff]  ;;  %v3585_v46 = vld [vmem:[%s10965_s2 + $0x30] sm:$0xff] }
 0x900   : > { %v3584_v19 = vld [vmem:[%s10965_s2 + $0x28] sm:$0xff]  ;;  %v3583_v50 = vld [vmem:[%s10965_s2 + $0x20] sm:$0xff]  ;;  %v3582_v54 = vld [vmem:[%s10965_s2 + $0x18] sm:$0xff] }
 0x901   : > { %3601 = vmatpush.msra.mxu0 %v3592_v39  ;;  %v3581_v58 = vld [vmem:[%s10965_s2 + $0x10] sm:$0xff]  ;;  %v3579_v2 = vld [vmem:[%s10965_s2] sm:$0xff] }
 0x903   : > { %3602 = vmatpush.msra.mxu0 %v3591_v41 }
 0x905   : > { %3603 = vmatpush.msra.mxu0 %v3590_v60 }
 0x907   : > { %3604 = vmatpush.msra.mxu0 %v3589_v44 }
 0x909   : > { %3605 = vmatpush.msra.mxu0 %v3588_v31 }
 0x90b   : > { %3606 = vmatpush.msra.mxu0 %v3587_v40 }
 0x90d   : > { %3607 = vmatpush.msra.mxu0 %v3586_v43 }
 0x90f   : > { %3608 = vmatpush.msra.mxu0 %v3585_v46 }
 0x911   : > { %3609 = vmatpush.msra.mxu0 %v3584_v19 }
 0x913   : > { %3610 = vmatpush.msra.mxu0 %v3583_v50 }
 0x915   : > { %3611 = vmatpush.msra.mxu0 %v3582_v54 }
 0x917   : > { %3612 = vmatpush.msra.mxu0 %v3581_v58 }
 0x93e   : > { %v3810_v1 = vpop.xlane.xlu2 %3809 }
 0x93f   : > { %v3811_v4 = vsub.f32 %v3807_v27, %v3810_v1 }
 0x941   : > { %v3812_v6 = vmul.f32 1.442695, %v3811_v4 }
 0x943   : > { %8144 = vpow2.f32 %v3812_v6 }
 0x946   : > { %v3833_v34 = vpop.permute.xlu2 %3832 }
 0x949   : > { %v9973_v62 = vpop.eup %8144 }
 0x94a   : > { %v3814_v7 = vsel %vm3086_vm1, %v9973_v62, 0.0 }
 0x94b   : > { %3815 = vadd.xlane.f32.xlu1 %v3814_v7 }
 0x94d   : > { %v3525_v9 = vpop.xlane.xlu0 %3524 }
 0x94e   : > { %v3526_v10 = vmul.f32 %v3525_v9, %v9961_v55  ;;  %v4009_v6 = vpop.permute.xlu2 %4008 }
 0x950   : > { %v3527_v11 = vadd.f32 1e-05, %v3526_v10 }
 0x952   : > { %8146 = vrsqrt.f32 %v3527_v11  ;;  %vm3534_vm9 = vweird.f32 %v3527_v11 }
 0x958   : > { %v8147_v12 = vpop.eup %8146 }
 0x959   : > { %v3529_v13 = vmul.f32 %v8147_v12, %v3527_v11  ;;  %vm3535_vm8 = vweird.f32 %v8147_v12 }
 0x95a   : > { %vm3536_vm10 = vmor %vm3534_vm9, %vm3535_vm8 }
 0x95b   : > { %v3530_v14 = vmul.f32 %v8147_v12, %v3529_v13 }
 0x95d   : > { %v3531_v15 = vmul.f32 0.5, %v3530_v14 }
 0x95f   : > { %v3532_v17 = vsub.f32 1.5, %v3531_v15 }
 0x960   : > { %v3907_v35 = vpop.permute.xlu0 %3906 }
 0x961   : > { %v3533_v18 = vmul.f32 %v8147_v12, %v3532_v17 }
 0x963   : > { %v3537_v21 = vsel %vm3536_vm10, %v8147_v12, %v3533_v18 }
 0x964   : > { %v3538_v22 = vmul.f32 %v3537_v21, %v3521_v63  ;;  %3904 = vrot.lane.b32.xlu1 %v9908_v24, %s10961_s8  ;;  %v3580_v63 = vld [vmem:[%s10965_s2 + $0x8] sm:$0xff]  ;;  %s10973_s2 = sld [smem:[#allocation78_spill]] }
 0x965   : > { %3613 = vmatpush.msra.mxu0 %v3580_v63 }
 0x966   : > { %v3542_v23 = vmul.f32 %v9979_v20, %v3538_v22 }
 0x967   : > { %3614 = vmatpush.msra.mxu0 %v3579_v2 }
 0x968   : > { %v9988_v32 = vadd.f32 %v9984_v3, %v3542_v23  ;;  %v4011_v1 = vpop.permute.xlu0 %4010 }
 0x96a   : > { %7643 = vmatmul.msk.f32.vlgmr.msra.gmra.mxu3 %vm3030_vm0, %v9988_v32 }
 0x96b   : > { %3853 = vmatpush.msra.mxu3 %v3833_v34 }
 0x972   : > { %7647 = vmatmul.msk.f32.vlgmr.msrb.gmra.mxu3 %vm3086_vm1, %v9908_v24 }
 0x973   : > { %7654 = vmatpush.xpose.msk.msrb.mxu3 %vm3086_vm1, %v3907_v35 }
 0x9be   : > { %v3816_v24 = vpop.xlane.xlu1 %3815 }
 0x9bf   : > { %8148 = vrcp.f32 %v3816_v24  ;;  %v3828_v26 = vand.u32 2147483648, %v3816_v24  ;;  %v3826_v27 = vand.u32 2147483647, %v3816_v24  ;;  %vm3822_vm12 = vweird.f32 %v3816_v24 }
 0x9c1   : > { %v3829_v53 = vor.u32 1.1754944e-38, %v3828_v26  ;;  %vm3827_vm14 = vcmp.eq.f32.partialorder %v3826_v27, 8.507059e+37 }
 0x9c5   : > { %v8149_v45 = vpop.eup %8148 }
 0x9c6   : > { %v3818_v47 = vmul.f32 %v8149_v45, %v3816_v24  ;;  %vm3823_vm11 = vweird.f32 %v8149_v45 }
 0x9c7   : > { %vm3824_vm13 = vmor %vm3822_vm12, %vm3823_vm11 }
 0x9c8   : > { %v3819_v25 = vsub.f32 1.0, %v3818_v47 }
 0x9ca   : > { %v3820_v5 = vmul.f32 %v8149_v45, %v3819_v25 }
 0x9cc   : > { %v3821_v28 = vadd.f32 %v8149_v45, %v3820_v5 }
 0x9ce   : > { %v3825_v59 = vsel %vm3824_vm13, %v8149_v45, %v3821_v28 }
 0x9cf   : > { %v3830_v61 = vsel %vm3827_vm14, %v3829_v53, %v3825_v59 }
 0x9d0   : > { %v3831_v0 = vmul.f32 %v9973_v62, %v3830_v61  ;;  %v10017_v62 = vld [vmem:[%s10966_s20] ss:$0 sm:$0xff]  ;;  %s10969_s20 = smov 80  }
 0x9d2   : > { %7651 = vmatmul.msk.f32.vlgmr.msra.gmra.mxu3 %vm3086_vm1, %v3831_v0 }
 0x9d3   : > { %7658 = vmatpush.xpose.msk.msra.mxu3 %vm3086_vm1, %v4011_v1 }
 0x9d6   : > { %v3905_v4 = vpop.permute.xlu1 %3904 }
 0x9da   : > { %7655 = vmatmul.msk.f32.vlgmr.msrb.gmra.mxu3 %vm3086_vm1, %v3905_v4 }
 0x9db   : > { %4182 = vmatpush.msrb.mxu3 %v3594_v36 }
 0x9dd   : > { %4183 = vmatpush.msrb.mxu3 %v3593_v37 }
 0x9df   : > { %4184 = vmatpush.msrb.mxu3 %v3592_v39 }
 0x9e1   : > { %4185 = vmatpush.msrb.mxu3 %v3591_v41 }
 0x9e2   : > { %7659 = vmatmul.msk.f32.vlgmr.msra.gmra.mxu3 %vm3086_vm1, %v4009_v6 }
 0x9e3   : > { %4186 = vmatpush.msrb.mxu3 %v3590_v60 }
 0x9e5   : > { %4187 = vmatpush.msrb.mxu3 %v3589_v44 }
 0x9e7   : > { %4188 = vmatpush.msrb.mxu3 %v3588_v31  ;;  %v10030_v31 = vld [vmem:[%s10967_s25] ss:$0 sm:$0xff]  ;;  %s10970_s25 = smov 72  }
 0x9e9   : > { %4189 = vmatpush.msrb.mxu3 %v3587_v40 }
 0x9eb   : > { %4190 = vmatpush.msrb.mxu3 %v3586_v43 }
 0x9ed   : > { %v3575_v7 = vpop.f32.mrf.mxu3  ;;  %4191 = vmatpush.msrb.mxu3 %v3585_v46 }
 0x9ee   : > { %v3576_v9 = vadd.f32 %v10017_v62, %v3575_v7 }
 0x9ef   : > { %4192 = vmatpush.msrb.mxu3 %v3584_v19 }
 0x9f0   : > { %v3578_v10 = vmax.f32 %v3576_v9, 0.0 }
 0x9f1   : > { %4193 = vmatpush.msrb.mxu3 %v3583_v50 }
 0x9f2   : > { %3615 = vmatmul.f32.vlgmr.msra.gmra.mxu0 %v3578_v10 }
 0x9f3   : > { %4194 = vmatpush.msrb.mxu3 %v3582_v54 }
 0x9f5   : > { %v3720_v11 = vpop.f32.mrf.mxu3  ;;  %4195 = vmatpush.msrb.mxu3 %v3581_v58 }
 0x9f6   : > { %v3723_v12 = vmul.f32 0.35355338, %v3720_v11 }
 0x9f7   : > { %4196 = vmatpush.msrb.mxu3 %v3580_v63 }
 0x9f8   : > { %v3727_v13 = vadd.f32 %v9957_v56, %v3723_v12 }
 0x9f9   : > { %4197 = vmatpush.msrb.mxu3 %v3579_v2 }
 0x9fa   : > { %v3728_v14 = vsel %vm3086_vm1, %v3727_v13, -inf }
 0x9fb   : > { %3729 = vmax.xlane.f32.xlu1 %v3728_v14 }
 0xa55   : > { %v3855_v15 = vpop.f32.mrf.mxu3 }
 0xa5d   : > { %v3929_v17 = vpop.f32.mrf.mxu3 }
 0xa5e   : > { %v3932_v18 = vmul.f32 0.35355338, %v3929_v17 }
 0xa60   : > { %v3933_v21 = vadd.f32 %v9957_v56, %v3932_v18 }
 0xa62   : > { %v3934_v22 = vsel %vm3086_vm1, %v3933_v21, -inf }
 0xa63   : > { %3935 = vmax.xlane.f32.xlu0 %v3934_v22 }
 0xa65   : > { %v4033_v23 = vpop.f32.mrf.mxu3 }
 0xa66   : > { %v4036_v34 = vmul.f32 0.35355338, %v4033_v23 }
 0xa68   : > { %v4037_v35 = vadd.f32 %v9957_v56, %v4036_v34 }
 0xa6a   : > { %v4038_v36 = vsel %vm3086_vm1, %v4037_v35, -inf }
 0xa6b   : > { %4039 = vmax.xlane.f32.xlu2 %v4038_v36 }
 0xa6e   : > { %v3730_v37 = vpop.xlane.xlu1 %3729 }
 0xa6f   : > { %v3731_v39 = vsub.f32 %v3727_v13, %v3730_v37  ;;  %v3616_v24 = vpop.f32.mrf.mxu0 }
 0xa70   : > { %v3617_v40 = vadd.f32 %v10030_v31, %v3616_v24 }
 0xa71   : > { %v3732_v41 = vmul.f32 1.442695, %v3731_v39 }
 0xa72   : > { %v3619_v56 = vadd.f32 %v3617_v40, %v9988_v32 }
 0xa73   : > { %8150 = vpow2.f32 %v3732_v41 }
 0xa74   : > { %v3622_v43 = vsel %vm3030_vm0, %v3619_v56, 0.0 }
 0xa79   : > { %v8151_v60 = vpop.eup %8150 }
 0xa7a   : > { %v3734_v44 = vsel %vm3086_vm1, %v8151_v60, 0.0 }
 0xa7b   : > { %3735 = vadd.xlane.f32.xlu1 %v3734_v44 }
 0xa83   : > { %3752 = vrot.lane.b32.xlu2 %v9936_v38, %s10968_s16 }
 0xaac   : > { %3623 = vadd.xlane.f32.xlu2 %v3622_v43 }
 0xad6   : > { %v3936_v46 = vpop.xlane.xlu0 %3935 }
 0xad7   : > { %v3937_v45 = vsub.f32 %v3933_v21, %v3936_v46 }
 0xad9   : > { %v3938_v19 = vmul.f32 1.442695, %v3937_v45 }
 0xadb   : > { %8152 = vpow2.f32 %v3938_v19 }
 0xade   : > { %v4040_v47 = vpop.xlane.xlu2 %4039 }
 0xadf   : > { %v4041_v50 = vsub.f32 %v4037_v35, %v4040_v47 }
 0xae1   : > { %v8153_v25 = vpop.eup %8152  ;;  %v4042_v26 = vmul.f32 1.442695, %v4041_v50 }
 0xae2   : > { %v3940_v54 = vsel %vm3086_vm1, %v8153_v25, 0.0 }
 0xae3   : > { %8154 = vpow2.f32 %v4042_v26  ;;  %3941 = vadd.xlane.f32.xlu0 %v3940_v54  ;;  %v10067_v26 = vld [vmem:[%s10971_s0 + $0x10] sm:$0xff]  ;;  %v10071_v54 = vld [vmem:[%s10971_s0 + $0x8] sm:$0xff] }
 0xae6   : > { %v3753_v5 = vpop.permute.xlu2 %3752 }
 0xae7   : > { %3773 = vmatpush.msrb.mxu1 %v3753_v5  ;;  %v10074_v5 = vld [vmem:[%s10971_s0] sm:$0xff] }
 0xae9   : > { %3876 = vmatpush.msra.mxu1 %v9913_v30  ;;  %v10037_v32 = vpop.eup %8154 }
 0xaea   : > { %v4044_v27 = vsel %vm3086_vm1, %v10037_v32, 0.0 }
 0xaeb   : > { %4045 = vadd.xlane.f32.xlu1 %v4044_v27 }
 0xaee   : > { %v3736_v28 = vpop.xlane.xlu1 %3735 }
 0xaef   : > { %8156 = vrcp.f32 %v3736_v28  ;;  %v3748_v61 = vand.u32 2147483648, %v3736_v28  ;;  %v3746_v0 = vand.u32 2147483647, %v3736_v28  ;;  %vm3742_vm2 = vweird.f32 %v3736_v28 }
 0xaf1   : > { %v3749_v30 = vor.u32 1.1754944e-38, %v3748_v61  ;;  %vm3747_vm4 = vcmp.eq.f32.partialorder %v3746_v0, 8.507059e+37  ;;  %v10084_v0 = vld [vmem:[%s10973_s2] ss:$0 sm:$0xff]  ;;  %s10975_s2 = smov 32  }
 0xaf5   : > { %v8157_v53 = vpop.eup %8156 }
 0xaf6   : > { %v3738_v58 = vmul.f32 %v8157_v53, %v3736_v28  ;;  %vm3743_vm15 = vweird.f32 %v8157_v53 }
 0xaf7   : > { %3958 = vrot.lane.b32.xlu0 %v9936_v38, %s10969_s20  ;;  %vm3744_vm3 = vmor %vm3742_vm2, %vm3743_vm15 }
 0xaf8   : > { %v3739_v59 = vsub.f32 1.0, %v3738_v58 }
 0xafa   : > { %v3740_v63 = vmul.f32 %v8157_v53, %v3739_v59  ;;  %v10080_v59 = vld [vmem:[%s10972_s1] ss:$0 sm:$0xff]  ;;  %s10976_s1 = smov 120  }
 0xafc   : > { %v3741_v2 = vadd.f32 %v8157_v53, %v3740_v63 }
 0xafe   : > { %v3745_v1 = vsel %vm3744_vm3, %v8157_v53, %v3741_v2 }
 0xaff   : > { %v3750_v4 = vsel %vm3747_vm4, %v3749_v30, %v3745_v1  ;;  %v10093_v1 = vld [vmem:[%s10974_s5 + $0x18] sm:$0xff] }
 0xb00   : > { %v3751_v6 = vmul.f32 %v8151_v60, %v3750_v4  ;;  %v10096_v4 = vld [vmem:[%s10974_s5 + $0x10] sm:$0xff] }
 0xb02   : > { %7648 = vmatmul.msk.f32.vlgmr.msrb.gmra.mxu1 %vm3086_vm1, %v3751_v6  ;;  %v10100_v6 = vld [vmem:[%s10974_s5 + $0x8] sm:$0xff] }
 0xb04   : > { %4062 = vrot.lane.b32.xlu1 %v9936_v38, %s10970_s25 }
 0xb0a   : > { %7652 = vmatmul.msk.f32.vlgmr.msra.gmra.mxu1 %vm3086_vm1, %v3855_v15 }
 0xb1f   : > { %v3624_v7 = vpop.xlane.xlu2 %3623 }
 0xb20   : > { %v3625_v9 = vmul.f32 %v3624_v7, %v9961_v55  ;;  %v10104_v7 = vld [vmem:[%s10974_s5] sm:$0xff]  ;;  %s10978_s5 = smov 104  }
 0xb22   : > { %v10048_v10 = vsub.f32 %v3619_v56, %v3625_v9 }
 0xb24   : > { %v3627_v11 = vmul.f32 %v10048_v10, %v10048_v10 }
 0xb26   : > { %v3628_v12 = vsel %vm3030_vm0, %v3627_v11, 0.0 }
 0xb27   : > { %3629 = vadd.xlane.f32.xlu0 %v3628_v12 }
 0xb56   : > { %v3942_v13 = vpop.xlane.xlu0 %3941 }
 0xb57   : > { %8158 = vrcp.f32 %v3942_v13  ;;  %v3954_v21 = vand.u32 2147483648, %v3942_v13  ;;  %v3952_v22 = vand.u32 2147483647, %v3942_v13  ;;  %vm3948_vm6 = vweird.f32 %v3942_v13 }
 0xb59   : > { %v3955_v35 = vor.u32 1.1754944e-38, %v3954_v21  ;;  %vm3953_vm9 = vcmp.eq.f32.partialorder %v3952_v22, 8.507059e+37 }
 0xb5d   : > { %v8159_v14 = vpop.eup %8158 }
 0xb5e   : > { %v3944_v17 = vmul.f32 %v8159_v14, %v3942_v13  ;;  %v4046_v18 = vpop.xlane.xlu1 %4045  ;;  %vm3949_vm5 = vweird.f32 %v8159_v14 }
 0xb5f   : > { %8160 = vrcp.f32 %v4046_v18  ;;  %vm3950_vm8 = vmor %vm3948_vm6, %vm3949_vm5  ;;  %v4058_v56 = vand.u32 2147483648, %v4046_v18  ;;  %vm4052_vm11 = vweird.f32 %v4046_v18  ;;  %v4056_v43 = vand.u32 2147483647, %v4046_v18 }
 0xb60   : > { %v3945_v38 = vsub.f32 1.0, %v3944_v17 }
 0xb61   : > { %v4059_v45 = vor.u32 1.1754944e-38, %v4058_v56  ;;  %vm4057_vm13 = vcmp.eq.f32.partialorder %v4056_v43, 8.507059e+37 }
 0xb62   : > { %v3946_v15 = vmul.f32 %v8159_v14, %v3945_v38 }
 0xb64   : > { %v3947_v23 = vadd.f32 %v8159_v14, %v3946_v15  ;;  %v10114_v15 = vld [vmem:[#allocation4] ss:$0 sm:$0xff] }
 0xb65   : > { %v8161_v34 = vpop.eup %8160 }
 0xb66   : > { %v3951_v36 = vsel %vm3950_vm8, %v8159_v14, %v3947_v23  ;;  %v4048_v37 = vmul.f32 %v8161_v34, %v4046_v18  ;;  %vm4053_vm10 = vweird.f32 %v8161_v34 }
 0xb67   : > { %v3956_v39 = vsel %vm3953_vm9, %v3955_v35, %v3951_v36  ;;  %vm4054_vm12 = vmor %vm4052_vm11, %vm4053_vm10 }
 0xb68   : > { %v4049_v41 = vsub.f32 1.0, %v4048_v37  ;;  %v3957_v60 = vmul.f32 %v8153_v25, %v3956_v39 }
 0xb69   : > { %v3959_v44 = vpop.permute.xlu0 %3958 }
 0xb6a   : > { %v4050_v24 = vmul.f32 %v8161_v34, %v4049_v41  ;;  %3979 = vmatpush.msrb.mxu1 %v3959_v44 }
 0xb6b   : > { %7656 = vmatmul.msk.f32.vlgmr.msrb.gmra.mxu1 %vm3086_vm1, %v3957_v60 }
 0xb6c   : > { %v4051_v40 = vadd.f32 %v8161_v34, %v4050_v24  ;;  %4106 = vmatpush.msra.mxu1 %v9896_v16  ;;  %v10063_v16 = vld [vmem:[%s10971_s0 + $0x18] sm:$0xff]  ;;  %s10977_s0 = smov 88  }
 0xb6e   : > { %v4055_v46 = vsel %vm4054_vm12, %v8161_v34, %v4051_v40  ;;  %4296 = vmatpush.msrb.mxu1 %v10093_v1  ;;  %v10123_v34 = vld [vmem:[#allocation8] ss:$0 sm:$0xff] }
 0xb6f   : > { %v4060_v19 = vsel %vm4057_vm13, %v4059_v45, %v4055_v46 }
 0xb70   : > { %v4061_v50 = vmul.f32 %v10037_v32, %v4060_v19  ;;  %4297 = vmatpush.msrb.mxu1 %v10096_v4 }
 0xb72   : > { %4298 = vmatpush.msrb.mxu1 %v10100_v6 }
 0xb74   : > { %4299 = vmatpush.msrb.mxu1 %v10104_v7 }
 0xb76   : > { %v4063_v47 = vpop.permute.xlu1 %4062 }
 0xb77   : > { %4083 = vmatpush.msrb.mxu0 %v4063_v47 }
 0xb78   : > { %7660 = vmatmul.msk.f32.vlgmr.msrb.gmra.mxu0 %vm3086_vm1, %v4061_v50 }
 0xb79   : > { %4268 = vmatpush.msra.mxu0 %v10063_v16 }
 0xb7b   : > { %4269 = vmatpush.msra.mxu0 %v10067_v26 }
 0xb7d   : > { %4270 = vmatpush.msra.mxu0 %v10071_v54 }
 0xb7f   : > { %v3775_v25 = vpop.f32.mrf.mxu1  ;;  %4271 = vmatpush.msra.mxu0 %v10074_v5 }
 0xb80   : > { %7653 = vmatmul.msk.f32.vlgmr.msrb.gmra.mxu2 %vm3086_vm1, %v3775_v25 }
 0xb81   : > { %4173 = vmatpush.msrb.mxu2 %v9918_v33 }
 0xb83   : > { %4174 = vmatpush.msrb.mxu2 %v9922_v8 }
 0xb85   : > { %4175 = vmatpush.msrb.mxu2 %v9926_v57 }
 0xb87   : > { %4176 = vmatpush.msrb.mxu2 %v9930_v29  ;;  %v3878_v9 = vpop.f32.mrf.mxu1 }
 0xb9a   : > { %v3630_v33 = vpop.xlane.xlu0 %3629 }
 0xb9b   : > { %v3631_v8 = vmul.f32 %v3630_v33, %v9961_v55 }
 0xb9d   : > { %v3632_v57 = vadd.f32 1e-05, %v3631_v8 }
 0xb9f   : > { %8162 = vrsqrt.f32 %v3632_v57  ;;  %vm3639_vm15 = vweird.f32 %v3632_v57 }
 0xba5   : > { %v8163_v29 = vpop.eup %8162 }
 0xba6   : > { %v3634_v32 = vmul.f32 %v8163_v29, %v3632_v57  ;;  %vm3640_vm14 = vweird.f32 %v8163_v29 }
 0xba7   : > { %vm3641_vm2 = vmor %vm3639_vm15, %vm3640_vm14 }
 0xba8   : > { %v3635_v27 = vmul.f32 %v8163_v29, %v3634_v32 }
 0xbaa   : > { %v3636_v28 = vmul.f32 0.5, %v3635_v27 }
 0xbac   : > { %v3637_v53 = vsub.f32 1.5, %v3636_v28 }
 0xbae   : > { %v3638_v58 = vmul.f32 %v8163_v29, %v3637_v53 }
 0xbb0   : > { %v3642_v61 = vsel %vm3641_vm2, %v8163_v29, %v3638_v58 }
 0xbb1   : > { %v3643_v63 = vmul.f32 %v3642_v61, %v10048_v10 }
 0xbb3   : > { %v3647_v2 = vmul.f32 %v10080_v59, %v3643_v63  ;;  %v10154_v63 = vld [vmem:[%s9810_s15] ss:$0 sm:$0xff] }
 0xbb5   : > { %v10088_v30 = vadd.f32 %v10084_v0, %v3647_v2 }
 0xbb7   : > { %7663 = vmatmul.msk.f32.vlgmr.msra.gmra.mxu0 %vm3030_vm0, %v10088_v30 }
 0xbe8   : > { %v3981_v10 = vpop.f32.mrf.mxu1 }
 0xbe9   : > { %7657 = vmatmul.msk.f32.vlgmr.msra.gmra.mxu2 %vm3086_vm1, %v3981_v10 }
 0xbf5   : > { %v4085_v11 = vpop.f32.mrf.mxu0 }
 0xbf6   : > { %7661 = vmatmul.msk.f32.vlgmr.msra.gmra.mxu1 %vm3086_vm1, %v4085_v11 }
 0xbfe   : > { %7664 = vmatmul.msk.f32.vlgmr.msrb.gmra.mxu1 %vm3030_vm0, %v10088_v30 }
 0xc03   : > { %v3901_v12 = vpop.f32.mrf.mxu2 }
 0xc04   : > { %v3902_v14 = vadd.f32 %v3901_v12, %v3878_v9 }
 0xc34   : > { %v4273_v35 = vpop.f32.mrf.mxu0 }
 0xc35   : > { %v10126_v36 = vadd.f32 %v10123_v34, %v4273_v35 }
 0xc6c   : > { %v4004_v13 = vpop.f32.mrf.mxu2 }
 0xc6d   : > { %v4007_v17 = vadd.f32 %v4004_v13, %v3902_v14 }
 0xc73   : > { %v4108_v18 = vpop.f32.mrf.mxu1 }
 0xc74   : > { %v4111_v38 = vadd.f32 %v4108_v18, %v4007_v17 }
 0xc76   : > { %v4112_v21 = vadd.f32 %v9951_v42, %v4111_v38 }
 0xc78   : > { %4114 = vrot.lane.b32.xlu1 %v4112_v21, %s10975_s2 }
 0xc7b   : > { %v4301_v22 = vpop.f32.mrf.mxu1 }
 0xc7c   : > { %v10117_v23 = vadd.f32 %v10114_v15, %v4301_v22 }
 0xc7e   : > { %4388 = vrot.lane.b32.xlu0 %v10117_v23, %s10976_s1  ;;  %7665 = vmatpush.xpose.msk.msra.mxu2 %vm3086_vm1, %v10117_v23 }
 0xc86   : > { %4386 = vrot.lane.b32.xlu0 %v10126_v36, %s10976_s1 }
 0xc8e   : > { %4152 = vrot.lane.b32.xlu0 %v9984_v3, %s10975_s2 }
 0xcea   : > { %v4115_v42 = vpop.permute.xlu1 %4114 }
 0xceb   : > { %v4117_v37 = vadd.f32 %v4115_v42, %v9885_v49 }
 0xced   : > { %4119 = vrot.lane.b32.xlu1 %v4117_v37, %s10968_s16 }
 0xcf0   : > { %v4389_v39 = vpop.permute.xlu0 %4388 }
 0xcf1   : > { %7668 = vmatpush.xpose.msk.msra.mxu1 %vm3086_vm1, %v4389_v39 }
 0xcf8   : > { %v4387_v41 = vpop.permute.xlu0 %4386 }
 0xcf9   : > { %7669 = vmatmul.msk.f32.vlgmr.msra.gmra.mxu1 %vm3086_vm1, %v4387_v41 }
 0xd00   : > { %v4153_v27 = vpop.permute.xlu0 %4152 }
 0xd5f   : > { %v4120_v60 = vpop.permute.xlu1 %4119 }
 0xd60   : > { %v4122_v44 = vsel %vm3030_vm0, %v4120_v60, 0.0 }
 0xd61   : > { %4123 = vadd.xlane.f32.xlu1 %v4122_v44 }
 0xd76   : > { %v4411_v58 = vpop.f32.mrf.mxu1 }
 0xd77   : > { %v4414_v61 = vmul.f32 0.35355338, %v4411_v58 }
 0xd79   : > { %v4415_v2 = vadd.f32 %v10154_v63, %v4414_v61 }
 0xd7a   : > { %4148 = vrot.lane.b32.xlu1 %v9979_v20, %s10975_s2 }
 0xd7b   : > { %v4416_v9 = vsel %vm3086_vm1, %v4415_v2, -inf }
 0xdd4   : > { %v4124_v24 = vpop.xlane.xlu1 %4123 }
 0xdd5   : > { %v4125_v3 = vmul.f32 %v4124_v24, %v9961_v55 }
 0xdd7   : > { %v4126_v40 = vsub.f32 %v4117_v37, %v4125_v3 }
 0xdd9   : > { %v4127_v49 = vmul.f32 %v4126_v40, %v4126_v40 }
 0xddb   : > { %4129 = vrot.lane.b32.xlu2 %v4127_v49, %s10968_s16 }
 0xdec   : > { %v4149_v29 = vpop.permute.xlu1 %4148 }
 0xe35   : > { %v4130_v56 = vpop.permute.xlu2 %4129 }
 0xe36   : > { %v4132_v43 = vsel %vm3030_vm0, %v4130_v56, 0.0 }
 0xe37   : > { %4133 = vadd.xlane.f32.xlu2 %v4132_v43 }
 0xe4f   : > { %4440 = vrot.lane.b32.xlu2 %v10117_v23, %s10977_s0 }
 0xe57   : > { %4514 = vrot.lane.b32.xlu2 %v10117_v23, %s10961_s8 }
 0xe5f   : > { %4618 = vrot.lane.b32.xlu2 %v10117_v23, %s10978_s5 }
 0xeaa   : > { %v4134_v20 = vpop.xlane.xlu2 %4133 }
 0xeab   : > { %v4135_v46 = vmul.f32 %v4134_v20, %v9961_v55 }
 0xead   : > { %v4136_v45 = vadd.f32 1e-05, %v4135_v46 }
 0xeaf   : > { %8164 = vrsqrt.f32 %v4136_v45  ;;  %vm4143_vm4 = vweird.f32 %v4136_v45 }
 0xeb2   : > { %v4441_v10 = vpop.permute.xlu2 %4440 }
 0xeb5   : > { %v8165_v19 = vpop.eup %8164 }
 0xeb6   : > { %v4138_v47 = vmul.f32 %v8165_v19, %v4136_v45  ;;  %vm4144_vm3 = vweird.f32 %v8165_v19 }
 0xeb7   : > { %vm4145_vm5 = vmor %vm4143_vm4, %vm4144_vm3 }
 0xeb8   : > { %v4139_v50 = vmul.f32 %v8165_v19, %v4138_v47 }
 0xeba   : > { %v4140_v25 = vmul.f32 0.5, %v4139_v50  ;;  %v4515_v12 = vpop.permute.xlu2 %4514 }
 0xebc   : > { %v4141_v33 = vsub.f32 1.5, %v4140_v25 }
 0xebe   : > { %v4142_v8 = vmul.f32 %v8165_v19, %v4141_v33 }
 0xec0   : > { %v4146_v57 = vsel %vm4145_vm5, %v8165_v19, %v4142_v8 }
 0xec1   : > { %v4147_v32 = vmul.f32 %v4146_v57, %v4126_v40 }
 0xec3   : > { %v4151_v28 = vmul.f32 %v4149_v29, %v4147_v32 }
 0xec5   : > { %v10149_v53 = vadd.f32 %v4153_v27, %v4151_v28 }
 0xec7   : > { %4157 = vrot.lane.b32.xlu0 %v10149_v53, %s10968_s16 }
 0xef1   : > { %4417 = vmax.xlane.f32.xlu0 %v4416_v9 }
 0xf05   : > { %4512 = vrot.lane.b32.xlu0 %v10126_v36, %s10961_s8 }
 0xf39   : > { %v4158_v11 = vpop.permute.xlu0 %4157 }
 0xf3a   : > { %7662 = vmatmul.msk.f32.vlgmr.msrb.gmra.mxu2 %vm3030_vm0, %v4158_v11 }
 0xf3b   : > { %4461 = vmatpush.msrb.mxu2 %v4441_v10 }
 0xf42   : > { %7666 = vmatmul.msk.f32.vlgmr.msra.gmra.mxu2 %vm3086_vm1, %v10126_v36 }
 0xf43   : > { %7673 = vmatpush.xpose.msk.msra.mxu2 %vm3086_vm1, %v4515_v12 }
 0xf64   : > { %v4418_v13 = vpop.xlane.xlu0 %4417 }
 0xf65   : > { %v4419_v14 = vsub.f32 %v4415_v2, %v4418_v13 }
 0xf67   : > { %v4420_v17 = vmul.f32 1.442695, %v4419_v14 }
 0xf69   : > { %8166 = vpow2.f32 %v4420_v17 }
 0xf6f   : > { %v8167_v18 = vpop.eup %8166 }
 0xf70   : > { %v4422_v38 = vsel %vm3086_vm1, %v8167_v18, 0.0 }
 0xf71   : > { %4423 = vadd.xlane.f32.xlu1 %v4422_v38 }
 0xf77   : > { %v4513_v43 = vpop.permute.xlu0 %4512 }
 0xf8a   : > { %4616 = vrot.lane.b32.xlu1 %v10126_v36, %s10978_s5 }
 0xfbd   : > { %v4178_v21 = vpop.f32.mrf.mxu2 }
 0xfbe   : > { %v4179_v22 = vadd.f32 %v10017_v62, %v4178_v21  ;;  %v4619_v62 = vpop.permute.xlu2 %4618 }
 0xfc0   : > { %v4181_v35 = vmax.f32 %v4179_v22, 0.0 }
 0xfc2   : > { %4198 = vmatmul.f32.vlgmr.msrb.gmra.mxu3 %v4181_v35 }
 0xfc5   : > { %v4331_v19 = vpop.f32.mrf.mxu2 }
 0xfc6   : > { %v4334_v61 = vmul.f32 0.35355338, %v4331_v19 }
 0xfc8   : > { %v4335_v9 = vadd.f32 %v10154_v63, %v4334_v61 }
 0xfca   : > { %v4336_v12 = vsel %vm3086_vm1, %v4335_v9, -inf }
 0xfe4   : > { %v4424_v42 = vpop.xlane.xlu1 %4423 }
 0xfe5   : > { %8168 = vrcp.f32 %v4424_v42  ;;  %v4436_v60 = vand.u32 2147483648, %v4424_v42  ;;  %v4434_v24 = vand.u32 2147483647, %v4424_v42  ;;  %vm4430_vm8 = vweird.f32 %v4424_v42 }
 0xfe7   : > { %v4437_v40 = vor.u32 1.1754944e-38, %v4436_v60  ;;  %vm4435_vm10 = vcmp.eq.f32.partialorder %v4434_v24, 8.507059e+37 }
 0xfeb   : > { %v8169_v37 = vpop.eup %8168 }
 0xfec   : > { %v4426_v39 = vmul.f32 %v8169_v37, %v4424_v42  ;;  %vm4431_vm6 = vweird.f32 %v8169_v37 }
 0xfed   : > { %vm4432_vm9 = vmor %vm4430_vm8, %vm4431_vm6 }
 0xfee   : > { %v4427_v41 = vsub.f32 1.0, %v4426_v39 }
 0xff0   : > { %v4428_v44 = vmul.f32 %v8169_v37, %v4427_v41 }
 0xff2   : > { %v4429_v3 = vadd.f32 %v8169_v37, %v4428_v44 }
 0xff4   : > { %v4433_v49 = vsel %vm4432_vm9, %v8169_v37, %v4429_v3 }
 0xff5   : > { %v4438_v36 = vsel %vm4435_vm10, %v4437_v40, %v4433_v49 }
 0xff6   : > { %v4439_v56 = vmul.f32 %v8167_v18, %v4438_v36 }
 0xff8   : > { %7670 = vmatmul.msk.f32.vlgmr.msrb.gmra.mxu2 %vm3086_vm1, %v4439_v56 }
 0xff9   : > { %7677 = vmatpush.xpose.msk.msrb.mxu2 %vm3086_vm1, %v4619_v62 }
 0xffc   : > { %v4617_v20 = vpop.permute.xlu1 %4616 }
0x1000   : > { %7674 = vmatmul.msk.f32.vlgmr.msra.gmra.mxu2 %vm3086_vm1, %v4513_v43 }
0x1008   : > { %7678 = vmatmul.msk.f32.vlgmr.msrb.gmra.mxu2 %vm3086_vm1, %v4617_v20 }
0x1045   : > { %v4199_v46 = vpop.f32.mrf.mxu3 }
0x1046   : > { %v4200_v45 = vadd.f32 %v10030_v31, %v4199_v46 }
0x1048   : > { %4203 = vrot.lane.b32.xlu2 %v4200_v45, %s10975_s2 }
0x107b   : > { %v10174_v47 = vpop.f32.mrf.mxu2 }
0x1083   : > { %v4537_v50 = vpop.f32.mrf.mxu2 }
0x1084   : > { %v4540_v31 = vmul.f32 0.35355338, %v4537_v50  ;;  %v10212_v50 = vld [vmem:[%s10979_s6 + $0x8] sm:$0xff] }
0x1086   : > { %v4541_v27 = vadd.f32 %v10154_v63, %v4540_v31 }
0x1088   : > { %v4542_v28 = vsel %vm3086_vm1, %v4541_v27, -inf }
0x108b   : > { %v4641_v25 = vpop.f32.mrf.mxu2 }
0x108c   : > { %v4644_v33 = vmul.f32 0.35355338, %v4641_v25 }
0x108e   : > { %v4645_v8 = vadd.f32 %v10154_v63, %v4644_v33 }
0x1090   : > { %v4646_v57 = vsel %vm3086_vm1, %v4645_v8, -inf }
0x1091   : > { %4647 = vmax.xlane.f32.xlu0 %v4646_v57 }
0x10a2   : > { %v4204_v29 = vpop.permute.xlu2 %4203 }
0x10a3   : > { %v4206_v32 = vadd.f32 %v4204_v29, %v10149_v53 }
0x10a5   : > { %4208 = vrot.lane.b32.xlu2 %v4206_v32, %s10968_s16  ;;  %4670 = vrot.lane.b32.xlu0 %v10117_v23, %s10970_s25 }
0x10cf   : > { %4543 = vmax.xlane.f32.xlu0 %v4542_v28 }
0x10e3   : > { %4360 = vrot.lane.b32.xlu0 %v10117_v23, %s10968_s16 }
0x10ff   : > { %v4209_v58 = vpop.permute.xlu2 %4208 }
0x1100   : > { %v4211_v2 = vsel %vm3030_vm0, %v4209_v58, 0.0 }
0x1101   : > { %4212 = vadd.xlane.f32.xlu1 %v4211_v2 }
0x1104   : > { %v4648_v53 = vpop.xlane.xlu0 %4647 }
0x1105   : > { %v4649_v10 = vsub.f32 %v4645_v8, %v4648_v53 }
0x1107   : > { %v4650_v11 = vmul.f32 1.442695, %v4649_v10 }
0x1109   : > { %8170 = vpow2.f32 %v4650_v11  ;;  %4337 = vmax.xlane.f32.xlu1 %v4336_v12 }
0x110f   : > { %v8171_v13 = vpop.eup %8170 }
0x1110   : > { %v4652_v14 = vsel %vm3086_vm1, %v8171_v13, 0.0 }
0x1111   : > { %4653 = vadd.xlane.f32.xlu2 %v4652_v14 }
0x1117   : > { %v4671_v17 = vpop.permute.xlu0 %4670 }
0x1118   : > { %4691 = vmatpush.msra.mxu3 %v4671_v17 }
0x111a   : > { %4880 = vmatpush.msrb.mxu3 %v10063_v16 }
0x111c   : > { %4881 = vmatpush.msrb.mxu3 %v10067_v26 }
0x111e   : > { %4882 = vmatpush.msrb.mxu3 %v10071_v54 }
0x1120   : > { %4883 = vmatpush.msrb.mxu3 %v10074_v5 }
0x1142   : > { %v4544_v63 = vpop.xlane.xlu0 %4543 }
0x1143   : > { %v4545_v62 = vsub.f32 %v4541_v27, %v4544_v63 }
0x1145   : > { %v4546_v43 = vmul.f32 1.442695, %v4545_v62  ;;  %v10247_v62 = vld [vmem:[%s10980_s7 + $0x10] sm:$0xff] }
0x1155   : > { %v4361_v18 = vpop.permute.xlu0 %4360 }
0x1156   : > { %4381 = vmatpush.msrb.mxu0 %v4361_v18 }
0x1158   : > { %4484 = vmatpush.msra.mxu0 %v10212_v50 }
0x1174   : > { %v4213_v38 = vpop.xlane.xlu1 %4212 }
0x1175   : > { %v4214_v21 = vmul.f32 %v4213_v38, %v9961_v55 }
0x1177   : > { %v10195_v22 = vsub.f32 %v4206_v32, %v4214_v21 }
0x1179   : > { %v4216_v35 = vmul.f32 %v10195_v22, %v10195_v22 }
0x117b   : > { %4218 = vrot.lane.b32.xlu2 %v4216_v35, %s10968_s16 }
0x117c   : > { %v4338_v16 = vpop.xlane.xlu1 %4337 }
0x117d   : > { %v4339_v42 = vsub.f32 %v4335_v9, %v4338_v16 }
0x117f   : > { %v4340_v26 = vmul.f32 1.442695, %v4339_v42 }
0x1181   : > { %8172 = vpow2.f32 %v4340_v26 }
0x1183   : > { %4237 = vrot.lane.b32.xlu2 %v10080_v59, %s10975_s2 }
0x1184   : > { %v4654_v54 = vpop.xlane.xlu2 %4653 }
0x1185   : > { %8174 = vrcp.f32 %v4654_v54  ;;  %v4666_v44 = vand.u32 2147483648, %v4654_v54  ;;  %v4664_v3 = vand.u32 2147483647, %v4654_v54  ;;  %vm4660_vm12 = vweird.f32 %v4654_v54 }
0x1186   : > { %8176 = vpow2.f32 %v4546_v43  ;;  %v10256_v43 = vld [vmem:[%s10980_s7] sm:$0xff] }
0x1187   : > { %v8173_v5 = vpop.eup %8172  ;;  %v4667_v49 = vor.u32 1.1754944e-38, %v4666_v44  ;;  %vm4665_vm14 = vcmp.eq.f32.partialorder %v4664_v3, 8.507059e+37 }
0x1188   : > { %v4342_v37 = vsel %vm3086_vm1, %v8173_v5, 0.0 }
0x1189   : > { %4343 = vadd.xlane.f32.xlu1 %v4342_v37 }
0x118b   : > { %v8175_v39 = vpop.eup %8174 }
0x118c   : > { %v4656_v41 = vmul.f32 %v8175_v39, %v4654_v54  ;;  %vm4661_vm11 = vweird.f32 %v8175_v39  ;;  %v10204_v20 = vpop.eup %8176 }
0x118d   : > { %vm4662_vm13 = vmor %vm4660_vm12, %vm4661_vm11  ;;  %v4548_v46 = vsel %vm3086_vm1, %v10204_v20, 0.0 }
0x118e   : > { %v4657_v60 = vsub.f32 1.0, %v4656_v41 }
0x1190   : > { %v4658_v24 = vmul.f32 %v8175_v39, %v4657_v60 }
0x1192   : > { %v4659_v40 = vadd.f32 %v8175_v39, %v4658_v24 }
0x1194   : > { %v4663_v36 = vsel %vm4662_vm13, %v8175_v39, %v4659_v40  ;;  %v4304_v40 = vld [vmem:[%s10979_s6] sm:$0xff] }
0x1195   : > { %v4668_v59 = vsel %vm4665_vm14, %v4667_v49, %v4663_v36  ;;  %4507 = vmatpush.msrb.mxu1 %v4304_v40 }
0x1196   : > { %v4669_v56 = vmul.f32 %v8171_v13, %v4668_v59  ;;  %v4306_v59 = vld [vmem:[%s10979_s6 + $0x10] sm:$0xff] }
0x1197   : > { %4610 = vmatpush.msra.mxu1 %v4306_v59 }
0x1198   : > { %7679 = vmatmul.msk.f32.vlgmr.msra.gmra.mxu3 %vm3086_vm1, %v4669_v56 }
0x11ac   : > { %4549 = vadd.xlane.f32.xlu2 %v4548_v46 }
0x11d5   : > { %v4219_v45 = vpop.permute.xlu2 %4218 }
0x11d6   : > { %v4221_v19 = vsel %vm3030_vm0, %v4219_v45, 0.0 }
0x11d7   : > { %4222 = vadd.xlane.f32.xlu1 %v4221_v19 }
0x11f0   : > { %4241 = vrot.lane.b32.xlu1 %v10084_v0, %s10975_s2 }
0x11f8   : > { %4566 = vrot.lane.b32.xlu1 %v10117_v23, %s10969_s20  ;;  %v4238_v23 = vpop.permute.xlu2 %4237 }
0x11fc   : > { %v4344_v25 = vpop.xlane.xlu1 %4343 }
0x11fd   : > { %8178 = vrcp.f32 %v4344_v25  ;;  %v4356_v29 = vand.u32 2147483648, %v4344_v25  ;;  %v4354_v31 = vand.u32 2147483647, %v4344_v25  ;;  %vm4350_vm2 = vweird.f32 %v4344_v25 }
0x11ff   : > { %v4357_v0 = vor.u32 1.1754944e-38, %v4356_v29  ;;  %vm4355_vm4 = vcmp.eq.f32.partialorder %v4354_v31, 8.507059e+37 }
0x1203   : > { %v8179_v33 = vpop.eup %8178 }
0x1204   : > { %v4346_v8 = vmul.f32 %v8179_v33, %v4344_v25  ;;  %vm4351_vm15 = vweird.f32 %v8179_v33 }
0x1205   : > { %vm4352_vm3 = vmor %vm4350_vm2, %vm4351_vm15 }
0x1206   : > { %v4347_v57 = vsub.f32 1.0, %v4346_v8 }
0x1208   : > { %v4348_v32 = vmul.f32 %v8179_v33, %v4347_v57 }
0x120a   : > { %v4349_v27 = vadd.f32 %v8179_v33, %v4348_v32  ;;  %v10268_v32 = vld [vmem:[#allocation6] ss:$0 sm:$0xff] }
0x120c   : > { %v4353_v28 = vsel %vm4352_vm3, %v8179_v33, %v4349_v27 }
0x120d   : > { %v4358_v58 = vsel %vm4355_vm4, %v4357_v0, %v4353_v28 }
0x120e   : > { %v4359_v61 = vmul.f32 %v8173_v5, %v4358_v58 }
0x1210   : > { %7667 = vmatmul.msk.f32.vlgmr.msrb.gmra.mxu0 %vm3086_vm1, %v4359_v61 }
0x1218   : > { %7671 = vmatmul.msk.f32.vlgmr.msra.gmra.mxu0 %vm3086_vm1, %v10174_v47 }
0x121b   : > { %v4693_v49 = vpop.f32.mrf.mxu3 }
0x121f   : > { %v4550_v2 = vpop.xlane.xlu2 %4549 }
0x1220   : > { %8180 = vrcp.f32 %v4550_v2  ;;  %v4562_v42 = vand.u32 2147483648, %v4550_v2  ;;  %vm4556_vm10 = vweird.f32 %v4550_v2  ;;  %v4560_v54 = vand.u32 2147483647, %v4550_v2 }
0x1222   : > { %v4563_v41 = vor.u32 1.1754944e-38, %v4562_v42  ;;  %vm4561_vm12 = vcmp.eq.f32.partialorder %v4560_v54, 8.507059e+37  ;;  %v10291_v54 = vld [vmem:[#allocation12] ss:$0 sm:$0xff] }
0x1226   : > { %v8181_v11 = vpop.eup %8180 }
0x1227   : > { %v4552_v12 = vmul.f32 %v8181_v11, %v4550_v2  ;;  %vm4557_vm9 = vweird.f32 %v8181_v11 }
0x1228   : > { %vm4558_vm11 = vmor %vm4556_vm10, %vm4557_vm9 }
0x1229   : > { %v4553_v17 = vsub.f32 1.0, %v4552_v12 }
0x122b   : > { %v4554_v38 = vmul.f32 %v8181_v11, %v4553_v17 }
0x122d   : > { %v4555_v35 = vadd.f32 %v8181_v11, %v4554_v38 }
0x122f   : > { %v4559_v39 = vsel %vm4558_vm11, %v8181_v11, %v4555_v35 }
0x1230   : > { %v4564_v44 = vsel %vm4561_vm12, %v4563_v41, %v4559_v39 }
0x1231   : > { %v4565_v3 = vmul.f32 %v10204_v20, %v4564_v44 }
0x124a   : > { %v4223_v53 = vpop.xlane.xlu1 %4222 }
0x124b   : > { %v4224_v9 = vmul.f32 %v4223_v53, %v9961_v55 }
0x124d   : > { %v4225_v10 = vadd.f32 1e-05, %v4224_v9 }
0x124f   : > { %8182 = vrsqrt.f32 %v4225_v10  ;;  %vm4232_vm6 = vweird.f32 %v4225_v10 }
0x1255   : > { %v8183_v13 = vpop.eup %8182 }
0x1256   : > { %v4227_v14 = vmul.f32 %v8183_v13, %v4225_v10  ;;  %vm4233_vm5 = vweird.f32 %v8183_v13  ;;  %v10283_v10 = vld [vmem:[%s9947_s10] ss:$0 sm:$0xff] }
0x1257   : > { %vm4234_vm8 = vmor %vm4232_vm6, %vm4233_vm5 }
0x1258   : > { %v4228_v63 = vmul.f32 %v8183_v13, %v4227_v14 }
0x125a   : > { %v4229_v18 = vmul.f32 0.5, %v4228_v63 }
0x125c   : > { %v4230_v21 = vsub.f32 1.5, %v4229_v18 }
0x125e   : > { %v4231_v47 = vmul.f32 %v8183_v13, %v4230_v21 }
0x1260   : > { %v4235_v16 = vsel %vm4234_vm8, %v8183_v13, %v4231_v47 }
0x1261   : > { %v4236_v26 = vmul.f32 %v4235_v16, %v10195_v22  ;;  %v10228_v22 = vld [vmem:[%s10979_s6 + $0x18] sm:$0xff]  ;;  %s10981_s6 = sld [smem:[#allocation85_spill]] }
0x1262   : > { %v4242_v5 = vpop.permute.xlu1 %4241  ;;  %v10289_v16 = vld [vmem:[#allocation14] ss:$0 sm:$0xff] }
0x1263   : > { %v4240_v37 = vmul.f32 %v4238_v23, %v4236_v26 }
0x1265   : > { %v10222_v60 = vadd.f32 %v4242_v5, %v4240_v37 }
0x1267   : > { %4864 = vrot.lane.b32.xlu1 %v10222_v60, %s10968_s16  ;;  %v10302_v44 = vld [vmem:[%s10981_s6 + $0x78] sm:$0xff] }
0x1268   : > { %4810 = vmatpush.msra.mxu2 %v10302_v44 }
0x126a   : > { %v4567_v24 = vpop.permute.xlu1 %4566 }
0x126b   : > { %4587 = vmatpush.msrb.mxu0 %v4567_v24  ;;  %v10305_v24 = vld [vmem:[%s10981_s6 + $0x70] sm:$0xff] }
0x126c   : > { %7675 = vmatmul.msk.f32.vlgmr.msrb.gmra.mxu0 %vm3086_vm1, %v4565_v3  ;;  %4811 = vmatpush.msra.mxu2 %v10305_v24  ;;  %v10310_v3 = vld [vmem:[%s10981_s6 + $0x68] sm:$0xff] }
0x126d   : > { %4714 = vmatpush.msra.mxu0 %v10228_v22 }
0x126e   : > { %4812 = vmatpush.msra.mxu2 %v10310_v3 }
0x126f   : > { %4900 = vmatpush.msrb.mxu0 %v10093_v1 }
0x1271   : > { %4901 = vmatpush.msrb.mxu0 %v10096_v4 }
0x1273   : > { %4902 = vmatpush.msrb.mxu0 %v10100_v6  ;;  %v10244_v6 = vld [vmem:[%s10980_s7 + $0x18] sm:$0xff] }
0x1274   : > { %7680 = vmatmul.msk.f32.vlgmr.msra.gmra.mxu0 %vm3086_vm1, %v4693_v49  ;;  %v10317_v49 = vld [vmem:[%s10981_s6 + $0x58] sm:$0xff] }
0x1275   : > { %4903 = vmatpush.msrb.mxu0 %v10104_v7  ;;  %v10251_v7 = vld [vmem:[%s10980_s7 + $0x8] sm:$0xff]  ;;  %s10983_s7 = sld [smem:[#allocation94_spill]] }
0x128d   : > { %v4383_v36 = vpop.f32.mrf.mxu0 }
0x128e   : > { %7672 = vmatmul.msk.f32.vlgmr.msrb.gmra.mxu1 %vm3086_vm1, %v4383_v36  ;;  %v10321_v36 = vld [vmem:[%s10981_s6 + $0x50] sm:$0xff] }
0x128f   : > { %4781 = vmatpush.msrb.mxu1 %v10244_v6 }
0x1291   : > { %4782 = vmatpush.msrb.mxu1 %v10247_v62 }
0x1293   : > { %4783 = vmatpush.msrb.mxu1 %v10251_v7 }
0x1295   : > { %v4486_v1 = vpop.f32.mrf.mxu0  ;;  %4784 = vmatpush.msrb.mxu1 %v10256_v43 }
0x12d9   : > { %v4865_v56 = vpop.permute.xlu1 %4864 }
0x12da   : > { %7682 = vmatmul.msk.f32.vlgmr.msrb.gmra.mxu3 %vm3030_vm0, %v4865_v56  ;;  %7683 = vmatmul.msk.f32.vlgmr.msrb.gmra.mxu0 %vm3030_vm0, %v4865_v56 }
0x12e9   : > { %v4589_v4 = vpop.f32.mrf.mxu0 }
0x12ea   : > { %7676 = vmatmul.msk.f32.vlgmr.msra.gmra.mxu1 %vm3086_vm1, %v4589_v4 }
0x12f1   : > { %v4716_v20 = vpop.f32.mrf.mxu0 }
0x130b   : > { %v4509_v33 = vpop.f32.mrf.mxu1 }
0x130c   : > { %v4510_v8 = vadd.f32 %v4509_v33, %v4486_v1  ;;  %v10329_v1 = vld [vmem:[%s10981_s6 + $0x40] sm:$0xff] }
0x130d   : > { %v4794_v33 = vld [vmem:[%s10981_s6 + $0x20] sm:$0xff] }
0x1357   : > { %v4905_v46 = vpop.f32.mrf.mxu0 }
0x1358   : > { %v10260_v45 = vadd.f32 %v10114_v15, %v4905_v46  ;;  %v4797_v46 = vld [vmem:[%s10981_s6 + $0x38] sm:$0xff] }
0x135a   : > { %4988 = vrot.lane.b32.xlu1 %v10260_v45, %s10976_s1  ;;  %7684 = vmatpush.xpose.msk.msra.mxu1 %vm3086_vm1, %v10260_v45 }
0x135d   : > { %v4885_v19 = vpop.f32.mrf.mxu3 }
0x135e   : > { %v4886_v25 = vadd.f32 %v10123_v34, %v4885_v19  ;;  %v4796_v19 = vld [vmem:[%s10981_s6 + $0x30] sm:$0xff] }
0x1360   : > { %4986 = vrot.lane.b32.xlu0 %v4886_v25, %s10976_s1 }
0x1367   : > { %v4612_v57 = vpop.f32.mrf.mxu1 }
0x1368   : > { %v4615_v29 = vadd.f32 %v4612_v57, %v4510_v8  ;;  %v4793_v57 = vld [vmem:[%s10981_s6 + $0x18] sm:$0xff] }
0x136a   : > { %v4719_v31 = vadd.f32 %v4716_v20, %v4615_v29 }
0x136c   : > { %v4724_v15 = vadd.f32 %v10268_v32, %v4719_v31  ;;  %v4792_v31 = vld [vmem:[%s10981_s6 + $0x10] sm:$0xff] }
0x136e   : > { %v4725_v27 = vadd.f32 %v4724_v15, %v10088_v30  ;;  %v4791_v15 = vld [vmem:[%s10981_s6 + $0x8] sm:$0xff] }
0x1370   : > { %v4728_v0 = vsel %vm3030_vm0, %v4725_v27, 0.0 }
0x1371   : > { %4729 = vadd.xlane.f32.xlu2 %v4728_v0  ;;  %v10344_v0 = vld [vmem:[#allocation9] ss:$0 sm:$0xff] }
0x1389   : > { %5040 = vrot.lane.b32.xlu2 %v10260_v45, %s10977_s0 }
0x1391   : > { %5114 = vrot.lane.b32.xlu2 %v10260_v45, %s10961_s8 }
0x13cc   : > { %v4989_v34 = vpop.permute.xlu1 %4988 }
0x13cd   : > { %7687 = vmatpush.xpose.msk.msra.mxu0 %vm3086_vm1, %v4989_v34 }
0x13d1   : > { %5107 = vmatpush.msrb.mxu0 %v4304_v40  ;;  %v10313_v40 = vld [vmem:[%s10981_s6 + $0x60] sm:$0xff] }
0x13d2   : > { %v4987_v28 = vpop.permute.xlu0 %4986  ;;  %4813 = vmatpush.msra.mxu2 %v10313_v40 }
0x13d3   : > { %7688 = vmatmul.msk.f32.vlgmr.msra.gmra.mxu0 %vm3086_vm1, %v4987_v28 }
0x13d4   : > { %5210 = vmatpush.msra.mxu0 %v4306_v59  ;;  %4814 = vmatpush.msra.mxu2 %v10317_v49  ;;  %v10325_v59 = vld [vmem:[%s10981_s6 + $0x48] sm:$0xff] }
0x13d6   : > { %4815 = vmatpush.msra.mxu2 %v10321_v36 }
0x13d8   : > { %4816 = vmatpush.msra.mxu2 %v10325_v59 }
0x13da   : > { %4817 = vmatpush.msra.mxu2 %v10329_v1 }
0x13dc   : > { %4818 = vmatpush.msra.mxu2 %v4797_v46 }
0x13de   : > { %4819 = vmatpush.msra.mxu2 %v4796_v19 }
0x13e4   : > { %v4730_v58 = vpop.xlane.xlu2 %4729 }
0x13e5   : > { %v4731_v30 = vmul.f32 %v4730_v58, %v9961_v55 }
0x13e7   : > { %v4732_v61 = vsub.f32 %v4725_v27, %v4731_v30  ;;  %v4790_v27 = vld [vmem:[%s10981_s6] sm:$0xff] }
0x13e9   : > { %v4733_v23 = vmul.f32 %v4732_v61, %v4732_v61 }
0x13eb   : > { %v4734_v2 = vsel %vm3030_vm0, %v4733_v23, 0.0 }
0x13ec   : > { %4735 = vadd.xlane.f32.xlu0 %v4734_v2  ;;  %v5041_v37 = vpop.permute.xlu2 %5040 }
0x13f4   : > { %v5115_v41 = vpop.permute.xlu2 %5114 }
0x1400   : > { %5216 = vrot.lane.b32.xlu0 %v4886_v25, %s10978_s5 }
0x1450   : > { %v5011_v53 = vpop.f32.mrf.mxu0 }
0x1451   : > { %v5014_v9 = vmul.f32 0.35355338, %v5011_v53 }
0x1453   : > { %v5015_v11 = vadd.f32 %v10283_v10, %v5014_v9 }
0x1455   : > { %v5016_v12 = vsel %vm3086_vm1, %v5015_v11, -inf }
0x1456   : > { %5017 = vmax.xlane.f32.xlu1 %v5016_v12 }
0x145f   : > { %v4736_v13 = vpop.xlane.xlu0 %4735 }
0x1460   : > { %v4737_v14 = vmul.f32 %v4736_v13, %v9961_v55 }
0x1462   : > { %v4738_v17 = vadd.f32 1e-05, %v4737_v14 }
0x1464   : > { %8184 = vrsqrt.f32 %v4738_v17  ;;  %vm4745_vm14 = vweird.f32 %v4738_v17 }
0x146a   : > { %v8185_v63 = vpop.eup %8184 }
0x146b   : > { %v4740_v18 = vmul.f32 %v8185_v63, %v4738_v17  ;;  %vm4746_vm13 = vweird.f32 %v8185_v63 }
0x146c   : > { %vm4747_vm15 = vmor %vm4745_vm14, %vm4746_vm13 }
0x146d   : > { %v4741_v38 = vmul.f32 %v8185_v63, %v4740_v18 }
0x146f   : > { %v4742_v21 = vmul.f32 0.5, %v4741_v38  ;;  %5112 = vrot.lane.b32.xlu1 %v4886_v25, %s10961_s8 }
0x1471   : > { %v4743_v47 = vsub.f32 1.5, %v4742_v21 }
0x1473   : > { %v4744_v35 = vmul.f32 %v8185_v63, %v4743_v47 }
0x1475   : > { %v4748_v42 = vsel %vm4747_vm15, %v8185_v63, %v4744_v35 }
0x1476   : > { %v4749_v26 = vmul.f32 %v4748_v42, %v4732_v61 }
0x1478   : > { %v4753_v5 = vmul.f32 %v10289_v16, %v4749_v26  ;;  %v5217_v26 = vpop.permute.xlu0 %5216 }
0x147a   : > { %v10295_v39 = vadd.f32 %v10291_v54, %v4753_v5 }
0x147c   : > { %7681 = vmatmul.msk.f32.vlgmr.msrb.gmra.mxu1 %vm3030_vm0, %v10295_v39 }
0x147d   : > { %5061 = vmatpush.msrb.mxu1 %v5041_v37 }
0x1484   : > { %7685 = vmatmul.msk.f32.vlgmr.msra.gmra.mxu1 %vm3086_vm1, %v4886_v25  ;;  %v4795_v25 = vld [vmem:[%s10981_s6 + $0x28] sm:$0xff]  ;;  %s10982_s6 = sld [smem:[#allocation96_spill]] }
0x1485   : > { %7692 = vmatpush.xpose.msk.msra.mxu1 %vm3086_vm1, %v5115_v41  ;;  %4820 = vmatpush.msra.mxu2 %v4795_v25 }
0x1487   : > { %4821 = vmatpush.msra.mxu2 %v4794_v33 }
0x1489   : > { %4822 = vmatpush.msra.mxu2 %v4793_v57 }
0x148b   : > { %4823 = vmatpush.msra.mxu2 %v4792_v31 }
0x148d   : > { %4824 = vmatpush.msra.mxu2 %v4791_v15 }
0x148f   : > { %4825 = vmatpush.msra.mxu2 %v4790_v27 }
0x14c9   : > { %v5018_v56 = vpop.xlane.xlu1 %5017 }
0x14ca   : > { %v5019_v4 = vsub.f32 %v5015_v11, %v5018_v56 }
0x14cc   : > { %v5020_v20 = vmul.f32 1.442695, %v5019_v4 }
0x14ce   : > { %8186 = vpow2.f32 %v5020_v20 }
0x14d4   : > { %v8187_v8 = vpop.eup %8186 }
0x14d5   : > { %v5022_v29 = vsel %vm3086_vm1, %v8187_v8, 0.0 }
0x14d6   : > { %5023 = vadd.xlane.f32.xlu2 %v5022_v29 }
0x14e1   : > { %v5113_v42 = vpop.permute.xlu1 %5112 }
0x14ee   : > { %5218 = vrot.lane.b32.xlu2 %v10260_v45, %s10978_s5 }
0x14f9   : > { %v4786_v34 = vpop.f32.mrf.mxu1 }
0x14fa   : > { %v4787_v28 = vadd.f32 %v10344_v0, %v4786_v34 }
0x14fc   : > { %v4789_v58 = vmax.f32 %v4787_v28, 0.0 }
0x14fe   : > { %4826 = vmatmul.f32.vlgmr.msra.gmra.mxu2 %v4789_v58 }
0x1501   : > { %v4931_v30 = vpop.f32.mrf.mxu1 }
0x1502   : > { %v4934_v61 = vmul.f32 0.35355338, %v4931_v30 }
0x1504   : > { %v4935_v23 = vadd.f32 %v10283_v10, %v4934_v61 }
0x1506   : > { %v4936_v2 = vsel %vm3086_vm1, %v4935_v23, -inf }
0x1517   : > { %4937 = vmax.xlane.f32.xlu2 %v4936_v2 }
0x1549   : > { %v5024_v53 = vpop.xlane.xlu2 %5023 }
0x154a   : > { %8188 = vrcp.f32 %v5024_v53  ;;  %v5036_v13 = vand.u32 2147483648, %v5024_v53  ;;  %v5034_v17 = vand.u32 2147483647, %v5024_v53  ;;  %vm5030_vm3 = vweird.f32 %v5024_v53 }
0x154c   : > { %v5037_v18 = vor.u32 1.1754944e-38, %v5036_v13  ;;  %vm5035_vm5 = vcmp.eq.f32.partialorder %v5034_v17, 8.507059e+37 }
0x1550   : > { %v8189_v9 = vpop.eup %8188 }
0x1551   : > { %v5026_v11 = vmul.f32 %v8189_v9, %v5024_v53  ;;  %vm5031_vm2 = vweird.f32 %v8189_v9  ;;  %v5219_v35 = vpop.permute.xlu2 %5218 }
0x1552   : > { %vm5032_vm4 = vmor %vm5030_vm3, %vm5031_vm2 }
0x1553   : > { %v5027_v12 = vsub.f32 1.0, %v5026_v11 }
0x1555   : > { %v5028_v14 = vmul.f32 %v8189_v9, %v5027_v12 }
0x1557   : > { %v5029_v63 = vadd.f32 %v8189_v9, %v5028_v14 }
0x1559   : > { %v5033_v38 = vsel %vm5032_vm4, %v8189_v9, %v5029_v63 }
0x155a   : > { %v5038_v21 = vsel %vm5035_vm5, %v5037_v18, %v5033_v38 }
0x155b   : > { %v5039_v47 = vmul.f32 %v8187_v8, %v5038_v21 }
0x155d   : > { %7689 = vmatmul.msk.f32.vlgmr.msrb.gmra.mxu1 %vm3086_vm1, %v5039_v47 }
0x155e   : > { %7696 = vmatpush.xpose.msk.msrb.mxu1 %vm3086_vm1, %v5219_v35 }
0x1565   : > { %7693 = vmatmul.msk.f32.vlgmr.msra.gmra.mxu1 %vm3086_vm1, %v5113_v42 }
0x1566   : > { %5390 = vmatpush.msra.mxu1 %v10302_v44 }
0x1568   : > { %5391 = vmatpush.msra.mxu1 %v10305_v24 }
0x156a   : > { %5392 = vmatpush.msra.mxu1 %v10310_v3 }
0x156c   : > { %5393 = vmatpush.msra.mxu1 %v10313_v40 }
0x156d   : > { %7697 = vmatmul.msk.f32.vlgmr.msrb.gmra.mxu1 %vm3086_vm1, %v5217_v26 }
0x156e   : > { %5394 = vmatpush.msra.mxu1 %v10317_v49 }
0x1570   : > { %5395 = vmatpush.msra.mxu1 %v10321_v36 }
0x1572   : > { %5396 = vmatpush.msra.mxu1 %v10325_v59 }
0x1574   : > { %5397 = vmatpush.msra.mxu1 %v10329_v1 }
0x1576   : > { %5398 = vmatpush.msra.mxu1 %v4797_v46 }
0x1578   : > { %5399 = vmatpush.msra.mxu1 %v4796_v19 }
0x157a   : > { %5400 = vmatpush.msra.mxu1 %v4795_v25 }
0x157c   : > { %5401 = vmatpush.msra.mxu1 %v4794_v33 }
0x157e   : > { %5402 = vmatpush.msra.mxu1 %v4793_v57 }
0x1580   : > { %5403 = vmatpush.msra.mxu1 %v4792_v31 }
0x1582   : > { %5404 = vmatpush.msra.mxu1 %v4791_v15 }
0x1584   : > { %5405 = vmatpush.msra.mxu1 %v4790_v27 }
0x158a   : > { %v4938_v5 = vpop.xlane.xlu2 %4937 }
0x158b   : > { %v4939_v37 = vsub.f32 %v4935_v23, %v4938_v5 }
0x158d   : > { %v4940_v41 = vmul.f32 1.442695, %v4939_v37 }
0x158f   : > { %8190 = vpow2.f32 %v4940_v41 }
0x1595   : > { %v8191_v44 = vpop.eup %8190 }
0x1596   : > { %v4942_v24 = vsel %vm3086_vm1, %v8191_v44, 0.0 }
0x1597   : > { %4943 = vadd.xlane.f32.xlu2 %v4942_v24 }
0x15da   : > { %v5063_v3 = vpop.f32.mrf.mxu1 }
0x15e2   : > { %v5137_v40 = vpop.f32.mrf.mxu1 }
0x15e3   : > { %v5140_v49 = vmul.f32 0.35355338, %v5137_v40 }
0x15e5   : > { %v5141_v36 = vadd.f32 %v10283_v10, %v5140_v49 }
0x15e7   : > { %v5142_v59 = vsel %vm3086_vm1, %v5141_v36, -inf }
0x15e8   : > { %5143 = vmax.xlane.f32.xlu1 %v5142_v59 }
0x15ea   : > { %v5241_v56 = vpop.f32.mrf.mxu1 }
0x15eb   : > { %v5244_v1 = vmul.f32 0.35355338, %v5241_v56 }
0x15ed   : > { %v5245_v4 = vadd.f32 %v10283_v10, %v5244_v1 }
0x15ef   : > { %v5246_v20 = vsel %vm3086_vm1, %v5245_v4, -inf }
0x15f0   : > { %5247 = vmax.xlane.f32.xlu0 %v5246_v20 }
0x1601   : > { %4960 = vrot.lane.b32.xlu1 %v10260_v45, %s10968_s16 }
0x160a   : > { %v4944_v46 = vpop.xlane.xlu2 %4943 }
0x160b   : > { %8192 = vrcp.f32 %v4944_v46  ;;  %v4956_v61 = vand.u32 2147483648, %v4944_v46  ;;  %vm4950_vm8 = vweird.f32 %v4944_v46  ;;  %v4954_v23 = vand.u32 2147483647, %v4944_v46 }
0x160d   : > { %v4957_v9 = vor.u32 1.1754944e-38, %v4956_v61  ;;  %vm4955_vm10 = vcmp.eq.f32.partialorder %v4954_v23, 8.507059e+37 }
0x1611   : > { %v8193_v19 = vpop.eup %8192 }
0x1612   : > { %v4946_v8 = vmul.f32 %v8193_v19, %v4944_v46  ;;  %vm4951_vm6 = vweird.f32 %v8193_v19 }
0x1613   : > { %vm4952_vm9 = vmor %vm4950_vm8, %vm4951_vm6 }
0x1614   : > { %v4947_v29 = vsub.f32 1.0, %v4946_v8 }
0x1616   : > { %v4948_v27 = vmul.f32 %v8193_v19, %v4947_v29 }
0x1618   : > { %v4949_v30 = vadd.f32 %v8193_v19, %v4948_v27 }
0x161a   : > { %v4953_v2 = vsel %vm4952_vm9, %v8193_v19, %v4949_v30 }
0x161b   : > { %v4958_v12 = vsel %vm4955_vm10, %v4957_v9, %v4953_v2 }
0x161c   : > { %v4959_v14 = vmul.f32 %v8191_v44, %v4958_v12 }
0x165b   : > { %v5144_v25 = vpop.xlane.xlu1 %5143 }
0x165c   : > { %v5145_v33 = vsub.f32 %v5141_v36, %v5144_v25  ;;  %v4827_v25 = vpop.f32.mrf.mxu2 }
0x165e   : > { %v5146_v57 = vmul.f32 1.442695, %v5145_v33 }
0x1660   : > { %8194 = vpow2.f32 %v5146_v57 }
0x1663   : > { %v5248_v31 = vpop.xlane.xlu0 %5247 }
0x1664   : > { %v5249_v15 = vsub.f32 %v5245_v4, %v5248_v31 }
0x1666   : > { %v8195_v34 = vpop.eup %8194  ;;  %v5250_v28 = vmul.f32 1.442695, %v5249_v15 }
0x1667   : > { %v5148_v58 = vsel %vm3086_vm1, %v8195_v34, 0.0 }
0x1668   : > { %8196 = vpow2.f32 %v5250_v28  ;;  %5149 = vadd.xlane.f32.xlu0 %v5148_v58 }
0x166e   : > { %v8197_v53 = vpop.eup %8196 }
0x166f   : > { %v5252_v11 = vsel %vm3086_vm1, %v8197_v53, 0.0 }
0x1670   : > { %5253 = vadd.xlane.f32.xlu2 %v5252_v11 }
0x1673   : > { %v4961_v13 = vpop.permute.xlu1 %4960 }
0x1674   : > { %4981 = vmatpush.msra.mxu3 %v4961_v13 }
0x1675   : > { %7686 = vmatmul.msk.f32.vlgmr.msra.gmra.mxu3 %vm3086_vm1, %v4959_v14 }
0x1676   : > { %5084 = vmatpush.msrb.mxu3 %v10212_v50 }
0x167c   : > { %5166 = vrot.lane.b32.xlu0 %v10260_v45, %s10969_s20 }
0x167d   : > { %7690 = vmatmul.msk.f32.vlgmr.msrb.gmra.mxu3 %vm3086_vm1, %v5063_v3 }
0x1688   : > { %5270 = vrot.lane.b32.xlu2 %v10260_v45, %s10970_s25 }
0x16db   : > { %v5150_v17 = vpop.xlane.xlu0 %5149 }
0x16dc   : > { %8198 = vrcp.f32 %v5150_v17  ;;  %v5162_v47 = vand.u32 2147483648, %v5150_v17  ;;  %v5160_v42 = vand.u32 2147483647, %v5150_v17  ;;  %vm5156_vm12 = vweird.f32 %v5150_v17 }
0x16de   : > { %v5163_v5 = vor.u32 1.1754944e-38, %v5162_v47  ;;  %vm5161_vm14 = vcmp.eq.f32.partialorder %v5160_v42, 8.507059e+37 }
0x16e2   : > { %v8199_v63 = vpop.eup %8198 }
0x16e3   : > { %v5152_v18 = vmul.f32 %v8199_v63, %v5150_v17  ;;  %v5254_v38 = vpop.xlane.xlu2 %5253  ;;  %vm5157_vm11 = vweird.f32 %v8199_v63 }
0x16e4   : > { %8200 = vrcp.f32 %v5254_v38  ;;  %vm5158_vm13 = vmor %vm5156_vm12, %vm5157_vm11  ;;  %v5266_v40 = vand.u32 2147483648, %v5254_v38  ;;  %v5264_v59 = vand.u32 2147483647, %v5254_v38  ;;  %vm5260_vm2 = vweird.f32 %v5254_v38 }
0x16e5   : > { %v5153_v21 = vsub.f32 1.0, %v5152_v18 }
0x16e6   : > { %v5267_v1 = vor.u32 1.1754944e-38, %v5266_v40  ;;  %vm5265_vm4 = vcmp.eq.f32.partialorder %v5264_v59, 8.507059e+37 }
0x16e7   : > { %v5154_v35 = vmul.f32 %v8199_v63, %v5153_v21 }
0x16e9   : > { %v5155_v50 = vadd.f32 %v8199_v63, %v5154_v35 }
0x16ea   : > { %v8201_v26 = vpop.eup %8200 }
0x16eb   : > { %v5159_v37 = vsel %vm5158_vm13, %v8199_v63, %v5155_v50  ;;  %v5256_v41 = vmul.f32 %v8201_v26, %v5254_v38  ;;  %v5271_v45 = vpop.permute.xlu2 %5270  ;;  %vm5261_vm15 = vweird.f32 %v8201_v26 }
0x16ec   : > { %v5164_v44 = vsel %vm5161_vm14, %v5163_v5, %v5159_v37  ;;  %5291 = vmatpush.msrb.mxu2 %v5271_v45  ;;  %vm5262_vm3 = vmor %vm5260_vm2, %vm5261_vm15  ;;  %v8113_v5 = vld [vmem:[#allocation11] ss:$0 sm:$0xff] }
0x16ed   : > { %v5257_v24 = vsub.f32 1.0, %v5256_v41  ;;  %v5165_v3 = vmul.f32 %v8195_v34, %v5164_v44 }
0x16ee   : > { %v5167_v49 = vpop.permute.xlu0 %5166 }
0x16ef   : > { %v5258_v36 = vmul.f32 %v8201_v26, %v5257_v24  ;;  %5187 = vmatpush.msra.mxu3 %v5167_v49  ;;  %v4828_v24 = vadd.f32 %v8113_v5, %v4827_v25 }
0x16f0   : > { %7694 = vmatmul.msk.f32.vlgmr.msra.gmra.mxu3 %vm3086_vm1, %v5165_v3 }
0x16f1   : > { %v5259_v56 = vadd.f32 %v8201_v26, %v5258_v36  ;;  %5314 = vmatpush.msrb.mxu3 %v10228_v22  ;;  %v4830_v3 = vadd.f32 %v4828_v24, %v10295_v39 }
0x16f3   : > { %v5263_v4 = vsel %vm5262_vm3, %v8201_v26, %v5259_v56  ;;  %v4833_v40 = vsel %vm3030_vm0, %v4830_v3, 0.0 }
0x16f4   : > { %v5268_v20 = vsel %vm5265_vm4, %v5267_v1, %v5263_v4  ;;  %v10410_v4 = vld [vmem:[#allocation17] ss:$0 sm:$0xff] }
0x16f5   : > { %v5269_v46 = vmul.f32 %v8197_v53, %v5268_v20  ;;  %v10412_v20 = vld [vmem:[#allocation15] ss:$0 sm:$0xff] }
0x16f7   : > { %7698 = vmatmul.msk.f32.vlgmr.msrb.gmra.mxu2 %vm3086_vm1, %v5269_v46 }
0x16f8   : > { %v4983_v19 = vpop.f32.mrf.mxu3 }
0x16f9   : > { %7691 = vmatmul.msk.f32.vlgmr.msrb.gmra.mxu0 %vm3086_vm1, %v4983_v19 }
0x16fa   : > { %5381 = vmatpush.msrb.mxu0 %v10244_v6 }
0x16fc   : > { %5382 = vmatpush.msrb.mxu0 %v10247_v62 }
0x16fe   : > { %5383 = vmatpush.msrb.mxu0 %v10251_v7 }
0x1700   : > { %5384 = vmatpush.msrb.mxu0 %v10256_v43  ;;  %v5086_v22 = vpop.f32.mrf.mxu3 }
0x1773   : > { %v5189_v33 = vpop.f32.mrf.mxu3 }
0x1774   : > { %7695 = vmatmul.msk.f32.vlgmr.msra.gmra.mxu0 %vm3086_vm1, %v5189_v33 }
0x1776   : > { %v5109_v57 = vpop.f32.mrf.mxu0 }
0x1777   : > { %v5110_v31 = vadd.f32 %v5109_v57, %v5086_v22  ;;  %v5456_v57 = vld [vmem:[%s10982_s6 + $0x18] sm:$0xff] }
0x1778   : > { %5476 = vmatpush.msra.mxu2 %v5456_v57 }
0x177a   : > { %v5293_v8 = vpop.f32.mrf.mxu2 }
0x177b   : > { %7699 = vmatmul.msk.f32.vlgmr.msrb.gmra.mxu3 %vm3086_vm1, %v5293_v8 }
0x17f1   : > { %v5212_v29 = vpop.f32.mrf.mxu0 }
0x17f2   : > { %v5215_v15 = vadd.f32 %v5212_v29, %v5110_v31  ;;  %v5455_v31 = vld [vmem:[%s10982_s6 + $0x10] sm:$0xff] }
0x17f3   : > { %5477 = vmatpush.msra.mxu2 %v5455_v31 }
0x17fe   : > { %v5316_v27 = vpop.f32.mrf.mxu3 }
0x17ff   : > { %v5319_v6 = vadd.f32 %v5316_v27, %v5215_v15  ;;  %v5454_v27 = vld [vmem:[%s10982_s6 + $0x8] sm:$0xff] }
0x1800   : > { %5478 = vmatpush.msra.mxu2 %v5454_v27 }
0x1801   : > { %v5320_v62 = vadd.f32 %v10268_v32, %v5319_v6  ;;  %v5453_v6 = vld [vmem:[%s10982_s6] sm:$0xff]  ;;  %s10984_s6 = sld [smem:[#allocation95_spill]] }
0x1802   : > { %5479 = vmatpush.msra.mxu2 %v5453_v6 }
0x1803   : > { %5322 = vrot.lane.b32.xlu1 %v5320_v62, %s10975_s2 }
0x1875   : > { %v5323_v7 = vpop.permute.xlu1 %5322 }
0x1876   : > { %v5325_v43 = vadd.f32 %v5323_v7, %v10222_v60  ;;  %v5487_v7 = vld [vmem:[%s10983_s7 + $0x18] sm:$0xff] }
0x1877   : > { %5509 = vmatpush.msra.mxu3 %v5487_v7 }
0x1878   : > { %5327 = vrot.lane.b32.xlu2 %v5325_v43, %s10968_s16 }
0x18d2   : > { %v5328_v34 = vpop.permute.xlu2 %5327 }
0x18d3   : > { %v5330_v28 = vsel %vm3030_vm0, %v5328_v34, 0.0  ;;  %v5485_v34 = vld [vmem:[%s10983_s7 + $0x8] sm:$0xff] }
0x18d4   : > { %5331 = vadd.xlane.f32.xlu0 %v5330_v28 }
0x1947   : > { %v5332_v58 = vpop.xlane.xlu0 %5331 }
0x1948   : > { %v5333_v30 = vmul.f32 %v5332_v58, %v9961_v55 }
0x194a   : > { %v5334_v61 = vsub.f32 %v5325_v43, %v5333_v30  ;;  %v5486_v43 = vld [vmem:[%s10983_s7 + $0x10] sm:$0xff]  ;;  %v5484_v30 = vld [vmem:[%s10983_s7] sm:$0xff]  ;;  %s10985_s7 = sld [smem:[#allocation100_spill]] }
0x194b   : > { %5510 = vmatpush.msra.mxu3 %v5486_v43 }
0x194c   : > { %v5335_v23 = vmul.f32 %v5334_v61, %v5334_v61 }
0x194d   : > { %5511 = vmatpush.msra.mxu3 %v5485_v34 }
0x194e   : > { %5337 = vrot.lane.b32.xlu1 %v5335_v23, %s10968_s16 }
0x194f   : > { %5512 = vmatpush.msra.mxu3 %v5484_v30 }
0x1956   : > { %5356 = vrot.lane.b32.xlu1 %v10289_v16, %s10975_s2 }
0x195e   : > { %5360 = vrot.lane.b32.xlu1 %v10291_v54, %s10975_s2 }
0x19c0   : > { %v5338_v60 = vpop.permute.xlu1 %5337 }
0x19c1   : > { %v5340_v32 = vsel %vm3030_vm0, %v5338_v60, 0.0 }
0x19c2   : > { %5341 = vadd.xlane.f32.xlu2 %v5340_v32 }
0x19c8   : > { %v5357_v14 = vpop.permute.xlu1 %5356 }
0x19d0   : > { %v5361_v38 = vpop.permute.xlu1 %5360 }
0x1a35   : > { %v5342_v2 = vpop.xlane.xlu2 %5341 }
0x1a36   : > { %v5343_v53 = vmul.f32 %v5342_v2, %v9961_v55 }
0x1a38   : > { %v5344_v9 = vadd.f32 1e-05, %v5343_v53 }
0x1a3a   : > { %8202 = vrsqrt.f32 %v5344_v9  ;;  %vm5351_vm6 = vweird.f32 %v5344_v9 }
0x1a40   : > { %v8203_v11 = vpop.eup %8202 }
0x1a41   : > { %v5346_v12 = vmul.f32 %v8203_v11, %v5344_v9  ;;  %vm5352_vm5 = vweird.f32 %v8203_v11 }
0x1a42   : > { %vm5353_vm8 = vmor %vm5351_vm6, %vm5352_vm5 }
0x1a43   : > { %v5347_v13 = vmul.f32 %v8203_v11, %v5346_v12 }
0x1a45   : > { %v5348_v17 = vmul.f32 0.5, %v5347_v13 }
0x1a47   : > { %v5349_v63 = vsub.f32 1.5, %v5348_v17 }
0x1a49   : > { %v5350_v16 = vmul.f32 %v8203_v11, %v5349_v63 }
0x1a4b   : > { %v5354_v54 = vsel %vm5353_vm8, %v8203_v11, %v5350_v16 }
0x1a4c   : > { %v5355_v18 = vmul.f32 %v5354_v54, %v5334_v61 }
0x1a4e   : > { %v5359_v21 = vmul.f32 %v5357_v14, %v5355_v18 }
0x1a50   : > { %v5363_v47 = vadd.f32 %v5361_v38, %v5359_v21 }
0x1a52   : > { %5365 = vrot.lane.b32.xlu1 %v5363_v47, %s10968_s16 }
0x1ac4   : > { %v5366_v35 = vpop.permute.xlu1 %5365 }
0x1ac5   : > { %7700 = vmatmul.msk.f32.vlgmr.msrb.gmra.mxu0 %vm3030_vm0, %v5366_v35 }
0x1b42   : > { %v5386_v42 = vpop.f32.mrf.mxu0 }
0x1b43   : > { %v5387_v50 = vadd.f32 %v10344_v0, %v5386_v42 }
0x1b45   : > { %v5389_v26 = vmax.f32 %v5387_v50, 0.0 }
0x1b47   : > { %5406 = vmatmul.f32.vlgmr.msra.gmra.mxu1 %v5389_v26 }
0x1bc4   : > { %v5407_v37 = vpop.f32.mrf.mxu1 }
0x1bc5   : > { %v5408_v41 = vadd.f32 %v8113_v5, %v5407_v37  ;;  %v8116_v37 = vld [vmem:[#allocation29] ss:$0 sm:$0xff] }
0x1bc7   : > { %5411 = vrot.lane.b32.xlu1 %v5408_v41, %s10975_s2 }
0x1c39   : > { %v5412_v45 = vpop.permute.xlu1 %5411 }
0x1c3a   : > { %v5414_v44 = vadd.f32 %v5412_v45, %v5363_v47 }
0x1c3c   : > { %5416 = vrot.lane.b32.xlu0 %v5414_v44, %s10968_s16 }
0x1c66   : > { %4834 = vadd.xlane.f32.xlu0 %v4833_v40 }
0x1c7a   : > { %5449 = vrot.lane.b32.xlu0 %v10412_v20, %s10975_s2 }
0x1cae   : > { %v5417_v49 = vpop.permute.xlu0 %5416 }
0x1caf   : > { %v5419_v0 = vsel %vm3030_vm0, %v5417_v49, 0.0 }
0x1cb0   : > { %5420 = vadd.xlane.f32.xlu1 %v5419_v0 }
0x1cc9   : > { %5445 = vrot.lane.b32.xlu1 %v10410_v4, %s10975_s2 }
0x1cd9   : > { %v4835_v39 = vpop.xlane.xlu0 %4834 }
0x1cda   : > { %v4836_v46 = vmul.f32 %v4835_v39, %v9961_v55 }
0x1cdc   : > { %v4837_v22 = vsub.f32 %v4830_v3, %v4836_v46 }
0x1cde   : > { %v4838_v33 = vmul.f32 %v4837_v22, %v4837_v22 }
0x1ce0   : > { %v4839_v8 = vsel %vm3030_vm0, %v4838_v33, 0.0 }
0x1cec   : > { %v5450_v54 = vpop.permute.xlu0 %5449 }
0x1d23   : > { %v5421_v36 = vpop.xlane.xlu1 %5420 }
0x1d24   : > { %v5422_v59 = vmul.f32 %v5421_v36, %v9961_v55 }
0x1d26   : > { %v5423_v56 = vsub.f32 %v5414_v44, %v5422_v59  ;;  %v8117_v44 = vld [vmem:[#allocation26] ss:$0 sm:$0xff] }
0x1d28   : > { %v5424_v1 = vmul.f32 %v5423_v56, %v5423_v56 }
0x1d2a   : > { %5426 = vrot.lane.b32.xlu2 %v5424_v1, %s10968_s16 }
0x1d3b   : > { %v5446_v17 = vpop.permute.xlu1 %5445 }
0x1d84   : > { %v5427_v19 = vpop.permute.xlu2 %5426 }
0x1d85   : > { %v5429_v25 = vsel %vm3030_vm0, %v5427_v19, 0.0 }
0x1d86   : > { %5430 = vadd.xlane.f32.xlu2 %v5429_v25 }
0x1d8e   : > { %4840 = vadd.xlane.f32.xlu2 %v4839_v8 }
0x1df9   : > { %v5431_v29 = vpop.xlane.xlu2 %5430 }
0x1dfa   : > { %v5432_v15 = vmul.f32 %v5431_v29, %v9961_v55 }
0x1dfc   : > { %v5433_v62 = vadd.f32 1e-05, %v5432_v15 }
0x1dfe   : > { %8204 = vrsqrt.f32 %v5433_v62  ;;  %vm5440_vm10 = vweird.f32 %v5433_v62 }
0x1e01   : > { %v4841_v28 = vpop.xlane.xlu2 %4840 }
0x1e02   : > { %v4842_v58 = vmul.f32 %v4841_v28, %v9961_v55 }
0x1e04   : > { %v8205_v61 = vpop.eup %8204  ;;  %v4843_v23 = vadd.f32 1e-05, %v4842_v58 }
0x1e05   : > { %v5435_v60 = vmul.f32 %v8205_v61, %v5433_v62  ;;  %vm5441_vm9 = vweird.f32 %v8205_v61 }
0x1e06   : > { %8206 = vrsqrt.f32 %v4843_v23  ;;  %vm5442_vm11 = vmor %vm5440_vm10, %vm5441_vm9  ;;  %vm4850_vm13 = vweird.f32 %v4843_v23 }
0x1e07   : > { %v5436_v32 = vmul.f32 %v8205_v61, %v5435_v60 }
0x1e09   : > { %v5437_v2 = vmul.f32 0.5, %v5436_v32 }
0x1e0b   : > { %v5438_v53 = vsub.f32 1.5, %v5437_v2 }
0x1e0c   : > { %v8207_v9 = vpop.eup %8206 }
0x1e0d   : > { %v4845_v11 = vmul.f32 %v8207_v9, %v4843_v23  ;;  %v5439_v12 = vmul.f32 %v8205_v61, %v5438_v53  ;;  %vm4851_vm12 = vweird.f32 %v8207_v9 }
0x1e0e   : > { %vm4852_vm14 = vmor %vm4850_vm13, %vm4851_vm12 }
0x1e0f   : > { %v4846_v13 = vmul.f32 %v8207_v9, %v4845_v11  ;;  %v5443_v14 = vsel %vm5442_vm11, %v8205_v61, %v5439_v12 }
0x1e10   : > { %v5444_v63 = vmul.f32 %v5443_v14, %v5423_v56 }
0x1e11   : > { %v4847_v16 = vmul.f32 0.5, %v4846_v13 }
0x1e12   : > { %v5448_v18 = vmul.f32 %v5446_v17, %v5444_v63 }
0x1e13   : > { %v4848_v38 = vsub.f32 1.5, %v4847_v16 }
0x1e14   : > { %v10431_v21 = vadd.f32 %v5450_v54, %v5448_v18 }
0x1e15   : > { %v4849_v47 = vmul.f32 %v8207_v9, %v4848_v38 }
0x1e16   : > { %5493 = vrot.lane.b32.xlu1 %v10431_v21, %s10968_s16 }
0x1e17   : > { %v4853_v35 = vsel %vm4852_vm14, %v8207_v9, %v4849_v47 }
0x1e18   : > { %v4854_v42 = vmul.f32 %v4853_v35, %v4837_v22 }
0x1e1a   : > { %v4858_v50 = vmul.f32 %v10410_v4, %v4854_v42  ;;  %v5518_v42 = vld [vmem:[%s10984_s6 + $0x8] sm:$0xff] }
0x1e1c   : > { %v10437_v26 = vadd.f32 %v10412_v20, %v4858_v50 }
0x1e1e   : > { %7701 = vmatmul.msk.f32.vlgmr.msra.gmra.mxu2 %vm3030_vm0, %v10437_v26 }
0x1e88   : > { %v10441_v5 = vpop.permute.xlu1 %5493 }
0x1e89   : > { %7702 = vmatmul.msk.f32.vlgmr.msra.gmra.mxu3 %vm3030_vm0, %v10441_v5 }
0x1ea1   : > { %v5481_v41 = vpop.f32.mrf.mxu2 }
0x1ea2   : > { %v5482_v45 = vadd.f32 %v8116_v37, %v5481_v41 }
0x1ea4   : > { %5599 = vrot.lane.b32.xlu1 %v5482_v45, %s10976_s1 }
0x1f0c   : > { %v5514_v24 = vpop.f32.mrf.mxu3 }
0x1f0d   : > { %v10446_v3 = vadd.f32 %v8117_v44, %v5514_v24 }
0x1f0f   : > { %5601 = vrot.lane.b32.xlu2 %v10446_v3, %s10976_s1  ;;  %7703 = vmatpush.xpose.msk.msra.mxu0 %vm3086_vm1, %v10446_v3 }
0x1f12   : > { %7704 = vmatmul.msk.f32.vlgmr.msra.gmra.mxu0 %vm3086_vm1, %v5482_v45 }
0x1f16   : > { %v5600_v49 = vpop.permute.xlu1 %5599 }
0x1f17   : > { %5653 = vrot.lane.b32.xlu2 %v10446_v3, %s10977_s0 }
0x1f1f   : > { %5727 = vrot.lane.b32.xlu2 %v10446_v3, %s10961_s8 }
0x1f27   : > { %5725 = vrot.lane.b32.xlu2 %v5482_v45, %s10961_s8 }
0x1f69   : > { %v5602_v40 = vpop.permute.xlu2 %5601 }
0x1f6a   : > { %7706 = vmatpush.xpose.msk.msrb.mxu3 %vm3086_vm1, %v5602_v40 }
0x1f6d   : > { %7707 = vmatmul.msk.f32.vlgmr.msrb.gmra.mxu3 %vm3086_vm1, %v5600_v49 }
0x1f71   : > { %v5654_v0 = vpop.permute.xlu2 %5653 }
0x1f72   : > { %5674 = vmatpush.msrb.mxu0 %v5654_v0 }
0x1f79   : > { %v5728_v36 = vpop.permute.xlu2 %5727 }
0x1f7a   : > { %7711 = vmatpush.xpose.msk.msra.mxu0 %vm3086_vm1, %v5728_v36 }
0x1f81   : > { %v5726_v54 = vpop.permute.xlu2 %5725 }
0x1f8f   : > { %v5544_v1 = vpop.f32.mrf.mxu0 }
0x1f90   : > { %v5547_v20 = vmul.f32 0.35355338, %v5544_v1 }
0x1f92   : > { %v5548_v46 = vadd.f32 %v10283_v10, %v5547_v20 }
0x1f94   : > { %v5549_v19 = vsel %vm3086_vm1, %v5548_v46, -inf }
0x1ff0   : > { %v5624_v59 = vpop.f32.mrf.mxu3 }
0x1ff1   : > { %v5627_v56 = vmul.f32 0.35355338, %v5624_v59 }
0x1ff3   : > { %v5628_v4 = vadd.f32 %v10283_v10, %v5627_v56 }
0x1ff5   : > { %v5629_v39 = vsel %vm3086_vm1, %v5628_v4, -inf }
0x1ff6   : > { %5630 = vmax.xlane.f32.xlu0 %v5629_v39 }
0x1ffe   : > { %5550 = vmax.xlane.f32.xlu0 %v5549_v19 }
0x2012   : > { %5779 = vrot.lane.b32.xlu0 %v10446_v3, %s10969_s20 }
0x2069   : > { %v5631_v22 = vpop.xlane.xlu0 %5630 }
0x206a   : > { %v5632_v25 = vsub.f32 %v5628_v4, %v5631_v22 }
0x206c   : > { %v5633_v33 = vmul.f32 1.442695, %v5632_v25 }
0x206e   : > { %8208 = vpow2.f32 %v5633_v33 }
0x2071   : > { %v5551_v8 = vpop.xlane.xlu0 %5550 }
0x2072   : > { %v5552_v57 = vsub.f32 %v5548_v46, %v5551_v8 }
0x2074   : > { %v8209_v29 = vpop.eup %8208  ;;  %v5553_v31 = vmul.f32 1.442695, %v5552_v57 }
0x2075   : > { %v5635_v15 = vsel %vm3086_vm1, %v8209_v29, 0.0 }
0x2076   : > { %8210 = vpow2.f32 %v5553_v31  ;;  %5636 = vadd.xlane.f32.xlu1 %v5635_v15  ;;  %v6002_v15 = vld [vmem:[%s10985_s7 + $0x18] sm:$0xff] }
0x207c   : > { %v8211_v27 = vpop.eup %8210 }
0x207d   : > { %v5555_v6 = vsel %vm3086_vm1, %v8211_v27, 0.0 }
0x207e   : > { %5556 = vadd.xlane.f32.xlu1 %v5555_v6  ;;  %v6001_v6 = vld [vmem:[%s10985_s7 + $0x10] sm:$0xff] }
0x2084   : > { %v5780_v50 = vpop.permute.xlu0 %5779 }
0x2097   : > { %5573 = vrot.lane.b32.xlu1 %v10446_v3, %s10968_s16 }
0x209f   : > { %5829 = vrot.lane.b32.xlu1 %v5482_v45, %s10978_s5  ;;  %v5517_v45 = vld [vmem:[%s10984_s6] sm:$0xff] }
0x20a0   : > { %5720 = vmatpush.msra.mxu3 %v5517_v45 }
0x20a7   : > { %5883 = vrot.lane.b32.xlu1 %v10446_v3, %s10970_s25 }
0x20e9   : > { %v5637_v62 = vpop.xlane.xlu1 %5636 }
0x20ea   : > { %8212 = vrcp.f32 %v5637_v62  ;;  %v5649_v58 = vand.u32 2147483648, %v5637_v62  ;;  %v5647_v61 = vand.u32 2147483647, %v5637_v62  ;;  %vm5643_vm2 = vweird.f32 %v5637_v62 }
0x20ec   : > { %v5650_v32 = vor.u32 1.1754944e-38, %v5649_v58  ;;  %vm5648_vm4 = vcmp.eq.f32.partialorder %v5647_v61, 8.507059e+37  ;;  %v5972_v58 = vld [vmem:[%s9343_s30 + $0x8] sm:$0xff] }
0x20f0   : > { %v8213_v7 = vpop.eup %8212 }
0x20f1   : > { %v5639_v43 = vmul.f32 %v8213_v7, %v5637_v62  ;;  %v5557_v34 = vpop.xlane.xlu1 %5556  ;;  %vm5644_vm15 = vweird.f32 %v8213_v7  ;;  %v6000_v62 = vld [vmem:[%s10985_s7 + $0x8] sm:$0xff] }
0x20f2   : > { %8214 = vrcp.f32 %v5557_v34  ;;  %vm5645_vm3 = vmor %vm5643_vm2, %vm5644_vm15  ;;  %v5569_v17 = vand.u32 2147483648, %v5557_v34  ;;  %vm5563_vm6 = vweird.f32 %v5557_v34  ;;  %v5567_v63 = vand.u32 2147483647, %v5557_v34 }
0x20f3   : > { %v5640_v28 = vsub.f32 1.0, %v5639_v43  ;;  %v5519_v43 = vld [vmem:[%s10984_s6 + $0x10] sm:$0xff] }
0x20f4   : > { %v5570_v18 = vor.u32 1.1754944e-38, %v5569_v17  ;;  %vm5568_vm9 = vcmp.eq.f32.partialorder %v5567_v63, 8.507059e+37  ;;  %5823 = vmatpush.msrb.mxu3 %v5519_v43 }
0x20f5   : > { %v5641_v30 = vmul.f32 %v8213_v7, %v5640_v28  ;;  %v5973_v28 = vld [vmem:[%s9343_s30 + $0x10] sm:$0xff] }
0x20f7   : > { %v5642_v23 = vadd.f32 %v8213_v7, %v5641_v30  ;;  %v5971_v30 = vld [vmem:[%s9343_s30] sm:$0xff] }
0x20f8   : > { %v8215_v60 = vpop.eup %8214 }
0x20f9   : > { %v5646_v2 = vsel %vm5645_vm3, %v8213_v7, %v5642_v23  ;;  %v5559_v53 = vmul.f32 %v8215_v60, %v5557_v34  ;;  %vm5564_vm5 = vweird.f32 %v8215_v60  ;;  %v5999_v7 = vld [vmem:[%s10985_s7] sm:$0xff]  ;;  %v5974_v34 = vld [vmem:[%s9343_s30 + $0x18] sm:$0xff] }
0x20fa   : > { %v5651_v9 = vsel %vm5648_vm4, %v5650_v32, %v5646_v2  ;;  %vm5565_vm8 = vmor %vm5563_vm6, %vm5564_vm5  ;;  %v8252_v2 = vld [vmem:[%s9947_s10] ss:$0 sm:$0xff]  ;;  %s10999_s10 = sld [smem:[#allocation50_spill]] }
0x20fb   : > { %v5560_v11 = vsub.f32 1.0, %v5559_v53  ;;  %v5652_v12 = vmul.f32 %v8209_v29, %v5651_v9 }
0x20fd   : > { %v5561_v13 = vmul.f32 %v8215_v60, %v5560_v11  ;;  %7708 = vmatmul.msk.f32.vlgmr.msrb.gmra.mxu0 %vm3086_vm1, %v5652_v12  ;;  %v8118_v11 = vld [vmem:[#allocation30] ss:$0 sm:$0xff] }
0x20ff   : > { %v5562_v14 = vadd.f32 %v8215_v60, %v5561_v13 }
0x2101   : > { %v5566_v16 = vsel %vm5565_vm8, %v8215_v60, %v5562_v14 }
0x2102   : > { %v5571_v38 = vsel %vm5568_vm9, %v5570_v18, %v5566_v16 }
0x2103   : > { %v5572_v35 = vmul.f32 %v8211_v27, %v5571_v38 }
0x2105   : > { %7712 = vmatmul.msk.f32.vlgmr.msra.gmra.mxu0 %vm3086_vm1, %v5726_v54 }
0x2109   : > { %v5574_v47 = vpop.permute.xlu1 %5573 }
0x210a   : > { %5594 = vmatpush.msrb.mxu2 %v5574_v47  ;;  %v8119_v47 = vld [vmem:[#allocation33] ss:$0 sm:$0xff] }
0x210b   : > { %7705 = vmatmul.msk.f32.vlgmr.msrb.gmra.mxu2 %vm3086_vm1, %v5572_v35 }
0x210c   : > { %5697 = vmatpush.msra.mxu2 %v5518_v42 }
0x210e   : > { %5800 = vmatpush.msrb.mxu2 %v5780_v50 }
0x2111   : > { %v5830_v37 = vpop.permute.xlu1 %5829 }
0x2119   : > { %v5884_v41 = vpop.permute.xlu1 %5883 }
0x211a   : > { %5904 = vmatpush.msrb.mxu1 %v5884_v41 }
0x217a   : > { %v5676_v44 = vpop.f32.mrf.mxu0 }
0x217b   : > { %7709 = vmatmul.msk.f32.vlgmr.msra.gmra.mxu2 %vm3086_vm1, %v5676_v44 }
0x2182   : > { %v5750_v24 = vpop.f32.mrf.mxu0 }
0x2183   : > { %v5753_v40 = vmul.f32 0.35355338, %v5750_v24 }
0x2185   : > { %v5754_v49 = vadd.f32 %v10283_v10, %v5753_v40 }
0x2187   : > { %v5755_v0 = vsel %vm3086_vm1, %v5754_v49, -inf }
0x2188   : > { %5756 = vmax.xlane.f32.xlu2 %v5755_v0 }
0x218e   : > { %v5596_v36 = vpop.f32.mrf.mxu2 }
0x218f   : > { %7710 = vmatmul.msk.f32.vlgmr.msra.gmra.mxu3 %vm3086_vm1, %v5596_v36 }
0x2190   : > { %5991 = vmatpush.msra.mxu3 %v5974_v34 }
0x2192   : > { %5992 = vmatpush.msra.mxu3 %v5973_v28 }
0x2194   : > { %5993 = vmatpush.msra.mxu3 %v5972_v58 }
0x2196   : > { %5994 = vmatpush.msra.mxu3 %v5971_v30 }
0x21fb   : > { %v5757_v59 = vpop.xlane.xlu2 %5756 }
0x21fc   : > { %v5758_v56 = vsub.f32 %v5754_v49, %v5757_v59 }
0x21fe   : > { %v5759_v1 = vmul.f32 1.442695, %v5758_v56  ;;  %v10500_v61 = vpop.f32.mrf.mxu2  ;;  %v5520_v56 = vld [vmem:[%s10984_s6 + $0x18] sm:$0xff] }
0x21ff   : > { %5927 = vmatpush.msra.mxu2 %v5520_v56 }
0x2200   : > { %8216 = vpow2.f32 %v5759_v1 }
0x2206   : > { %v8217_v4 = vpop.eup %8216 }
0x2207   : > { %v5761_v20 = vsel %vm3086_vm1, %v8217_v4, 0.0 }
0x2208   : > { %5762 = vadd.xlane.f32.xlu0 %v5761_v20 }
0x2212   : > { %v10511_v16 = vpop.f32.mrf.mxu3 }
0x221c   : > { %5831 = vrot.lane.b32.xlu0 %v10446_v3, %s10978_s5 }
0x227b   : > { %v5763_v39 = vpop.xlane.xlu0 %5762 }
0x227c   : > { %8218 = vrcp.f32 %v5763_v39  ;;  %v5775_v22 = vand.u32 2147483648, %v5763_v39  ;;  %v5773_v33 = vand.u32 2147483647, %v5763_v39  ;;  %vm5769_vm11 = vweird.f32 %v5763_v39 }
0x227e   : > { %v5776_v57 = vor.u32 1.1754944e-38, %v5775_v22  ;;  %vm5774_vm13 = vcmp.eq.f32.partialorder %v5773_v33, 8.507059e+37 }
0x2282   : > { %v8219_v10 = vpop.eup %8218 }
0x2283   : > { %v5765_v46 = vmul.f32 %v8219_v10, %v5763_v39  ;;  %vm5770_vm10 = vweird.f32 %v8219_v10  ;;  %v10523_v39 = vld [vmem:[%s9810_s15] ss:$0 sm:$0xff]  ;;  %s11000_s15 = sld [smem:[#allocation52_spill]] }
0x2284   : > { %vm5771_vm12 = vmor %vm5769_vm11, %vm5770_vm10 }
0x2285   : > { %v5766_v19 = vsub.f32 1.0, %v5765_v46 }
0x2287   : > { %v5767_v25 = vmul.f32 %v8219_v10, %v5766_v19 }
0x2289   : > { %v5768_v8 = vadd.f32 %v8219_v10, %v5767_v25 }
0x228b   : > { %v5772_v29 = vsel %vm5771_vm12, %v8219_v10, %v5768_v8 }
0x228c   : > { %v5777_v3 = vsel %vm5774_vm13, %v5776_v57, %v5772_v29 }
0x228d   : > { %v5778_v31 = vmul.f32 %v8217_v4, %v5777_v3 }
0x228e   : > { %v5832_v27 = vpop.permute.xlu0 %5831 }
0x228f   : > { %7713 = vmatmul.msk.f32.vlgmr.msrb.gmra.mxu2 %vm3086_vm1, %v5778_v31  ;;  %7715 = vmatpush.xpose.msk.msrb.mxu0 %vm3086_vm1, %v5832_v27 }
0x2292   : > { %7716 = vmatmul.msk.f32.vlgmr.msrb.gmra.mxu0 %vm3086_vm1, %v5830_v37 }
0x2293   : > { %6019 = vmatpush.msra.mxu0 %v6002_v15 }
0x2295   : > { %6020 = vmatpush.msra.mxu0 %v6001_v6  ;;  %v6027_v6 = vld [vmem:[%s9338_s4] sm:$0xff] }
0x2297   : > { %6021 = vmatpush.msra.mxu0 %v6000_v62 }
0x2299   : > { %6022 = vmatpush.msra.mxu0 %v5999_v7 }
0x229a   : > { %7720 = vmatmul.msk.f32.vlgmr.msra.gmra.mxu0 %vm3030_vm0, %v10437_v26 }
0x230f   : > { %v5854_v23 = vpop.f32.mrf.mxu0 }
0x2310   : > { %v5857_v60 = vmul.f32 0.35355338, %v5854_v23 }
0x2312   : > { %v5802_v32 = vpop.f32.mrf.mxu2  ;;  %v5858_v53 = vadd.f32 %v8252_v2, %v5857_v60 }
0x2313   : > { %7714 = vmatmul.msk.f32.vlgmr.msrb.gmra.mxu3 %vm3086_vm1, %v5802_v32 }
0x2314   : > { %v5859_v9 = vsel %vm3086_vm1, %v5858_v53, -inf }
0x2315   : > { %5860 = vmax.xlane.f32.xlu2 %v5859_v9 }
0x2317   : > { %v6024_v12 = vpop.f32.mrf.mxu0 }
0x2318   : > { %v10505_v13 = vadd.f32 %v8118_v11, %v6024_v12 }
0x231a   : > { %7721 = vmatpush.xpose.msk.msra.mxu1 %vm3086_vm1, %v10505_v13 }
0x231b   : > { %7719 = vmatmul.msk.f32.vlgmr.msra.gmra.mxu3 %vm3030_vm0, %v10441_v5 }
0x2388   : > { %v5861_v14 = vpop.xlane.xlu2 %5860 }
0x2389   : > { %v5862_v17 = vsub.f32 %v5858_v53, %v5861_v14 }
0x238b   : > { %v5863_v63 = vmul.f32 1.442695, %v5862_v17 }
0x238d   : > { %8220 = vpow2.f32 %v5863_v63 }
0x2393   : > { %v8221_v54 = vpop.eup %8220 }
0x2394   : > { %v5865_v18 = vsel %vm3086_vm1, %v8221_v54, 0.0 }
0x2395   : > { %5866 = vadd.xlane.f32.xlu0 %v5865_v18 }
0x2396   : > { %v10514_v38 = vpop.f32.mrf.mxu3 }
0x239e   : > { %v5996_v35 = vpop.f32.mrf.mxu3 }
0x239f   : > { %v5997_v42 = vadd.f32 %v8119_v47, %v5996_v35 }
0x23a9   : > { %6109 = vrot.lane.b32.xlu0 %v5997_v42, %s10976_s1 }
0x23b1   : > { %6235 = vrot.lane.b32.xlu0 %v5997_v42, %s10961_s8 }
0x2408   : > { %v5867_v5 = vpop.xlane.xlu0 %5866 }
0x2409   : > { %8222 = vrcp.f32 %v5867_v5  ;;  %v5879_v45 = vand.u32 2147483648, %v5867_v5  ;;  %v5877_v24 = vand.u32 2147483647, %v5867_v5  ;;  %vm5873_vm15 = vweird.f32 %v5867_v5 }
0x240b   : > { %v5880_v49 = vor.u32 1.1754944e-38, %v5879_v45  ;;  %vm5878_vm3 = vcmp.eq.f32.partialorder %v5877_v24, 8.507059e+37 }
0x240f   : > { %v8223_v50 = vpop.eup %8222 }
0x2410   : > { %v5869_v37 = vmul.f32 %v8223_v50, %v5867_v5  ;;  %vm5874_vm14 = vweird.f32 %v8223_v50 }
0x2411   : > { %vm5875_vm2 = vmor %vm5873_vm15, %vm5874_vm14 }
0x2412   : > { %v5870_v41 = vsub.f32 1.0, %v5869_v37 }
0x2414   : > { %v5871_v44 = vmul.f32 %v8223_v50, %v5870_v41 }
0x2416   : > { %v5872_v40 = vadd.f32 %v8223_v50, %v5871_v44 }
0x2418   : > { %v5876_v0 = vsel %vm5875_vm2, %v8223_v50, %v5872_v40 }
0x2419   : > { %v5881_v36 = vsel %vm5878_vm3, %v5880_v49, %v5876_v0 }
0x241a   : > { %v5882_v59 = vmul.f32 %v8221_v54, %v5881_v36 }
0x241b   : > { %v6110_v3 = vpop.permute.xlu0 %6109 }
0x241c   : > { %7717 = vmatmul.msk.f32.vlgmr.msrb.gmra.mxu1 %vm3086_vm1, %v5882_v59  ;;  %v5723_v59 = vadd.f32 %v10511_v16, %v10500_v61 }
0x241e   : > { %v5828_v56 = vadd.f32 %v10514_v38, %v5723_v59 }
0x2423   : > { %v6236_v27 = vpop.permute.xlu0 %6235 }
0x2424   : > { %7722 = vmatmul.msk.f32.vlgmr.msra.gmra.mxu1 %vm3086_vm1, %v5997_v42 }
0x2499   : > { %v5906_v1 = vpop.f32.mrf.mxu1 }
0x249a   : > { %7718 = vmatmul.msk.f32.vlgmr.msra.gmra.mxu2 %vm3086_vm1, %v5906_v1 }
0x24a1   : > { %v6054_v4 = vpop.f32.mrf.mxu1 }
0x24a2   : > { %v6057_v20 = vmul.f32 0.35355338, %v6054_v4  ;;  %v8120_v4 = vld [vmem:[#allocation27] ss:$0 sm:$0xff] }
0x24a4   : > { %v6058_v10 = vadd.f32 %v10523_v39, %v6057_v20 }
0x24a6   : > { %v6059_v46 = vsel %vm3086_vm1, %v6058_v10, -inf }
0x24a7   : > { %6060 = vmax.xlane.f32.xlu2 %v6059_v46 }
0x24bf   : > { %6083 = vrot.lane.b32.xlu2 %v10505_v13, %s10968_s16 }
0x24c7   : > { %6111 = vrot.lane.b32.xlu2 %v10505_v13, %s10976_s1  ;;  %s11006_s1 = sld [smem:[#allocation60_spill]] }
0x24cf   : > { %6341 = vrot.lane.b32.xlu2 %v10505_v13, %s10978_s5 }
0x24d7   : > { %6237 = vrot.lane.b32.xlu2 %v10505_v13, %s10961_s8  ;;  %s11001_s8 = sld [smem:[#allocation51_spill]] }
0x251a   : > { %v6061_v19 = vpop.xlane.xlu2 %6060 }
0x251b   : > { %v6062_v22 = vsub.f32 %v6058_v10, %v6061_v19 }
0x251d   : > { %v6063_v25 = vmul.f32 1.442695, %v6062_v22  ;;  %v5929_v47 = vpop.f32.mrf.mxu2 }
0x251e   : > { %v5932_v1 = vadd.f32 %v5929_v47, %v5828_v56 }
0x251f   : > { %8224 = vpow2.f32 %v6063_v25 }
0x2520   : > { %v5937_v20 = vadd.f32 %v8120_v4, %v5932_v1 }
0x2522   : > { %v6084_v33 = vpop.permute.xlu2 %6083  ;;  %v10560_v10 = vadd.f32 %v5937_v20, %v10437_v26 }
0x2523   : > { %6104 = vmatpush.msrb.mxu2 %v6084_v33 }
0x2524   : > { %v5941_v46 = vsel %vm3030_vm0, %v10560_v10, 0.0 }
0x2525   : > { %v8225_v8 = vpop.eup %8224  ;;  %6230 = vmatpush.msra.mxu2 %v6027_v6 }
0x2526   : > { %v6065_v57 = vsel %vm3086_vm1, %v8225_v8, 0.0 }
0x2527   : > { %6066 = vadd.xlane.f32.xlu1 %v6065_v57 }
0x252a   : > { %v6112_v29 = vpop.permute.xlu2 %6111 }
0x252b   : > { %7724 = vmatpush.xpose.msk.msrb.mxu3 %vm3086_vm1, %v6112_v29 }
0x252e   : > { %7725 = vmatmul.msk.f32.vlgmr.msrb.gmra.mxu3 %vm3086_vm1, %v6110_v3 }
0x2532   : > { %v6342_v31 = vpop.permute.xlu2 %6341 }
0x253a   : > { %v6238_v15 = vpop.permute.xlu2 %6237 }
0x253b   : > { %7729 = vmatpush.xpose.msk.msra.mxu3 %vm3086_vm1, %v6238_v15 }
0x253e   : > { %7730 = vmatmul.msk.f32.vlgmr.msra.gmra.mxu3 %vm3086_vm1, %v6236_v27 }
0x2540   : > { %6339 = vrot.lane.b32.xlu1 %v5997_v42, %s10978_s5  ;;  %s9003_s5 = smov 64  }
0x259a   : > { %v6067_v62 = vpop.xlane.xlu1 %6066 }
0x259b   : > { %8226 = vrcp.f32 %v6067_v62  ;;  %v6079_v28 = vand.u32 2147483648, %v6067_v62  ;;  %v6077_v30 = vand.u32 2147483647, %v6067_v62  ;;  %vm6073_vm5 = vweird.f32 %v6067_v62 }
0x259d   : > { %v6080_v60 = vor.u32 1.1754944e-38, %v6079_v28  ;;  %vm6078_vm8 = vcmp.eq.f32.partialorder %v6077_v30, 8.507059e+37 }
0x25a1   : > { %v8227_v7 = vpop.eup %8226 }
0x25a2   : > { %v6069_v43 = vmul.f32 %v8227_v7, %v6067_v62  ;;  %vm6074_vm4 = vweird.f32 %v8227_v7 }
0x25a3   : > { %vm6075_vm6 = vmor %vm6073_vm5, %vm6074_vm4 }
0x25a4   : > { %v6070_v34 = vsub.f32 1.0, %v6069_v43 }
0x25a6   : > { %v6071_v58 = vmul.f32 %v8227_v7, %v6070_v34 }
0x25a8   : > { %v6072_v23 = vadd.f32 %v8227_v7, %v6071_v58 }
0x25aa   : > { %v6076_v32 = vsel %vm6075_vm6, %v8227_v7, %v6072_v23 }
0x25ab   : > { %v6081_v2 = vsel %vm6078_vm8, %v6080_v60, %v6076_v32 }
0x25ac   : > { %v6082_v53 = vmul.f32 %v8225_v8, %v6081_v2 }
0x25ae   : > { %7723 = vmatmul.msk.f32.vlgmr.msrb.gmra.mxu2 %vm3086_vm1, %v6082_v53 }
0x25af   : > { %7733 = vmatpush.xpose.msk.msrb.mxu2 %vm3086_vm1, %v6342_v31 }
0x25b1   : > { %v6134_v9 = vpop.f32.mrf.mxu3 }
0x25b2   : > { %v6137_v11 = vmul.f32 0.35355338, %v6134_v9  ;;  %v6340_v37 = vpop.permute.xlu1 %6339 }
0x25b4   : > { %v6138_v12 = vadd.f32 %v10523_v39, %v6137_v11  ;;  %v6028_v11 = vld [vmem:[%s9338_s4 + $0x8] sm:$0xff] }
0x25b5   : > { %6207 = vmatpush.msrb.mxu1 %v6028_v11 }
0x25b6   : > { %v6139_v14 = vsel %vm3086_vm1, %v6138_v12, -inf }
0x25b7   : > { %6140 = vmax.xlane.f32.xlu2 %v6139_v14 }
0x25c1   : > { %v6260_v17 = vpop.f32.mrf.mxu3 }
0x25c2   : > { %v6263_v63 = vmul.f32 0.35355338, %v6260_v17 }
0x25c4   : > { %v6264_v54 = vadd.f32 %v10523_v39, %v6263_v63 }
0x25c6   : > { %v6265_v18 = vsel %vm3086_vm1, %v6264_v54, -inf }
0x25c7   : > { %6266 = vmax.xlane.f32.xlu1 %v6265_v18 }
0x25e0   : > { %6163 = vrot.lane.b32.xlu1 %v10505_v13, %s10977_s0  ;;  %s10998_s0 = sld [smem:[#allocation61_spill]] }
0x262a   : > { %v6141_v35 = vpop.xlane.xlu2 %6140 }
0x262b   : > { %v6142_v42 = vsub.f32 %v6138_v12, %v6141_v35  ;;  %v6029_v12 = vld [vmem:[%s9338_s4 + $0x10] sm:$0xff] }
0x262c   : > { %6333 = vmatpush.msra.mxu1 %v6029_v12 }
0x262d   : > { %v6143_v5 = vmul.f32 1.442695, %v6142_v42 }
0x262f   : > { %8228 = vpow2.f32 %v6143_v5 }
0x2631   : > { %v6106_v50 = vpop.f32.mrf.mxu2 }
0x2632   : > { %7728 = vmatmul.msk.f32.vlgmr.msra.gmra.mxu2 %vm3086_vm1, %v6106_v50 }
0x2635   : > { %v8229_v41 = vpop.eup %8228 }
0x2636   : > { %v6145_v45 = vsel %vm3086_vm1, %v8229_v41, 0.0 }
0x2637   : > { %6146 = vadd.xlane.f32.xlu2 %v6145_v45 }
0x263a   : > { %7734 = vmatmul.msk.f32.vlgmr.msrb.gmra.mxu2 %vm3086_vm1, %v6340_v37  ;;  %v6267_v44 = vpop.xlane.xlu1 %6266 }
0x263b   : > { %v6268_v24 = vsub.f32 %v6264_v54, %v6267_v44 }
0x263d   : > { %v6269_v40 = vmul.f32 1.442695, %v6268_v24 }
0x263f   : > { %8230 = vpow2.f32 %v6269_v40 }
0x2645   : > { %v8231_v49 = vpop.eup %8230 }
0x2646   : > { %v6271_v0 = vsel %vm3086_vm1, %v8231_v49, 0.0 }
0x2647   : > { %6272 = vadd.xlane.f32.xlu2 %v6271_v0 }
0x2652   : > { %v6164_v36 = vpop.permute.xlu1 %6163 }
0x2653   : > { %6184 = vmatpush.msrb.mxu0 %v6164_v36 }
0x265f   : > { %6289 = vrot.lane.b32.xlu2 %v10505_v13, %s10969_s20  ;;  %s11003_s20 = sld [smem:[#allocation56_spill]] }
0x2688   : > { %5942 = vadd.xlane.f32.xlu2 %v5941_v46 }
0x26aa   : > { %v6147_v19 = vpop.xlane.xlu2 %6146 }
0x26ab   : > { %8232 = vrcp.f32 %v6147_v19  ;;  %v6159_v8 = vand.u32 2147483648, %v6147_v19  ;;  %v6157_v16 = vand.u32 2147483647, %v6147_v19  ;;  %vm6153_vm10 = vweird.f32 %v6147_v19 }
0x26ad   : > { %v6160_v26 = vor.u32 1.1754944e-38, %v6159_v8  ;;  %vm6158_vm12 = vcmp.eq.f32.partialorder %v6157_v16, 8.507059e+37 }
0x26b1   : > { %v8233_v22 = vpop.eup %8232 }
0x26b2   : > { %v6149_v25 = vmul.f32 %v8233_v22, %v6147_v19  ;;  %vm6154_vm9 = vweird.f32 %v8233_v22  ;;  %v8121_v19 = vld [vmem:[#allocation32] ss:$0 sm:$0xff] }
0x26b3   : > { %vm6155_vm11 = vmor %vm6153_vm10, %vm6154_vm9  ;;  %vm10590_vm10 = vcmp.lt.s32.totalorder %v6497_v48, 32 }
0x26b4   : > { %v6150_v33 = vsub.f32 1.0, %v6149_v25 }
0x26b5   : > { %v10564_v57 = vpop.f32.mrf.mxu2 }
0x26b6   : > { %v6151_v61 = vmul.f32 %v8233_v22, %v6150_v33 }
0x26b8   : > { %v6152_v38 = vadd.f32 %v8233_v22, %v6151_v61 }
0x26ba   : > { %v6156_v29 = vsel %vm6155_vm11, %v8233_v22, %v6152_v38  ;;  %v6273_v3 = vpop.xlane.xlu2 %6272  ;;  %vm6509_vm11 = vcmp.ge.s32.totalorder %v6497_v48, 32 }
0x26bb   : > { %v6161_v31 = vsel %vm6158_vm12, %v6160_v26, %v6156_v29  ;;  %8234 = vrcp.f32 %v6273_v3  ;;  %v6285_v30 = vand.u32 2147483648, %v6273_v3  ;;  %v6283_v60 = vand.u32 2147483647, %v6273_v3  ;;  %vm10608_vm12 = vmand %vm6509_vm11, %vm9849_vm7 }
0x26bc   : > { %v6162_v15 = vmul.f32 %v8229_v41, %v6161_v31  ;;  %vm6279_vm14 = vweird.f32 %v6273_v3 }
0x26bd   : > { %v6364_v27 = vpop.f32.mrf.mxu2  ;;  %v6286_v2 = vor.u32 1.1754944e-38, %v6285_v30  ;;  %vm6284_vm2 = vcmp.eq.f32.partialorder %v6283_v60, 8.507059e+37  ;;  %v8123_v30 = vld [vmem:[#allocation23] ss:$0 sm:$0xff] }
0x26be   : > { %v6367_v6 = vmul.f32 0.35355338, %v6364_v27  ;;  %7726 = vmatmul.msk.f32.vlgmr.msrb.gmra.mxu0 %vm3086_vm1, %v6162_v15 }
0x26c0   : > { %v6368_v62 = vadd.f32 %v10523_v39, %v6367_v6 }
0x26c1   : > { %v8235_v7 = vpop.eup %8234 }
0x26c2   : > { %v6275_v43 = vmul.f32 %v8235_v7, %v6273_v3  ;;  %v6290_v34 = vpop.permute.xlu2 %6289  ;;  %v6369_v28 = vsel %vm3086_vm1, %v6368_v62, -inf  ;;  %vm6280_vm13 = vweird.f32 %v8235_v7 }
0x26c3   : > { %6370 = vmax.xlane.f32.xlu0 %v6369_v28  ;;  %6310 = vmatpush.msra.mxu0 %v6290_v34  ;;  %vm6281_vm15 = vmor %vm6279_vm14, %vm6280_vm13  ;;  %v8122_v28 = vld [vmem:[#allocation24] ss:$0 sm:$0xff] }
0x26c4   : > { %v6276_v58 = vsub.f32 1.0, %v6275_v43 }
0x26c6   : > { %v6277_v23 = vmul.f32 %v8235_v7, %v6276_v58 }
0x26c8   : > { %v6278_v32 = vadd.f32 %v8235_v7, %v6277_v23 }
0x26ca   : > { %v6282_v53 = vsel %vm6281_vm15, %v8235_v7, %v6278_v32  ;;  %vm10620_vm15 = vcmp.ge.s32.totalorder %v6497_v48, 64 }
0x26cb   : > { %v6287_v39 = vsel %vm6284_vm2, %v6286_v2, %v6282_v53  ;;  %v8124_v53 = vld [vmem:[#allocation21] ss:$0 sm:$0xff]  ;;  %vm6520_vm2 = vcmp.lt.s32.totalorder %v6497_v48, 96  ;;  %v6663_v2 = vld [vmem:[%s10998_s0 + $0x150] sm:$0xff] }
0x26cc   : > { %v6288_v9 = vmul.f32 %v8231_v49, %v6287_v39 }
0x26ce   : > { %7731 = vmatmul.msk.f32.vlgmr.msra.gmra.mxu0 %vm3086_vm1, %v6288_v9 }
0x26fb   : > { %v5943_v16 = vpop.xlane.xlu2 %5942 }
0x26fc   : > { %v5944_v38 = vmul.f32 %v5943_v16, %v9961_v55 }
0x26fe   : > { %v5945_v26 = vsub.f32 %v10560_v10, %v5944_v38 }
0x2700   : > { %v5946_v29 = vmul.f32 %v5945_v26, %v5945_v26 }
0x2736   : > { %v6371_v14 = vpop.xlane.xlu0 %6370 }
0x2737   : > { %v6372_v17 = vsub.f32 %v6368_v62, %v6371_v14 }
0x2739   : > { %v6373_v63 = vmul.f32 1.442695, %v6372_v17 }
0x273b   : > { %8236 = vpow2.f32 %v6373_v63  ;;  %v6186_v54 = vpop.f32.mrf.mxu0 }
0x273c   : > { %7727 = vmatmul.msk.f32.vlgmr.msrb.gmra.mxu1 %vm3086_vm1, %v6186_v54 }
0x2741   : > { %v8237_v18 = vpop.eup %8236 }
0x2742   : > { %v6375_v47 = vsel %vm3086_vm1, %v8237_v18, 0.0 }
0x2743   : > { %6376 = vadd.xlane.f32.xlu0 %v6375_v47 }
0x274b   : > { %v6312_v35 = vpop.f32.mrf.mxu0 }
0x274c   : > { %7732 = vmatmul.msk.f32.vlgmr.msra.gmra.mxu1 %vm3086_vm1, %v6312_v35 }
0x2757   : > { %6393 = vrot.lane.b32.xlu0 %v10505_v13, %s10970_s25  ;;  %v6030_v13 = vld [vmem:[%s9338_s4 + $0x18] sm:$0xff]  ;;  %s11004_s25 = sld [smem:[#allocation55_spill]] }
0x2758   : > { %6437 = vmatpush.msrb.mxu0 %v6030_v13 }
0x27b6   : > { %v6377_v42 = vpop.xlane.xlu0 %6376 }
0x27b7   : > { %8238 = vrcp.f32 %v6377_v42  ;;  %v6389_v41 = vand.u32 2147483648, %v6377_v42  ;;  %v6387_v44 = vand.u32 2147483647, %v6377_v42  ;;  %vm6383_vm4 = vweird.f32 %v6377_v42 }
0x27b9   : > { %v6390_v40 = vor.u32 1.1754944e-38, %v6389_v41  ;;  %vm6388_vm6 = vcmp.eq.f32.partialorder %v6387_v44, 8.507059e+37  ;;  %v6209_v1 = vpop.f32.mrf.mxu1 }
0x27ba   : > { %v6233_v20 = vadd.f32 %v10564_v57, %v6209_v1  ;;  %v5947_v57 = vsel %vm3030_vm0, %v5946_v29, 0.0 }
0x27bd   : > { %v8239_v5 = vpop.eup %8238 }
0x27be   : > { %v6379_v50 = vmul.f32 %v8239_v5, %v6377_v42  ;;  %vm6384_vm3 = vweird.f32 %v8239_v5 }
0x27bf   : > { %vm6385_vm5 = vmor %vm6383_vm4, %vm6384_vm3  ;;  %vm6529_vm4 = vcmp.ge.s32.totalorder %v6497_v48, 96 }
0x27c0   : > { %v6380_v37 = vsub.f32 1.0, %v6379_v50  ;;  %vm10627_vm3 = vmand %vm10620_vm15, %vm6520_vm2 }
0x27c2   : > { %v6381_v45 = vmul.f32 %v8239_v5, %v6380_v37  ;;  %v6662_v37 = vld [vmem:[%s10998_s0 + $0x148] sm:$0xff] }
0x27c4   : > { %v6382_v24 = vadd.f32 %v8239_v5, %v6381_v45  ;;  %v8125_v45 = vld [vmem:[#allocation20] ss:$0 sm:$0xff] }
0x27c6   : > { %v6386_v49 = vsel %vm6385_vm5, %v8239_v5, %v6382_v24  ;;  %vm10638_vm5 = vcmp.lt.s32.totalorder %v6497_v48, 128 }
0x27c7   : > { %v6391_v0 = vsel %vm6388_vm6, %v6390_v40, %v6386_v49  ;;  %vm10644_vm6 = vmand %vm6529_vm4, %vm10638_vm5 }
0x27c8   : > { %v6392_v36 = vmul.f32 %v8237_v18, %v6391_v0 }
0x27c9   : > { %v6394_v59 = vpop.permute.xlu0 %6393  ;;  %v6335_v4 = vpop.f32.mrf.mxu1 }
0x27ca   : > { %6414 = vmatpush.msrb.mxu3 %v6394_v59  ;;  %v6338_v46 = vadd.f32 %v6335_v4, %v6233_v20 }
0x27cb   : > { %7735 = vmatmul.msk.f32.vlgmr.msrb.gmra.mxu3 %vm3086_vm1, %v6392_v36 }
0x284e   : > { %v6416_v56 = vpop.f32.mrf.mxu3 }
0x284f   : > { %7736 = vmatmul.msk.f32.vlgmr.msrb.gmra.mxu0 %vm3086_vm1, %v6416_v56 }
0x28cc   : > { %v6439_v22 = vpop.f32.mrf.mxu0 }
0x28cd   : > { %v6442_v25 = vadd.f32 %v6439_v22, %v6338_v46 }
0x28cf   : > { %v6447_v33 = vadd.f32 %v8121_v19, %v6442_v25  ;;  %v6696_v25 = vld [vmem:[%s10998_s0 + $0x258] sm:$0xff] }
0x28d1   : > { %6449 = vrot.lane.b32.xlu0 %v6447_v33, %s10975_s2 }
0x2943   : > { %v6450_v8 = vpop.permute.xlu0 %6449 }
0x2944   : > { %v6452_v61 = vadd.f32 %v6450_v8, %v10431_v21 }
0x2946   : > { %6456 = vrot.lane.b32.xlu1 %v6452_v61, %s10968_s16 }
0x2970   : > { %5948 = vadd.xlane.f32.xlu1 %v5947_v57 }
0x2989   : > { %6487 = vrot.lane.b32.xlu1 %v8124_v53, %s10975_s2  ;;  %v6684_v53 = vld [vmem:[%s10998_s0 + $0x1f8] sm:$0xff] }
0x298a   : > { %6773 = vmatpush.msra.mxu0 %v6684_v53  ;;  %v6638_v53 = vld [vmem:[%s10998_s0 + $0x88] sm:$0xff] }
0x29b8   : > { %v6457_v3 = vpop.permute.xlu1 %6456 }
0x29b9   : > { %v6459_v31 = vsel %vm3030_vm0, %v6457_v3, 0.0 }
0x29ba   : > { %6460 = vadd.xlane.f32.xlu0 %v6459_v31 }
0x29e3   : > { %v5949_v15 = vpop.xlane.xlu1 %5948 }
0x29e4   : > { %v5950_v27 = vmul.f32 %v5949_v15, %v9961_v55 }
0x29e6   : > { %v5951_v6 = vadd.f32 1e-05, %v5950_v27 }
0x29e8   : > { %8240 = vrsqrt.f32 %v5951_v6  ;;  %vm5958_vm8 = vweird.f32 %v5951_v6 }
0x29ee   : > { %v8241_v21 = vpop.eup %8240 }
0x29ef   : > { %v5953_v62 = vmul.f32 %v8241_v21, %v5951_v6  ;;  %vm5959_vm1 = vweird.f32 %v8241_v21 }
0x29f0   : > { %vm5960_vm9 = vmor %vm5958_vm8, %vm5959_vm1  ;;  %vm6815_vm8 = vcmask 253952  }
0x29f1   : > { %v5954_v7 = vmul.f32 %v8241_v21, %v5953_v62  ;;  %v6636_v62 = vld [vmem:[%s10998_s0 + $0x78] sm:$0xff]  ;;  %vm6618_vm1 = vmand %vm10620_vm15, %vm10638_vm5 }
0x29f2   : > { %6713 = vmatpush.msrb.mxu1 %v6636_v62  ;;  %v6641_v62 = vld [vmem:[%s10998_s0 + $0xa0] sm:$0xff] }
0x29f3   : > { %v5955_v43 = vmul.f32 0.5, %v5954_v7  ;;  %v6635_v7 = vld [vmem:[%s10998_s0 + $0x70] sm:$0xff] }
0x29f4   : > { %6714 = vmatpush.msrb.mxu1 %v6635_v7  ;;  %v6657_v7 = vld [vmem:[%s10998_s0 + $0x120] sm:$0xff] }
0x29f5   : > { %v5956_v34 = vsub.f32 1.5, %v5955_v43  ;;  %v6633_v43 = vld [vmem:[%s10998_s0 + $0x60] sm:$0xff] }
0x29f7   : > { %v5957_v10 = vmul.f32 %v8241_v21, %v5956_v34  ;;  %v6632_v34 = vld [vmem:[%s10998_s0 + $0x58] sm:$0xff] }
0x29f9   : > { %v5961_v58 = vsel %vm5960_vm9, %v8241_v21, %v5957_v10  ;;  %v6631_v10 = vld [vmem:[%s10998_s0 + $0x50] sm:$0xff] }
0x29fa   : > { %v5962_v23 = vmul.f32 %v5961_v58, %v5945_v26  ;;  %v6629_v58 = vld [vmem:[%s10998_s0 + $0x40] sm:$0xff] }
0x29fb   : > { %v6488_v50 = vpop.permute.xlu1 %6487 }
0x29fc   : > { %v5966_v60 = vmul.f32 %v8122_v28, %v5962_v23  ;;  %v6630_v28 = vld [vmem:[%s10998_s0 + $0x48] sm:$0xff]  ;;  %v6652_v23 = vld [vmem:[%s10998_s0 + $0xf8] sm:$0xff] }
0x29fd   : > { %6733 = vmatpush.msra.mxu2 %v6652_v23  ;;  %v6655_v23 = vld [vmem:[%s10998_s0 + $0x110] sm:$0xff] }
0x29fe   : > { %v5970_v32 = vadd.f32 %v8123_v30, %v5966_v60  ;;  %v6628_v30 = vld [vmem:[%s10998_s0 + $0x38] sm:$0xff]  ;;  %v6627_v60 = vld [vmem:[%s10998_s0 + $0x30] sm:$0xff] }
0x2a00   : > { %6503 = vst [vmem:[#allocation1] sm:$0xff] %v5970_v32 }
0x2a01   : > { %6501 = vst.msk [vmem:[#allocation2] sm:$0x1] %vm10590_vm10, %v5970_v32 }
0x2a07   : > { %v6505_v39 = vld [vmem:[#allocation1 + $0x1] ss:$9 sm:$0xff] }
0x2a08   : > { %6513 = vst [vmem:[#allocation1] sm:$0xff] %v5970_v32 }
0x2a0f   : > { %v6515_v9 = vld [vmem:[#allocation1 + $0x2] ss:$9 sm:$0xff] }
0x2a10   : > { %6523 = vst [vmem:[#allocation1] sm:$0xff] %v5970_v32 }
0x2a17   : > { %v6525_v11 = vld [vmem:[#allocation1 + $0x3] ss:$9 sm:$0xff] }
0x2a18   : > { %6533 = vst [vmem:[#allocation1] sm:$0xff] %v5970_v32 }
0x2a1f   : > { %v6535_v12 = vld [vmem:[#allocation1 + $0x4] ss:$9 sm:$0xff] }
0x2a20   : > { %6538 = vst [vmem:[#allocation1] sm:$0xff] %v5970_v32 }
0x2a21   : > { %6537 = vst.msk [vmem:[#allocation2 + $0x1] sm:$0x1] %vm10590_vm10, %v6535_v12  ;;  %v6650_v12 = vld [vmem:[%s10998_s0 + $0xe8] sm:$0xff] }
0x2a27   : > { %v6540_v14 = vld [vmem:[#allocation1 + $0x5] ss:$9 sm:$0xff] }
0x2a28   : > { %6541 = vrot.lane.b32.xlu1 %v6540_v14, %s10975_s2  ;;  %6545 = vst [vmem:[#allocation1] sm:$0xff] %v5970_v32  ;;  %v6666_v14 = vld [vmem:[%s10998_s0 + $0x168] sm:$0xff] }
0x2a2d   : > { %v6461_v17 = vpop.xlane.xlu0 %6460 }
0x2a2e   : > { %v6462_v63 = vmul.f32 %v6461_v17, %v9961_v55  ;;  %v6626_v17 = vld [vmem:[%s10998_s0 + $0x28] sm:$0xff] }
0x2a2f   : > { %v6547_v54 = vld [vmem:[#allocation1 + $0x6] ss:$9 sm:$0xff] }
0x2a30   : > { %v6463_v18 = vsub.f32 %v6452_v61, %v6462_v63  ;;  %6552 = vst [vmem:[#allocation1] sm:$0xff] %v5970_v32  ;;  %v6668_v32 = vld [vmem:[%s10998_s0 + $0x178] sm:$0xff]  ;;  %v6682_v63 = vld [vmem:[%s10998_s0 + $0x1e8] sm:$0xff]  ;;  %v6701_v61 = vld [vmem:[%s10999_s10] sm:$0x1]  ;;  %s11008_s10 = sld [smem:[#allocation58_spill]] }
0x2a31   : > { %6753 = vmatpush.msra.mxu3 %v6668_v32  ;;  %v6691_v32 = vld [vmem:[%s10998_s0 + $0x230] sm:$0xff] }
0x2a32   : > { %v6464_v47 = vmul.f32 %v6463_v18, %v6463_v18 }
0x2a34   : > { %6466 = vrot.lane.b32.xlu2 %v6464_v47, %s10968_s16  ;;  %v6681_v47 = vld [vmem:[%s10998_s0 + $0x1e0] sm:$0xff] }
0x2a37   : > { %v6554_v35 = vld [vmem:[#allocation1 + $0x7] ss:$9 sm:$0xff] }
0x2a38   : > { %6555 = vrot.lane.b32.xlu1 %v6554_v35, %s10968_s16 }
0x2a3c   : > { %6516 = vrot.lane.b32.xlu2 %v6515_v9, %s9003_s5  ;;  %v6667_v9 = vld [vmem:[%s10998_s0 + $0x170] sm:$0xff] }
0x2a3d   : > { %6754 = vmatpush.msra.mxu3 %v6667_v9  ;;  %v6670_v9 = vld [vmem:[%s10998_s0 + $0x188] sm:$0xff] }
0x2a3f   : > { %6755 = vmatpush.msra.mxu3 %v6666_v14  ;;  %v6653_v14 = vld [vmem:[%s10998_s0 + $0x100] sm:$0xff] }
0x2a8e   : > { %v6467_v42 = vpop.permute.xlu2 %6466 }
0x2a8f   : > { %v6469_v5 = vsel %vm3030_vm0, %v6467_v42, 0.0  ;;  %v6625_v42 = vld [vmem:[%s10998_s0 + $0x20] sm:$0xff] }
0x2a90   : > { %6470 = vadd.xlane.f32.xlu0 %v6469_v5  ;;  %v6648_v5 = vld [vmem:[%s10998_s0 + $0xd8] sm:$0xff] }
0x2a96   : > { %v6517_v33 = vpop.permute.xlu2 %6516 }
0x2a9a   : > { %v6542_v41 = vpop.permute.xlu1 %6541 }
0x2a9b   : > { %6544 = vst.msk [vmem:[#allocation2 + $0x1] sm:$0x1] %vm10608_vm12, %v6542_v41  ;;  %v6680_v41 = vld [vmem:[%s10998_s0 + $0x1d8] sm:$0xff] }
0x2aa4   : > { %6493 = vrot.lane.b32.xlu0 %v8125_v45, %s10975_s2  ;;  %v6624_v45 = vld [vmem:[%s10998_s0 + $0x18] sm:$0xff] }
0x2aaa   : > { %v6556_v38 = vpop.permute.xlu1 %6555 }
0x2aac   : > { %6506 = vrot.lane.b32.xlu0 %v6505_v39, %s10975_s2  ;;  %v6651_v39 = vld [vmem:[%s10998_s0 + $0xf0] sm:$0xff] }
0x2aad   : > { %6734 = vmatpush.msra.mxu2 %v6651_v39  ;;  %v6654_v39 = vld [vmem:[%s10998_s0 + $0x108] sm:$0xff] }
0x2aaf   : > { %6735 = vmatpush.msra.mxu2 %v6650_v12  ;;  %v6637_v12 = vld [vmem:[%s10998_s0 + $0x80] sm:$0xff] }
0x2ab4   : > { %6548 = vrot.lane.b32.xlu0 %v6547_v54, %s9003_s5  ;;  %v6649_v54 = vld [vmem:[%s10998_s0 + $0xe0] sm:$0xff] }
0x2ab5   : > { %6736 = vmatpush.msra.mxu2 %v6649_v54  ;;  %v6688_v54 = vld [vmem:[%s10998_s0 + $0x218] sm:$0xff] }
0x2ab7   : > { %6737 = vmatpush.msra.mxu2 %v6648_v5 }
0x2abc   : > { %6526 = vrot.lane.b32.xlu0 %v6525_v11, %s10968_s16  ;;  %v6683_v11 = vld [vmem:[%s10998_s0 + $0x1f0] sm:$0xff] }
0x2abd   : > { %6774 = vmatpush.msra.mxu0 %v6683_v11  ;;  %v6690_v11 = vld [vmem:[%s10998_s0 + $0x228] sm:$0xff] }
0x2abf   : > { %6775 = vmatpush.msra.mxu0 %v6682_v63  ;;  %v6689_v63 = vld [vmem:[%s10998_s0 + $0x220] sm:$0xff] }
0x2ac1   : > { %6776 = vmatpush.msra.mxu0 %v6681_v47  ;;  %v6686_v47 = vld [vmem:[%s10998_s0 + $0x208] sm:$0xff] }
0x2ac3   : > { %6777 = vmatpush.msra.mxu0 %v6680_v41 }
0x2b03   : > { %v6471_v44 = vpop.xlane.xlu0 %6470 }
0x2b04   : > { %v6472_v51 = vmul.f32 %v6471_v44, %v9961_v55  ;;  %v6647_v44 = vld [vmem:[%s10998_s0 + $0xd0] sm:$0xff] }
0x2b05   : > { %6738 = vmatpush.msra.mxu2 %v6647_v44 }
0x2b06   : > { %v6473_v24 = vadd.f32 1e-05, %v6472_v51  ;;  %v6679_v51 = vld [vmem:[%s10998_s0 + $0x1d0] sm:$0xff] }
0x2b07   : > { %6778 = vmatpush.msra.mxu0 %v6679_v51 }
0x2b08   : > { %8242 = vrsqrt.f32 %v6473_v24  ;;  %vm6480_vm13 = vweird.f32 %v6473_v24 }
0x2b0e   : > { %v8243_v40 = vpop.eup %8242 }
0x2b0f   : > { %v6475_v49 = vmul.f32 %v8243_v40, %v6473_v24  ;;  %vm6481_vm7 = vweird.f32 %v8243_v40  ;;  %v6623_v24 = vld [vmem:[%s10998_s0 + $0x10] sm:$0xff] }
0x2b10   : > { %vm6482_vm14 = vmor %vm6480_vm13, %vm6481_vm7 }
0x2b11   : > { %v6476_v0 = vmul.f32 %v8243_v40, %v6475_v49  ;;  %v6678_v49 = vld [vmem:[%s10998_s0 + $0x1c8] sm:$0xff] }
0x2b12   : > { %6779 = vmatpush.msra.mxu0 %v6678_v49 }
0x2b13   : > { %v6477_v36 = vmul.f32 0.5, %v6476_v0  ;;  %v6622_v0 = vld [vmem:[%s10998_s0 + $0x8] sm:$0xff] }
0x2b15   : > { %v6478_v59 = vsub.f32 1.5, %v6477_v36 }
0x2b16   : > { %v6494_v13 = vpop.permute.xlu0 %6493 }
0x2b17   : > { %v6479_v56 = vmul.f32 %v8243_v40, %v6478_v59  ;;  %v6621_v59 = vld [vmem:[%s10998_s0] sm:$0xff] }
0x2b19   : > { %v6483_v1 = vsel %vm6482_vm14, %v8243_v40, %v6479_v56  ;;  %v6646_v40 = vld [vmem:[%s10998_s0 + $0xc8] sm:$0xff]  ;;  %v6699_v56 = vld [vmem:[%s10998_s0 + $0x270] sm:$0xff] }
0x2b1a   : > { %v6484_v4 = vmul.f32 %v6483_v1, %v6463_v18  ;;  %v6665_v18 = vld [vmem:[%s10998_s0 + $0x160] sm:$0xff]  ;;  %6739 = vmatpush.msra.mxu2 %v6646_v40  ;;  %v6698_v1 = vld [vmem:[%s10998_s0 + $0x268] sm:$0xff] }
0x2b1b   : > { %6756 = vmatpush.msra.mxu3 %v6665_v18  ;;  %v6687_v18 = vld [vmem:[%s10998_s0 + $0x210] sm:$0xff] }
0x2b1c   : > { %v6490_v46 = vmul.f32 %v6488_v50, %v6484_v4  ;;  %v6664_v50 = vld [vmem:[%s10998_s0 + $0x158] sm:$0xff] }
0x2b1d   : > { %6757 = vmatpush.msra.mxu3 %v6664_v50 }
0x2b1e   : > { %v6496_v19 = vadd.f32 %v6494_v13, %v6490_v46  ;;  %v6507_v22 = vpop.permute.xlu0 %6506  ;;  %v6700_v13 = vld [vmem:[%s10998_s0 + $0x278] sm:$0xff]  ;;  %v6645_v46 = vld [vmem:[%s10998_s0 + $0xc0] sm:$0xff] }
0x2b1f   : > { %6512 = vst.msk [vmem:[#allocation2] sm:$0x1] %vm10608_vm12, %v6507_v22  ;;  %6758 = vmatpush.msra.mxu3 %v6663_v2  ;;  %v6677_v22 = vld [vmem:[%s10998_s0 + $0x1c0] sm:$0xff]  ;;  %6740 = vmatpush.msra.mxu2 %v6645_v46 }
0x2b20   : > { %6564 = vst [vmem:[#allocation1] sm:$0xff] %v6496_v19  ;;  %6560 = vrot.lane.b32.xlu2 %v6496_v19, %s10968_s16  ;;  %6780 = vmatpush.msra.mxu0 %v6677_v22 }
0x2b21   : > { %6522 = vst.msk [vmem:[#allocation2] sm:$0x1] %vm10627_vm3, %v6517_v33  ;;  %6759 = vmatpush.msra.mxu3 %v6662_v37  ;;  %v6697_v33 = vld [vmem:[%s10998_s0 + $0x260] sm:$0xff] }
0x2b26   : > { %v6549_v16 = vpop.permute.xlu0 %6548 }
0x2b27   : > { %6551 = vst.msk [vmem:[#allocation2 + $0x1] sm:$0x1] %vm10627_vm3, %v6549_v16  ;;  %v6566_v26 = vld [vmem:[#allocation1 + $0x1] ss:$9 sm:$0xff] }
0x2b28   : > { %6558 = vst.msk [vmem:[#allocation2 + $0x1] sm:$0x1] %vm10644_vm6, %v6556_v38  ;;  %v6644_v16 = vld [vmem:[%s10998_s0 + $0xb8] sm:$0xff] }
0x2b29   : > { %6569 = vst [vmem:[#allocation1] sm:$0xff] %v6496_v19  ;;  %v6660_v38 = vld [vmem:[%s10998_s0 + $0x138] sm:$0xff]  ;;  %6741 = vmatpush.msra.mxu2 %v6644_v16 }
0x2b2e   : > { %v6527_v48 = vpop.permute.xlu0 %6526 }
0x2b2f   : > { %6532 = vst.msk [vmem:[#allocation2] sm:$0x1] %vm10644_vm6, %v6527_v48  ;;  %v6643_v48 = vld [vmem:[%s10998_s0 + $0xb0] sm:$0xff] }
0x2b30   : > { %v6571_v29 = vld [vmem:[#allocation1 + $0x2] ss:$9 sm:$0xff]  ;;  %6742 = vmatpush.msra.mxu2 %v6643_v48 }
0x2b31   : > { %6572 = vrot.lane.b32.xlu1 %v6571_v29, %s10975_s2  ;;  %6576 = vst [vmem:[#allocation1] sm:$0xff] %v6496_v19  ;;  %v6659_v29 = vld [vmem:[%s10998_s0 + $0x130] sm:$0xff] }
0x2b38   : > { %v6578_v57 = vld [vmem:[#allocation1 + $0x3] ss:$9 sm:$0xff] }
0x2b39   : > { %6583 = vst [vmem:[#allocation1] sm:$0xff] %v6496_v19 }
0x2b40   : > { %v6585_v3 = vld [vmem:[#allocation1 + $0x4] ss:$9 sm:$0xff] }
0x2b41   : > { %6586 = vrot.lane.b32.xlu2 %v6585_v3, %s10968_s16  ;;  %6590 = vst [vmem:[#allocation1] sm:$0xff] %v6496_v19  ;;  %v6695_v3 = vld [vmem:[%s10998_s0 + $0x250] sm:$0xff]  ;;  %s11002_s16 = sld [smem:[#allocation59_spill]] }
0x2b48   : > { %v10656_v31 = vld [vmem:[#allocation1 + $0x5] ss:$9 sm:$0xff] }
0x2b49   : > { %6595 = vst [vmem:[#allocation1] sm:$0xff] %v6496_v19 }
0x2b50   : > { %v6597_v15 = vld [vmem:[#allocation1 + $0x6] ss:$9 sm:$0xff] }
0x2b51   : > { %6598 = vrot.lane.b32.xlu2 %v6597_v15, %s10975_s2  ;;  %6602 = vst [vmem:[#allocation1] sm:$0xff] %v6496_v19  ;;  %v6661_v19 = vld [vmem:[%s10998_s0 + $0x140] sm:$0xff]  ;;  %v6658_v15 = vld [vmem:[%s10998_s0 + $0x128] sm:$0xff]  ;;  %s11005_s2 = sld [smem:[#allocation53_spill]] }
0x2b52   : > { %6760 = vmatpush.msra.mxu3 %v6661_v19 }
0x2b54   : > { %6761 = vmatpush.msra.mxu3 %v6660_v38 }
0x2b56   : > { %6762 = vmatpush.msra.mxu3 %v6659_v29 }
0x2b58   : > { %v6604_v27 = vld [vmem:[#allocation1 + $0x7] ss:$9 sm:$0xff]  ;;  %6763 = vmatpush.msra.mxu3 %v6658_v15  ;;  %v6813_v15 = vld [vmem:[%s11000_s15] sm:$0x1]  ;;  %s11009_s15 = sld [smem:[#allocation57_spill]] }
0x2b59   : > { %6579 = vrot.lane.b32.xlu2 %v6578_v57, %s9003_s5  ;;  %6605 = vrot.lane.b32.xlu0 %v6604_v27, %s9003_s5  ;;  %6612 = vst [vmem:[#allocation1] sm:$0xff] %v9853_v52  ;;  %v6634_v52 = vld [vmem:[%s10998_s0 + $0x68] sm:$0xff]  ;;  %v6675_v57 = vld [vmem:[%s10998_s0 + $0x1b0] sm:$0xff] }
0x2b5a   : > { %6715 = vmatpush.msrb.mxu1 %v6634_v52  ;;  %v6674_v27 = vld [vmem:[%s10998_s0 + $0x1a8] sm:$0xff]  ;;  %v6673_v52 = vld [vmem:[%s10998_s0 + $0x1a0] sm:$0xff]  ;;  %6764 = vmatpush.msra.mxu3 %v6657_v7 }
0x2b5c   : > { %6716 = vmatpush.msrb.mxu1 %v6633_v43  ;;  %v6693_v43 = vld [vmem:[%s10998_s0 + $0x240] sm:$0xff] }
0x2b5e   : > { %6717 = vmatpush.msrb.mxu1 %v6632_v34  ;;  %v6640_v34 = vld [vmem:[%s10998_s0 + $0x98] sm:$0xff] }
0x2b60   : > { %v6614_v6 = vld [vmem:[#allocation1 + $0x1] ss:$9 sm:$0xff]  ;;  %6718 = vmatpush.msrb.mxu1 %v6631_v10 }
0x2b61   : > { %6615 = vrot.lane.b32.xlu1 %v6614_v6, %s9003_s5  ;;  %v6694_v6 = vld [vmem:[%s10998_s0 + $0x248] sm:$0xff]  ;;  %v6656_v10 = vld [vmem:[%s10998_s0 + $0x118] sm:$0xff]  ;;  %s11007_s5 = sld [smem:[#allocation62_spill]] }
0x2b62   : > { %6719 = vmatpush.msrb.mxu1 %v6630_v28  ;;  %v6672_v28 = vld [vmem:[%s10998_s0 + $0x198] sm:$0xff]  ;;  %6765 = vmatpush.msra.mxu3 %v6656_v10 }
0x2b64   : > { %6720 = vmatpush.msrb.mxu1 %v6629_v58  ;;  %v6692_v58 = vld [vmem:[%s10998_s0 + $0x238] sm:$0xff]  ;;  %6766 = vmatpush.msra.mxu3 %v6655_v23  ;;  %v6870_v23 = vld [vmem:[%s11002_s16 + $0x10] sm:$0xff] }
0x2b66   : > { %6721 = vmatpush.msrb.mxu1 %v6628_v30  ;;  %v6639_v30 = vld [vmem:[%s10998_s0 + $0x90] sm:$0xff]  ;;  %6767 = vmatpush.msra.mxu3 %v6654_v39 }
0x2b68   : > { %6722 = vmatpush.msrb.mxu1 %v6627_v60  ;;  %v6671_v60 = vld [vmem:[%s10998_s0 + $0x190] sm:$0xff]  ;;  %6768 = vmatpush.msra.mxu3 %v6653_v14 }
0x2b6a   : > { %6723 = vmatpush.msrb.mxu1 %v6626_v17  ;;  %v6669_v17 = vld [vmem:[%s10998_s0 + $0x180] sm:$0xff] }
0x2b6c   : > { %6724 = vmatpush.msrb.mxu1 %v6625_v42 }
0x2b6e   : > { %6725 = vmatpush.msrb.mxu1 %v6624_v45 }
0x2b70   : > { %6726 = vmatpush.msrb.mxu1 %v6623_v24 }
0x2b72   : > { %6727 = vmatpush.msrb.mxu1 %v6622_v0 }
0x2b74   : > { %6728 = vmatpush.msrb.mxu1 %v6621_v59 }
0x2b76   : > { %6793 = vmatpush.msra.mxu1 %v6700_v13 }
0x2b78   : > { %6794 = vmatpush.msra.mxu1 %v6699_v56 }
0x2b7a   : > { %v6561_v21 = vpop.permute.xlu2 %6560  ;;  %6795 = vmatpush.msra.mxu1 %v6698_v1 }
0x2b7b   : > { %6563 = vst.msk [vmem:[#allocation2 + $0x2] sm:$0x1] %vm10590_vm10, %v6561_v21 }
0x2b7c   : > { %6568 = vst.msk [vmem:[#allocation2 + $0x2] sm:$0x1] %vm10608_vm12, %v6566_v26  ;;  %6796 = vmatpush.msra.mxu1 %v6697_v33  ;;  %v6676_v26 = vld [vmem:[%s10998_s0 + $0x1b8] sm:$0xff] }
0x2b7d   : > { %6781 = vmatpush.msra.mxu0 %v6676_v26 }
0x2b7e   : > { %6797 = vmatpush.msra.mxu1 %v6696_v25 }
0x2b7f   : > { %6782 = vmatpush.msra.mxu0 %v6675_v57 }
0x2b80   : > { %6798 = vmatpush.msra.mxu1 %v6695_v3 }
0x2b81   : > { %6783 = vmatpush.msra.mxu0 %v6674_v27 }
0x2b82   : > { %6799 = vmatpush.msra.mxu1 %v6694_v6  ;;  %v6814_v6 = vld [vmem:[%s11001_s8] sm:$0x1]  ;;  %s11010_s8 = sld [smem:[#allocation54_spill]] }
0x2b83   : > { %6784 = vmatpush.msra.mxu0 %v6673_v52 }
0x2b84   : > { %6800 = vmatpush.msra.mxu1 %v6693_v43 }
0x2b85   : > { %6785 = vmatpush.msra.mxu0 %v6672_v28 }
0x2b86   : > { %6801 = vmatpush.msra.mxu1 %v6692_v58 }
0x2b87   : > { %6786 = vmatpush.msra.mxu0 %v6671_v60  ;;  %v6869_v60 = vld [vmem:[%s11002_s16 + $0x8] sm:$0xff] }
0x2b88   : > { %6802 = vmatpush.msra.mxu1 %v6691_v32  ;;  %v6868_v32 = vld [vmem:[%s11002_s16] sm:$0xff] }
0x2b89   : > { %6787 = vmatpush.msra.mxu0 %v6670_v9 }
0x2b8a   : > { %6803 = vmatpush.msra.mxu1 %v6690_v11 }
0x2b8b   : > { %6788 = vmatpush.msra.mxu0 %v6669_v17 }
0x2b8c   : > { %6804 = vmatpush.msra.mxu1 %v6689_v63 }
0x2b8e   : > { %6805 = vmatpush.msra.mxu1 %v6688_v54 }
0x2b90   : > { %6806 = vmatpush.msra.mxu1 %v6687_v18  ;;  %v6841_v18 = vld [vmem:[%s11003_s20] sm:$0x1]  ;;  %s11011_s20 = sld [smem:[#allocation101_spill]] }
0x2b92   : > { %6807 = vmatpush.msra.mxu1 %v6686_v47 }
0x2b9b   : > { %v6587_v35 = vpop.permute.xlu2 %6586 }
0x2b9c   : > { %6589 = vst.msk [vmem:[#allocation2 + $0x3] sm:$0x1] %vm10590_vm10, %v6587_v35  ;;  %v6685_v35 = vld [vmem:[%s10998_s0 + $0x200] sm:$0xff] }
0x2b9d   : > { %6594 = vst.msk [vmem:[#allocation2 + $0x3] sm:$0x1] %vm10608_vm12, %v10656_v31  ;;  %v6642_v31 = vld [vmem:[%s10998_s0 + $0xa8] sm:$0xff]  ;;  %6808 = vmatpush.msra.mxu1 %v6685_v35 }
0x2b9e   : > { %6743 = vmatpush.msra.mxu2 %v6642_v31 }
0x2ba0   : > { %6744 = vmatpush.msra.mxu2 %v6641_v62 }
0x2ba2   : > { %6745 = vmatpush.msra.mxu2 %v6640_v34 }
0x2ba3   : > { %v6573_v36 = vpop.permute.xlu1 %6572 }
0x2ba4   : > { %6575 = vst.msk [vmem:[#allocation2 + $0x2] sm:$0x1] %vm10627_vm3, %v6573_v36  ;;  %6746 = vmatpush.msra.mxu2 %v6639_v30  ;;  %v6871_v30 = vld [vmem:[%s11002_s16 + $0x18] sm:$0xff] }
0x2ba6   : > { %6747 = vmatpush.msra.mxu2 %v6638_v53 }
0x2ba8   : > { %6748 = vmatpush.msra.mxu2 %v6637_v12 }
0x2baa   : > { %6888 = vmatpush.msrb.mxu2 %v6871_v30 }
0x2bab   : > { %v6599_v4 = vpop.permute.xlu2 %6598 }
0x2bac   : > { %6601 = vst.msk [vmem:[#allocation2 + $0x3] sm:$0x1] %vm10627_vm3, %v6599_v4  ;;  %6889 = vmatpush.msrb.mxu2 %v6870_v23  ;;  %vm6980_vm3 = vcmask 0  }
0x2bae   : > { %6890 = vmatpush.msrb.mxu2 %v6869_v60 }
0x2bb0   : > { %6891 = vmatpush.msrb.mxu2 %v6868_v32 }
0x2bb3   : > { %v6580_v21 = vpop.permute.xlu2 %6579 }
0x2bb4   : > { %6582 = vst.msk [vmem:[#allocation2 + $0x2] sm:$0x1] %vm10644_vm6, %v6580_v21 }
0x2bcb   : > { %v6606_v42 = vpop.permute.xlu0 %6605 }
0x2bcc   : > { %6608 = vst.msk [vmem:[#allocation2 + $0x3] sm:$0x1] %vm10644_vm6, %v6606_v42  ;;  %v6842_v42 = vld [vmem:[%s11004_s25] sm:$0x1]  ;;  %s2328_s25 = scalar_lea.vmem %s11011_s20, %s11014_s3 }
0x2bd3   : > { %v6616_v5 = vpop.permute.xlu1 %6615 }
0x2bd4   : > { %6619 = vst.msk [vmem:[#allocation2 + $0x4] sm:$0x1] %vm6618_vm1, %v6616_v5 }
0x2bdb   : > { %v6620_v50 = vld [vmem:[#allocation2] sm:$0x1f] }
0x2bdc   : > { %v6703_v41 = vperm.slane %v6620_v50, 0  ;;  %v6704_v45 = vperm.slane %v6620_v50, 1  ;;  %v6705_v44 = vperm.slane %v6620_v50, 2  ;;  %v6706_v2 = vperm.slane %v6620_v50, 3 }
0x2bdd   : > { %v6707_v51 = vperm.slane %v6620_v50, 4 }
0x2bde   : > { %6729 = vmatmul.f32.vlgmr.msrb.gmra.mxu1 %v6703_v41  ;;  %6749 = vmatmul.f32.vlgmr.msra.gmra.mxu2 %v6704_v45  ;;  %v6872_v45 = vld [vmem:[%s11005_s2] sm:$0x1] }
0x2bdf   : > { %6769 = vmatmul.f32.vlgmr.msra.gmra.mxu3 %v6705_v44  ;;  %6789 = vmatmul.f32.vlgmr.msra.gmra.mxu0 %v6706_v2 }
0x2be6   : > { %6809 = vmatmul.f32.vlgmr.msra.gmra.mxu1 %v6707_v51 }
0x2c5b   : > { %v6730_v24 = vpop.f32.mrf.mxu1 }
0x2c5c   : > { %v6731_v40 = vadd.f32 %v6730_v24, %v6701_v61  ;;  %v6790_v0 = vpop.f32.mrf.mxu0 }
0x2c61   : > { %v6750_v8 = vpop.f32.mrf.mxu2 }
0x2c62   : > { %v6751_v37 = vadd.f32 %v6750_v8, %v6731_v40  ;;  %v6770_v20 = vpop.f32.mrf.mxu3 }
0x2c63   : > { %v6810_v59 = vpop.f32.mrf.mxu1 }
0x2c64   : > { %v6771_v49 = vadd.f32 %v6770_v20, %v6751_v37  ;;  %v6926_v20 = vld [vmem:[%s11006_s1 + $0x18] sm:$0xff] }
0x2c65   : > { %6943 = vmatpush.msrb.mxu3 %v6926_v20 }
0x2c66   : > { %v6791_v36 = vadd.f32 %v6790_v0, %v6771_v49  ;;  %v6925_v49 = vld [vmem:[%s11006_s1 + $0x10] sm:$0xff]  ;;  %v6924_v0 = vld [vmem:[%s11006_s1 + $0x8] sm:$0xff] }
0x2c67   : > { %6944 = vmatpush.msrb.mxu3 %v6925_v49 }
0x2c68   : > { %v6811_v13 = vadd.f32 %v6810_v59, %v6791_v36  ;;  %v6923_v36 = vld [vmem:[%s11006_s1] sm:$0xff]  ;;  %v6955_v59 = vld [vmem:[%s11007_s5 + $0x18] sm:$0xff] }
0x2c69   : > { %6945 = vmatpush.msrb.mxu3 %v6924_v0  ;;  %6972 = vmatpush.msrb.mxu0 %v6955_v59 }
0x2c6a   : > { %v6816_v56 = vsel %vm6815_vm8, %v6811_v13, 0.0 }
0x2c6b   : > { %6817 = vadd.xlane.f32.xlu2 %v6816_v56  ;;  %6946 = vmatpush.msrb.mxu3 %v6923_v36 }
0x2cde   : > { %v6818_v1 = vpop.xlane.xlu2 %6817 }
0x2cdf   : > { %v6819_v4 = vmul.f32 %v6818_v1, %v9961_v55 }
0x2ce1   : > { %v6820_v46 = vsub.f32 %v6811_v13, %v6819_v4 }
0x2ce3   : > { %v6821_v19 = vmul.f32 %v6820_v46, %v6820_v46 }
0x2ce5   : > { %v6822_v22 = vsel %vm6815_vm8, %v6821_v19, 0.0 }
0x2ce6   : > { %6823 = vadd.xlane.f32.xlu0 %v6822_v22 }
0x2d59   : > { %v6824_v33 = vpop.xlane.xlu0 %6823 }
0x2d5a   : > { %v6825_v16 = vmul.f32 %v6824_v33, %v9961_v55 }
0x2d5c   : > { %v6826_v38 = vadd.f32 1e-05, %v6825_v16 }
0x2d5e   : > { %8244 = vrsqrt.f32 %v6826_v38  ;;  %vm6833_vm10 = vweird.f32 %v6826_v38 }
0x2d64   : > { %v8245_v26 = vpop.eup %8244 }
0x2d65   : > { %v6828_v25 = vmul.f32 %v8245_v26, %v6826_v38  ;;  %vm6834_vm9 = vweird.f32 %v8245_v26  ;;  %v6896_v38 = vld [vmem:[%s11008_s10] sm:$0x1] }
0x2d66   : > { %vm6835_vm11 = vmor %vm6833_vm10, %vm6834_vm9 }
0x2d67   : > { %v6829_v48 = vmul.f32 %v8245_v26, %v6828_v25 }
0x2d69   : > { %v6830_v29 = vmul.f32 0.5, %v6829_v48  ;;  %v6897_v48 = vld [vmem:[%s11009_s15] sm:$0x1] }
0x2d6b   : > { %v6831_v57 = vsub.f32 1.5, %v6830_v29 }
0x2d6d   : > { %v6832_v3 = vmul.f32 %v8245_v26, %v6831_v57 }
0x2d6f   : > { %v6836_v31 = vsel %vm6835_vm11, %v8245_v26, %v6832_v3  ;;  %v6954_v3 = vld [vmem:[%s11007_s5 + $0x10] sm:$0xff] }
0x2d70   : > { %v6837_v27 = vmul.f32 %v6836_v31, %v6820_v46  ;;  %6973 = vmatpush.msrb.mxu0 %v6954_v3  ;;  %v6953_v31 = vld [vmem:[%s11007_s5 + $0x8] sm:$0xff] }
0x2d72   : > { %v6838_v21 = vmul.f32 %v6837_v27, %v6813_v15  ;;  %6974 = vmatpush.msrb.mxu0 %v6953_v31  ;;  %v6952_v15 = vld [vmem:[%s11007_s5] sm:$0xff] }
0x2d73   : > { %v6927_v27 = vld [vmem:[%s11010_s8] sm:$0x1] }
0x2d74   : > { %v6839_v62 = vadd.f32 %v6838_v21, %v6814_v6  ;;  %6975 = vmatpush.msrb.mxu0 %v6952_v15 }
0x2d76   : > { %v10771_v7 = vmax.f32 %v6839_v62, 0.0 }
0x2d78   : > { %v6843_v52 = vsel %vm6815_vm8, %v10771_v7, 0.0 }
0x2d79   : > { %6844 = vadd.xlane.f32.xlu1 %v6843_v52  ;;  %v6956_v52 = vld [vmem:[#allocation3] sm:$0x1] }
0x2dec   : > { %v6845_v43 = vpop.xlane.xlu1 %6844 }
0x2ded   : > { %v6846_v34 = vmul.f32 %v6845_v43, %v9961_v55 }
0x2def   : > { %v6847_v10 = vsub.f32 %v10771_v7, %v6846_v34 }
0x2df1   : > { %v6848_v28 = vmul.f32 %v6847_v10, %v6847_v10 }
0x2df3   : > { %v6849_v58 = vsel %vm6815_vm8, %v6848_v28, 0.0 }
0x2df4   : > { %6850 = vadd.xlane.f32.xlu2 %v6849_v58 }
0x2e67   : > { %v6851_v53 = vpop.xlane.xlu2 %6850 }
0x2e68   : > { %v6852_v39 = vmul.f32 %v6851_v53, %v9961_v55 }
0x2e6a   : > { %v6853_v9 = vadd.f32 1e-05, %v6852_v39 }
0x2e6c   : > { %8246 = vrsqrt.f32 %v6853_v9  ;;  %vm6860_vm7 = vweird.f32 %v6853_v9 }
0x2e72   : > { %v8247_v11 = vpop.eup %8246 }
0x2e73   : > { %v6855_v12 = vmul.f32 %v8247_v11, %v6853_v9  ;;  %vm6861_vm12 = vweird.f32 %v8247_v11 }
0x2e74   : > { %vm6862_vm13 = vmor %vm6860_vm7, %vm6861_vm12 }
0x2e75   : > { %v6856_v14 = vmul.f32 %v8247_v11, %v6855_v12 }
0x2e77   : > { %v6857_v17 = vmul.f32 0.5, %v6856_v14 }
0x2e79   : > { %v6858_v63 = vsub.f32 1.5, %v6857_v17 }
0x2e7b   : > { %v6859_v54 = vmul.f32 %v8247_v11, %v6858_v63 }
0x2e7d   : > { %v6863_v47 = vsel %vm6862_vm13, %v8247_v11, %v6859_v54 }
0x2e7e   : > { %v6864_v35 = vmul.f32 %v6863_v47, %v6847_v10 }
0x2e80   : > { %v6865_v5 = vmul.f32 %v6864_v35, %v6841_v18 }
0x2e82   : > { %v6866_v50 = vadd.f32 %v6865_v5, %v6842_v42 }
0x2e84   : > { %v6867_v41 = vmax.f32 %v6866_v50, 0.0 }
0x2e86   : > { %7737 = vmatmul.msk.f32.vlgmr.msrb.gmra.mxu2 %vm3030_vm0, %v6867_v41 }
0x2f09   : > { %v6893_v44 = vpop.f32.mrf.mxu2 }
0x2f0a   : > { %v6894_v2 = vadd.f32 %v6893_v44, %v6872_v45 }
0x2f0c   : > { %v6898_v51 = vsel %vm6815_vm8, %v6894_v2, 0.0 }
0x2f0d   : > { %6899 = vadd.xlane.f32.xlu0 %v6898_v51 }
0x2f80   : > { %v6900_v61 = vpop.xlane.xlu0 %6899 }
0x2f81   : > { %v6901_v24 = vmul.f32 %v6900_v61, %v9961_v55 }
0x2f83   : > { %v6902_v40 = vsub.f32 %v6894_v2, %v6901_v24 }
0x2f85   : > { %v6903_v8 = vmul.f32 %v6902_v40, %v6902_v40 }
0x2f87   : > { %v6904_v37 = vsel %vm6815_vm8, %v6903_v8, 0.0 }
0x2f88   : > { %6905 = vadd.xlane.f32.xlu1 %v6904_v37 }
0x2ffb   : > { %v6906_v13 = vpop.xlane.xlu1 %6905 }
0x2ffc   : > { %v6907_v56 = vmul.f32 %v6906_v13, %v9961_v55 }
0x2ffe   : > { %v6908_v1 = vadd.f32 1e-05, %v6907_v56 }
0x3000   : > { %8248 = vrsqrt.f32 %v6908_v1  ;;  %vm6915_vm15 = vweird.f32 %v6908_v1 }
0x3006   : > { %v8249_v4 = vpop.eup %8248 }
0x3007   : > { %v6910_v46 = vmul.f32 %v8249_v4, %v6908_v1  ;;  %vm6916_vm14 = vweird.f32 %v8249_v4 }
0x3008   : > { %vm6917_vm2 = vmor %vm6915_vm15, %vm6916_vm14 }
0x3009   : > { %v6911_v19 = vmul.f32 %v8249_v4, %v6910_v46 }
0x300b   : > { %v6912_v22 = vmul.f32 0.5, %v6911_v19 }
0x300d   : > { %v6913_v33 = vsub.f32 1.5, %v6912_v22 }
0x300f   : > { %v6914_v16 = vmul.f32 %v8249_v4, %v6913_v33 }
0x3011   : > { %v6918_v26 = vsel %vm6917_vm2, %v8249_v4, %v6914_v16 }
0x3012   : > { %v6919_v25 = vmul.f32 %v6918_v26, %v6902_v40 }
0x3014   : > { %v6920_v55 = vmul.f32 %v6919_v25, %v6896_v38 }
0x3016   : > { %v6921_v29 = vadd.f32 %v6920_v55, %v6897_v48 }
0x3018   : > { %v6922_v57 = vmax.f32 %v6921_v29, 0.0 }
0x301a   : > { %7738 = vmatmul.msk.f32.vlgmr.msrb.gmra.mxu3 %vm3030_vm0, %v6922_v57 }
0x309d   : > { %v6948_v6 = vpop.f32.mrf.mxu3 }
0x309e   : > { %v6949_v21 = vadd.f32 %v6948_v6, %v6927_v27 }
0x30a0   : > { %v6951_v62 = vadd.f32 %v6949_v21, %v10771_v7 }
0x30a2   : > { %7739 = vmatmul.msk.f32.vlgmr.msrb.gmra.mxu0 %vm3030_vm0, %v6951_v62 }
0x311f   : > { %v6977_v43 = vpop.f32.mrf.mxu0 }
0x3120   : > { %v6978_v34 = vadd.f32 %v6977_v43, %v6956_v52 }
0x3122   : > { %6981 = vst.msk [vmem:[%s2328_s25] sm:$0x1] %vm6980_vm3, %v6978_v34 }
0x3123 PF: > { %s11012_s2 = sld [smem:[#allocation102_spill]] }
0x3129   : > { %s160_s20 = sadd.s32 1, %s11012_s2  }
0x312a   : > { %p157_p3 = scmp.ge.s32.totalorder %s160_s20, 4  }
0x312c   :  { %159 = sbr.rel (!%p157_p3) target bundleno = 145 (0x91), region = 495 }
0x3131   :  { %6999 = vsyncpa [#allocation5], 1 }
0x3132   :  { %7001 = vsyncpa [#allocation5 + $0x1], 1 }
0x3133   :  { %7002 = vsyncpa [#allocation7], 1 }
0x3134   :  { %7003 = vsyncpa [#allocation10], 1 }
0x3135   :  { %7004 = vsyncpa [#allocation13], 1 }
0x3136   :  { %7005 = vsyncpa [#allocation16], 1 }
0x3137   :  { %7006 = vsyncpa [#allocation19], 1 }
0x3138   :  { %7007 = vsyncpa [#allocation22], 1 }
0x3139   :  { %7008 = vsyncpa [#allocation25], 1 }
0x313a   :  { %7009 = vsyncpa [#allocation28], 1 }
0x313b   :  { %7010 = vsyncpa [#allocation31], 1 }
0x313c   :  { %7011 = vsyncpa [#allocation34], 1 }

</bundles_post_ra>
